<compile_context>
chip_gen: v6e
topology: v6e:2x2x1
jax: 0.10.0
libtpu: 0.0.40
codegen_flags: <defaults>
</compile_context>

<pallas_src>
import functools

import jax
import jax.numpy as jnp
from jax import lax
from jax.experimental import pallas as pl
from jax.experimental.pallas import tpu as pltpu

NUM_CLASSES = 73
C_IN = 4
C_OUT = 128
CONV_K = 21
KC = C_IN * CONV_K            # 84
KC_PAD = 128                  # lane-dense im2col width
SEQ_LEN = 500                 # pool(kernel=10) -> 50, matching dense1 in_features=50
POOL_W = 10
POOLED = SEQ_LEN // POOL_W    # 50
HIDDEN = 128
OUT_PAD = 128                 # dense3 lane-dense compute width (>= 73)


# ----------------------------------------------------------------------------
# Kernel 1: fused  conv1d(im2col matmul) + bias + ReLU + MaxPool(10) +
#           dense1(on length axis, via kron(W1, I_N)) + ReLU
#   patches rows ordered (w, p, n)  ->  pooled/output rows ordered (p, n)
# ----------------------------------------------------------------------------
def conv_pool_dense1_kernel(p_ref, wc_ref, bc_ref, w1k_ref, b1_ref, o_ref, *,
                            pool_w):
    rows = o_ref.shape[0]                                    # POOLED * N
    y = jnp.dot(p_ref[...], wc_ref[...], preferred_element_type=jnp.float32)
    y = jnp.maximum(y + bc_ref[...], 0.0)                    # (pool_w*rows, C)
    # MaxPool1d(10,10): pure-VPU maximum chain over 10 row slabs (no XLU).
    pooled = y[:rows]
    for w in range(1, pool_w):
        pooled = jnp.maximum(pooled, y[w * rows:(w + 1) * rows])
    # dense1 on the length axis with channels kept lane-dense:
    #   z[(t,n), c] = sum_j W1[t,j] * pooled[(j,n), c] + b1[t]
    z = jnp.dot(w1k_ref[...], pooled, preferred_element_type=jnp.float32)
    o_ref[...] = jnp.maximum(z + b1_ref[...], 0.0)


def conv_pool_dense1(patches, wc, bc, w1k, b1r, n_batch):
    rows = POOLED * n_batch
    return pl.pallas_call(
        functools.partial(conv_pool_dense1_kernel, pool_w=POOL_W),
        out_shape=jax.ShapeDtypeStruct((rows, C_OUT), jnp.float32),
        grid=(1,),
        in_specs=[pl.BlockSpec((POOL_W * rows, KC_PAD), lambda i: (0, 0)),
                  pl.BlockSpec((KC_PAD, C_OUT), lambda i: (0, 0)),
                  pl.BlockSpec((1, C_OUT), lambda i: (0, 0)),
                  pl.BlockSpec((rows, rows), lambda i: (0, 0)),
                  pl.BlockSpec((rows, 1), lambda i: (0, 0))],
        out_specs=pl.BlockSpec((rows, C_OUT), lambda i: (0, 0)),
    )(patches, wc, bc.reshape(1, C_OUT), w1k, b1r)


# ----------------------------------------------------------------------------
# Kernel 2: generic  act(X @ W + b)
#   k_tiles == 1 : no scratch, dot+bias+act written straight to the output
#   k_tiles  > 1 : K-axis tiling with an f32 VMEM accumulator
# ----------------------------------------------------------------------------
def _finish(y, activation):
    if activation == "relu":
        return jnp.maximum(y, 0.0)
    if activation == "sigmoid":
        return jax.nn.sigmoid(y)
    return y


def mm_simple_kernel(x_ref, w_ref, b_ref, o_ref, *, activation):
    y = jnp.dot(x_ref[...], w_ref[...], preferred_element_type=jnp.float32)
    o_ref[...] = _finish(y + b_ref[...], activation).astype(o_ref.dtype)


def mm_tiled_kernel(x_ref, w_ref, b_ref, o_ref, acc_ref, *, activation):
    k = pl.program_id(0)

    @pl.when(k == 0)
    def _():
        acc_ref[...] = jnp.zeros_like(acc_ref)

    acc_ref[...] += jnp.dot(x_ref[...], w_ref[...],
                            preferred_element_type=jnp.float32)

    @pl.when(k == pl.num_programs(0) - 1)
    def _():
        o_ref[...] = _finish(acc_ref[...] + b_ref[...],
                             activation).astype(o_ref.dtype)


def matmul_bias_act(x, w, b, activation="none", k_tiles=1):
    M, K = x.shape
    K2, Nf = w.shape
    assert K == K2 and K % k_tiles == 0
    b2 = b.reshape(1, Nf).astype(jnp.float32)
    if k_tiles == 1:
        return pl.pallas_call(
            functools.partial(mm_simple_kernel, activation=activation),
            out_shape=jax.ShapeDtypeStruct((M, Nf), jnp.float32),
            grid=(1,),
            in_specs=[pl.BlockSpec((M, K), lambda i: (0, 0)),
                      pl.BlockSpec((K, Nf), lambda i: (0, 0)),
                      pl.BlockSpec((1, Nf), lambda i: (0, 0))],
            out_specs=pl.BlockSpec((M, Nf), lambda i: (0, 0)),
        )(x, w, b2)
    tk = K // k_tiles
    return pl.pallas_call(
        functools.partial(mm_tiled_kernel, activation=activation),
        out_shape=jax.ShapeDtypeStruct((M, Nf), jnp.float32),
        grid=(k_tiles,),
        in_specs=[pl.BlockSpec((M, tk), lambda k: (0, k)),
                  pl.BlockSpec((tk, Nf), lambda k: (k, 0)),
                  pl.BlockSpec((1, Nf), lambda k: (0, 0))],
        out_specs=pl.BlockSpec((M, Nf), lambda k: (0, 0)),
        scratch_shapes=[pltpu.VMEM((M, Nf), jnp.float32)],
        compiler_params=pltpu.CompilerParams(
            dimension_semantics=("arbitrary",)),
    )(x, w, b2)


# ----------------------------------------------------------------------------
# Kernel 3: bidirectional LSTM layer — BOTH directions in ONE serial loop.
#   "Schedule order": loop step s handles forward time t = s (rows [:N]) and
#   reverse time t = T-1-s (rows [N:]) simultaneously.  Gate order (i,f,g,o).
#   Recurrent matmul: h_both @ [Whh_f | Whh_r], then per-row lane-half select.
# ----------------------------------------------------------------------------
def bilstm_fused_kernel(xg_ref, whh_ref, o_ref, h_scr, c_scr):
    # xg_ref : (T, 2N, 4H) schedule-ordered precomputed input gates (+ biases)
    # whh_ref: (H, 8H) = [Whh_fwd^T | Whh_rev^T]
    # o_ref  : (T, 2N, H) schedule-ordered hidden states (same row convention)
    T = xg_ref.shape[0]
    R, H = h_scr.shape                                       # R = 2N
    h_scr[...] = jnp.zeros_like(h_scr)
    c_scr[...] = jnp.zeros_like(c_scr)
    w_hh = whh_ref[...]                                      # hoisted
    # rows >= N belong to the reverse direction -> take the right lane half
    is_rev = lax.broadcasted_iota(jnp.int32, (R, 1), 0) >= (R // 2)

    def step(s, carry):
        gg = jnp.dot(h_scr[...], w_hh,
                     preferred_element_type=jnp.float32)      # (2N, 8H)
        g_rec = jnp.where(is_rev, gg[:, 4 * H:], gg[:, :4 * H])
        g = xg_ref[s] + g_rec                                 # (2N, 4H)
        i_g = jax.nn.sigmoid(g[:, 0 * H:1 * H])
        f_g = jax.nn.sigmoid(g[:, 1 * H:2 * H])
        c_g = jnp.tanh(g[:, 2 * H:3 * H])
        o_g = jax.nn.sigmoid(g[:, 3 * H:4 * H])
        c = f_g * c_scr[...] + i_g * c_g
        h = o_g * jnp.tanh(c)
        c_scr[...] = c
        h_scr[...] = h
        o_ref[s] = h
        return carry

    lax.fori_loop(0, T, step, 0)


def bilstm_layer(x_flat, t_len, n_batch, lp):
    # x_flat: (T*N, Din), rows ordered (t, n) ; returns (T, N, 2H)
    H = HIDDEN
    # fused ih projection for both directions: (T*N, Din) @ (Din, 8H)
    xg = matmul_bias_act(x_flat, lp["w_ih_cat"], lp["b_cat"], "none")
    xg = xg.reshape(t_len, n_batch, 8 * H)
    # schedule order: fwd gates at t = s on top, rev gates at t = T-1-s below
    xg_sched = jnp.concatenate([xg[:, :, :4 * H], xg[::-1, :, 4 * H:]], axis=1)
    o_sched = pl.pallas_call(
        bilstm_fused_kernel,
        out_shape=jax.ShapeDtypeStruct((t_len, 2 * n_batch, H), jnp.float32),
        grid=(1,),
        in_specs=[pl.BlockSpec((t_len, 2 * n_batch, 4 * H), lambda i: (0, 0, 0)),
                  pl.BlockSpec((H, 8 * H), lambda i: (0, 0))],
        out_specs=pl.BlockSpec((t_len, 2 * n_batch, H), lambda i: (0, 0, 0)),
        scratch_shapes=[pltpu.VMEM((2 * n_batch, H), jnp.float32),
                        pltpu.VMEM((2 * n_batch, H), jnp.float32)],
    )(xg_sched, lp["w_hh_cat"])
    # un-schedule: PyTorch layout = [fwd(t) | rev(t)] on the feature axis
    return jnp.concatenate([o_sched[:, :n_batch, :],
                            o_sched[::-1, n_batch:, :]], axis=-1)   # (T, N, 2H)


# ----------------------------------------------------------------------------
# Parameters (deterministic, PyTorch-style uniform init shapes, then re-packed
# into the layouts the kernels consume)
# ----------------------------------------------------------------------------
def init_params(key):
    def uni(k, shape, bound):
        return jax.random.uniform(k, shape, jnp.float32, -bound, bound)

    ks = iter(jax.random.split(key, 40))
    p = {}
    bc = 1.0 / (C_IN * CONV_K) ** 0.5
    conv_w = uni(next(ks), (C_OUT, C_IN, CONV_K), bc)
    p["conv_b"] = uni(next(ks), (C_OUT,), bc)
    # lane-dense flattened conv weight, feature order (c_in, k), padded 84->128
    w_flat = conv_w.transpose(1, 2, 0).reshape(KC, C_OUT)
    p["conv_w_flat"] = jnp.pad(w_flat, ((0, KC_PAD - KC), (0, 0)))

    b1 = 1.0 / POOLED ** 0.5
    p["w1"] = uni(next(ks), (POOLED, POOLED), b1)
    p["b1"] = uni(next(ks), (POOLED,), b1)

    b2 = 1.0 / (POOLED * 2 * HIDDEN) ** 0.5
    # dense2 is HBM-bound on its 13 MB weight: stream it in bf16 (f32 acc).
    p["w2T"] = uni(next(ks), (256, POOLED * 2 * HIDDEN), b2).T.astype(jnp.bfloat16)
    p["b2"] = uni(next(ks), (256,), b2)

    b3 = 1.0 / 512 ** 0.5
    w3 = uni(next(ks), (NUM_CLASSES, 512), b3)
    b3v = uni(next(ks), (NUM_CLASSES,), b3)
    # pad dense3 to 128 output lanes (unmasked stores); sliced to 73 in JAX
    p["w3T_pad"] = jnp.pad(w3.T, ((0, 0), (0, OUT_PAD - NUM_CLASSES)))
    p["b3_pad"] = jnp.pad(b3v, (0, OUT_PAD - NUM_CLASSES))

    bl = 1.0 / HIDDEN ** 0.5
    p["lstm"] = []
    for layer in range(2):
        din = HIDDEN if layer == 0 else 2 * HIDDEN
        wih, whh, bias = [], [], []
        for _ in range(2):                                   # forward, reverse
            w_ih = uni(next(ks), (4 * HIDDEN, din), bl)
            w_hh = uni(next(ks), (4 * HIDDEN, HIDDEN), bl)
            b_ih = uni(next(ks), (4 * HIDDEN,), bl)
            b_hh = uni(next(ks), (4 * HIDDEN,), bl)
            wih.append(w_ih.T)                               # (Din, 4H)
            whh.append(w_hh.T)                               # (H, 4H)
            bias.append(b_ih + b_hh)                         # (4H,)
        p["lstm"].append({
            "w_ih_cat": jnp.concatenate(wih, axis=1),        # (Din, 8H)
            "w_hh_cat": jnp.concatenate(whh, axis=1),        # (H, 8H)
            "b_cat": jnp.concatenate(bias, axis=0),          # (8H,)
        })
    return p


# ----------------------------------------------------------------------------
# Forward pass
# ----------------------------------------------------------------------------
def features(x, p):
    # x: (N, C_IN, SEQ_LEN)  (both external inputs stacked on the batch axis)
    N = x.shape[0]
    # im2col with rows ordered (w, p, n) so pooling keeps rows in (t, n) order;
    # feature axis zero-padded 84 -> 128 for lane-dense MXU operands.
    x_pad = jnp.pad(x, ((0, 0), (0, 0), (CONV_K // 2, CONV_K // 2)))
    idx = jnp.arange(SEQ_LEN)[:, None] + jnp.arange(CONV_K)[None, :]
    patches = x_pad[:, :, idx]                               # (N, Cin, L, K)
    patches = patches.transpose(2, 0, 1, 3).reshape(SEQ_LEN, N, KC)
    patches = patches.reshape(POOLED, POOL_W, N, KC).transpose(1, 0, 2, 3)
    patches = patches.reshape(POOL_W * POOLED * N, KC)
    patches = jnp.pad(patches, ((0, 0), (0, KC_PAD - KC)))   # (10*50*N, 128)

    # dense1 (acts on the length axis) lifted to a single lane-dense matmul
    w1k = jnp.kron(p["w1"], jnp.eye(N, dtype=jnp.float32))   # (50N, 50N)
    b1r = jnp.repeat(p["b1"], N).reshape(POOLED * N, 1)

    # fused conv + ReLU + maxpool10 + dense1 + ReLU  -> (50N, 128), rows (t, n)
    z = conv_pool_dense1(patches, p["conv_w_flat"], p["conv_b"], w1k, b1r, N)

    # 2-layer bidirectional LSTM in time-major (T, N, .) layout
    # (inter-layer dropout p=0.2 is identity in eval)
    h = bilstm_layer(z, POOLED, N, p["lstm"][0])             # (50, N, 256)
    h = bilstm_layer(h.reshape(POOLED * N, 2 * HIDDEN), POOLED, N,
                     p["lstm"][1])                           # (50, N, 256)

    # flatten per batch element in (t, feature) order for dense2
    h = h.transpose(1, 0, 2).reshape(N, POOLED * 2 * HIDDEN)  # (N, 12800)
    # drop2/drop3: identity; dense2 + ReLU (bf16 stream, f32 accumulation)
    return matmul_bias_act(h.astype(jnp.bfloat16), p["w2T"], p["b2"],
                           "relu", k_tiles=4)                 # (N, 256)


def cnn_lstm2_forward(p, *inputs):
    B = inputs[0].shape[0]
    xb = jnp.concatenate(inputs, axis=0) if len(inputs) > 1 else inputs[0]
    feats = features(xb, p)                                   # (len*B, 256)
    first = feats[:B]
    last = feats[(len(inputs) - 1) * B:]
    cat = jnp.concatenate([first, last], axis=1)              # (B, 512)
    out = matmul_bias_act(cat, p["w3T_pad"], p["b3_pad"], "sigmoid")  # (B,128)
    return out[:, :NUM_CLASSES]                               # (B, 73)


if __name__ == "__main__":
    key = jax.random.PRNGKey(0)
    pkey, k1, k2 = jax.random.split(key, 3)
    params = init_params(pkey)
    x1 = jax.random.normal(k1, (2, C_IN, SEQ_LEN), jnp.float32)
    x2 = jax.random.normal(k2, (2, C_IN, SEQ_LEN), jnp.float32)

    fwd = jax.jit(cnn_lstm2_forward)
    out = fwd(params, x1, x2)
    out = jax.block_until_ready(out)

    assert out.shape == (2, NUM_CLASSES), out.shape
    assert bool(jnp.all(jnp.isfinite(out)))
    assert bool(jnp.all((out >= 0.0) & (out <= 1.0)))   # sigmoid range
    print("KERNEL_OK")
</pallas_src>

<mosaic_0001>
module attributes {stable_mosaic.version = 11 : i64} {
  func.func @conv_pool_dense1_kernel(%arg0: i32, %arg1: memref<2000x128xf32, #tpu.memory_space<vmem>>, %arg2: memref<128x128xf32, #tpu.memory_space<vmem>>, %arg3: memref<1x128xf32, #tpu.memory_space<vmem>>, %arg4: memref<200x200xf32, #tpu.memory_space<vmem>>, %arg5: memref<200x1xf32, #tpu.memory_space<vmem>>, %arg6: memref<200x128xf32, #tpu.memory_space<vmem>>) attributes {dimension_semantics = [#tpu.dimension_semantics<arbitrary>], iteration_bounds = array<i64: 1>, scalar_prefetch = 0 : i64, scratch_operands = 0 : i64, tpu.core_type = #tpu.core_type<tc>, window_params = [{pipeline_mode = #tpu.pipeline_mode<synchronous>, transform_indices = @transform_0, window_bounds = array<i64: 2000, 128>}, {pipeline_mode = #tpu.pipeline_mode<synchronous>, transform_indices = @transform_1, window_bounds = array<i64: 128, 128>}, {pipeline_mode = #tpu.pipeline_mode<synchronous>, transform_indices = @transform_2, window_bounds = array<i64: 1, 128>}, {pipeline_mode = #tpu.pipeline_mode<synchronous>, transform_indices = @transform_3, window_bounds = array<i64: 200, 200>}, {pipeline_mode = #tpu.pipeline_mode<synchronous>, transform_indices = @transform_4, window_bounds = array<i64: 200, 1>}, {pipeline_mode = #tpu.pipeline_mode<synchronous>, transform_indices = @transform_5, window_bounds = array<i64: 200, 128>}]} {
    %c0 = arith.constant 0 : index
    %c0_0 = arith.constant 0 : index
    %0 = vector.load %arg1[%c0, %c0_0] : memref<2000x128xf32, #tpu.memory_space<vmem>>, vector<2000x128xf32>
    %c0_1 = arith.constant 0 : index
    %c0_2 = arith.constant 0 : index
    %1 = vector.load %arg2[%c0_1, %c0_2] : memref<128x128xf32, #tpu.memory_space<vmem>>, vector<128x128xf32>
    %cst = arith.constant dense<0.000000e+00> : vector<2000x128xf32>
    %2 = tpu.matmul %0, %1, %cst {dimension_numbers = #tpu.dot_dimension_numbers<[1], [0], [0], [1], [0, 0, 1, 1], [], []>} : vector<2000x128xf32>, vector<128x128xf32>, vector<2000x128xf32> -> vector<2000x128xf32>
    %c0_3 = arith.constant 0 : index
    %c0_4 = arith.constant 0 : index
    %3 = vector.load %arg3[%c0_3, %c0_4] : memref<1x128xf32, #tpu.memory_space<vmem>>, vector<1x128xf32>
    %4 = vector.broadcast %3 : vector<1x128xf32> to vector<2000x128xf32>
    %5 = arith.addf %2, %4 : vector<2000x128xf32>
    %cst_5 = arith.constant 0.000000e+00 : f32
    %6 = vector.broadcast %cst_5 : f32 to vector<2000x128xf32>
    %7 = arith.maximumf %5, %6 : vector<2000x128xf32>
    %8 = vector.extract_strided_slice %7 {offsets = [0, 0], sizes = [200, 128], strides = [1, 1]} : vector<2000x128xf32> to vector<200x128xf32>
    %9 = vector.extract_strided_slice %7 {offsets = [200, 0], sizes = [200, 128], strides = [1, 1]} : vector<2000x128xf32> to vector<200x128xf32>
    %10 = arith.maximumf %8, %9 : vector<200x128xf32>
    %11 = vector.extract_strided_slice %7 {offsets = [400, 0], sizes = [200, 128], strides = [1, 1]} : vector<2000x128xf32> to vector<200x128xf32>
    %12 = arith.maximumf %10, %11 : vector<200x128xf32>
    %13 = vector.extract_strided_slice %7 {offsets = [600, 0], sizes = [200, 128], strides = [1, 1]} : vector<2000x128xf32> to vector<200x128xf32>
    %14 = arith.maximumf %12, %13 : vector<200x128xf32>
    %15 = vector.extract_strided_slice %7 {offsets = [800, 0], sizes = [200, 128], strides = [1, 1]} : vector<2000x128xf32> to vector<200x128xf32>
    %16 = arith.maximumf %14, %15 : vector<200x128xf32>
    %17 = vector.extract_strided_slice %7 {offsets = [1000, 0], sizes = [200, 128], strides = [1, 1]} : vector<2000x128xf32> to vector<200x128xf32>
    %18 = arith.maximumf %16, %17 : vector<200x128xf32>
    %19 = vector.extract_strided_slice %7 {offsets = [1200, 0], sizes = [200, 128], strides = [1, 1]} : vector<2000x128xf32> to vector<200x128xf32>
    %20 = arith.maximumf %18, %19 : vector<200x128xf32>
    %21 = vector.extract_strided_slice %7 {offsets = [1400, 0], sizes = [200, 128], strides = [1, 1]} : vector<2000x128xf32> to vector<200x128xf32>
    %22 = arith.maximumf %20, %21 : vector<200x128xf32>
    %23 = vector.extract_strided_slice %7 {offsets = [1600, 0], sizes = [200, 128], strides = [1, 1]} : vector<2000x128xf32> to vector<200x128xf32>
    %24 = arith.maximumf %22, %23 : vector<200x128xf32>
    %25 = vector.extract_strided_slice %7 {offsets = [1800, 0], sizes = [200, 128], strides = [1, 1]} : vector<2000x128xf32> to vector<200x128xf32>
    %26 = arith.maximumf %24, %25 : vector<200x128xf32>
    %c0_6 = arith.constant 0 : index
    %c0_7 = arith.constant 0 : index
    %27 = vector.load %arg4[%c0_6, %c0_7] : memref<200x200xf32, #tpu.memory_space<vmem>>, vector<200x200xf32>
    %cst_8 = arith.constant dense<0.000000e+00> : vector<200x128xf32>
    %28 = tpu.matmul %27, %26, %cst_8 {dimension_numbers = #tpu.dot_dimension_numbers<[1], [0], [0], [1], [0, 0, 1, 1], [], []>} : vector<200x200xf32>, vector<200x128xf32>, vector<200x128xf32> -> vector<200x128xf32>
    %c0_9 = arith.constant 0 : index
    %c0_10 = arith.constant 0 : index
    %29 = vector.load %arg5[%c0_9, %c0_10] : memref<200x1xf32, #tpu.memory_space<vmem>>, vector<200x1xf32>
    %30 = vector.broadcast %29 : vector<200x1xf32> to vector<200x128xf32>
    %31 = arith.addf %28, %30 : vector<200x128xf32>
    %cst_11 = arith.constant 0.000000e+00 : f32
    %32 = vector.broadcast %cst_11 : f32 to vector<200x128xf32>
    %33 = arith.maximumf %31, %32 : vector<200x128xf32>
    %c0_12 = arith.constant 0 : index
    %c0_13 = arith.constant 0 : index
    %34 = vector.load %arg6[%c0_12, %c0_13] : memref<200x128xf32, #tpu.memory_space<vmem>>, vector<200x128xf32>
    tpu.vector_store %arg6[%c0_12, %c0_13], %33 {strides = array<i32>} : memref<200x128xf32, #tpu.memory_space<vmem>>, vector<200x128xf32>,
    return
  }
  func.func @transform_0(%arg0: i32) -> (i32, i32) {
    %c0_i32 = arith.constant 0 : i32
    %c0_i32_0 = arith.constant 0 : i32
    %c0_i32_1 = arith.constant 0 : i32
    return %c0_i32, %c0_i32_0 : i32, i32
  }
  func.func @transform_1(%arg0: i32) -> (i32, i32) {
    %c0_i32 = arith.constant 0 : i32
    %c0_i32_0 = arith.constant 0 : i32
    %c0_i32_1 = arith.constant 0 : i32
    return %c0_i32, %c0_i32_0 : i32, i32
  }
  func.func @transform_2(%arg0: i32) -> (i32, i32) {
    %c0_i32 = arith.constant 0 : i32
    %c0_i32_0 = arith.constant 0 : i32
    %c0_i32_1 = arith.constant 0 : i32
    return %c0_i32, %c0_i32_0 : i32, i32
  }
  func.func @transform_3(%arg0: i32) -> (i32, i32) {
    %c0_i32 = arith.constant 0 : i32
    %c0_i32_0 = arith.constant 0 : i32
    %c0_i32_1 = arith.constant 0 : i32
    return %c0_i32, %c0_i32_0 : i32, i32
  }
  func.func @transform_4(%arg0: i32) -> (i32, i32) {
    %c0_i32 = arith.constant 0 : i32
    %c0_i32_0 = arith.constant 0 : i32
    %c0_i32_1 = arith.constant 0 : i32
    return %c0_i32, %c0_i32_0 : i32, i32
  }
  func.func @transform_5(%arg0: i32) -> (i32, i32) {
    %c0_i32 = arith.constant 0 : i32
    %c0_i32_0 = arith.constant 0 : i32
    %c0_i32_1 = arith.constant 0 : i32
    return %c0_i32, %c0_i32_0 : i32, i32
  }
}

module attributes {stable_mosaic.version = 11 : i64} {
  func.func @mm_simple_kernel(%arg0: i32, %arg1: memref<200x128xf32, #tpu.memory_space<vmem>>, %arg2: memref<128x1024xf32, #tpu.memory_space<vmem>>, %arg3: memref<1x1024xf32, #tpu.memory_space<vmem>>, %arg4: memref<200x1024xf32, #tpu.memory_space<vmem>>) attributes {dimension_semantics = [#tpu.dimension_semantics<arbitrary>], iteration_bounds = array<i64: 1>, scalar_prefetch = 0 : i64, scratch_operands = 0 : i64, tpu.core_type = #tpu.core_type<tc>, window_params = [{pipeline_mode = #tpu.pipeline_mode<synchronous>, transform_indices = @transform_0, window_bounds = array<i64: 200, 128>}, {pipeline_mode = #tpu.pipeline_mode<synchronous>, transform_indices = @transform_1, window_bounds = array<i64: 128, 1024>}, {pipeline_mode = #tpu.pipeline_mode<synchronous>, transform_indices = @transform_2, window_bounds = array<i64: 1, 1024>}, {pipeline_mode = #tpu.pipeline_mode<synchronous>, transform_indices = @transform_3, window_bounds = array<i64: 200, 1024>}]} {
    %c0 = arith.constant 0 : index
    %c0_0 = arith.constant 0 : index
    %0 = vector.load %arg1[%c0, %c0_0] : memref<200x128xf32, #tpu.memory_space<vmem>>, vector<200x128xf32>
    %c0_1 = arith.constant 0 : index
    %c0_2 = arith.constant 0 : index
    %1 = vector.load %arg2[%c0_1, %c0_2] : memref<128x1024xf32, #tpu.memory_space<vmem>>, vector<128x1024xf32>
    %cst = arith.constant dense<0.000000e+00> : vector<200x1024xf32>
    %2 = tpu.matmul %0, %1, %cst {dimension_numbers = #tpu.dot_dimension_numbers<[1], [0], [0], [1], [0, 0, 1, 1], [], []>} : vector<200x128xf32>, vector<128x1024xf32>, vector<200x1024xf32> -> vector<200x1024xf32>
    %c0_3 = arith.constant 0 : index
    %c0_4 = arith.constant 0 : index
    %3 = vector.load %arg3[%c0_3, %c0_4] : memref<1x1024xf32, #tpu.memory_space<vmem>>, vector<1x1024xf32>
    %4 = vector.broadcast %3 : vector<1x1024xf32> to vector<200x1024xf32>
    %5 = arith.addf %2, %4 : vector<200x1024xf32>
    %c0_5 = arith.constant 0 : index
    %c0_6 = arith.constant 0 : index
    %6 = vector.load %arg4[%c0_5, %c0_6] : memref<200x1024xf32, #tpu.memory_space<vmem>>, vector<200x1024xf32>
    tpu.vector_store %arg4[%c0_5, %c0_6], %5 {strides = array<i32>} : memref<200x1024xf32, #tpu.memory_space<vmem>>, vector<200x1024xf32>,
    return
  }
  func.func @transform_0(%arg0: i32) -> (i32, i32) {
    %c0_i32 = arith.constant 0 : i32
    %c0_i32_0 = arith.constant 0 : i32
    %c0_i32_1 = arith.constant 0 : i32
    return %c0_i32, %c0_i32_0 : i32, i32
  }
  func.func @transform_1(%arg0: i32) -> (i32, i32) {
    %c0_i32 = arith.constant 0 : i32
    %c0_i32_0 = arith.constant 0 : i32
    %c0_i32_1 = arith.constant 0 : i32
    return %c0_i32, %c0_i32_0 : i32, i32
  }
  func.func @transform_2(%arg0: i32) -> (i32, i32) {
    %c0_i32 = arith.constant 0 : i32
    %c0_i32_0 = arith.constant 0 : i32
    %c0_i32_1 = arith.constant 0 : i32
    return %c0_i32, %c0_i32_0 : i32, i32
  }
  func.func @transform_3(%arg0: i32) -> (i32, i32) {
    %c0_i32 = arith.constant 0 : i32
    %c0_i32_0 = arith.constant 0 : i32
    %c0_i32_1 = arith.constant 0 : i32
    return %c0_i32, %c0_i32_0 : i32, i32
  }
}

module attributes {stable_mosaic.version = 11 : i64} {
  func.func @bilstm_fused_kernel(%arg0: i32, %arg1: memref<50x8x512xf32, #tpu.memory_space<vmem>>, %arg2: memref<128x1024xf32, #tpu.memory_space<vmem>>, %arg3: memref<50x8x128xf32, #tpu.memory_space<vmem>>, %arg4: memref<8x128xf32, #tpu.memory_space<vmem>>, %arg5: memref<8x128xf32, #tpu.memory_space<vmem>>) attributes {dimension_semantics = [#tpu.dimension_semantics<arbitrary>], iteration_bounds = array<i64: 1>, scalar_prefetch = 0 : i64, scratch_operands = 2 : i64, tpu.core_type = #tpu.core_type<tc>, window_params = [{pipeline_mode = #tpu.pipeline_mode<synchronous>, transform_indices = @transform_0, window_bounds = array<i64: 50, 8, 512>}, {pipeline_mode = #tpu.pipeline_mode<synchronous>, transform_indices = @transform_1, window_bounds = array<i64: 128, 1024>}, {pipeline_mode = #tpu.pipeline_mode<synchronous>, transform_indices = @transform_2, window_bounds = array<i64: 50, 8, 128>}]} {
    %cst = arith.constant 0.000000e+00 : f32
    %0 = vector.broadcast %cst : f32 to vector<8x128xf32>
    %c0 = arith.constant 0 : index
    %c0_0 = arith.constant 0 : index
    %1 = vector.load %arg4[%c0, %c0_0] : memref<8x128xf32, #tpu.memory_space<vmem>>, vector<8x128xf32>
    tpu.vector_store %arg4[%c0, %c0_0], %0 {strides = array<i32>} : memref<8x128xf32, #tpu.memory_space<vmem>>, vector<8x128xf32>,
    %cst_1 = arith.constant 0.000000e+00 : f32
    %2 = vector.broadcast %cst_1 : f32 to vector<8x128xf32>
    %c0_2 = arith.constant 0 : index
    %c0_3 = arith.constant 0 : index
    %3 = vector.load %arg5[%c0_2, %c0_3] : memref<8x128xf32, #tpu.memory_space<vmem>>, vector<8x128xf32>
    tpu.vector_store %arg5[%c0_2, %c0_3], %2 {strides = array<i32>} : memref<8x128xf32, #tpu.memory_space<vmem>>, vector<8x128xf32>,
    %c0_4 = arith.constant 0 : index
    %c0_5 = arith.constant 0 : index
    %4 = vector.load %arg2[%c0_4, %c0_5] : memref<128x1024xf32, #tpu.memory_space<vmem>>, vector<128x1024xf32>
    %5 = tpu.iota {dimensions = array<i32: 0>} : vector<8x1xi32>
    %c4_i32 = arith.constant 4 : i32
    %6 = vector.broadcast %c4_i32 : i32 to vector<8x1xi32>
    %7 = arith.cmpi sge, %5, %6 : vector<8x1xi32>
    %c0_i32 = arith.constant 0 : i32
    %c50_i32 = arith.constant 50 : i32
    %8 = arith.addi %c0_i32, %c50_i32 : i32
    %c1_i32 = arith.constant 1 : i32
    scf.for %arg6 = %c0_i32 to %8 step %c1_i32  : i32 {
      %c0_7 = arith.constant 0 : index
      %c0_8 = arith.constant 0 : index
      %9 = vector.load %arg4[%c0_7, %c0_8] : memref<8x128xf32, #tpu.memory_space<vmem>>, vector<8x128xf32>
      %cst_9 = arith.constant dense<0.000000e+00> : vector<8x1024xf32>
      %10 = tpu.matmul %9, %4, %cst_9 {dimension_numbers = #tpu.dot_dimension_numbers<[1], [0], [0], [1], [0, 0, 1, 1], [], []>} : vector<8x128xf32>, vector<128x1024xf32>, vector<8x1024xf32> -> vector<8x1024xf32>
      %11 = vector.extract_strided_slice %10 {offsets = [0, 512], sizes = [8, 512], strides = [1, 1]} : vector<8x1024xf32> to vector<8x512xf32>
      %12 = vector.extract_strided_slice %10 {offsets = [0, 0], sizes = [8, 512], strides = [1, 1]} : vector<8x1024xf32> to vector<8x512xf32>
      %13 = vector.shape_cast %7 : vector<8x1xi1> to vector<8x1xi1>
      %14 = vector.broadcast %13 : vector<8x1xi1> to vector<8x512xi1>
      %15 = arith.select %14, %11, %12 : vector<8x512xi1>, vector<8x512xf32>
      %16 = arith.index_cast %arg6 : i32 to index
      %c0_10 = arith.constant 0 : index
      %c0_11 = arith.constant 0 : index
      %17 = vector.load %arg1[%16, %c0_10, %c0_11] : memref<50x8x512xf32, #tpu.memory_space<vmem>>, vector<1x8x512xf32>
      %18 = vector.shape_cast %17 : vector<1x8x512xf32> to vector<8x512xf32>
      %19 = arith.addf %18, %15 : vector<8x512xf32>
      %20 = vector.extract_strided_slice %19 {offsets = [0, 0], sizes = [8, 128], strides = [1, 1]} : vector<8x512xf32> to vector<8x128xf32>
      %21 = arith.negf %20 : vector<8x128xf32>
      %22 = math.exp %21 : vector<8x128xf32>
      %cst_12 = arith.constant 1.000000e+00 : f32
      %23 = vector.broadcast %cst_12 : f32 to vector<8x128xf32>
      %24 = arith.addf %23, %22 : vector<8x128xf32>
      %25 = arith.divf %23, %24 : vector<8x128xf32>
      %26 = vector.extract_strided_slice %19 {offsets = [0, 128], sizes = [8, 128], strides = [1, 1]} : vector<8x512xf32> to vector<8x128xf32>
      %27 = arith.negf %26 : vector<8x128xf32>
      %28 = math.exp %27 : vector<8x128xf32>
      %cst_13 = arith.constant 1.000000e+00 : f32
      %29 = vector.broadcast %cst_13 : f32 to vector<8x128xf32>
      %30 = arith.addf %29, %28 : vector<8x128xf32>
      %31 = arith.divf %29, %30 : vector<8x128xf32>
      %32 = vector.extract_strided_slice %19 {offsets = [0, 256], sizes = [8, 128], strides = [1, 1]} : vector<8x512xf32> to vector<8x128xf32>
      %33 = math.tanh %32 : vector<8x128xf32>
      %34 = vector.extract_strided_slice %19 {offsets = [0, 384], sizes = [8, 128], strides = [1, 1]} : vector<8x512xf32> to vector<8x128xf32>
      %35 = arith.negf %34 : vector<8x128xf32>
      %36 = math.exp %35 : vector<8x128xf32>
      %cst_14 = arith.constant 1.000000e+00 : f32
      %37 = vector.broadcast %cst_14 : f32 to vector<8x128xf32>
      %38 = arith.addf %37, %36 : vector<8x128xf32>
      %39 = arith.divf %37, %38 : vector<8x128xf32>
      %c0_15 = arith.constant 0 : index
      %c0_16 = arith.constant 0 : index
      %40 = vector.load %arg5[%c0_15, %c0_16] : memref<8x128xf32, #tpu.memory_space<vmem>>, vector<8x128xf32>
      %41 = arith.mulf %31, %40 : vector<8x128xf32>
      %42 = arith.mulf %25, %33 : vector<8x128xf32>
      %43 = arith.addf %41, %42 : vector<8x128xf32>
      %44 = math.tanh %43 : vector<8x128xf32>
      %45 = arith.mulf %39, %44 : vector<8x128xf32>
      %c0_17 = arith.constant 0 : index
      %c0_18 = arith.constant 0 : index
      %46 = vector.load %arg5[%c0_17, %c0_18] : memref<8x128xf32, #tpu.memory_space<vmem>>, vector<8x128xf32>
      tpu.vector_store %arg5[%c0_17, %c0_18], %43 {strides = array<i32>} : memref<8x128xf32, #tpu.memory_space<vmem>>, vector<8x128xf32>,
      %c0_19 = arith.constant 0 : index
      %c0_20 = arith.constant 0 : index
      %47 = vector.load %arg4[%c0_19, %c0_20] : memref<8x128xf32, #tpu.memory_space<vmem>>, vector<8x128xf32>
      tpu.vector_store %arg4[%c0_19, %c0_20], %45 {strides = array<i32>} : memref<8x128xf32, #tpu.memory_space<vmem>>, vector<8x128xf32>,
      %48 = arith.index_cast %arg6 : i32 to index
      %c0_21 = arith.constant 0 : index
      %c0_22 = arith.constant 0 : index
      %49 = vector.load %arg3[%48, %c0_21, %c0_22] : memref<50x8x128xf32, #tpu.memory_space<vmem>>, vector<1x8x128xf32>
      %50 = vector.shape_cast %49 : vector<1x8x128xf32> to vector<8x128xf32>
      %51 = vector.shape_cast %45 : vector<8x128xf32> to vector<1x8x128xf32>
      tpu.vector_store %arg3[%48, %c0_21, %c0_22], %51 {strides = array<i32>} : memref<50x8x128xf32, #tpu.memory_space<vmem>>, vector<1x8x128xf32>,
    }
    %c50_i32_6 = arith.constant 50 : i32
    return
  }
  func.func @transform_0(%arg0: i32) -> (i32, i32, i32) {
    %c0_i32 = arith.constant 0 : i32
    %c0_i32_0 = arith.constant 0 : i32
    %c0_i32_1 = arith.constant 0 : i32
    %c0_i32_2 = arith.constant 0 : i32
    return %c0_i32, %c0_i32_0, %c0_i32_1 : i32, i32, i32
  }
  func.func @transform_1(%arg0: i32) -> (i32, i32) {
    %c0_i32 = arith.constant 0 : i32
    %c0_i32_0 = arith.constant 0 : i32
    %c0_i32_1 = arith.constant 0 : i32
    return %c0_i32, %c0_i32_0 : i32, i32
  }
  func.func @transform_2(%arg0: i32) -> (i32, i32, i32) {
    %c0_i32 = arith.constant 0 : i32
    %c0_i32_0 = arith.constant 0 : i32
    %c0_i32_1 = arith.constant 0 : i32
    %c0_i32_2 = arith.constant 0 : i32
    return %c0_i32, %c0_i32_0, %c0_i32_1 : i32, i32, i32
  }
}

module attributes {stable_mosaic.version = 11 : i64} {
  func.func @mm_simple_kernel(%arg0: i32, %arg1: memref<200x256xf32, #tpu.memory_space<vmem>>, %arg2: memref<256x1024xf32, #tpu.memory_space<vmem>>, %arg3: memref<1x1024xf32, #tpu.memory_space<vmem>>, %arg4: memref<200x1024xf32, #tpu.memory_space<vmem>>) attributes {dimension_semantics = [#tpu.dimension_semantics<arbitrary>], iteration_bounds = array<i64: 1>, scalar_prefetch = 0 : i64, scratch_operands = 0 : i64, tpu.core_type = #tpu.core_type<tc>, window_params = [{pipeline_mode = #tpu.pipeline_mode<synchronous>, transform_indices = @transform_0, window_bounds = array<i64: 200, 256>}, {pipeline_mode = #tpu.pipeline_mode<synchronous>, transform_indices = @transform_1, window_bounds = array<i64: 256, 1024>}, {pipeline_mode = #tpu.pipeline_mode<synchronous>, transform_indices = @transform_2, window_bounds = array<i64: 1, 1024>}, {pipeline_mode = #tpu.pipeline_mode<synchronous>, transform_indices = @transform_3, window_bounds = array<i64: 200, 1024>}]} {
    %c0 = arith.constant 0 : index
    %c0_0 = arith.constant 0 : index
    %0 = vector.load %arg1[%c0, %c0_0] : memref<200x256xf32, #tpu.memory_space<vmem>>, vector<200x256xf32>
    %c0_1 = arith.constant 0 : index
    %c0_2 = arith.constant 0 : index
    %1 = vector.load %arg2[%c0_1, %c0_2] : memref<256x1024xf32, #tpu.memory_space<vmem>>, vector<256x1024xf32>
    %cst = arith.constant dense<0.000000e+00> : vector<200x1024xf32>
    %2 = tpu.matmul %0, %1, %cst {dimension_numbers = #tpu.dot_dimension_numbers<[1], [0], [0], [1], [0, 0, 1, 1], [], []>} : vector<200x256xf32>, vector<256x1024xf32>, vector<200x1024xf32> -> vector<200x1024xf32>
    %c0_3 = arith.constant 0 : index
    %c0_4 = arith.constant 0 : index
    %3 = vector.load %arg3[%c0_3, %c0_4] : memref<1x1024xf32, #tpu.memory_space<vmem>>, vector<1x1024xf32>
    %4 = vector.broadcast %3 : vector<1x1024xf32> to vector<200x1024xf32>
    %5 = arith.addf %2, %4 : vector<200x1024xf32>
    %c0_5 = arith.constant 0 : index
    %c0_6 = arith.constant 0 : index
    %6 = vector.load %arg4[%c0_5, %c0_6] : memref<200x1024xf32, #tpu.memory_space<vmem>>, vector<200x1024xf32>
    tpu.vector_store %arg4[%c0_5, %c0_6], %5 {strides = array<i32>} : memref<200x1024xf32, #tpu.memory_space<vmem>>, vector<200x1024xf32>,
    return
  }
  func.func @transform_0(%arg0: i32) -> (i32, i32) {
    %c0_i32 = arith.constant 0 : i32
    %c0_i32_0 = arith.constant 0 : i32
    %c0_i32_1 = arith.constant 0 : i32
    return %c0_i32, %c0_i32_0 : i32, i32
  }
  func.func @transform_1(%arg0: i32) -> (i32, i32) {
    %c0_i32 = arith.constant 0 : i32
    %c0_i32_0 = arith.constant 0 : i32
    %c0_i32_1 = arith.constant 0 : i32
    return %c0_i32, %c0_i32_0 : i32, i32
  }
  func.func @transform_2(%arg0: i32) -> (i32, i32) {
    %c0_i32 = arith.constant 0 : i32
    %c0_i32_0 = arith.constant 0 : i32
    %c0_i32_1 = arith.constant 0 : i32
    return %c0_i32, %c0_i32_0 : i32, i32
  }
  func.func @transform_3(%arg0: i32) -> (i32, i32) {
    %c0_i32 = arith.constant 0 : i32
    %c0_i32_0 = arith.constant 0 : i32
    %c0_i32_1 = arith.constant 0 : i32
    return %c0_i32, %c0_i32_0 : i32, i32
  }
}

module attributes {stable_mosaic.version = 11 : i64} {
  func.func @mm_tiled_kernel(%arg0: i32, %arg1: memref<4x3200xbf16, #tpu.memory_space<vmem>>, %arg2: memref<3200x256xbf16, #tpu.memory_space<vmem>>, %arg3: memref<1x256xf32, #tpu.memory_space<vmem>>, %arg4: memref<4x256xf32, #tpu.memory_space<vmem>>, %arg5: memref<4x256xf32, #tpu.memory_space<vmem>>) attributes {dimension_semantics = [#tpu.dimension_semantics<arbitrary>], iteration_bounds = array<i64: 4>, scalar_prefetch = 0 : i64, scratch_operands = 1 : i64, tpu.core_type = #tpu.core_type<tc>, window_params = [{transform_indices = @transform_0, window_bounds = array<i64: 4, 3200>}, {transform_indices = @transform_1, window_bounds = array<i64: 3200, 256>}, {pipeline_mode = #tpu.pipeline_mode<synchronous>, transform_indices = @transform_2, window_bounds = array<i64: 1, 256>}, {pipeline_mode = #tpu.pipeline_mode<synchronous>, transform_indices = @transform_3, window_bounds = array<i64: 4, 256>}]} {
    %c0_i32 = arith.constant 0 : i32
    %0 = arith.cmpi eq, %arg0, %c0_i32 : i32
    %1 = arith.extui %0 : i1 to i32
    %c0_i32_0 = arith.constant 0 : i32
    %2 = arith.cmpi ne, %1, %c0_i32_0 : i32
    scf.if %2 {
      %cst_9 = arith.constant 0.000000e+00 : f32
      %12 = vector.broadcast %cst_9 : f32 to vector<4x256xf32>
      %c0_10 = arith.constant 0 : index
      %c0_11 = arith.constant 0 : index
      %13 = vector.load %arg5[%c0_10, %c0_11] : memref<4x256xf32, #tpu.memory_space<vmem>>, vector<4x256xf32>
      tpu.vector_store %arg5[%c0_10, %c0_11], %12 {strides = array<i32>} : memref<4x256xf32, #tpu.memory_space<vmem>>, vector<4x256xf32>,
    } else {
    }
    %c0 = arith.constant 0 : index
    %c0_1 = arith.constant 0 : index
    %3 = vector.load %arg5[%c0, %c0_1] : memref<4x256xf32, #tpu.memory_space<vmem>>, vector<4x256xf32>
    %c0_2 = arith.constant 0 : index
    %c0_3 = arith.constant 0 : index
    %4 = vector.load %arg1[%c0_2, %c0_3] : memref<4x3200xbf16, #tpu.memory_space<vmem>>, vector<4x3200xbf16>
    %c0_4 = arith.constant 0 : index
    %c0_5 = arith.constant 0 : index
    %5 = vector.load %arg2[%c0_4, %c0_5] : memref<3200x256xbf16, #tpu.memory_space<vmem>>, vector<3200x256xbf16>
    %cst = arith.constant dense<0.000000e+00> : vector<4x256xf32>
    %6 = tpu.matmul %4, %5, %cst {dimension_numbers = #tpu.dot_dimension_numbers<[1], [0], [0], [1], [0, 0, 1, 1], [], []>} : vector<4x3200xbf16>, vector<3200x256xbf16>, vector<4x256xf32> -> vector<4x256xf32>
    %7 = arith.addf %3, %6 : vector<4x256xf32>
    %c0_6 = arith.constant 0 : index
    %c0_7 = arith.constant 0 : index
    %8 = vector.load %arg5[%c0_6, %c0_7] : memref<4x256xf32, #tpu.memory_space<vmem>>, vector<4x256xf32>
    tpu.vector_store %arg5[%c0_6, %c0_7], %7 {strides = array<i32>} : memref<4x256xf32, #tpu.memory_space<vmem>>, vector<4x256xf32>,
    %c3_i32 = arith.constant 3 : i32
    %9 = arith.cmpi eq, %arg0, %c3_i32 : i32
    %10 = arith.extui %9 : i1 to i32
    %c0_i32_8 = arith.constant 0 : i32
    %11 = arith.cmpi ne, %10, %c0_i32_8 : i32
    scf.if %11 {
      %c0_9 = arith.constant 0 : index
      %c0_10 = arith.constant 0 : index
      %12 = vector.load %arg5[%c0_9, %c0_10] : memref<4x256xf32, #tpu.memory_space<vmem>>, vector<4x256xf32>
      %c0_11 = arith.constant 0 : index
      %c0_12 = arith.constant 0 : index
      %13 = vector.load %arg3[%c0_11, %c0_12] : memref<1x256xf32, #tpu.memory_space<vmem>>, vector<1x256xf32>
      %14 = vector.broadcast %13 : vector<1x256xf32> to vector<4x256xf32>
      %15 = arith.addf %12, %14 : vector<4x256xf32>
      %cst_13 = arith.constant 0.000000e+00 : f32
      %16 = vector.broadcast %cst_13 : f32 to vector<4x256xf32>
      %17 = arith.maximumf %15, %16 : vector<4x256xf32>
      %c0_14 = arith.constant 0 : index
      %c0_15 = arith.constant 0 : index
      %18 = vector.load %arg4[%c0_14, %c0_15] : memref<4x256xf32, #tpu.memory_space<vmem>>, vector<4x256xf32>
      tpu.vector_store %arg4[%c0_14, %c0_15], %17 {strides = array<i32>} : memref<4x256xf32, #tpu.memory_space<vmem>>, vector<4x256xf32>,
    } else {
    }
    return
  }
  func.func @transform_0(%arg0: i32) -> (i32, i32) {
    %c0_i32 = arith.constant 0 : i32
    %c0_i32_0 = arith.constant 0 : i32
    return %c0_i32, %arg0 : i32, i32
  }
  func.func @transform_1(%arg0: i32) -> (i32, i32) {
    %c0_i32 = arith.constant 0 : i32
    %c0_i32_0 = arith.constant 0 : i32
    return %arg0, %c0_i32 : i32, i32
  }
  func.func @transform_2(%arg0: i32) -> (i32, i32) {
    %c0_i32 = arith.constant 0 : i32
    %c0_i32_0 = arith.constant 0 : i32
    %c0_i32_1 = arith.constant 0 : i32
    return %c0_i32, %c0_i32_0 : i32, i32
  }
  func.func @transform_3(%arg0: i32) -> (i32, i32) {
    %c0_i32 = arith.constant 0 : i32
    %c0_i32_0 = arith.constant 0 : i32
    %c0_i32_1 = arith.constant 0 : i32
    return %c0_i32, %c0_i32_0 : i32, i32
  }
}

module attributes {stable_mosaic.version = 11 : i64} {
  func.func @mm_simple_kernel(%arg0: i32, %arg1: memref<2x512xf32, #tpu.memory_space<vmem>>, %arg2: memref<512x128xf32, #tpu.memory_space<vmem>>, %arg3: memref<1x128xf32, #tpu.memory_space<vmem>>, %arg4: memref<2x128xf32, #tpu.memory_space<vmem>>) attributes {dimension_semantics = [#tpu.dimension_semantics<arbitrary>], iteration_bounds = array<i64: 1>, scalar_prefetch = 0 : i64, scratch_operands = 0 : i64, tpu.core_type = #tpu.core_type<tc>, window_params = [{pipeline_mode = #tpu.pipeline_mode<synchronous>, transform_indices = @transform_0, window_bounds = array<i64: 2, 512>}, {pipeline_mode = #tpu.pipeline_mode<synchronous>, transform_indices = @transform_1, window_bounds = array<i64: 512, 128>}, {pipeline_mode = #tpu.pipeline_mode<synchronous>, transform_indices = @transform_2, window_bounds = array<i64: 1, 128>}, {pipeline_mode = #tpu.pipeline_mode<synchronous>, transform_indices = @transform_3, window_bounds = array<i64: 2, 128>}]} {
    %c0 = arith.constant 0 : index
    %c0_0 = arith.constant 0 : index
    %0 = vector.load %arg1[%c0, %c0_0] : memref<2x512xf32, #tpu.memory_space<vmem>>, vector<2x512xf32>
    %c0_1 = arith.constant 0 : index
    %c0_2 = arith.constant 0 : index
    %1 = vector.load %arg2[%c0_1, %c0_2] : memref<512x128xf32, #tpu.memory_space<vmem>>, vector<512x128xf32>
    %cst = arith.constant dense<0.000000e+00> : vector<2x128xf32>
    %2 = tpu.matmul %0, %1, %cst {dimension_numbers = #tpu.dot_dimension_numbers<[1], [0], [0], [1], [0, 0, 1, 1], [], []>} : vector<2x512xf32>, vector<512x128xf32>, vector<2x128xf32> -> vector<2x128xf32>
    %c0_3 = arith.constant 0 : index
    %c0_4 = arith.constant 0 : index
    %3 = vector.load %arg3[%c0_3, %c0_4] : memref<1x128xf32, #tpu.memory_space<vmem>>, vector<1x128xf32>
    %4 = vector.broadcast %3 : vector<1x128xf32> to vector<2x128xf32>
    %5 = arith.addf %2, %4 : vector<2x128xf32>
    %6 = arith.negf %5 : vector<2x128xf32>
    %7 = math.exp %6 : vector<2x128xf32>
    %cst_5 = arith.constant 1.000000e+00 : f32
    %8 = vector.broadcast %cst_5 : f32 to vector<2x128xf32>
    %9 = arith.addf %8, %7 : vector<2x128xf32>
    %10 = arith.divf %8, %9 : vector<2x128xf32>
    %c0_6 = arith.constant 0 : index
    %c0_7 = arith.constant 0 : index
    %11 = vector.load %arg4[%c0_6, %c0_7] : memref<2x128xf32, #tpu.memory_space<vmem>>, vector<2x128xf32>
    tpu.vector_store %arg4[%c0_6, %c0_7], %10 {strides = array<i32>} : memref<2x128xf32, #tpu.memory_space<vmem>>, vector<2x128xf32>,
    return
  }
  func.func @transform_0(%arg0: i32) -> (i32, i32) {
    %c0_i32 = arith.constant 0 : i32
    %c0_i32_0 = arith.constant 0 : i32
    %c0_i32_1 = arith.constant 0 : i32
    return %c0_i32, %c0_i32_0 : i32, i32
  }
  func.func @transform_1(%arg0: i32) -> (i32, i32) {
    %c0_i32 = arith.constant 0 : i32
    %c0_i32_0 = arith.constant 0 : i32
    %c0_i32_1 = arith.constant 0 : i32
    return %c0_i32, %c0_i32_0 : i32, i32
  }
  func.func @transform_2(%arg0: i32) -> (i32, i32) {
    %c0_i32 = arith.constant 0 : i32
    %c0_i32_0 = arith.constant 0 : i32
    %c0_i32_1 = arith.constant 0 : i32
    return %c0_i32, %c0_i32_0 : i32, i32
  }
  func.func @transform_3(%arg0: i32) -> (i32, i32) {
    %c0_i32 = arith.constant 0 : i32
    %c0_i32_0 = arith.constant 0 : i32
    %c0_i32_1 = arith.constant 0 : i32
    return %c0_i32, %c0_i32_0 : i32, i32
  }
}

</mosaic_0001>

<bundles_post_ra>
// kernel: cnn_lstm2_forward.7
= control target key start
LH: loop header
LB: loop body
LE: loop exit
PB: predicated region body
PF: predicated region fallthrough
CT: control target
= control target key end

     0   :  { %vm2283_vm0 = vcmask 588800   ;;  %s5490_s1 = inlined_call_operand.vmem [shape: f32[128,128], index: 1, kind: input, shape index: {}]   ;;  %s5491_s0 = inlined_call_operand.vmem [shape: f32[2000,128], index: 0, kind: input, shape index: {}]   ;;  %s5492_s2 = inlined_call_operand.vmem [shape: f32[1,128], index: 2, kind: input, shape index: {}]   ;;  %s5493_s3 = inlined_call_operand.vmem [shape: f32[200,200], index: 3, kind: input, shape index: {}]   ;;  %s5494_s4 = inlined_call_operand.vmem [shape: f32[200,1], index: 4, kind: input, shape index: {}]   ;;  %s5495_s5 = inlined_call_operand.vmem [shape: f32[200,128], index: 5, kind: output, shape index: {}]  }
   0x1   :  { %v285_v0 = vld [vmem:[%s5490_s1 + $0x78] sm:$0xff]  ;;  %v284_v1 = vld [vmem:[%s5490_s1 + $0x70] sm:$0xff]  ;;  %v283_v2 = vld [vmem:[%s5490_s1 + $0x68] sm:$0xff] }
   0x2   :  { %2895 = vmatprep.subr.mxu0 %v285_v0  ;;  %3302 = vmatprep.subr.mxu1 %v285_v0  ;;  %v282_v3 = vld [vmem:[%s5490_s1 + $0x60] sm:$0xff]  ;;  %v281_v5 = vld [vmem:[%s5490_s1 + $0x58] sm:$0xff]  ;;  %v280_v6 = vld [vmem:[%s5490_s1 + $0x50] sm:$0xff] }
   0x3   :  { %2896 = vmatpush3.msra.mxu0 %v285_v0  ;;  %3318 = vmatpush3.msra.mxu1 %v285_v0  ;;  %v20_v4 = vld [vmem:[%s5491_s0] sm:$0xff]  ;;  %v279_v7 = vld [vmem:[%s5490_s1 + $0x48] sm:$0xff]  ;;  %v277_v9 = vld [vmem:[%s5490_s1 + $0x38] sm:$0xff] }
   0x4   :  { %2897 = vmatprep.subr.mxu0 %v284_v1  ;;  %3303 = vmatprep.subr.mxu1 %v284_v1  ;;  %v278_v8 = vld [vmem:[%s5490_s1 + $0x40] sm:$0xff]  ;;  %v276_v10 = vld [vmem:[%s5490_s1 + $0x30] sm:$0xff]  ;;  %v275_v11 = vld [vmem:[%s5490_s1 + $0x28] sm:$0xff] }
   0x5   :  { %2898 = vmatpush3.msra.mxu0 %v284_v1  ;;  %3319 = vmatpush3.msra.mxu1 %v284_v1  ;;  %v274_v12 = vld [vmem:[%s5490_s1 + $0x20] sm:$0xff]  ;;  %v273_v13 = vld [vmem:[%s5490_s1 + $0x18] sm:$0xff]  ;;  %v272_v14 = vld [vmem:[%s5490_s1 + $0x10] sm:$0xff] }
   0x6   :  { %2899 = vmatprep.subr.mxu0 %v283_v2  ;;  %3304 = vmatprep.subr.mxu1 %v283_v2  ;;  %v271_v15 = vld [vmem:[%s5490_s1 + $0x8] sm:$0xff]  ;;  %v270_v16 = vld [vmem:[%s5490_s1] sm:$0xff]  ;;  %v22_v18 = vld [vmem:[%s5491_s0 + $0x10] sm:$0xff] }
   0x7   :  { %2900 = vmatpush3.msra.mxu0 %v283_v2  ;;  %2927 = vmatprep.mubr.f32.mxu0 %v20_v4  ;;  %v21_v17 = vld [vmem:[%s5491_s0 + $0x8] sm:$0xff]  ;;  %v170_v19 = vld [vmem:[%s5491_s0 + $0x4b0] sm:$0xff]  ;;  %v171_v20 = vld [vmem:[%s5491_s0 + $0x4b8] sm:$0xff] }
   0x8   :  { %2901 = vmatprep.subr.mxu0 %v282_v3  ;;  %3320 = vmatpush3.msra.mxu1 %v283_v2  ;;  %v172_v21 = vld [vmem:[%s5491_s0 + $0x4c0] sm:$0xff]  ;;  %v23_v22 = vld [vmem:[%s5491_s0 + $0x18] sm:$0xff]  ;;  %v173_v24 = vld [vmem:[%s5491_s0 + $0x4c8] sm:$0xff] }
   0x9   :  { %2902 = vmatpush3.msra.mxu0 %v282_v3  ;;  %3305 = vmatprep.subr.mxu1 %v282_v3  ;;  %v24_v23 = vld [vmem:[%s5491_s0 + $0x20] sm:$0xff]  ;;  %v174_v25 = vld [vmem:[%s5491_s0 + $0x4d0] sm:$0xff]  ;;  %v25_v26 = vld [vmem:[%s5491_s0 + $0x28] sm:$0xff] }
   0xa   :  { %2903 = vmatprep.subr.mxu0 %v281_v5  ;;  %3321 = vmatpush3.msra.mxu1 %v282_v3  ;;  %v26_v27 = vld [vmem:[%s5491_s0 + $0x30] sm:$0xff]  ;;  %v175_v28 = vld [vmem:[%s5491_s0 + $0x4d8] sm:$0xff]  ;;  %v176_v29 = vld [vmem:[%s5491_s0 + $0x4e0] sm:$0xff] }
   0xb   :  { %2904 = vmatpush3.msra.mxu0 %v281_v5  ;;  %3306 = vmatprep.subr.mxu1 %v281_v5  ;;  %v27_v30 = vld [vmem:[%s5491_s0 + $0x38] sm:$0xff]  ;;  %v28_v31 = vld [vmem:[%s5491_s0 + $0x40] sm:$0xff]  ;;  %v177_v32 = vld [vmem:[%s5491_s0 + $0x4e8] sm:$0xff] }
   0xc   :  { %2905 = vmatprep.subr.mxu0 %v280_v6  ;;  %3322 = vmatpush3.msra.mxu1 %v281_v5  ;;  %v178_v33 = vld [vmem:[%s5491_s0 + $0x4f0] sm:$0xff]  ;;  %v29_v34 = vld [vmem:[%s5491_s0 + $0x48] sm:$0xff]  ;;  %v179_v36 = vld [vmem:[%s5491_s0 + $0x4f8] sm:$0xff] }
   0xd   :  { %2906 = vmatpush3.msra.mxu0 %v280_v6  ;;  %3307 = vmatprep.subr.mxu1 %v280_v6  ;;  %v30_v35 = vld [vmem:[%s5491_s0 + $0x50] sm:$0xff]  ;;  %v180_v37 = vld [vmem:[%s5491_s0 + $0x500] sm:$0xff]  ;;  %v31_v38 = vld [vmem:[%s5491_s0 + $0x58] sm:$0xff] }
   0xe   :  { %2907 = vmatprep.subr.mxu0 %v279_v7  ;;  %3323 = vmatpush3.msra.mxu1 %v280_v6  ;;  %v32_v39 = vld [vmem:[%s5491_s0 + $0x60] sm:$0xff]  ;;  %v181_v40 = vld [vmem:[%s5491_s0 + $0x508] sm:$0xff]  ;;  %v182_v41 = vld [vmem:[%s5491_s0 + $0x510] sm:$0xff] }
   0xf   :  { %2908 = vmatpush3.msra.mxu0 %v279_v7  ;;  %3308 = vmatprep.subr.mxu1 %v279_v7  ;;  %v33_v42 = vld [vmem:[%s5491_s0 + $0x68] sm:$0xff]  ;;  %v34_v43 = vld [vmem:[%s5491_s0 + $0x70] sm:$0xff]  ;;  %v183_v44 = vld [vmem:[%s5491_s0 + $0x518] sm:$0xff] }
  0x10   :  { %2909 = vmatprep.subr.mxu0 %v278_v8  ;;  %3324 = vmatpush3.msra.mxu1 %v279_v7  ;;  %v184_v45 = vld [vmem:[%s5491_s0 + $0x520] sm:$0xff]  ;;  %v35_v46 = vld [vmem:[%s5491_s0 + $0x78] sm:$0xff]  ;;  %v185_v48 = vld [vmem:[%s5491_s0 + $0x528] sm:$0xff] }
  0x11   :  { %2910 = vmatpush3.msra.mxu0 %v278_v8  ;;  %3309 = vmatprep.subr.mxu1 %v278_v8  ;;  %v36_v47 = vld [vmem:[%s5491_s0 + $0x80] sm:$0xff]  ;;  %v186_v49 = vld [vmem:[%s5491_s0 + $0x530] sm:$0xff]  ;;  %v37_v50 = vld [vmem:[%s5491_s0 + $0x88] sm:$0xff] }
  0x12   :  { %2911 = vmatprep.subr.mxu0 %v277_v9  ;;  %3325 = vmatpush3.msra.mxu1 %v278_v8  ;;  %v38_v51 = vld [vmem:[%s5491_s0 + $0x90] sm:$0xff]  ;;  %v187_v52 = vld [vmem:[%s5491_s0 + $0x538] sm:$0xff]  ;;  %v188_v53 = vld [vmem:[%s5491_s0 + $0x540] sm:$0xff] }
  0x13   :  { %2912 = vmatpush3.msra.mxu0 %v277_v9  ;;  %3310 = vmatprep.subr.mxu1 %v277_v9  ;;  %v39_v54 = vld [vmem:[%s5491_s0 + $0x98] sm:$0xff]  ;;  %v40_v55 = vld [vmem:[%s5491_s0 + $0xa0] sm:$0xff]  ;;  %v189_v56 = vld [vmem:[%s5491_s0 + $0x548] sm:$0xff] }
  0x14   :  { %2913 = vmatprep.subr.mxu0 %v276_v10  ;;  %3326 = vmatpush3.msra.mxu1 %v277_v9  ;;  %v190_v57 = vld [vmem:[%s5491_s0 + $0x550] sm:$0xff]  ;;  %v41_v58 = vld [vmem:[%s5491_s0 + $0xa8] sm:$0xff]  ;;  %v191_v60 = vld [vmem:[%s5491_s0 + $0x558] sm:$0xff] }
  0x15   :  { %2914 = vmatpush3.msra.mxu0 %v276_v10  ;;  %3311 = vmatprep.subr.mxu1 %v276_v10  ;;  %v42_v59 = vld [vmem:[%s5491_s0 + $0xb0] sm:$0xff]  ;;  %v192_v61 = vld [vmem:[%s5491_s0 + $0x560] sm:$0xff]  ;;  %v43_v62 = vld [vmem:[%s5491_s0 + $0xb8] sm:$0xff] }
  0x16   :  { %2915 = vmatprep.subr.mxu0 %v275_v11  ;;  %3327 = vmatpush3.msra.mxu1 %v276_v10  ;;  %v44_v63 = vld [vmem:[%s5491_s0 + $0xc0] sm:$0xff]  ;;  %v193_v0 = vld [vmem:[%s5491_s0 + $0x568] sm:$0xff]  ;;  %v194_v1 = vld [vmem:[%s5491_s0 + $0x570] sm:$0xff] }
  0x17   :  { %2916 = vmatpush3.msra.mxu0 %v275_v11  ;;  %3312 = vmatprep.subr.mxu1 %v275_v11  ;;  %v45_v2 = vld [vmem:[%s5491_s0 + $0xc8] sm:$0xff]  ;;  %v46_v3 = vld [vmem:[%s5491_s0 + $0xd0] sm:$0xff]  ;;  %v195_v4 = vld [vmem:[%s5491_s0 + $0x578] sm:$0xff] }
  0x18   :  { %2917 = vmatprep.subr.mxu0 %v274_v12  ;;  %3328 = vmatpush3.msra.mxu1 %v275_v11  ;;  %v196_v5 = vld [vmem:[%s5491_s0 + $0x580] sm:$0xff]  ;;  %v47_v6 = vld [vmem:[%s5491_s0 + $0xd8] sm:$0xff]  ;;  %v197_v8 = vld [vmem:[%s5491_s0 + $0x588] sm:$0xff] }
  0x19   :  { %2918 = vmatpush3.msra.mxu0 %v274_v12  ;;  %3313 = vmatprep.subr.mxu1 %v274_v12  ;;  %v48_v7 = vld [vmem:[%s5491_s0 + $0xe0] sm:$0xff]  ;;  %v198_v9 = vld [vmem:[%s5491_s0 + $0x590] sm:$0xff]  ;;  %v49_v10 = vld [vmem:[%s5491_s0 + $0xe8] sm:$0xff] }
  0x1a   :  { %2919 = vmatprep.subr.mxu0 %v273_v13  ;;  %3329 = vmatpush3.msra.mxu1 %v274_v12  ;;  %v50_v11 = vld [vmem:[%s5491_s0 + $0xf0] sm:$0xff]  ;;  %v199_v12 = vld [vmem:[%s5491_s0 + $0x598] sm:$0xff] }
  0x1b   :  { %2920 = vmatpush3.msra.mxu0 %v273_v13  ;;  %3314 = vmatprep.subr.mxu1 %v273_v13 }
  0x1c   :  { %2921 = vmatprep.subr.mxu0 %v272_v14  ;;  %3330 = vmatpush3.msra.mxu1 %v273_v13  ;;  %v200_v13 = vld [vmem:[%s5491_s0 + $0x5a0] sm:$0xff] }
  0x1d   :  { %2922 = vmatpush3.msra.mxu0 %v272_v14  ;;  %3315 = vmatprep.subr.mxu1 %v272_v14 }
  0x1e   :  { %2923 = vmatprep.subr.mxu0 %v271_v15  ;;  %3331 = vmatpush3.msra.mxu1 %v272_v14  ;;  %v51_v14 = vld [vmem:[%s5491_s0 + $0xf8] sm:$0xff] }
  0x1f   :  { %2924 = vmatpush3.msra.mxu0 %v271_v15  ;;  %3316 = vmatprep.subr.mxu1 %v271_v15 }
  0x20   :  { %2925 = vmatprep.subr.mxu0 %v270_v16  ;;  %3332 = vmatpush3.msra.mxu1 %v271_v15  ;;  %v52_v15 = vld [vmem:[%s5491_s0 + $0x100] sm:$0xff] }
  0x21   :  { %2926 = vmatpush3.msra.mxu0 %v270_v16  ;;  %3317 = vmatprep.subr.mxu1 %v270_v16 }
  0x22   :  { %2928 = vmatmul.mubr.f32.vlgmr.msra.gmra.mxu0 %v21_v17  ;;  %3333 = vmatpush3.msra.mxu1 %v270_v16  ;;  %v201_v16 = vld [vmem:[%s5491_s0 + $0x5a8] sm:$0xff]  ;;  %v202_v17 = vld [vmem:[%s5491_s0 + $0x5b0] sm:$0xff] }
  0x23   :  { %2930 = vmatprep.mubr.f32.mxu0 %v22_v18  ;;  %3152 = vmatprep.mubr.f32.mxu1 %v170_v19  ;;  %v53_v18 = vld [vmem:[%s5491_s0 + $0x108] sm:$0xff]  ;;  %v54_v19 = vld [vmem:[%s5491_s0 + $0x110] sm:$0xff] }
  0x24   :  { %3153 = vmatmul.mubr.f32.vlgmr.msra.gmra.mxu1 %v171_v20  ;;  %v203_v20 = vld [vmem:[%s5491_s0 + $0x5b8] sm:$0xff] }
  0x25   :  { %3155 = vmatprep.mubr.f32.mxu1 %v172_v21  ;;  %v204_v21 = vld [vmem:[%s5491_s0 + $0x5c0] sm:$0xff] }
  0x26   :  { %2931 = vmatmul.mubr.f32.gmra.mxu0 %v23_v22  ;;  %v55_v22 = vld [vmem:[%s5491_s0 + $0x118] sm:$0xff] }
  0x27   :  { %2933 = vmatprep.mubr.f32.mxu0 %v24_v23  ;;  %v56_v23 = vld [vmem:[%s5491_s0 + $0x120] sm:$0xff] }
  0x28   :  { %3156 = vmatmul.mubr.f32.gmra.mxu1 %v173_v24  ;;  %v205_v24 = vld [vmem:[%s5491_s0 + $0x5c8] sm:$0xff] }
  0x29   :  { %3158 = vmatprep.mubr.f32.mxu1 %v174_v25  ;;  %v206_v25 = vld [vmem:[%s5491_s0 + $0x5d0] sm:$0xff] }
  0x2a   :  { %2934 = vmatmul.mubr.f32.gmra.mxu0 %v25_v26  ;;  %v57_v26 = vld [vmem:[%s5491_s0 + $0x128] sm:$0xff] }
  0x2b   :  { %2936 = vmatprep.mubr.f32.mxu0 %v26_v27  ;;  %v58_v27 = vld [vmem:[%s5491_s0 + $0x130] sm:$0xff] }
  0x2c   :  { %3159 = vmatmul.mubr.f32.gmra.mxu1 %v175_v28  ;;  %v207_v28 = vld [vmem:[%s5491_s0 + $0x5d8] sm:$0xff] }
  0x2d   :  { %3161 = vmatprep.mubr.f32.mxu1 %v176_v29  ;;  %v208_v29 = vld [vmem:[%s5491_s0 + $0x5e0] sm:$0xff] }
  0x2e   :  { %2937 = vmatmul.mubr.f32.gmra.mxu0 %v27_v30  ;;  %v59_v30 = vld [vmem:[%s5491_s0 + $0x138] sm:$0xff] }
  0x2f   :  { %2939 = vmatprep.mubr.f32.mxu0 %v28_v31  ;;  %v60_v31 = vld [vmem:[%s5491_s0 + $0x140] sm:$0xff] }
  0x30   :  { %3162 = vmatmul.mubr.f32.gmra.mxu1 %v177_v32  ;;  %v209_v32 = vld [vmem:[%s5491_s0 + $0x5e8] sm:$0xff] }
  0x31   :  { %3164 = vmatprep.mubr.f32.mxu1 %v178_v33  ;;  %v210_v33 = vld [vmem:[%s5491_s0 + $0x5f0] sm:$0xff] }
  0x32   :  { %2940 = vmatmul.mubr.f32.gmra.mxu0 %v29_v34  ;;  %v61_v34 = vld [vmem:[%s5491_s0 + $0x148] sm:$0xff] }
  0x33   :  { %2942 = vmatprep.mubr.f32.mxu0 %v30_v35  ;;  %v62_v35 = vld [vmem:[%s5491_s0 + $0x150] sm:$0xff] }
  0x34   :  { %3165 = vmatmul.mubr.f32.gmra.mxu1 %v179_v36  ;;  %v211_v36 = vld [vmem:[%s5491_s0 + $0x5f8] sm:$0xff] }
  0x35   :  { %3167 = vmatprep.mubr.f32.mxu1 %v180_v37  ;;  %v212_v37 = vld [vmem:[%s5491_s0 + $0x600] sm:$0xff] }
  0x36   :  { %2943 = vmatmul.mubr.f32.gmra.mxu0 %v31_v38  ;;  %v63_v38 = vld [vmem:[%s5491_s0 + $0x158] sm:$0xff] }
  0x37   :  { %2945 = vmatprep.mubr.f32.mxu0 %v32_v39  ;;  %v64_v39 = vld [vmem:[%s5491_s0 + $0x160] sm:$0xff] }
  0x38   :  { %3168 = vmatmul.mubr.f32.gmra.mxu1 %v181_v40  ;;  %v213_v40 = vld [vmem:[%s5491_s0 + $0x608] sm:$0xff] }
  0x39   :  { %3170 = vmatprep.mubr.f32.mxu1 %v182_v41  ;;  %v214_v41 = vld [vmem:[%s5491_s0 + $0x610] sm:$0xff] }
  0x3a   :  { %2946 = vmatmul.mubr.f32.gmra.mxu0 %v33_v42  ;;  %v65_v42 = vld [vmem:[%s5491_s0 + $0x168] sm:$0xff] }
  0x3b   :  { %2948 = vmatprep.mubr.f32.mxu0 %v34_v43  ;;  %v66_v43 = vld [vmem:[%s5491_s0 + $0x170] sm:$0xff] }
  0x3c   :  { %3171 = vmatmul.mubr.f32.gmra.mxu1 %v183_v44  ;;  %v215_v44 = vld [vmem:[%s5491_s0 + $0x618] sm:$0xff] }
  0x3d   :  { %3173 = vmatprep.mubr.f32.mxu1 %v184_v45  ;;  %v216_v45 = vld [vmem:[%s5491_s0 + $0x620] sm:$0xff] }
  0x3e   :  { %2949 = vmatmul.mubr.f32.gmra.mxu0 %v35_v46  ;;  %v67_v46 = vld [vmem:[%s5491_s0 + $0x178] sm:$0xff] }
  0x3f   :  { %2951 = vmatprep.mubr.f32.mxu0 %v36_v47  ;;  %v68_v47 = vld [vmem:[%s5491_s0 + $0x180] sm:$0xff] }
  0x40   :  { %3174 = vmatmul.mubr.f32.gmra.mxu1 %v185_v48  ;;  %v217_v48 = vld [vmem:[%s5491_s0 + $0x628] sm:$0xff] }
  0x41   :  { %3176 = vmatprep.mubr.f32.mxu1 %v186_v49  ;;  %v218_v49 = vld [vmem:[%s5491_s0 + $0x630] sm:$0xff] }
  0x42   :  { %2952 = vmatmul.mubr.f32.gmra.mxu0 %v37_v50  ;;  %v69_v50 = vld [vmem:[%s5491_s0 + $0x188] sm:$0xff] }
  0x43   :  { %2954 = vmatprep.mubr.f32.mxu0 %v38_v51  ;;  %v70_v51 = vld [vmem:[%s5491_s0 + $0x190] sm:$0xff] }
  0x44   :  { %3177 = vmatmul.mubr.f32.gmra.mxu1 %v187_v52  ;;  %v219_v52 = vld [vmem:[%s5491_s0 + $0x638] sm:$0xff] }
  0x45   :  { %3179 = vmatprep.mubr.f32.mxu1 %v188_v53  ;;  %v220_v53 = vld [vmem:[%s5491_s0 + $0x640] sm:$0xff] }
  0x46   :  { %2955 = vmatmul.mubr.f32.gmra.mxu0 %v39_v54  ;;  %v71_v54 = vld [vmem:[%s5491_s0 + $0x198] sm:$0xff] }
  0x47   :  { %2957 = vmatprep.mubr.f32.mxu0 %v40_v55  ;;  %v72_v55 = vld [vmem:[%s5491_s0 + $0x1a0] sm:$0xff] }
  0x48   :  { %3180 = vmatmul.mubr.f32.gmra.mxu1 %v189_v56  ;;  %v221_v56 = vld [vmem:[%s5491_s0 + $0x648] sm:$0xff] }
  0x49   :  { %3182 = vmatprep.mubr.f32.mxu1 %v190_v57  ;;  %v222_v57 = vld [vmem:[%s5491_s0 + $0x650] sm:$0xff] }
  0x4a   :  { %2958 = vmatmul.mubr.f32.gmra.mxu0 %v41_v58  ;;  %v73_v58 = vld [vmem:[%s5491_s0 + $0x1a8] sm:$0xff] }
  0x4b   :  { %2960 = vmatprep.mubr.f32.mxu0 %v42_v59  ;;  %v74_v59 = vld [vmem:[%s5491_s0 + $0x1b0] sm:$0xff] }
  0x4c   :  { %3183 = vmatmul.mubr.f32.gmra.mxu1 %v191_v60  ;;  %v223_v60 = vld [vmem:[%s5491_s0 + $0x658] sm:$0xff] }
  0x4d   :  { %3185 = vmatprep.mubr.f32.mxu1 %v192_v61  ;;  %v224_v61 = vld [vmem:[%s5491_s0 + $0x660] sm:$0xff] }
  0x4e   :  { %2961 = vmatmul.mubr.f32.gmra.mxu0 %v43_v62  ;;  %v75_v62 = vld [vmem:[%s5491_s0 + $0x1b8] sm:$0xff] }
  0x4f   :  { %2963 = vmatprep.mubr.f32.mxu0 %v44_v63  ;;  %v76_v63 = vld [vmem:[%s5491_s0 + $0x1c0] sm:$0xff] }
  0x50   :  { %3186 = vmatmul.mubr.f32.gmra.mxu1 %v193_v0  ;;  %v225_v0 = vld [vmem:[%s5491_s0 + $0x668] sm:$0xff] }
  0x51   :  { %3188 = vmatprep.mubr.f32.mxu1 %v194_v1  ;;  %v226_v1 = vld [vmem:[%s5491_s0 + $0x670] sm:$0xff] }
  0x52   :  { %2964 = vmatmul.mubr.f32.gmra.mxu0 %v45_v2  ;;  %v77_v2 = vld [vmem:[%s5491_s0 + $0x1c8] sm:$0xff] }
  0x53   :  { %2966 = vmatprep.mubr.f32.mxu0 %v46_v3  ;;  %v78_v3 = vld [vmem:[%s5491_s0 + $0x1d0] sm:$0xff] }
  0x54   :  { %3189 = vmatmul.mubr.f32.gmra.mxu1 %v195_v4  ;;  %v227_v4 = vld [vmem:[%s5491_s0 + $0x678] sm:$0xff] }
  0x55   :  { %3191 = vmatprep.mubr.f32.mxu1 %v196_v5  ;;  %v228_v5 = vld [vmem:[%s5491_s0 + $0x680] sm:$0xff] }
  0x56   :  { %2967 = vmatmul.mubr.f32.gmra.mxu0 %v47_v6  ;;  %v79_v6 = vld [vmem:[%s5491_s0 + $0x1d8] sm:$0xff] }
  0x57   :  { %2969 = vmatprep.mubr.f32.mxu0 %v48_v7  ;;  %v80_v7 = vld [vmem:[%s5491_s0 + $0x1e0] sm:$0xff] }
  0x58   :  { %3192 = vmatmul.mubr.f32.gmra.mxu1 %v197_v8  ;;  %v229_v8 = vld [vmem:[%s5491_s0 + $0x688] sm:$0xff] }
  0x59   :  { %3194 = vmatprep.mubr.f32.mxu1 %v198_v9  ;;  %v230_v9 = vld [vmem:[%s5491_s0 + $0x690] sm:$0xff] }
  0x5a   :  { %2970 = vmatmul.mubr.f32.gmra.mxu0 %v49_v10  ;;  %v81_v10 = vld [vmem:[%s5491_s0 + $0x1e8] sm:$0xff] }
  0x5b   :  { %2972 = vmatprep.mubr.f32.mxu0 %v50_v11  ;;  %v82_v11 = vld [vmem:[%s5491_s0 + $0x1f0] sm:$0xff] }
  0x5c   :  { %3195 = vmatmul.mubr.f32.gmra.mxu1 %v199_v12  ;;  %v231_v12 = vld [vmem:[%s5491_s0 + $0x698] sm:$0xff] }
  0x5d   :  { %3197 = vmatprep.mubr.f32.mxu1 %v200_v13  ;;  %v232_v13 = vld [vmem:[%s5491_s0 + $0x6a0] sm:$0xff] }
  0x5e   :  { %2973 = vmatmul.mubr.f32.gmra.mxu0 %v51_v14  ;;  %v83_v14 = vld [vmem:[%s5491_s0 + $0x1f8] sm:$0xff] }
  0x5f   :  { %2975 = vmatprep.mubr.f32.mxu0 %v52_v15  ;;  %v84_v15 = vld [vmem:[%s5491_s0 + $0x200] sm:$0xff] }
  0x60   :  { %3198 = vmatmul.mubr.f32.gmra.mxu1 %v201_v16  ;;  %v233_v16 = vld [vmem:[%s5491_s0 + $0x6a8] sm:$0xff] }
  0x61   :  { %3200 = vmatprep.mubr.f32.mxu1 %v202_v17  ;;  %v234_v17 = vld [vmem:[%s5491_s0 + $0x6b0] sm:$0xff] }
  0x62   :  { %2976 = vmatmul.mubr.f32.gmra.mxu0 %v53_v18  ;;  %v85_v18 = vld [vmem:[%s5491_s0 + $0x208] sm:$0xff] }
  0x63   :  { %2978 = vmatprep.mubr.f32.mxu0 %v54_v19  ;;  %v86_v19 = vld [vmem:[%s5491_s0 + $0x210] sm:$0xff] }
  0x64   :  { %3201 = vmatmul.mubr.f32.gmra.mxu1 %v203_v20  ;;  %v235_v20 = vld [vmem:[%s5491_s0 + $0x6b8] sm:$0xff] }
  0x65   :  { %3203 = vmatprep.mubr.f32.mxu1 %v204_v21  ;;  %v236_v21 = vld [vmem:[%s5491_s0 + $0x6c0] sm:$0xff] }
  0x66   :  { %2979 = vmatmul.mubr.f32.gmra.mxu0 %v55_v22  ;;  %v87_v22 = vld [vmem:[%s5491_s0 + $0x218] sm:$0xff] }
  0x67   :  { %2981 = vmatprep.mubr.f32.mxu0 %v56_v23  ;;  %v88_v23 = vld [vmem:[%s5491_s0 + $0x220] sm:$0xff] }
  0x68   :  { %3204 = vmatmul.mubr.f32.gmra.mxu1 %v205_v24  ;;  %v237_v24 = vld [vmem:[%s5491_s0 + $0x6c8] sm:$0xff] }
  0x69   :  { %3206 = vmatprep.mubr.f32.mxu1 %v206_v25  ;;  %v238_v25 = vld [vmem:[%s5491_s0 + $0x6d0] sm:$0xff] }
  0x6a   :  { %2982 = vmatmul.mubr.f32.gmra.mxu0 %v57_v26  ;;  %v89_v26 = vld [vmem:[%s5491_s0 + $0x228] sm:$0xff] }
  0x6b   :  { %2984 = vmatprep.mubr.f32.mxu0 %v58_v27  ;;  %v90_v27 = vld [vmem:[%s5491_s0 + $0x230] sm:$0xff] }
  0x6c   :  { %3207 = vmatmul.mubr.f32.gmra.mxu1 %v207_v28  ;;  %v239_v28 = vld [vmem:[%s5491_s0 + $0x6d8] sm:$0xff] }
  0x6d   :  { %3209 = vmatprep.mubr.f32.mxu1 %v208_v29  ;;  %v240_v29 = vld [vmem:[%s5491_s0 + $0x6e0] sm:$0xff] }
  0x6e   :  { %2985 = vmatmul.mubr.f32.gmra.mxu0 %v59_v30  ;;  %v91_v30 = vld [vmem:[%s5491_s0 + $0x238] sm:$0xff] }
  0x6f   :  { %2987 = vmatprep.mubr.f32.mxu0 %v60_v31  ;;  %v92_v31 = vld [vmem:[%s5491_s0 + $0x240] sm:$0xff] }
  0x70   :  { %3210 = vmatmul.mubr.f32.gmra.mxu1 %v209_v32  ;;  %v241_v32 = vld [vmem:[%s5491_s0 + $0x6e8] sm:$0xff] }
  0x71   :  { %3212 = vmatprep.mubr.f32.mxu1 %v210_v33  ;;  %v242_v33 = vld [vmem:[%s5491_s0 + $0x6f0] sm:$0xff] }
  0x72   :  { %2988 = vmatmul.mubr.f32.gmra.mxu0 %v61_v34  ;;  %v93_v34 = vld [vmem:[%s5491_s0 + $0x248] sm:$0xff] }
  0x73   :  { %2990 = vmatprep.mubr.f32.mxu0 %v62_v35  ;;  %v94_v35 = vld [vmem:[%s5491_s0 + $0x250] sm:$0xff] }
  0x74   :  { %3213 = vmatmul.mubr.f32.gmra.mxu1 %v211_v36  ;;  %v243_v36 = vld [vmem:[%s5491_s0 + $0x6f8] sm:$0xff] }
  0x75   :  { %3215 = vmatprep.mubr.f32.mxu1 %v212_v37  ;;  %v244_v37 = vld [vmem:[%s5491_s0 + $0x700] sm:$0xff] }
  0x76   :  { %2991 = vmatmul.mubr.f32.gmra.mxu0 %v63_v38  ;;  %v95_v38 = vld [vmem:[%s5491_s0 + $0x258] sm:$0xff] }
  0x77   :  { %2993 = vmatprep.mubr.f32.mxu0 %v64_v39  ;;  %v96_v39 = vld [vmem:[%s5491_s0 + $0x260] sm:$0xff] }
  0x78   :  { %3216 = vmatmul.mubr.f32.gmra.mxu1 %v213_v40  ;;  %v245_v40 = vld [vmem:[%s5491_s0 + $0x708] sm:$0xff] }
  0x79   :  { %3218 = vmatprep.mubr.f32.mxu1 %v214_v41  ;;  %v246_v41 = vld [vmem:[%s5491_s0 + $0x710] sm:$0xff] }
  0x7a   :  { %2994 = vmatmul.mubr.f32.gmra.mxu0 %v65_v42  ;;  %v97_v42 = vld [vmem:[%s5491_s0 + $0x268] sm:$0xff] }
  0x7b   :  { %2996 = vmatprep.mubr.f32.mxu0 %v66_v43  ;;  %v98_v43 = vld [vmem:[%s5491_s0 + $0x270] sm:$0xff] }
  0x7c   :  { %3219 = vmatmul.mubr.f32.gmra.mxu1 %v215_v44  ;;  %v247_v44 = vld [vmem:[%s5491_s0 + $0x718] sm:$0xff] }
  0x7d   :  { %3221 = vmatprep.mubr.f32.mxu1 %v216_v45  ;;  %v248_v45 = vld [vmem:[%s5491_s0 + $0x720] sm:$0xff] }
  0x7e   :  { %2997 = vmatmul.mubr.f32.gmra.mxu0 %v67_v46  ;;  %v99_v46 = vld [vmem:[%s5491_s0 + $0x278] sm:$0xff] }
  0x7f   :  { %2999 = vmatprep.mubr.f32.mxu0 %v68_v47  ;;  %v100_v47 = vld [vmem:[%s5491_s0 + $0x280] sm:$0xff] }
  0x80   :  { %3222 = vmatmul.mubr.f32.gmra.mxu1 %v217_v48  ;;  %v249_v48 = vld [vmem:[%s5491_s0 + $0x728] sm:$0xff] }
  0x81   :  { %3224 = vmatprep.mubr.f32.mxu1 %v218_v49  ;;  %v250_v49 = vld [vmem:[%s5491_s0 + $0x730] sm:$0xff] }
  0x82   :  { %3000 = vmatmul.mubr.f32.gmra.mxu0 %v69_v50  ;;  %v101_v50 = vld [vmem:[%s5491_s0 + $0x288] sm:$0xff] }
  0x83   :  { %3002 = vmatprep.mubr.f32.mxu0 %v70_v51  ;;  %v102_v51 = vld [vmem:[%s5491_s0 + $0x290] sm:$0xff] }
  0x84   :  { %3225 = vmatmul.mubr.f32.gmra.mxu1 %v219_v52  ;;  %v251_v52 = vld [vmem:[%s5491_s0 + $0x738] sm:$0xff] }
  0x85   :  { %3227 = vmatprep.mubr.f32.mxu1 %v220_v53  ;;  %v252_v53 = vld [vmem:[%s5491_s0 + $0x740] sm:$0xff] }
  0x86   :  { %3003 = vmatmul.mubr.f32.gmra.mxu0 %v71_v54  ;;  %v103_v54 = vld [vmem:[%s5491_s0 + $0x298] sm:$0xff] }
  0x87   :  { %3005 = vmatprep.mubr.f32.mxu0 %v72_v55  ;;  %v104_v55 = vld [vmem:[%s5491_s0 + $0x2a0] sm:$0xff] }
  0x88   :  { %3228 = vmatmul.mubr.f32.gmra.mxu1 %v221_v56  ;;  %v253_v56 = vld [vmem:[%s5491_s0 + $0x748] sm:$0xff] }
  0x89   :  { %3230 = vmatprep.mubr.f32.mxu1 %v222_v57  ;;  %v254_v57 = vld [vmem:[%s5491_s0 + $0x750] sm:$0xff] }
  0x8a   :  { %3006 = vmatmul.mubr.f32.gmra.mxu0 %v73_v58  ;;  %v105_v58 = vld [vmem:[%s5491_s0 + $0x2a8] sm:$0xff] }
  0x8b   :  { %3008 = vmatprep.mubr.f32.mxu0 %v74_v59  ;;  %v106_v59 = vld [vmem:[%s5491_s0 + $0x2b0] sm:$0xff] }
  0x8c   :  { %3231 = vmatmul.mubr.f32.gmra.mxu1 %v223_v60  ;;  %v255_v60 = vld [vmem:[%s5491_s0 + $0x758] sm:$0xff] }
  0x8d   :  { %3233 = vmatprep.mubr.f32.mxu1 %v224_v61  ;;  %v256_v61 = vld [vmem:[%s5491_s0 + $0x760] sm:$0xff] }
  0x8e   :  { %3009 = vmatmul.mubr.f32.gmra.mxu0 %v75_v62  ;;  %v107_v62 = vld [vmem:[%s5491_s0 + $0x2b8] sm:$0xff] }
  0x8f   :  { %3011 = vmatprep.mubr.f32.mxu0 %v76_v63  ;;  %v108_v63 = vld [vmem:[%s5491_s0 + $0x2c0] sm:$0xff] }
  0x90   :  { %3234 = vmatmul.mubr.f32.gmra.mxu1 %v225_v0  ;;  %v257_v0 = vld [vmem:[%s5491_s0 + $0x768] sm:$0xff] }
  0x91   :  { %3236 = vmatprep.mubr.f32.mxu1 %v226_v1  ;;  %v258_v1 = vld [vmem:[%s5491_s0 + $0x770] sm:$0xff] }
  0x92   :  { %3012 = vmatmul.mubr.f32.gmra.mxu0 %v77_v2  ;;  %v109_v2 = vld [vmem:[%s5491_s0 + $0x2c8] sm:$0xff] }
  0x93   :  { %3014 = vmatprep.mubr.f32.mxu0 %v78_v3  ;;  %v110_v3 = vld [vmem:[%s5491_s0 + $0x2d0] sm:$0xff] }
  0x94   :  { %3237 = vmatmul.mubr.f32.gmra.mxu1 %v227_v4  ;;  %v259_v4 = vld [vmem:[%s5491_s0 + $0x778] sm:$0xff] }
  0x95   :  { %3239 = vmatprep.mubr.f32.mxu1 %v228_v5  ;;  %v260_v5 = vld [vmem:[%s5491_s0 + $0x780] sm:$0xff] }
  0x96   :  { %3015 = vmatmul.mubr.f32.gmra.mxu0 %v79_v6  ;;  %v111_v6 = vld [vmem:[%s5491_s0 + $0x2d8] sm:$0xff] }
  0x97   :  { %3017 = vmatprep.mubr.f32.mxu0 %v80_v7  ;;  %v112_v7 = vld [vmem:[%s5491_s0 + $0x2e0] sm:$0xff] }
  0x98   :  { %3240 = vmatmul.mubr.f32.gmra.mxu1 %v229_v8  ;;  %v261_v8 = vld [vmem:[%s5491_s0 + $0x788] sm:$0xff] }
  0x99   :  { %3242 = vmatprep.mubr.f32.mxu1 %v230_v9  ;;  %v262_v9 = vld [vmem:[%s5491_s0 + $0x790] sm:$0xff] }
  0x9a   :  { %3018 = vmatmul.mubr.f32.gmra.mxu0 %v81_v10  ;;  %v113_v10 = vld [vmem:[%s5491_s0 + $0x2e8] sm:$0xff] }
  0x9b   :  { %3020 = vmatprep.mubr.f32.mxu0 %v82_v11  ;;  %v114_v11 = vld [vmem:[%s5491_s0 + $0x2f0] sm:$0xff] }
  0x9c   :  { %3243 = vmatmul.mubr.f32.gmra.mxu1 %v231_v12  ;;  %v263_v12 = vld [vmem:[%s5491_s0 + $0x798] sm:$0xff] }
  0x9d   :  { %3245 = vmatprep.mubr.f32.mxu1 %v232_v13  ;;  %v264_v13 = vld [vmem:[%s5491_s0 + $0x7a0] sm:$0xff] }
  0x9e   :  { %3021 = vmatmul.mubr.f32.gmra.mxu0 %v83_v14  ;;  %v115_v14 = vld [vmem:[%s5491_s0 + $0x2f8] sm:$0xff] }
  0x9f   :  { %3023 = vmatprep.mubr.f32.mxu0 %v84_v15  ;;  %v116_v15 = vld [vmem:[%s5491_s0 + $0x300] sm:$0xff] }
  0xa0   :  { %3246 = vmatmul.mubr.f32.gmra.mxu1 %v233_v16  ;;  %v265_v16 = vld [vmem:[%s5491_s0 + $0x7a8] sm:$0xff] }
  0xa1   :  { %3248 = vmatprep.mubr.f32.mxu1 %v234_v17  ;;  %v266_v17 = vld [vmem:[%s5491_s0 + $0x7b0] sm:$0xff] }
  0xa2   :  { %3024 = vmatmul.mubr.f32.gmra.mxu0 %v85_v18  ;;  %v117_v18 = vld [vmem:[%s5491_s0 + $0x308] sm:$0xff] }
  0xa3   :  { %3026 = vmatprep.mubr.f32.mxu0 %v86_v19  ;;  %v118_v19 = vld [vmem:[%s5491_s0 + $0x310] sm:$0xff] }
  0xa4   :  { %3249 = vmatmul.mubr.f32.gmra.mxu1 %v235_v20  ;;  %v267_v20 = vld [vmem:[%s5491_s0 + $0x7b8] sm:$0xff] }
  0xa5   :  { %3251 = vmatprep.mubr.f32.mxu1 %v236_v21 }
  0xa6   :  { %3027 = vmatmul.mubr.f32.gmra.mxu0 %v87_v22  ;;  %v268_v22 = vld [vmem:[%s5491_s0 + $0x7c0] sm:$0xff] }
  0xa7   :  { %3029 = vmatprep.mubr.f32.mxu0 %v88_v23  ;;  %v119_v23 = vld [vmem:[%s5491_s0 + $0x318] sm:$0xff] }
  0xa8   :  { %3252 = vmatmul.mubr.f32.gmra.mxu1 %v237_v24 }
  0xa9   :  { %3254 = vmatprep.mubr.f32.mxu1 %v238_v25  ;;  %v120_v25 = vld [vmem:[%s5491_s0 + $0x320] sm:$0xff] }
  0xaa   :  { %3030 = vmatmul.mubr.f32.gmra.mxu0 %v89_v26 }
  0xab   :  { %3032 = vmatprep.mubr.f32.mxu0 %v90_v27  ;;  %v269_v27 = vld [vmem:[%s5491_s0 + $0x7c8] sm:$0xff] }
  0xac   :  { %3255 = vmatmul.mubr.f32.gmra.mxu1 %v239_v28 }
  0xad   :  { %3257 = vmatprep.mubr.f32.mxu1 %v240_v29 }
  0xae   :  { %3033 = vmatmul.mubr.f32.gmra.mxu0 %v91_v30  ;;  %v121_v30 = vld [vmem:[%s5491_s0 + $0x328] sm:$0xff] }
  0xaf   :  { %3035 = vmatprep.mubr.f32.mxu0 %v92_v31 }
  0xb0   :  { %3258 = vmatmul.mubr.f32.gmra.mxu1 %v241_v32  ;;  %v122_v32 = vld [vmem:[%s5491_s0 + $0x330] sm:$0xff] }
  0xb1   :  { %3260 = vmatprep.mubr.f32.mxu1 %v242_v33 }
  0xb2   :  { %3036 = vmatmul.mubr.f32.gmra.mxu0 %v93_v34 }
  0xb3   :  { %3038 = vmatprep.mubr.f32.mxu0 %v94_v35 }
  0xb4   :  { %3261 = vmatmul.mubr.f32.gmra.mxu1 %v243_v36  ;;  %v123_v36 = vld [vmem:[%s5491_s0 + $0x338] sm:$0xff] }
  0xb5   :  { %3263 = vmatprep.mubr.f32.mxu1 %v244_v37 }
  0xb6   :  { %3039 = vmatmul.mubr.f32.gmra.mxu0 %v95_v38  ;;  %v124_v38 = vld [vmem:[%s5491_s0 + $0x340] sm:$0xff] }
  0xb7   :  { %3041 = vmatprep.mubr.f32.mxu0 %v96_v39 }
  0xb8   :  { %3264 = vmatmul.mubr.f32.gmra.mxu1 %v245_v40 }
  0xb9   :  { %3266 = vmatprep.mubr.f32.mxu1 %v246_v41 }
  0xba   :  { %3042 = vmatmul.mubr.f32.gmra.mxu0 %v97_v42  ;;  %v125_v42 = vld [vmem:[%s5491_s0 + $0x348] sm:$0xff] }
  0xbb   :  { %3044 = vmatprep.mubr.f32.mxu0 %v98_v43 }
  0xbc   :  { %3267 = vmatmul.mubr.f32.gmra.mxu1 %v247_v44  ;;  %v126_v44 = vld [vmem:[%s5491_s0 + $0x350] sm:$0xff] }
  0xbd   :  { %3269 = vmatprep.mubr.f32.mxu1 %v248_v45 }
  0xbe   :  { %3045 = vmatmul.mubr.f32.gmra.mxu0 %v99_v46 }
  0xbf   :  { %3047 = vmatprep.mubr.f32.mxu0 %v100_v47 }
  0xc0   :  { %3270 = vmatmul.mubr.f32.gmra.mxu1 %v249_v48  ;;  %v127_v48 = vld [vmem:[%s5491_s0 + $0x358] sm:$0xff] }
  0xc1   :  { %3272 = vmatprep.mubr.f32.mxu1 %v250_v49 }
  0xc2   :  { %3048 = vmatmul.mubr.f32.gmra.mxu0 %v101_v50  ;;  %v128_v50 = vld [vmem:[%s5491_s0 + $0x360] sm:$0xff] }
  0xc3   :  { %3050 = vmatprep.mubr.f32.mxu0 %v102_v51 }
  0xc4   :  { %3273 = vmatmul.mubr.f32.gmra.mxu1 %v251_v52 }
  0xc5   :  { %3275 = vmatprep.mubr.f32.mxu1 %v252_v53 }
  0xc6   :  { %3051 = vmatmul.mubr.f32.gmra.mxu0 %v103_v54  ;;  %v129_v54 = vld [vmem:[%s5491_s0 + $0x368] sm:$0xff] }
  0xc7   :  { %3053 = vmatprep.mubr.f32.mxu0 %v104_v55 }
  0xc8   :  { %3276 = vmatmul.mubr.f32.gmra.mxu1 %v253_v56  ;;  %v130_v56 = vld [vmem:[%s5491_s0 + $0x370] sm:$0xff] }
  0xc9   :  { %3278 = vmatprep.mubr.f32.mxu1 %v254_v57 }
  0xca   :  { %3054 = vmatmul.mubr.f32.gmra.mxu0 %v105_v58 }
  0xcb   :  { %3056 = vmatprep.mubr.f32.mxu0 %v106_v59 }
  0xcc   :  { %3279 = vmatmul.mubr.f32.gmra.mxu1 %v255_v60  ;;  %v131_v60 = vld [vmem:[%s5491_s0 + $0x378] sm:$0xff] }
  0xcd   :  { %3281 = vmatprep.mubr.f32.mxu1 %v256_v61 }
  0xce   :  { %3057 = vmatmul.mubr.f32.gmra.mxu0 %v107_v62  ;;  %v132_v62 = vld [vmem:[%s5491_s0 + $0x380] sm:$0xff] }
  0xcf   :  { %3059 = vmatprep.mubr.f32.mxu0 %v108_v63 }
  0xd0   :  { %3282 = vmatmul.mubr.f32.gmra.mxu1 %v257_v0 }
  0xd1   :  { %3284 = vmatprep.mubr.f32.mxu1 %v258_v1 }
  0xd2   :  { %3060 = vmatmul.mubr.f32.gmra.mxu0 %v109_v2  ;;  %v133_v2 = vld [vmem:[%s5491_s0 + $0x388] sm:$0xff] }
  0xd3   :  { %3062 = vmatprep.mubr.f32.mxu0 %v110_v3 }
  0xd4   :  { %3285 = vmatmul.mubr.f32.gmra.mxu1 %v259_v4  ;;  %v134_v4 = vld [vmem:[%s5491_s0 + $0x390] sm:$0xff] }
  0xd5   :  { %3287 = vmatprep.mubr.f32.mxu1 %v260_v5 }
  0xd6   :  { %3063 = vmatmul.mubr.f32.gmra.mxu0 %v111_v6 }
  0xd7   :  { %3065 = vmatprep.mubr.f32.mxu0 %v112_v7 }
  0xd8   :  { %3288 = vmatmul.mubr.f32.gmra.mxu1 %v261_v8  ;;  %v135_v8 = vld [vmem:[%s5491_s0 + $0x398] sm:$0xff] }
  0xd9   :  { %3290 = vmatprep.mubr.f32.mxu1 %v262_v9 }
  0xda   :  { %3066 = vmatmul.mubr.f32.gmra.mxu0 %v113_v10  ;;  %v136_v10 = vld [vmem:[%s5491_s0 + $0x3a0] sm:$0xff] }
  0xdb   :  { %3068 = vmatprep.mubr.f32.mxu0 %v114_v11 }
  0xdc   :  { %3291 = vmatmul.mubr.f32.gmra.mxu1 %v263_v12 }
  0xdd   :  { %3293 = vmatprep.mubr.f32.mxu1 %v264_v13 }
  0xde   :  { %3069 = vmatmul.mubr.f32.gmra.mxu0 %v115_v14  ;;  %v137_v14 = vld [vmem:[%s5491_s0 + $0x3a8] sm:$0xff] }
  0xdf   :  { %3071 = vmatprep.mubr.f32.mxu0 %v116_v15 }
  0xe0   :  { %3294 = vmatmul.mubr.f32.gmra.mxu1 %v265_v16  ;;  %v138_v16 = vld [vmem:[%s5491_s0 + $0x3b0] sm:$0xff] }
  0xe1   :  { %3296 = vmatprep.mubr.f32.mxu1 %v266_v17 }
  0xe2   :  { %v4011_v21 = vpop.f32.mrf.mxu0  ;;  %3072 = vmatmul.mubr.f32.gmra.mxu0 %v117_v18 }
  0xe3   :  { %3074 = vmatprep.mubr.f32.mxu0 %v118_v19 }
  0xe4   :  { %v4019_v24 = vpop.f32.mrf.mxu0  ;;  %v4024_v26 = vpop.f32.mrf.mxu1  ;;  %3297 = vmatmul.mubr.f32.gmra.mxu1 %v267_v20  ;;  %v139_v20 = vld [vmem:[%s5491_s0 + $0x3b8] sm:$0xff] }
  0xe5   :  { %3299 = vmatprep.mubr.f32.mxu1 %v268_v22 }
  0xe6   :  { %v4029_v28 = vpop.f32.mrf.mxu0  ;;  %3075 = vmatmul.mubr.f32.gmra.mxu0 %v119_v23  ;;  %v4031_v29 = vpop.f32.mrf.mxu1  ;;  %v140_v23 = vld [vmem:[%s5491_s0 + $0x3c0] sm:$0xff] }
  0xe7   :  { %3077 = vmatprep.mubr.f32.mxu0 %v120_v25 }
  0xe8   :  { %v4036_v31 = vpop.f32.mrf.mxu0  ;;  %v4041_v33 = vpop.f32.mrf.mxu1  ;;  %3300 = vmatmul.mubr.f32.gmra.mxu1 %v269_v27 }
  0xea   :  { %v4043_v34 = vpop.f32.mrf.mxu0  ;;  %3078 = vmatmul.mubr.f32.gmra.mxu0 %v121_v30  ;;  %v4045_v35 = vpop.f32.mrf.mxu1 }
  0xeb   :  { %3080 = vmatprep.mubr.f32.mxu0 %v122_v32  ;;  %v141_v32 = vld [vmem:[%s5491_s0 + $0x3c8] sm:$0xff] }
  0xec   :  { %v4050_v37 = vpop.f32.mrf.mxu0  ;;  %v4055_v39 = vpop.f32.mrf.mxu1 }
  0xee   :  { %v4057_v40 = vpop.f32.mrf.mxu0  ;;  %3081 = vmatmul.mubr.f32.gmra.mxu0 %v123_v36  ;;  %v4059_v41 = vpop.f32.mrf.mxu1  ;;  %v4179_v36 = vld [vmem:[%s5492_s2] ss:$0 sm:$0xff] }
  0xef   :  { %3083 = vmatprep.mubr.f32.mxu0 %v124_v38 }
  0xf0   :  { %v4064_v43 = vpop.f32.mrf.mxu0  ;;  %v4069_v45 = vpop.f32.mrf.mxu1 }
  0xf2   :  { %v4071_v46 = vpop.f32.mrf.mxu0  ;;  %3084 = vmatmul.mubr.f32.gmra.mxu0 %v125_v42  ;;  %v4073_v47 = vpop.f32.mrf.mxu1  ;;  %v142_v42 = vld [vmem:[%s5491_s0 + $0x3d0] sm:$0xff] }
  0xf3   :  { %3086 = vmatprep.mubr.f32.mxu0 %v126_v44 }
  0xf4   :  { %v4078_v49 = vpop.f32.mrf.mxu0  ;;  %v4083_v51 = vpop.f32.mrf.mxu1 }
  0xf6   :  { %v4085_v52 = vpop.f32.mrf.mxu0  ;;  %3087 = vmatmul.mubr.f32.gmra.mxu0 %v127_v48  ;;  %v4087_v53 = vpop.f32.mrf.mxu1  ;;  %v360_v48 = vadd.f32 %v4179_v36, %v4019_v24 }
  0xf7   :  { %3089 = vmatprep.mubr.f32.mxu0 %v128_v50 }
  0xf8   :  { %v4092_v55 = vpop.f32.mrf.mxu0  ;;  %v4097_v57 = vpop.f32.mrf.mxu1  ;;  %v1608_v24 = vmax.f32 %v360_v48, 0.0 }
  0xfa   :  { %v4099_v58 = vpop.f32.mrf.mxu0  ;;  %3090 = vmatmul.mubr.f32.gmra.mxu0 %v129_v54  ;;  %v4101_v59 = vpop.f32.mrf.mxu1 }
  0xfb   :  { %5498 = vst [vmem:[#allocation2_spill] sm:$0xff] %v4101_v59  ;;  %3092 = vmatprep.mubr.f32.mxu0 %v130_v56 }
  0xfc   :  { %v4106_v61 = vpop.f32.mrf.mxu0  ;;  %v4111_v63 = vpop.f32.mrf.mxu1 }
  0xfe   :  { %v4113_v0 = vpop.f32.mrf.mxu0  ;;  %3093 = vmatmul.mubr.f32.gmra.mxu0 %v131_v60  ;;  %v4115_v1 = vpop.f32.mrf.mxu1  ;;  %v143_v60 = vld [vmem:[%s5491_s0 + $0x3d8] sm:$0xff] }
  0xff   :  { %5499 = vst [vmem:[#allocation3_spill] sm:$0xff] %v4115_v1  ;;  %3095 = vmatprep.mubr.f32.mxu0 %v132_v62 }
 0x100   :  { %v4120_v3 = vpop.f32.mrf.mxu0  ;;  %v4125_v5 = vpop.f32.mrf.mxu1 }
 0x102   :  { %v4127_v6 = vpop.f32.mrf.mxu0  ;;  %3096 = vmatmul.mubr.f32.gmra.mxu0 %v133_v2  ;;  %v4129_v7 = vpop.f32.mrf.mxu1  ;;  %v144_v2 = vld [vmem:[%s5491_s0 + $0x3e0] sm:$0xff] }
 0x103   :  { %5500 = vst [vmem:[#allocation4_spill] sm:$0xff] %v4129_v7  ;;  %3098 = vmatprep.mubr.f32.mxu0 %v134_v4 }
 0x104   :  { %v4134_v9 = vpop.f32.mrf.mxu0  ;;  %v4139_v11 = vpop.f32.mrf.mxu1 }
 0x106   :  { %v4141_v12 = vpop.f32.mrf.mxu0  ;;  %3099 = vmatmul.mubr.f32.gmra.mxu0 %v135_v8  ;;  %v4143_v13 = vpop.f32.mrf.mxu1  ;;  %v370_v8 = vadd.f32 %v4179_v36, %v4036_v31  ;;  %v146_v31 = vld [vmem:[%s5491_s0 + $0x3f0] sm:$0xff] }
 0x107   :  { %5501 = vst [vmem:[#allocation5_spill] sm:$0xff] %v4143_v13  ;;  %3101 = vmatprep.mubr.f32.mxu0 %v136_v10 }
 0x108   :  { %v4148_v15 = vpop.f32.mrf.mxu0  ;;  %v4153_v17 = vpop.f32.mrf.mxu1 }
 0x10a   :  { %v4155_v18 = vpop.f32.mrf.mxu0  ;;  %3102 = vmatmul.mubr.f32.gmra.mxu0 %v137_v14  ;;  %v4157_v19 = vpop.f32.mrf.mxu1  ;;  %v365_v14 = vadd.f32 %v4011_v21, %v4179_v36  ;;  %v1610_v21 = vmax.f32 %v370_v8, 0.0  ;;  %v390_v8 = vadd.f32 %v4179_v36, %v4064_v43 }
 0x10b   :  { %5502 = vst [vmem:[#allocation6_spill] sm:$0xff] %v4157_v19  ;;  %3104 = vmatprep.mubr.f32.mxu0 %v138_v16 }
 0x10c   :  { %v4162_v22 = vpop.f32.mrf.mxu0  ;;  %v4167_v25 = vpop.f32.mrf.mxu1 }
 0x10e   :  { %v4169_v27 = vpop.f32.mrf.mxu0  ;;  %3105 = vmatmul.mubr.f32.gmra.mxu0 %v139_v20  ;;  %v4171_v30 = vpop.f32.mrf.mxu1 }
 0x10f   :  { %5503 = vst [vmem:[#allocation7_spill] sm:$0xff] %v4171_v30  ;;  %3107 = vmatprep.mubr.f32.mxu0 %v140_v23 }
 0x110   :  { %v4181_v38 = vpop.f32.mrf.mxu0  ;;  %v4186_v44 = vpop.f32.mrf.mxu1 }
 0x112   :  { %v2965_v50 = vpop.f32.mrf.mxu0  ;;  %3108 = vmatmul.mubr.f32.gmra.mxu0 %v141_v32  ;;  %v4190_v54 = vpop.f32.mrf.mxu1 }
 0x113   :  { %5504 = vst [vmem:[#allocation8_spill] sm:$0xff] %v4190_v54  ;;  %v485_v56 = vadd.f32 %v2965_v50, %v4179_v36  ;;  %3110 = vmatprep.mubr.f32.mxu0 %v142_v42  ;;  %v145_v42 = vld [vmem:[%s5491_s0 + $0x3e8] sm:$0xff] }
 0x114   :  { %v4196_v62 = vpop.f32.mrf.mxu0  ;;  %v4201_v4 = vpop.f32.mrf.mxu1 }
 0x115   :  { %v1633_v10 = vmax.f32 %v485_v56, 0.0  ;;  %v380_v56 = vadd.f32 %v4179_v36, %v4050_v37  ;;  %v147_v37 = vld [vmem:[%s5491_s0 + $0x3f8] sm:$0xff] }
 0x116   :  { %v2968_v16 = vpop.f32.mrf.mxu0  ;;  %3111 = vmatmul.mubr.f32.gmra.mxu0 %v143_v60  ;;  %v4207_v20 = vpop.f32.mrf.mxu1 }
 0x117   :  { %5505 = vst [vmem:[#allocation9_spill] sm:$0xff] %v4207_v20  ;;  %v4209_v23 = vmax.f32 %v1608_v24, %v1633_v10  ;;  %v495_v32 = vadd.f32 %v2968_v16, %v4179_v36  ;;  %3113 = vmatprep.mubr.f32.mxu0 %v144_v2  ;;  %v1609_v10 = vmax.f32 %v365_v14, 0.0  ;;  %v375_v20 = vadd.f32 %v4029_v28, %v4179_v36 }
 0x118   :  { %v489_v48 = vpop.f32.mrf.mxu0  ;;  %v4218_v50 = vpop.f32.mrf.mxu1  ;;  %v1612_v28 = vmax.f32 %v380_v56, 0.0 }
 0x119   :  { %v1635_v60 = vmax.f32 %v495_v32, 0.0  ;;  %v490_v24 = vadd.f32 %v4179_v36, %v489_v48  ;;  %v148_v32 = vld [vmem:[%s5491_s0 + $0x400] sm:$0xff]  ;;  %v1611_v43 = vmax.f32 %v375_v20, 0.0  ;;  %v400_v20 = vadd.f32 %v4179_v36, %v4078_v49  ;;  %v151_v49 = vld [vmem:[%s5491_s0 + $0x418] sm:$0xff] }
 0x11a   :  { %v2971_v2 = vpop.f32.mrf.mxu0  ;;  %3114 = vmatmul.mubr.f32.gmra.mxu0 %v145_v42  ;;  %v4223_v16 = vpop.f32.mrf.mxu1 }
 0x11b   :  { %5506 = vst [vmem:[#allocation10_spill] sm:$0xff] %v4223_v16  ;;  %v4227_v54 = vmax.f32 %v1610_v21, %v1635_v60  ;;  %v1634_v30 = vmax.f32 %v490_v24, 0.0  ;;  %v505_v19 = vadd.f32 %v2971_v2, %v4179_v36  ;;  %3116 = vmatprep.mubr.f32.mxu0 %v146_v31  ;;  %v385_v60 = vadd.f32 %v4043_v34, %v4179_v36  ;;  %v150_v34 = vld [vmem:[%s5491_s0 + $0x410] sm:$0xff] }
 0x11c   :  { %v499_v14 = vpop.f32.mrf.mxu0  ;;  %v4238_v42 = vpop.f32.mrf.mxu1 }
 0x11d   :  { %v4240_v48 = vmax.f32 %v1609_v10, %v1634_v30  ;;  %v1637_v21 = vmax.f32 %v505_v19, 0.0  ;;  %v500_v31 = vadd.f32 %v4179_v36, %v499_v14  ;;  %v149_v19 = vld [vmem:[%s5491_s0 + $0x408] sm:$0xff]  ;;  %v1614_v30 = vmax.f32 %v390_v8, 0.0 }
 0x11e   :  { %v2974_v24 = vpop.f32.mrf.mxu0  ;;  %3117 = vmatmul.mubr.f32.gmra.mxu0 %v147_v37  ;;  %v4245_v2 = vpop.f32.mrf.mxu1  ;;  %v395_v8 = vadd.f32 %v4057_v40, %v4179_v36  ;;  %v1616_v40 = vmax.f32 %v400_v20, 0.0 }
 0x11f   :  { %5507 = vst [vmem:[#allocation11_spill] sm:$0xff] %v4245_v2  ;;  %v4247_v16 = vmax.f32 %v1612_v28, %v1637_v21  ;;  %v1636_v13 = vmax.f32 %v500_v31, 0.0  ;;  %v515_v7 = vadd.f32 %v2974_v24, %v4179_v36  ;;  %3119 = vmatprep.mubr.f32.mxu0 %v148_v32  ;;  %v1613_v28 = vmax.f32 %v385_v60, 0.0  ;;  %v152_v60 = vld [vmem:[%s5491_s0 + $0x420] sm:$0xff] }
 0x120   :  { %v509_v56 = vpop.f32.mrf.mxu0  ;;  %v4256_v10 = vpop.f32.mrf.mxu1 }
 0x121   :  { %v4260_v37 = vmax.f32 %v1611_v43, %v1636_v13  ;;  %v1639_v14 = vmax.f32 %v515_v7, 0.0  ;;  %v510_v32 = vadd.f32 %v4179_v36, %v509_v56  ;;  %v410_v7 = vadd.f32 %v4179_v36, %v4092_v55 }
 0x122   :  { %v2977_v21 = vpop.f32.mrf.mxu0  ;;  %3120 = vmatmul.mubr.f32.gmra.mxu0 %v149_v19  ;;  %v4263_v31 = vpop.f32.mrf.mxu1  ;;  %v1615_v55 = vmax.f32 %v395_v8, 0.0  ;;  %v420_v8 = vadd.f32 %v4179_v36, %v4106_v61  ;;  %v430_v61 = vadd.f32 %v4179_v36, %v4120_v3 }
 0x123   :  { %5508 = vst [vmem:[#allocation12_spill] sm:$0xff] %v4263_v31  ;;  %v4267_v24 = vmax.f32 %v1614_v30, %v1639_v14  ;;  %v1638_v2 = vmax.f32 %v510_v32, 0.0  ;;  %v525_v1 = vadd.f32 %v2977_v21, %v4179_v36  ;;  %3122 = vmatprep.mubr.f32.mxu0 %v150_v34  ;;  %v405_v34 = vadd.f32 %v4071_v46, %v4179_v36  ;;  %v154_v46 = vld [vmem:[%s5491_s0 + $0x430] sm:$0xff] }
 0x124   :  { %v519_v13 = vpop.f32.mrf.mxu0  ;;  %v4278_v43 = vpop.f32.mrf.mxu1 }
 0x125   :  { %5509 = vst [vmem:[#allocation13_spill] sm:$0xff] %v4278_v43  ;;  %v4280_v19 = vmax.f32 %v1613_v28, %v1638_v2  ;;  %v1641_v30 = vmax.f32 %v525_v1, 0.0  ;;  %v520_v56 = vadd.f32 %v4179_v36, %v519_v13  ;;  %v153_v1 = vld [vmem:[%s5491_s0 + $0x428] sm:$0xff]  ;;  %v1618_v2 = vmax.f32 %v410_v7, 0.0 }
 0x126   :  { %v2980_v14 = vpop.f32.mrf.mxu0  ;;  %3123 = vmatmul.mubr.f32.gmra.mxu0 %v151_v49  ;;  %v4285_v32 = vpop.f32.mrf.mxu1  ;;  %v415_v7 = vadd.f32 %v4085_v52, %v4179_v36  ;;  %v1620_v52 = vmax.f32 %v420_v8, 0.0 }
 0x127   :  { %5510 = vst [vmem:[#allocation14_spill] sm:$0xff] %v4285_v32  ;;  %v4287_v21 = vmax.f32 %v1616_v40, %v1641_v30  ;;  %v1640_v31 = vmax.f32 %v520_v56, 0.0  ;;  %v535_v59 = vadd.f32 %v2980_v14, %v4179_v36  ;;  %3125 = vmatprep.mubr.f32.mxu0 %v152_v60  ;;  %v1617_v40 = vmax.f32 %v405_v34, 0.0  ;;  %v156_v34 = vld [vmem:[%s5491_s0 + $0x440] sm:$0xff] }
 0x128   :  { %v529_v20 = vpop.f32.mrf.mxu0  ;;  %v4296_v28 = vpop.f32.mrf.mxu1  ;;  %v1619_v3 = vmax.f32 %v415_v7, 0.0  ;;  %v440_v7 = vadd.f32 %v4179_v36, %v4134_v9  ;;  %v159_v9 = vld [vmem:[%s5491_s0 + $0x458] sm:$0xff] }
 0x129   :  { %5511 = vst [vmem:[#allocation15_spill] sm:$0xff] %v4296_v28  ;;  %v4300_v49 = vmax.f32 %v1615_v55, %v1640_v31  ;;  %v1643_v13 = vmax.f32 %v535_v59, 0.0  ;;  %v530_v60 = vadd.f32 %v4179_v36, %v529_v20  ;;  %v155_v59 = vld [vmem:[%s5491_s0 + $0x438] sm:$0xff] }
 0x12a   :  { %v2983_v30 = vpop.f32.mrf.mxu0  ;;  %3126 = vmatmul.mubr.f32.gmra.mxu0 %v153_v1  ;;  %v4303_v56 = vpop.f32.mrf.mxu1 }
 0x12b   :  { %5512 = vst [vmem:[#allocation16_spill] sm:$0xff] %v4303_v56  ;;  %v4307_v14 = vmax.f32 %v1618_v2, %v1643_v13  ;;  %v1642_v32 = vmax.f32 %v530_v60, 0.0  ;;  %v545_v28 = vadd.f32 %v2983_v30, %v4179_v36  ;;  %3128 = vmatprep.mubr.f32.mxu0 %v154_v46  ;;  %v425_v46 = vadd.f32 %v4099_v58, %v4179_v36  ;;  %v158_v58 = vld [vmem:[%s5491_s0 + $0x450] sm:$0xff] }
 0x12c   :  { %v539_v31 = vpop.f32.mrf.mxu0  ;;  %v4318_v55 = vpop.f32.mrf.mxu1 }
 0x12d   :  { %5513 = vst [vmem:[#allocation17_spill] sm:$0xff] %v4318_v55  ;;  %v4320_v1 = vmax.f32 %v1617_v40, %v1642_v32  ;;  %v1645_v2 = vmax.f32 %v545_v28, 0.0  ;;  %v540_v20 = vadd.f32 %v4179_v36, %v539_v31  ;;  %v157_v32 = vld [vmem:[%s5491_s0 + $0x448] sm:$0xff]  ;;  %v1622_v28 = vmax.f32 %v430_v61, 0.0 }
 0x12e   :  { %v2986_v13 = vpop.f32.mrf.mxu0  ;;  %3129 = vmatmul.mubr.f32.gmra.mxu0 %v155_v59  ;;  %v4325_v60 = vpop.f32.mrf.mxu1  ;;  %v435_v61 = vadd.f32 %v4113_v0, %v4179_v36  ;;  %v1624_v0 = vmax.f32 %v440_v7, 0.0 }
 0x12f   :  { %5514 = vst [vmem:[#allocation18_spill] sm:$0xff] %v4325_v60  ;;  %v4327_v30 = vmax.f32 %v1620_v52, %v1645_v2  ;;  %v1644_v56 = vmax.f32 %v540_v20, 0.0  ;;  %v555_v43 = vadd.f32 %v2986_v13, %v4179_v36  ;;  %3131 = vmatprep.mubr.f32.mxu0 %v156_v34  ;;  %v1621_v52 = vmax.f32 %v425_v46, 0.0  ;;  %v160_v46 = vld [vmem:[%s5491_s0 + $0x460] sm:$0xff] }
 0x130   :  { %v549_v8 = vpop.f32.mrf.mxu0  ;;  %v4336_v40 = vpop.f32.mrf.mxu1 }
 0x131   :  { %5515 = vst [vmem:[#allocation19_spill] sm:$0xff] %v4336_v40  ;;  %v4340_v59 = vmax.f32 %v1619_v3, %v1644_v56  ;;  %v1647_v31 = vmax.f32 %v555_v43, 0.0  ;;  %v550_v34 = vadd.f32 %v4179_v36, %v549_v8  ;;  %v450_v43 = vadd.f32 %v4179_v36, %v4148_v15 }
 0x132   :  { %v2989_v2 = vpop.f32.mrf.mxu0  ;;  %3132 = vmatmul.mubr.f32.gmra.mxu0 %v157_v32  ;;  %v4343_v20 = vpop.f32.mrf.mxu1  ;;  %v1623_v15 = vmax.f32 %v435_v61, 0.0  ;;  %v460_v61 = vadd.f32 %v4179_v36, %v4162_v22  ;;  %v163_v22 = vld [vmem:[%s5491_s0 + $0x478] sm:$0xff] }
 0x133   :  { %5516 = vst [vmem:[#allocation20_spill] sm:$0xff] %v4343_v20  ;;  %v4347_v13 = vmax.f32 %v1622_v28, %v1647_v31  ;;  %v1646_v60 = vmax.f32 %v550_v34, 0.0  ;;  %v565_v40 = vadd.f32 %v2989_v2, %v4179_v36  ;;  %3134 = vmatprep.mubr.f32.mxu0 %v158_v58  ;;  %v445_v58 = vadd.f32 %v4127_v6, %v4179_v36  ;;  %v162_v6 = vld [vmem:[%s5491_s0 + $0x470] sm:$0xff] }
 0x134   :  { %v559_v56 = vpop.f32.mrf.mxu0  ;;  %v4358_v3 = vpop.f32.mrf.mxu1 }
 0x135   :  { %v4360_v32 = vmax.f32 %v1621_v52, %v1646_v60  ;;  %v1649_v28 = vmax.f32 %v565_v40, 0.0  ;;  %v560_v8 = vadd.f32 %v4179_v36, %v559_v56  ;;  %v161_v60 = vld [vmem:[%s5491_s0 + $0x468] sm:$0xff]  ;;  %v1626_v40 = vmax.f32 %v450_v43, 0.0 }
 0x136   :  { %v2992_v31 = vpop.f32.mrf.mxu0  ;;  %3135 = vmatmul.mubr.f32.gmra.mxu0 %v159_v9  ;;  %v4365_v34 = vpop.f32.mrf.mxu1  ;;  %v455_v43 = vadd.f32 %v4141_v12, %v4179_v36 }
 0x137   :  { %5517 = vst [vmem:[#allocation21_spill] sm:$0xff] %v4365_v34  ;;  %v4367_v2 = vmax.f32 %v1624_v0, %v1649_v28  ;;  %v1648_v20 = vmax.f32 %v560_v8, 0.0  ;;  %v575_v55 = vadd.f32 %v2992_v31, %v4179_v36  ;;  %3137 = vmatprep.mubr.f32.mxu0 %v160_v46  ;;  %v1625_v0 = vmax.f32 %v445_v58, 0.0  ;;  %v164_v58 = vld [vmem:[%s5491_s0 + $0x480] sm:$0xff] }
 0x138   :  { %v569_v7 = vpop.f32.mrf.mxu0  ;;  %v4376_v52 = vpop.f32.mrf.mxu1 }
 0x139   :  { %5518 = vst [vmem:[#allocation22_spill] sm:$0xff] %v4376_v52  ;;  %v4380_v9 = vmax.f32 %v1623_v15, %v1648_v20  ;;  %v1651_v56 = vmax.f32 %v575_v55, 0.0  ;;  %v570_v46 = vadd.f32 %v4179_v36, %v569_v7  ;;  %v470_v55 = vadd.f32 %v4179_v36, %v4181_v38 }
 0x13a   :  { %v2995_v28 = vpop.f32.mrf.mxu0  ;;  %3138 = vmatmul.mubr.f32.gmra.mxu0 %v161_v60  ;;  %v4383_v8 = vpop.f32.mrf.mxu1  ;;  %v1628_v15 = vmax.f32 %v460_v61, 0.0 }
 0x13b   :  { %5519 = vst [vmem:[#allocation23_spill] sm:$0xff] %v4383_v8  ;;  %v4387_v31 = vmax.f32 %v1626_v40, %v1651_v56  ;;  %v1650_v34 = vmax.f32 %v570_v46, 0.0  ;;  %v585_v52 = vadd.f32 %v2995_v28, %v4179_v36  ;;  %3140 = vmatprep.mubr.f32.mxu0 %v162_v6  ;;  %v465_v6 = vadd.f32 %v4155_v18, %v4179_v36 }
 0x13c   :  { %v579_v20 = vpop.f32.mrf.mxu0  ;;  %v4401_v7 = vpop.f32.mrf.mxu1  ;;  %v1627_v46 = vmax.f32 %v455_v43, 0.0  ;;  %v480_v18 = vadd.f32 %v4179_v36, %v4196_v62  ;;  %v167_v62 = vld [vmem:[%s5491_s0 + $0x498] sm:$0xff] }
 0x13d   :  { %v4398_v12 = vmax.f32 %v1625_v0, %v1650_v34  ;;  %v1653_v60 = vmax.f32 %v585_v52, 0.0  ;;  %v580_v40 = vadd.f32 %v4179_v36, %v579_v20  ;;  %5520 = vst [vmem:[#allocation24_spill] sm:$0xff] %v4401_v7  ;;  %v165_v34 = vld [vmem:[%s5491_s0 + $0x488] sm:$0xff]  ;;  %v1630_v52 = vmax.f32 %v470_v55, 0.0  ;;  %v166_v0 = vld [vmem:[%s5491_s0 + $0x490] sm:$0xff] }
 0x13e   :  { %v2998_v56 = vpop.f32.mrf.mxu0  ;;  %3141 = vmatmul.mubr.f32.gmra.mxu0 %v163_v22  ;;  %v475_v55 = vadd.f32 %v4169_v27, %v4179_v36 }
 0x13f   :  { %v4405_v38 = vmax.f32 %v1628_v15, %v1653_v60  ;;  %v1652_v28 = vmax.f32 %v580_v40, 0.0  ;;  %v595_v8 = vadd.f32 %v2998_v56, %v4179_v36  ;;  %3143 = vmatprep.mubr.f32.mxu0 %v164_v58  ;;  %v4419_v15 = vpop.f32.mrf.mxu1  ;;  %v1629_v58 = vmax.f32 %v465_v6, 0.0  ;;  %v168_v6 = vld [vmem:[%s5491_s0 + $0x4a0] sm:$0xff] }
 0x140   :  { %v589_v61 = vpop.f32.mrf.mxu0  ;;  %5521 = vst [vmem:[#allocation25_spill] sm:$0xff] %v4419_v15 }
 0x141   :  { %v4416_v43 = vmax.f32 %v1627_v46, %v1652_v28  ;;  %v1655_v22 = vmax.f32 %v595_v8, 0.0  ;;  %v590_v20 = vadd.f32 %v4179_v36, %v589_v61  ;;  %v1115_v46 = vadd.f32 %v4024_v26, %v4179_v36  ;;  %v4437_v61 = vpop.f32.mrf.mxu1  ;;  %v169_v26 = vld [vmem:[%s5491_s0 + $0x4a8] sm:$0xff] }
 0x142   :  { %v3001_v60 = vpop.f32.mrf.mxu0  ;;  %3144 = vmatmul.mubr.f32.gmra.mxu0 %v165_v34  ;;  %v1632_v28 = vmax.f32 %v480_v18, 0.0  ;;  %5522 = vst [vmem:[#allocation26_spill] sm:$0xff] %v4437_v61 }
 0x143   :  { %v4423_v40 = vmax.f32 %v1630_v52, %v1655_v22  ;;  %v1654_v56 = vmax.f32 %v590_v20, 0.0  ;;  %v605_v7 = vadd.f32 %v3001_v60, %v4179_v36  ;;  %3146 = vmatprep.mubr.f32.mxu0 %v166_v0  ;;  %v1631_v22 = vmax.f32 %v475_v55, 0.0 }
 0x144   :  { %v599_v8 = vpop.f32.mrf.mxu0  ;;  %v1759_v55 = vmax.f32 %v1115_v46, 0.0 }
 0x145   :  { %v4434_v27 = vmax.f32 %v1629_v58, %v1654_v56  ;;  %v1657_v34 = vmax.f32 %v605_v7, 0.0  ;;  %v600_v52 = vadd.f32 %v4179_v36, %v599_v8  ;;  %v1125_v7 = vadd.f32 %v4041_v33, %v4179_v36  ;;  %v4450_v8 = vpop.f32.mrf.mxu1 }
 0x146   :  { %v3004_v0 = vpop.f32.mrf.mxu0  ;;  %3147 = vmatmul.mubr.f32.gmra.mxu0 %v167_v62  ;;  %v1135_v33 = vadd.f32 %v4055_v39, %v4179_v36  ;;  %v1145_v39 = vadd.f32 %v4069_v45, %v4179_v36  ;;  %v1155_v45 = vadd.f32 %v4083_v51, %v4179_v36  ;;  %v1165_v51 = vadd.f32 %v4097_v57, %v4179_v36 }
 0x147   :  { %v4439_v20 = vmax.f32 %v1632_v28, %v1657_v34  ;;  %v1656_v60 = vmax.f32 %v600_v52, 0.0  ;;  %v615_v15 = vadd.f32 %v3004_v0, %v4179_v36  ;;  %3149 = vmatprep.mubr.f32.mxu0 %v168_v6  ;;  %v1761_v61 = vmax.f32 %v1125_v7, 0.0 }
 0x148   :  { %v609_v18 = vpop.f32.mrf.mxu0  ;;  %v1175_v57 = vadd.f32 %v4111_v63, %v4179_v36  ;;  %v1185_v63 = vadd.f32 %v4125_v5, %v4179_v36  ;;  %v1195_v5 = vadd.f32 %v4139_v11, %v4179_v36  ;;  %v1205_v11 = vadd.f32 %v4153_v17, %v4179_v36 }
 0x149   :  { %v4447_v58 = vmax.f32 %v1631_v22, %v1656_v60  ;;  %v1659_v56 = vmax.f32 %v615_v15, 0.0  ;;  %v610_v62 = vadd.f32 %v4179_v36, %v609_v18  ;;  %v4462_v18 = vpop.f32.mrf.mxu1  ;;  %v1215_v17 = vadd.f32 %v4167_v25, %v4179_v36 }
 0x14a   :  { %v3007_v28 = vpop.f32.mrf.mxu0  ;;  %3150 = vmatmul.mubr.f32.gmra.mxu0 %v169_v26  ;;  %v1225_v25 = vadd.f32 %v4186_v44, %v4179_v36 }
 0x14b   :  { %v1884_v6 = vmax.f32 %v4240_v48, %v1659_v56  ;;  %v1658_v34 = vmax.f32 %v610_v62, 0.0  ;;  %v625_v52 = vadd.f32 %v3007_v28, %v4179_v36  ;;  %v1763_v28 = vmax.f32 %v1135_v33, 0.0 }
 0x14c   :  { %v619_v0 = vpop.f32.mrf.mxu0 }
 0x14d   :  { %v4457_v22 = vmax.f32 %v4209_v23, %v1658_v34  ;;  %v1661_v15 = vmax.f32 %v625_v52, 0.0  ;;  %v620_v46 = vadd.f32 %v4179_v36, %v619_v0  ;;  %v4460_v60 = vmax.f32 %v1884_v6, %v1759_v55  ;;  %v4474_v52 = vpop.f32.mrf.mxu1 }
 0x14e   :  { %v3010_v26 = vpop.f32.mrf.mxu0 }
 0x14f   :  { %v1886_v48 = vmax.f32 %v4260_v37, %v1661_v15  ;;  %v1660_v56 = vmax.f32 %v620_v46, 0.0  ;;  %v635_v62 = vadd.f32 %v3010_v26, %v4179_v36  ;;  %v1765_v26 = vmax.f32 %v1145_v39, 0.0 }
 0x150   :  { %v629_v7 = vpop.f32.mrf.mxu0 }
 0x151   :  { %v4469_v23 = vmax.f32 %v4227_v54, %v1660_v56  ;;  %v1663_v34 = vmax.f32 %v635_v62, 0.0  ;;  %v630_v55 = vadd.f32 %v4179_v36, %v629_v7  ;;  %v4472_v6 = vmax.f32 %v1886_v48, %v1761_v61  ;;  %v4486_v62 = vpop.f32.mrf.mxu1 }
 0x152   :  { %v3013_v0 = vpop.f32.mrf.mxu0 }
 0x153   :  { %v1888_v37 = vmax.f32 %v4280_v19, %v1663_v34  ;;  %v1662_v15 = vmax.f32 %v630_v55, 0.0  ;;  %v645_v46 = vadd.f32 %v3013_v0, %v4179_v36  ;;  %v1767_v0 = vmax.f32 %v1155_v45, 0.0 }
 0x154   :  { %v639_v33 = vpop.f32.mrf.mxu0 }
 0x155   :  { %v4481_v54 = vmax.f32 %v4247_v16, %v1662_v15  ;;  %v1665_v56 = vmax.f32 %v645_v46, 0.0  ;;  %v640_v61 = vadd.f32 %v4179_v36, %v639_v33  ;;  %v4484_v48 = vmax.f32 %v1888_v37, %v1763_v28  ;;  %v4498_v46 = vpop.f32.mrf.mxu1 }
 0x156   :  { %v3016_v7 = vpop.f32.mrf.mxu0 }
 0x157   :  { %v1890_v19 = vmax.f32 %v4300_v49, %v1665_v56  ;;  %v1664_v34 = vmax.f32 %v640_v61, 0.0  ;;  %v655_v55 = vadd.f32 %v3016_v7, %v4179_v36  ;;  %v1769_v7 = vmax.f32 %v1165_v51, 0.0 }
 0x158   :  { %v649_v39 = vpop.f32.mrf.mxu0 }
 0x159   :  { %v4493_v16 = vmax.f32 %v4267_v24, %v1664_v34  ;;  %v1667_v15 = vmax.f32 %v655_v55, 0.0  ;;  %v650_v28 = vadd.f32 %v4179_v36, %v649_v39  ;;  %v4496_v37 = vmax.f32 %v1890_v19, %v1765_v26  ;;  %v4510_v55 = vpop.f32.mrf.mxu1 }
 0x15a   :  { %v3019_v33 = vpop.f32.mrf.mxu0 }
 0x15b   :  { %v1892_v49 = vmax.f32 %v4320_v1, %v1667_v15  ;;  %v1666_v56 = vmax.f32 %v650_v28, 0.0  ;;  %v665_v61 = vadd.f32 %v3019_v33, %v4179_v36  ;;  %v1771_v33 = vmax.f32 %v1175_v57, 0.0 }
 0x15c   :  { %v659_v45 = vpop.f32.mrf.mxu0 }
 0x15d   :  { %v4505_v24 = vmax.f32 %v4287_v21, %v1666_v56  ;;  %v1669_v34 = vmax.f32 %v665_v61, 0.0  ;;  %v660_v26 = vadd.f32 %v4179_v36, %v659_v45  ;;  %v4508_v19 = vmax.f32 %v1892_v49, %v1767_v0  ;;  %v4522_v61 = vpop.f32.mrf.mxu1 }
 0x15e   :  { %v3022_v39 = vpop.f32.mrf.mxu0 }
 0x15f   :  { %v1894_v1 = vmax.f32 %v4340_v59, %v1669_v34  ;;  %v1668_v15 = vmax.f32 %v660_v26, 0.0  ;;  %v675_v28 = vadd.f32 %v3022_v39, %v4179_v36  ;;  %v1773_v39 = vmax.f32 %v1185_v63, 0.0 }
 0x160   :  { %v669_v51 = vpop.f32.mrf.mxu0 }
 0x161   :  { %v4517_v21 = vmax.f32 %v4307_v14, %v1668_v15  ;;  %v1671_v56 = vmax.f32 %v675_v28, 0.0  ;;  %v670_v0 = vadd.f32 %v4179_v36, %v669_v51  ;;  %v4520_v49 = vmax.f32 %v1894_v1, %v1769_v7  ;;  %v4534_v28 = vpop.f32.mrf.mxu1 }
 0x162   :  { %v3025_v45 = vpop.f32.mrf.mxu0 }
 0x163   :  { %v1896_v59 = vmax.f32 %v4360_v32, %v1671_v56  ;;  %v1670_v34 = vmax.f32 %v670_v0, 0.0  ;;  %v685_v26 = vadd.f32 %v3025_v45, %v4179_v36  ;;  %v1775_v45 = vmax.f32 %v1195_v5, 0.0 }
 0x164   :  { %v679_v57 = vpop.f32.mrf.mxu0 }
 0x165   :  { %v4529_v14 = vmax.f32 %v4327_v30, %v1670_v34  ;;  %v1673_v15 = vmax.f32 %v685_v26, 0.0  ;;  %v680_v7 = vadd.f32 %v4179_v36, %v679_v57  ;;  %v4532_v1 = vmax.f32 %v1896_v59, %v1771_v33  ;;  %v4546_v26 = vpop.f32.mrf.mxu1 }
 0x166   :  { %v3028_v51 = vpop.f32.mrf.mxu0 }
 0x167   :  { %v1898_v32 = vmax.f32 %v4380_v9, %v1673_v15  ;;  %v1672_v56 = vmax.f32 %v680_v7, 0.0  ;;  %v695_v0 = vadd.f32 %v3028_v51, %v4179_v36  ;;  %v1777_v51 = vmax.f32 %v1205_v11, 0.0 }
 0x168   :  { %v689_v63 = vpop.f32.mrf.mxu0 }
 0x169   :  { %v4541_v30 = vmax.f32 %v4347_v13, %v1672_v56  ;;  %v1675_v34 = vmax.f32 %v695_v0, 0.0  ;;  %v690_v33 = vadd.f32 %v4179_v36, %v689_v63  ;;  %v4544_v59 = vmax.f32 %v1898_v32, %v1773_v39  ;;  %v4558_v0 = vpop.f32.mrf.mxu1 }
 0x16a   :  { %v3031_v57 = vpop.f32.mrf.mxu0 }
 0x16b   :  { %v1900_v9 = vmax.f32 %v4398_v12, %v1675_v34  ;;  %v1674_v15 = vmax.f32 %v690_v33, 0.0  ;;  %v705_v7 = vadd.f32 %v3031_v57, %v4179_v36  ;;  %v1779_v57 = vmax.f32 %v1215_v17, 0.0 }
 0x16c   :  { %v699_v5 = vpop.f32.mrf.mxu0 }
 0x16d   :  { %v4553_v13 = vmax.f32 %v4367_v2, %v1674_v15  ;;  %v1677_v56 = vmax.f32 %v705_v7, 0.0  ;;  %v700_v39 = vadd.f32 %v4179_v36, %v699_v5  ;;  %v4556_v32 = vmax.f32 %v1900_v9, %v1775_v45  ;;  %v4570_v7 = vpop.f32.mrf.mxu1 }
 0x16e   :  { %v3034_v63 = vpop.f32.mrf.mxu0 }
 0x16f   :  { %v1902_v12 = vmax.f32 %v4416_v43, %v1677_v56  ;;  %v1676_v34 = vmax.f32 %v700_v39, 0.0  ;;  %v715_v33 = vadd.f32 %v3034_v63, %v4179_v36  ;;  %v1110_v43 = vadd.f32 %v4179_v36, %v4031_v29  ;;  %v4584_v29 = vpop.f32.mrf.mxu1 }
 0x170   :  { %v709_v11 = vpop.f32.mrf.mxu0  ;;  %v1781_v63 = vmax.f32 %v1225_v25, 0.0 }
 0x171   :  { %v4565_v2 = vmax.f32 %v4387_v31, %v1676_v34  ;;  %v1679_v15 = vmax.f32 %v715_v33, 0.0  ;;  %v710_v45 = vadd.f32 %v4179_v36, %v709_v11  ;;  %v4568_v9 = vmax.f32 %v1902_v12, %v1777_v51 }
 0x172   :  { %v3037_v5 = vpop.f32.mrf.mxu0  ;;  %v1235_v31 = vadd.f32 %v4201_v4, %v4179_v36  ;;  %v1758_v11 = vmax.f32 %v1110_v43, 0.0 }
 0x173   :  { %v1904_v56 = vmax.f32 %v4434_v27, %v1679_v15  ;;  %v1678_v17 = vmax.f32 %v710_v45, 0.0  ;;  %v725_v39 = vadd.f32 %v3037_v5, %v4179_v36  ;;  %v1120_v27 = vadd.f32 %v4179_v36, %v4045_v35 }
 0x174   :  { %v719_v44 = vpop.f32.mrf.mxu0 }
 0x175   :  { %v4579_v34 = vmax.f32 %v4405_v38, %v1678_v17  ;;  %v1681_v51 = vmax.f32 %v725_v39, 0.0  ;;  %v720_v12 = vadd.f32 %v4179_v36, %v719_v44  ;;  %v4582_v33 = vmax.f32 %v1904_v56, %v1779_v57  ;;  %v4599_v44 = vpop.f32.mrf.mxu1 }
 0x176   :  { %v3040_v15 = vpop.f32.mrf.mxu0  ;;  %v1908_v38 = vmax.f32 %v4457_v22, %v1758_v11  ;;  %v1783_v17 = vmax.f32 %v1235_v31, 0.0  ;;  %v1245_v57 = vadd.f32 %v4218_v50, %v4179_v36 }
 0x177   :  { %v1906_v25 = vmax.f32 %v4447_v58, %v1681_v51  ;;  %v1680_v45 = vmax.f32 %v720_v12, 0.0  ;;  %v735_v4 = vadd.f32 %v3040_v15, %v4179_v36  ;;  %v1760_v58 = vmax.f32 %v1120_v27, 0.0 }
 0x178   :  { %v729_v5 = vpop.f32.mrf.mxu0  ;;  %v1130_v51 = vadd.f32 %v4179_v36, %v4059_v41  ;;  %v1785_v15 = vmax.f32 %v1245_v57, 0.0  ;;  %v4613_v41 = vpop.f32.mrf.mxu1 }
 0x179   :  { %v4594_v56 = vmax.f32 %v4423_v40, %v1680_v45  ;;  %v1683_v43 = vmax.f32 %v735_v4, 0.0  ;;  %v730_v39 = vadd.f32 %v4179_v36, %v729_v5  ;;  %v4597_v35 = vmax.f32 %v1906_v25, %v1781_v63 }
 0x17a   :  { %v3043_v22 = vpop.f32.mrf.mxu0  ;;  %v1910_v50 = vmax.f32 %v4469_v23, %v1760_v58  ;;  %v1255_v45 = vadd.f32 %v4238_v42, %v4179_v36  ;;  %v1140_v5 = vadd.f32 %v4179_v36, %v4073_v47  ;;  %v4627_v47 = vpop.f32.mrf.mxu1 }
 0x17b   :  { %v1933_v12 = vmax.f32 %v1908_v38, %v1683_v43  ;;  %v1682_v31 = vmax.f32 %v730_v39, 0.0  ;;  %v745_v11 = vadd.f32 %v3043_v22, %v4179_v36  ;;  %v1762_v38 = vmax.f32 %v1130_v51, 0.0 }
 0x17c   :  { %v739_v40 = vpop.f32.mrf.mxu0  ;;  %v1787_v58 = vmax.f32 %v1255_v45, 0.0  ;;  %v1265_v22 = vadd.f32 %v4256_v10, %v4179_v36 }
 0x17d   :  { %v4608_v63 = vmax.f32 %v4439_v20, %v1682_v31  ;;  %v1685_v25 = vmax.f32 %v745_v11, 0.0  ;;  %v740_v27 = vadd.f32 %v4179_v36, %v739_v40  ;;  %v4611_v4 = vmax.f32 %v1933_v12, %v1783_v17 }
 0x17e   :  { %v3046_v23 = vpop.f32.mrf.mxu0  ;;  %v1912_v42 = vmax.f32 %v4481_v54, %v1762_v38  ;;  %v1764_v11 = vmax.f32 %v1140_v5, 0.0  ;;  %v5523_v38 = vld [vmem:[#allocation13_spill] sm:$0xff] }
 0x17f   :  { %v1935_v43 = vmax.f32 %v1910_v50, %v1685_v25  ;;  %v1684_v57 = vmax.f32 %v740_v27, 0.0  ;;  %v755_v39 = vadd.f32 %v3046_v23, %v4179_v36  ;;  %v1150_v50 = vadd.f32 %v4179_v36, %v4087_v53  ;;  %v4641_v53 = vpop.f32.mrf.mxu1 }
 0x180   :  { %v749_v20 = vpop.f32.mrf.mxu0  ;;  %v1914_v10 = vmax.f32 %v4493_v16, %v1764_v11  ;;  %v1789_v27 = vmax.f32 %v1265_v22, 0.0  ;;  %v1275_v23 = vadd.f32 %v5523_v38, %v4179_v36  ;;  %5524 = vst [vmem:[#allocation13_spill] sm:$0xff] %v4641_v53  ;;  %v5525_v16 = vld [vmem:[#allocation2_spill] sm:$0xff] }
 0x181   :  { %v4622_v17 = vmax.f32 %v4460_v60, %v1684_v57  ;;  %v1687_v12 = vmax.f32 %v755_v39, 0.0  ;;  %v750_v51 = vadd.f32 %v4179_v36, %v749_v20  ;;  %v4625_v31 = vmax.f32 %v1935_v43, %v1785_v15 }
 0x182   :  { %v3049_v54 = vpop.f32.mrf.mxu0  ;;  %v5496_v39 = vmov 0.0   ;;  %v1160_v20 = vadd.f32 %v4179_v36, %v5525_v16  ;;  %v4656_v16 = vpop.f32.mrf.mxu1 }
 0x183   :  { %v1937_v40 = vmax.f32 %v1912_v42, %v1687_v12  ;;  %v1686_v45 = vmax.f32 %v750_v51, 0.0  ;;  %v765_v25 = vadd.f32 %v3049_v54, %v4179_v36  ;;  %2359 = vmatprep.subr.mxu1 %v5496_v39  ;;  %v1766_v42 = vmax.f32 %v1150_v50, 0.0  ;;  %5527 = vst [vmem:[#allocation2_spill] sm:$0xff] %v4656_v16 }
 0x184   :  { %v759_v60 = vpop.f32.mrf.mxu0 }
 0x185   :  { %v4636_v15 = vmax.f32 %v4472_v6, %v1686_v45  ;;  %v1689_v43 = vmax.f32 %v765_v25, 0.0  ;;  %v760_v5 = vadd.f32 %v4179_v36, %v759_v60  ;;  %v4639_v57 = vmax.f32 %v1937_v40, %v1787_v58  ;;  %v5526_v58 = vld [vmem:[#allocation15_spill] sm:$0xff] }
 0x186   :  { %v3052_v22 = vpop.f32.mrf.mxu0  ;;  %v1916_v11 = vmax.f32 %v4505_v24, %v1766_v42  ;;  %v1791_v45 = vmax.f32 %v1275_v23, 0.0  ;;  %v1285_v40 = vadd.f32 %v5526_v58, %v4179_v36 }
 0x187   :  { %v1939_v12 = vmax.f32 %v1914_v10, %v1689_v43  ;;  %v1688_v51 = vmax.f32 %v760_v5, 0.0  ;;  %v775_v6 = vadd.f32 %v3052_v22, %v4179_v36  ;;  %v1768_v10 = vmax.f32 %v1160_v20, 0.0  ;;  %v5528_v43 = vld [vmem:[#allocation3_spill] sm:$0xff] }
 0x188   :  { %v769_v54 = vpop.f32.mrf.mxu0  ;;  %v1170_v5 = vadd.f32 %v4179_v36, %v5528_v43  ;;  %v4670_v43 = vpop.f32.mrf.mxu1 }
 0x189   :  { %v4651_v25 = vmax.f32 %v4484_v48, %v1688_v51  ;;  %v1691_v60 = vmax.f32 %v775_v6, 0.0  ;;  %v770_v50 = vadd.f32 %v4179_v36, %v769_v54  ;;  %v4654_v38 = vmax.f32 %v1939_v12, %v1789_v27  ;;  %v5529_v6 = vld [vmem:[#allocation17_spill] sm:$0xff]  ;;  %5530 = vst [vmem:[#allocation15_spill] sm:$0xff] %v4670_v43 }
 0x18a   :  { %v3055_v24 = vpop.f32.mrf.mxu0  ;;  %v1918_v58 = vmax.f32 %v4517_v21, %v1768_v10  ;;  %v1793_v51 = vmax.f32 %v1285_v40, 0.0  ;;  %v1295_v54 = vadd.f32 %v5529_v6, %v4179_v36 }
 0x18b   :  { %v1941_v42 = vmax.f32 %v1916_v11, %v1691_v60  ;;  %v1690_v23 = vmax.f32 %v770_v50, 0.0  ;;  %v785_v22 = vadd.f32 %v3055_v24, %v4179_v36  ;;  %v1770_v11 = vmax.f32 %v1170_v5, 0.0  ;;  %v5531_v60 = vld [vmem:[#allocation4_spill] sm:$0xff] }
 0x18c   :  { %v779_v48 = vpop.f32.mrf.mxu0  ;;  %v1180_v50 = vadd.f32 %v4179_v36, %v5531_v60  ;;  %v4684_v60 = vpop.f32.mrf.mxu1 }
 0x18d   :  { %v4665_v27 = vmax.f32 %v4496_v37, %v1690_v23  ;;  %v1693_v12 = vmax.f32 %v785_v22, 0.0  ;;  %v780_v20 = vadd.f32 %v4179_v36, %v779_v48  ;;  %v4668_v39 = vmax.f32 %v1941_v42, %v1791_v45  ;;  %v5532_v22 = vld [vmem:[#allocation19_spill] sm:$0xff]  ;;  %5533 = vst [vmem:[#allocation3_spill] sm:$0xff] %v4684_v60 }
 0x18e   :  { %v3058_v21 = vpop.f32.mrf.mxu0  ;;  %v1920_v6 = vmax.f32 %v4529_v14, %v1770_v11  ;;  %v1795_v23 = vmax.f32 %v1295_v54, 0.0  ;;  %v1305_v48 = vadd.f32 %v5532_v22, %v4179_v36 }
 0x18f   :  { %v1943_v10 = vmax.f32 %v1918_v58, %v1693_v12  ;;  %v1692_v40 = vmax.f32 %v780_v20, 0.0  ;;  %v795_v24 = vadd.f32 %v3058_v21, %v4179_v36  ;;  %v1772_v58 = vmax.f32 %v1180_v50, 0.0  ;;  %v5534_v12 = vld [vmem:[#allocation5_spill] sm:$0xff] }
 0x190   :  { %v789_v37 = vpop.f32.mrf.mxu0  ;;  %v1190_v20 = vadd.f32 %v4179_v36, %v5534_v12 }
 0x191   :  { %v4679_v45 = vmax.f32 %v4508_v19, %v1692_v40  ;;  %v1695_v42 = vmax.f32 %v795_v24, 0.0  ;;  %v790_v5 = vadd.f32 %v4179_v36, %v789_v37  ;;  %v4682_v16 = vmax.f32 %v1943_v10, %v1793_v51  ;;  %v5535_v24 = vld [vmem:[#allocation20_spill] sm:$0xff] }
 0x192   :  { %v3061_v14 = vpop.f32.mrf.mxu0  ;;  %v1922_v22 = vmax.f32 %v4541_v30, %v1772_v58  ;;  %v1797_v40 = vmax.f32 %v1305_v48, 0.0  ;;  %v1300_v37 = vadd.f32 %v4179_v36, %v5535_v24  ;;  %v1315_v51 = vadd.f32 %v4358_v3, %v4179_v36  ;;  %v5537_v30 = vld [vmem:[#allocation6_spill] sm:$0xff] }
 0x193   :  { %v1945_v11 = vmax.f32 %v1920_v6, %v1695_v42  ;;  %v1694_v54 = vmax.f32 %v790_v5, 0.0  ;;  %v805_v21 = vadd.f32 %v3061_v14, %v4179_v36  ;;  %v4700_v42 = vpop.f32.mrf.mxu1  ;;  %v1774_v5 = vmax.f32 %v1190_v20, 0.0  ;;  %v5538_v14 = vld [vmem:[#allocation21_spill] sm:$0xff] }
 0x194   :  { %v799_v19 = vpop.f32.mrf.mxu0  ;;  %v1200_v48 = vadd.f32 %v4179_v36, %v5537_v30  ;;  %v1310_v24 = vadd.f32 %v4179_v36, %v5538_v14  ;;  %v4714_v30 = vld [vmem:[%s5492_s2] ss:$0 sm:$0xff] }
 0x195   :  { %v4695_v50 = vmax.f32 %v4520_v49, %v1694_v54  ;;  %v1697_v10 = vmax.f32 %v805_v21, 0.0  ;;  %v800_v12 = vadd.f32 %v4179_v36, %v799_v19  ;;  %v4698_v6 = vmax.f32 %v1945_v11, %v1795_v23  ;;  %v5539_v11 = vld [vmem:[#allocation22_spill] sm:$0xff] }
 0x196   :  { %v3064_v58 = vpop.f32.mrf.mxu0  ;;  %v1924_v54 = vmax.f32 %v4553_v13, %v1774_v5  ;;  %v1796_v19 = vmax.f32 %v1300_v37, 0.0  ;;  %v1799_v23 = vmax.f32 %v1315_v51, 0.0  ;;  %v1776_v13 = vmax.f32 %v1200_v48, 0.0  ;;  %v5541_v37 = vld [vmem:[#allocation7_spill] sm:$0xff] }
 0x197   :  { %5536 = vst [vmem:[#allocation17_spill] sm:$0xff] %v4698_v6  ;;  %v1947_v60 = vmax.f32 %v1922_v22, %v1697_v10  ;;  %v1696_v3 = vmax.f32 %v800_v12, 0.0  ;;  %v815_v49 = vadd.f32 %v3064_v58, %v4179_v36  ;;  %v1325_v6 = vadd.f32 %v5539_v11, %v4179_v36  ;;  %v4719_v12 = vpop.f32.mrf.mxu1 }
 0x198   :  { %v809_v21 = vpop.f32.mrf.mxu0  ;;  %v1210_v51 = vadd.f32 %v4714_v30, %v5541_v37  ;;  %v1798_v36 = vmax.f32 %v1310_v24, 0.0 }
 0x199   :  { %v1946_v20 = vmax.f32 %v4532_v1, %v1696_v3  ;;  %v1699_v43 = vmax.f32 %v815_v49, 0.0  ;;  %v810_v22 = vadd.f32 %v4714_v30, %v809_v21  ;;  %v4717_v10 = vmax.f32 %v1947_v60, %v1797_v40  ;;  %v5543_v60 = vld [vmem:[#allocation23_spill] sm:$0xff] }
 0x19a   :  { %v3067_v5 = vpop.f32.mrf.mxu0  ;;  %v1926_v49 = vmax.f32 %v4565_v2, %v1776_v13  ;;  %v1801_v21 = vmax.f32 %v1325_v6, 0.0  ;;  %v1320_v40 = vadd.f32 %v4714_v30, %v5543_v60 }
 0x19b   :  { %5540 = vst [vmem:[#allocation4_spill] sm:$0xff] %v4717_v10  ;;  %v1949_v58 = vmax.f32 %v1924_v54, %v1699_v43  ;;  %v1698_v1 = vmax.f32 %v810_v22, 0.0  ;;  %v825_v14 = vadd.f32 %v4714_v30, %v3067_v5  ;;  %v4724_v3 = vmax.f32 %v1946_v20, %v1796_v19  ;;  %v5544_v10 = vld [vmem:[#allocation24_spill] sm:$0xff]  ;;  %v4735_v54 = vpop.f32.mrf.mxu1  ;;  %v5547_v22 = vld [vmem:[#allocation25_spill] sm:$0xff] }
 0x19c   :  { %v819_v11 = vpop.f32.mrf.mxu0  ;;  %v1335_v48 = vadd.f32 %v4714_v30, %v5544_v10  ;;  %v1778_v19 = vmax.f32 %v1210_v51, 0.0  ;;  %v5546_v20 = vld [vmem:[#allocation8_spill] sm:$0xff]  ;;  %v1330_v13 = vadd.f32 %v4714_v30, %v5547_v22 }
 0x19d   :  { %5542 = vst [vmem:[#allocation19_spill] sm:$0xff] %v4724_v3  ;;  %v1948_v37 = vmax.f32 %v4544_v59, %v1698_v1  ;;  %v1701_v53 = vmax.f32 %v825_v14, 0.0  ;;  %v820_v43 = vadd.f32 %v4714_v30, %v819_v11  ;;  %v4733_v24 = vmax.f32 %v1949_v58, %v1799_v23  ;;  %v5548_v11 = vld [vmem:[#allocation26_spill] sm:$0xff] }
 0x19e   :  { %v1220_v2 = vadd.f32 %v4714_v30, %v5546_v20  ;;  %v3070_v6 = vpop.f32.mrf.mxu0  ;;  %v1928_v1 = vmax.f32 %v4579_v34, %v1778_v19  ;;  %v1800_v58 = vmax.f32 %v1320_v40, 0.0  ;;  %v1803_v14 = vmax.f32 %v1335_v48, 0.0 }
 0x19f   :  { %5545 = vst [vmem:[#allocation5_spill] sm:$0xff] %v4733_v24  ;;  %v1951_v5 = vmax.f32 %v1926_v49, %v1701_v53  ;;  %v1700_v60 = vmax.f32 %v820_v43, 0.0  ;;  %v835_v10 = vadd.f32 %v4714_v30, %v3070_v6  ;;  %v4742_v59 = vmax.f32 %v1948_v37, %v1798_v36  ;;  %v4751_v53 = vpop.f32.mrf.mxu1  ;;  %v5549_v36 = vld [vmem:[#allocation9_spill] sm:$0xff] }
 0x1a0   :  { %v829_v23 = vpop.f32.mrf.mxu0  ;;  %v1345_v51 = vadd.f32 %v4714_v30, %v5548_v11  ;;  %v1780_v49 = vmax.f32 %v1220_v2, 0.0  ;;  %v1230_v37 = vadd.f32 %v4714_v30, %v5549_v36  ;;  %v1802_v43 = vmax.f32 %v1330_v13, 0.0 }
 0x1a1   :  { %v1950_v20 = vmax.f32 %v4556_v32, %v1700_v60  ;;  %v1703_v3 = vmax.f32 %v835_v10, 0.0  ;;  %v830_v24 = vadd.f32 %v4714_v30, %v829_v23  ;;  %v4749_v22 = vmax.f32 %v1951_v5, %v1801_v21  ;;  %v4767_v13 = vpop.f32.mrf.mxu1 }
 0x1a2   :  { %v3073_v34 = vpop.f32.mrf.mxu0  ;;  %v1930_v32 = vmax.f32 %v4594_v56, %v1780_v49  ;;  %v1805_v10 = vmax.f32 %v1345_v51, 0.0  ;;  %v1340_v21 = vadd.f32 %v4714_v30, %v4450_v8  ;;  %v1355_v2 = vadd.f32 %v4714_v30, %v4462_v18 }
 0x1a3   :  { %v1953_v40 = vmax.f32 %v1928_v1, %v1703_v3  ;;  %v1702_v48 = vmax.f32 %v830_v24, 0.0  ;;  %v845_v19 = vadd.f32 %v4714_v30, %v3073_v34  ;;  %v4756_v6 = vmax.f32 %v1950_v20, %v1800_v58  ;;  %v5550_v58 = vld [vmem:[#allocation10_spill] sm:$0xff] }
 0x1a4   :  { %v839_v60 = vpop.f32.mrf.mxu0  ;;  %v1782_v1 = vmax.f32 %v1230_v37, 0.0  ;;  %v1240_v56 = vadd.f32 %v4714_v30, %v5550_v58  ;;  %v1350_v8 = vadd.f32 %v4714_v30, %v4474_v52  ;;  %v1804_v36 = vmax.f32 %v1340_v21, 0.0 }
 0x1a5   :  { %v1952_v5 = vmax.f32 %v4568_v9, %v1702_v48  ;;  %v1705_v23 = vmax.f32 %v845_v19, 0.0  ;;  %v840_v3 = vadd.f32 %v4714_v30, %v839_v60  ;;  %v4765_v24 = vmax.f32 %v1953_v40, %v1803_v14 }
 0x1a6   :  { %v3076_v11 = vpop.f32.mrf.mxu0  ;;  %v1932_v49 = vmax.f32 %v4608_v63, %v1782_v1  ;;  %v1807_v34 = vmax.f32 %v1355_v2, 0.0  ;;  %v1365_v37 = vadd.f32 %v4714_v30, %v4486_v62  ;;  %v1784_v60 = vmax.f32 %v1240_v56, 0.0 }
 0x1a7   :  { %v1955_v51 = vmax.f32 %v1930_v32, %v1705_v23  ;;  %v1704_v20 = vmax.f32 %v840_v3, 0.0  ;;  %v855_v18 = vadd.f32 %v4714_v30, %v3076_v11  ;;  %v4774_v9 = vmax.f32 %v1952_v5, %v1802_v43  ;;  %v4783_v32 = vpop.f32.mrf.mxu1  ;;  %v5551_v43 = vld [vmem:[#allocation11_spill] sm:$0xff] }
 0x1a8   :  { %v849_v14 = vpop.f32.mrf.mxu0  ;;  %v1250_v5 = vadd.f32 %v4714_v30, %v5551_v43  ;;  %v1806_v23 = vmax.f32 %v1350_v8, 0.0  ;;  %v1809_v58 = vmax.f32 %v1365_v37, 0.0  ;;  %v1375_v56 = vadd.f32 %v4714_v30, %v4510_v55 }
 0x1a9   :  { %v1954_v40 = vmax.f32 %v4582_v33, %v1704_v20  ;;  %v1707_v48 = vmax.f32 %v855_v18, 0.0  ;;  %v850_v19 = vadd.f32 %v4714_v30, %v849_v14  ;;  %v4781_v52 = vmax.f32 %v1955_v51, %v1805_v10  ;;  %v4799_v18 = vpop.f32.mrf.mxu1  ;;  %v5553_v14 = vld [vmem:[#allocation12_spill] sm:$0xff] }
 0x1aa   :  { %v3079_v63 = vpop.f32.mrf.mxu0  ;;  %v1959_v33 = vmax.f32 %v4622_v17, %v1784_v60  ;;  %v1360_v10 = vadd.f32 %v4714_v30, %v4498_v46  ;;  %v1260_v17 = vadd.f32 %v4714_v30, %v5553_v14  ;;  %v1370_v46 = vadd.f32 %v4714_v30, %v4522_v61  ;;  %v2084_v14 = vld [vmem:[%s5493_s3 + $0x8] sm:$0xff] }
 0x1ab   :  { %v1957_v21 = vmax.f32 %v1932_v49, %v1707_v48  ;;  %v1706_v2 = vmax.f32 %v850_v19, 0.0  ;;  %v865_v3 = vadd.f32 %v4714_v30, %v3079_v63  ;;  %v4788_v62 = vmax.f32 %v1954_v40, %v1804_v36  ;;  %2604 = vmatprep.mubr.msk.f32.mxu1 %vm2283_vm0, %v2084_v14 }
 0x1ac   :  { %v859_v1 = vpop.f32.mrf.mxu0  ;;  %v1786_v49 = vmax.f32 %v1250_v5, 0.0  ;;  %v1385_v55 = vadd.f32 %v4714_v30, %v4534_v28  ;;  %v1808_v60 = vmax.f32 %v1360_v10, 0.0  ;;  %v1811_v43 = vmax.f32 %v1375_v56, 0.0 }
 0x1ad   :  { %v1956_v11 = vmax.f32 %v4597_v35, %v1706_v2  ;;  %v1709_v51 = vmax.f32 %v865_v3, 0.0  ;;  %v860_v8 = vadd.f32 %v4714_v30, %v859_v1  ;;  %v4797_v20 = vmax.f32 %v1957_v21, %v1807_v34  ;;  %v4815_v2 = vpop.f32.mrf.mxu1  ;;  %v5555_v3 = vld [vmem:[#allocation14_spill] sm:$0xff] }
 0x1ae   :  { %v3082_v36 = vpop.f32.mrf.mxu0  ;;  %v1961_v34 = vmax.f32 %v4636_v15, %v1786_v49  ;;  %v1788_v28 = vmax.f32 %v1260_v17, 0.0  ;;  %v1810_v1 = vmax.f32 %v1370_v46, 0.0  ;;  %v1395_v49 = vadd.f32 %v4714_v30, %v4558_v0 }
 0x1af   :  { %5552 = vst [vmem:[#allocation20_spill] sm:$0xff] %v4797_v20  ;;  %v1984_v37 = vmax.f32 %v1959_v33, %v1709_v51  ;;  %v1708_v35 = vmax.f32 %v860_v8, 0.0  ;;  %v875_v40 = vadd.f32 %v4714_v30, %v3082_v36  ;;  %v4808_v48 = vmax.f32 %v1956_v11, %v1806_v23 }
 0x1b0   :  { %v869_v19 = vpop.f32.mrf.mxu0  ;;  %v1270_v33 = vadd.f32 %v4714_v30, %v5555_v3  ;;  %v1813_v11 = vmax.f32 %v1385_v55, 0.0 }
 0x1b1   :  { %v1983_v5 = vmax.f32 %v4611_v4, %v1708_v35  ;;  %v1711_v63 = vmax.f32 %v875_v40, 0.0  ;;  %v870_v21 = vadd.f32 %v4714_v30, %v869_v19  ;;  %v4813_v61 = vmax.f32 %v1984_v37, %v1809_v58  ;;  %v5557_v37 = vld [vmem:[#allocation16_spill] sm:$0xff] }
 0x1b2   :  { %v3085_v23 = vpop.f32.mrf.mxu0  ;;  %v1963_v4 = vmax.f32 %v4651_v25, %v1788_v28  ;;  %v1380_v58 = vadd.f32 %v4714_v30, %v4546_v26  ;;  %v4834_v25 = vpop.f32.mrf.mxu1  ;;  %v1790_v26 = vmax.f32 %v1270_v33, 0.0  ;;  %v1280_v0 = vadd.f32 %v4714_v30, %v5557_v37 }
 0x1b3   :  { %5554 = vst [vmem:[#allocation6_spill] sm:$0xff] %v4813_v61  ;;  %v1986_v15 = vmax.f32 %v1961_v34, %v1711_v63  ;;  %v1710_v51 = vmax.f32 %v870_v21, 0.0  ;;  %v885_v10 = vadd.f32 %v4714_v30, %v3085_v23  ;;  %v4820_v56 = vmax.f32 %v1983_v5, %v1808_v60 }
 0x1b4   :  { %v879_v8 = vpop.f32.mrf.mxu0  ;;  %v1390_v40 = vadd.f32 %v4714_v30, %v4570_v7  ;;  %v1812_v63 = vmax.f32 %v1380_v58, 0.0  ;;  %v1815_v21 = vmax.f32 %v1395_v49, 0.0  ;;  %v1405_v28 = vadd.f32 %v4714_v30, %v4584_v29 }
 0x1b5   :  { %v1985_v17 = vmax.f32 %v4625_v31, %v1710_v51  ;;  %v1713_v36 = vmax.f32 %v885_v10, 0.0  ;;  %v880_v46 = vadd.f32 %v4714_v30, %v879_v8  ;;  %v4832_v55 = vmax.f32 %v1986_v15, %v1811_v43  ;;  %v4851_v15 = vpop.f32.mrf.mxu1 }
 0x1b6   :  { %v3088_v35 = vpop.f32.mrf.mxu0  ;;  %v1965_v43 = vmax.f32 %v4665_v27, %v1790_v26  ;;  %5559 = vst [vmem:[#allocation7_spill] sm:$0xff] %v4851_v15  ;;  %v1792_v51 = vmax.f32 %v1280_v0, 0.0 }
 0x1b7   :  { %5556 = vst [vmem:[#allocation21_spill] sm:$0xff] %v4832_v55  ;;  %v1988_v34 = vmax.f32 %v1963_v4, %v1713_v36  ;;  %v1712_v19 = vmax.f32 %v880_v46, 0.0  ;;  %v895_v31 = vadd.f32 %v4714_v30, %v3088_v35  ;;  %v4842_v60 = vmax.f32 %v1985_v17, %v1810_v1  ;;  %v5560_v1 = vld [vmem:[#allocation18_spill] sm:$0xff]  ;;  %v4867_v35 = vpop.f32.mrf.mxu1  ;;  %v5578_v55 = vld [vmem:[#allocation17_spill] sm:$0xff] }
 0x1b8   :  { %v889_v5 = vpop.f32.mrf.mxu0  ;;  %v1290_v10 = vadd.f32 %v4714_v30, %v5560_v1  ;;  %v1814_v4 = vmax.f32 %v1390_v40, 0.0  ;;  %v1817_v17 = vmax.f32 %v1405_v28, 0.0  ;;  %v1415_v36 = vadd.f32 %v4714_v30, %v4613_v41 }
 0x1b9   :  { %5558 = vst [vmem:[#allocation22_spill] sm:$0xff] %v4842_v60  ;;  %v1987_v3 = vmax.f32 %v4639_v57, %v1712_v19  ;;  %v1715_v33 = vmax.f32 %v895_v31, 0.0  ;;  %v890_v23 = vadd.f32 %v4714_v30, %v889_v5  ;;  %v4849_v7 = vmax.f32 %v1988_v34, %v1813_v11  ;;  %v5575_v60 = vld [vmem:[#allocation4_spill] sm:$0xff] }
 0x1ba   :  { %v3091_v27 = vpop.f32.mrf.mxu0  ;;  %v1967_v57 = vmax.f32 %v4679_v45, %v1792_v51  ;;  %v1400_v11 = vadd.f32 %v4714_v30, %v4599_v44  ;;  %v1794_v40 = vmax.f32 %v1290_v10, 0.0 }
 0x1bb   :  { %v1990_v8 = vmax.f32 %v1965_v43, %v1715_v33  ;;  %v1714_v58 = vmax.f32 %v890_v23, 0.0  ;;  %v905_v49 = vadd.f32 %v4714_v30, %v3091_v27  ;;  %v4856_v29 = vmax.f32 %v1987_v3, %v1812_v63  ;;  %v4879_v23 = vpop.f32.mrf.mxu1 }
 0x1bc   :  { %v899_v14 = vpop.f32.mrf.mxu0  ;;  %v1969_v44 = vmax.f32 %v4695_v50, %v1794_v40  ;;  %v1816_v5 = vmax.f32 %v1400_v11, 0.0  ;;  %v1410_v63 = vadd.f32 %v4714_v30, %v4627_v47  ;;  %5561 = vst [vmem:[#allocation23_spill] sm:$0xff] %v4879_v23 }
 0x1bd   :  { %v1989_v46 = vmax.f32 %v4654_v38, %v1714_v58  ;;  %v1717_v26 = vmax.f32 %v905_v49, 0.0  ;;  %v900_v37 = vadd.f32 %v4714_v30, %v899_v14  ;;  %v4865_v0 = vmax.f32 %v1990_v8, %v1815_v21  ;;  %v4890_v8 = vpop.f32.mrf.mxu1 }
 0x1be   :  { %v3094_v34 = vpop.f32.mrf.mxu0  ;;  %v1819_v38 = vmax.f32 %v1415_v36, 0.0  ;;  %v1445_v14 = vadd.f32 %v4714_v30, %v4700_v42 }
 0x1bf   :  { %v1992_v45 = vmax.f32 %v1967_v57, %v1717_v26  ;;  %v1716_v19 = vmax.f32 %v900_v37, 0.0  ;;  %v915_v31 = vadd.f32 %v4714_v30, %v3094_v34  ;;  %v4870_v43 = vmax.f32 %v1989_v46, %v1814_v4 }
 0x1c0   :  { %v909_v41 = vpop.f32.mrf.mxu0  ;;  %v1440_v46 = vadd.f32 %v4714_v30, %v4719_v12  ;;  %v1455_v26 = vadd.f32 %v4714_v30, %v4735_v54  ;;  %v1825_v34 = vmax.f32 %v1445_v14, 0.0  ;;  %v1450_v12 = vadd.f32 %v4714_v30, %v4751_v53 }
 0x1c1   :  { %v1991_v21 = vmax.f32 %v4668_v39, %v1716_v19  ;;  %v1719_v28 = vmax.f32 %v915_v31, 0.0  ;;  %v910_v3 = vadd.f32 %v4714_v30, %v909_v41  ;;  %v4877_v33 = vmax.f32 %v1992_v45, %v1817_v17  ;;  %v4900_v17 = vpop.f32.mrf.mxu1 }
 0x1c2   :  { %v4881_v51 = vpop.f32.mrf.mxu0  ;;  %v1818_v39 = vmax.f32 %v1410_v63, 0.0  ;;  %v1465_v54 = vadd.f32 %v4714_v30, %v4767_v13  ;;  %v5562_v63 = vld [vmem:[#allocation5_spill] sm:$0xff] }
 0x1c3   :  { %v1994_v1 = vmax.f32 %v1969_v44, %v1719_v28  ;;  %v1718_v10 = vmax.f32 %v910_v3, 0.0  ;;  %v4883_v50 = vmax.f32 %v1991_v21, %v1816_v5  ;;  %v4908_v45 = vpop.f32.mrf.mxu1  ;;  %v1824_v5 = vmax.f32 %v1440_v46, 0.0 }
 0x1c4   :  { %v4885_v27 = vpop.f32.mrf.mxu0  ;;  %v1829_v13 = vmax.f32 %v1465_v54, 0.0  ;;  %v1475_v46 = vadd.f32 %v4714_v30, %v4799_v18 }
 0x1c5   :  { %v1993_v4 = vmax.f32 %v4682_v16, %v1718_v10  ;;  %v4888_v47 = vmax.f32 %v1994_v1, %v1819_v38  ;;  %v1827_v38 = vmax.f32 %v1455_v26, 0.0 }
 0x1c6   :  { %v4892_v58 = vpop.f32.mrf.mxu0  ;;  %v1831_v18 = vmax.f32 %v1475_v46, 0.0 }
 0x1c7   :  { %v4894_v49 = vmax.f32 %v1993_v4, %v1818_v39 }
 0x1c8   :  { %v4896_v57 = vpop.f32.mrf.mxu0 }
 0x1ca   :  { %v3103_v11 = vpop.f32.mrf.mxu0 }
 0x1cb   :  { %v945_v36 = vadd.f32 %v4714_v30, %v3103_v11 }
 0x1cc   :  { %v939_v16 = vpop.f32.mrf.mxu0 }
 0x1cd   :  { %v1725_v37 = vmax.f32 %v945_v36, 0.0  ;;  %v940_v40 = vadd.f32 %v4714_v30, %v939_v16  ;;  %v1826_v36 = vmax.f32 %v1450_v12, 0.0  ;;  %v1460_v16 = vadd.f32 %v4714_v30, %v4783_v32 }
 0x1ce   :  { %v3106_v19 = vpop.f32.mrf.mxu0 }
 0x1cf   :  { %v2000_v42 = vmax.f32 %v4756_v6, %v1725_v37  ;;  %v1724_v31 = vmax.f32 %v940_v40, 0.0  ;;  %v955_v44 = vadd.f32 %v4714_v30, %v3106_v19  ;;  %v4920_v6 = vpop.f32.mrf.mxu1 }
 0x1d0   :  { %v949_v41 = vpop.f32.mrf.mxu0 }
 0x1d1   :  { %v1999_v21 = vmax.f32 %v5562_v63, %v1724_v31  ;;  %v1727_v28 = vmax.f32 %v955_v44, 0.0  ;;  %v950_v3 = vadd.f32 %v4714_v30, %v949_v41  ;;  %v4918_v1 = vmax.f32 %v2000_v42, %v1825_v34  ;;  %v4934_v34 = vpop.f32.mrf.mxu1 }
 0x1d2   :  { %v3109_v10 = vpop.f32.mrf.mxu0 }
 0x1d3   :  { %5563 = vst [vmem:[#allocation24_spill] sm:$0xff] %v4918_v1  ;;  %v2002_v4 = vmax.f32 %v4774_v9, %v1727_v28  ;;  %v1726_v39 = vmax.f32 %v950_v3, 0.0  ;;  %v965_v14 = vadd.f32 %v4714_v30, %v3109_v10  ;;  %v4924_v11 = vmax.f32 %v1999_v21, %v1824_v5  ;;  %v4948_v21 = vpop.f32.mrf.mxu1 }
 0x1d4   :  { %v959_v53 = vpop.f32.mrf.mxu0  ;;  %v1828_v5 = vmax.f32 %v1460_v16, 0.0 }
 0x1d5   :  { %v2001_v26 = vmax.f32 %v4749_v22, %v1726_v39  ;;  %v1729_v37 = vmax.f32 %v965_v14, 0.0  ;;  %v960_v40 = vadd.f32 %v4714_v30, %v959_v53  ;;  %v4932_v9 = vmax.f32 %v2002_v4, %v1827_v38 }
 0x1d6   :  { %v3112_v19 = vpop.f32.mrf.mxu0  ;;  %v1470_v22 = vadd.f32 %v4714_v30, %v4815_v2  ;;  %v1485_v38 = vadd.f32 %v4714_v30, %v4834_v25 }
 0x1d7   :  { %5564 = vst [vmem:[#allocation8_spill] sm:$0xff] %v4932_v9  ;;  %v2004_v42 = vmax.f32 %v4788_v62, %v1729_v37  ;;  %v1728_v31 = vmax.f32 %v960_v40, 0.0  ;;  %v975_v44 = vadd.f32 %v4714_v30, %v3112_v19  ;;  %v4938_v41 = vmax.f32 %v2001_v26, %v1826_v36  ;;  %v5573_v9 = vld [vmem:[#allocation2_spill] sm:$0xff] }
 0x1d8   :  { %v969_v32 = vpop.f32.mrf.mxu0  ;;  %v1830_v25 = vmax.f32 %v1470_v22, 0.0  ;;  %v1833_v36 = vmax.f32 %v1485_v38, 0.0 }
 0x1d9   :  { %5565 = vst [vmem:[#allocation25_spill] sm:$0xff] %v4938_v41  ;;  %v2003_v12 = vmax.f32 %v4765_v24, %v1728_v31  ;;  %v1731_v54 = vmax.f32 %v975_v44, 0.0  ;;  %v970_v63 = vadd.f32 %v4714_v30, %v969_v32  ;;  %v4946_v62 = vmax.f32 %v2004_v42, %v1829_v13  ;;  %v4959_v13 = vpop.f32.mrf.mxu1 }
 0x1da   :  { %v3115_v28 = vpop.f32.mrf.mxu0 }
 0x1db   :  { %5566 = vst [vmem:[#allocation26_spill] sm:$0xff] %v4946_v62  ;;  %v2006_v3 = vmax.f32 %v4808_v48, %v1731_v54  ;;  %v1730_v10 = vmax.f32 %v970_v63, 0.0  ;;  %v985_v4 = vadd.f32 %v4714_v30, %v3115_v28  ;;  %v4952_v39 = vmax.f32 %v2003_v12, %v1828_v5  ;;  %v4970_v40 = vpop.f32.mrf.mxu1 }
 0x1dc   :  { %v4954_v2 = vpop.f32.mrf.mxu0  ;;  %v935_v54 = vadd.f32 %v4714_v30, %v4892_v58  ;;  %v930_v63 = vadd.f32 %v4714_v30, %v4896_v57  ;;  %v1420_v57 = vadd.f32 %v4714_v30, %v5573_v9 }
 0x1dd   :  { %5567 = vst [vmem:[#allocation9_spill] sm:$0xff] %v4952_v39  ;;  %v2005_v24 = vmax.f32 %v4781_v52, %v1730_v10  ;;  %v1733_v14 = vmax.f32 %v985_v4, 0.0  ;;  %v4957_v53 = vmax.f32 %v2006_v3, %v1831_v18  ;;  %v3283_v42 = vpop.f32.mrf.mxu1  ;;  %v925_v3 = vadd.f32 %v4714_v30, %v4881_v51  ;;  %v5571_v4 = vld [vmem:[#allocation13_spill] sm:$0xff]  ;;  %v5574_v39 = vld [vmem:[#allocation3_spill] sm:$0xff] }
 0x1de   :  { %v4961_v16 = vpop.f32.mrf.mxu0  ;;  %v1723_v1 = vmax.f32 %v935_v54, 0.0  ;;  %v1722_v58 = vmax.f32 %v930_v63, 0.0  ;;  %v1430_v51 = vadd.f32 %v4714_v30, %v5574_v39  ;;  %v2133_v39 = vld [vmem:[%s5494_s4] sm:$0xff] }
 0x1df   :  { %5568 = vst [vmem:[#allocation10_spill] sm:$0xff] %v4957_v53  ;;  %v2033_v48 = vmax.f32 %v4820_v56, %v1733_v14  ;;  %v4964_v46 = vmax.f32 %v2005_v24, %v1830_v25  ;;  %v4980_v32 = vpop.f32.mrf.mxu1  ;;  %v1425_v25 = vadd.f32 %v4714_v30, %v5571_v4  ;;  %v5572_v24 = vld [vmem:[#allocation15_spill] sm:$0xff]  ;;  %v1721_v62 = vmax.f32 %v925_v3, 0.0 }
 0x1e0   :  { %v4966_v26 = vpop.f32.mrf.mxu0  ;;  %v1435_v14 = vadd.f32 %v4714_v30, %v5572_v24  ;;  %v1998_v63 = vmax.f32 %v4742_v59, %v1723_v1  ;;  %v1997_v9 = vmax.f32 %v5575_v60, %v1722_v58  ;;  %v1820_v3 = vmax.f32 %v1420_v57, 0.0 }
 0x1e1   :  { %5569 = vst [vmem:[#allocation11_spill] sm:$0xff] %v4964_v46  ;;  %v4968_v37 = vmax.f32 %v2033_v48, %v1833_v36  ;;  %v3286_v18 = vpop.f32.mrf.mxu1  ;;  %v920_v48 = vadd.f32 %v4714_v30, %v4885_v27  ;;  %v1821_v46 = vmax.f32 %v1425_v25, 0.0  ;;  %v5018_v59 = vadd.f32 %v4714_v30, %v3283_v42 }
 0x1e2   :  { %v4972_v19 = vpop.f32.mrf.mxu0  ;;  %v1823_v53 = vmax.f32 %v1435_v14, 0.0  ;;  %v5007_v61 = vadd.f32 %v4714_v30, %v3286_v18  ;;  %v3341_v14 = vmov 0   ;;  %v5576_v18 = vld [vmem:[#allocation19_spill] sm:$0xff] }
 0x1e3   :  { %5570 = vst [vmem:[#allocation12_spill] sm:$0xff] %v4968_v37  ;;  %v1549_v12 = vpop.f32.mrf.mxu1  ;;  %v1720_v54 = vmax.f32 %v920_v48, 0.0  ;;  %3336 = vset.pattern.permute.xlu0 %v3341_v14  ;;  %3337 = vset.pattern.permute.xlu1 %v3341_v14  ;;  %v1996_v48 = vmax.f32 %v5576_v18, %v1721_v62 }
 0x1e4   :  { %v4974_v52 = vpop.f32.mrf.mxu0  ;;  %2160 = vperm.xlu0 %3336, %v2133_v39   ;;  %v2023_v15 = vmax.f32 %v1998_v63, %v1823_v53  ;;  %v1847_v42 = vmax.f32 %v5007_v61, 0.0 }
 0x1e5   :  { %v3289_v36 = vpop.f32.mrf.mxu1  ;;  %v1995_v14 = vmax.f32 %v5578_v55, %v1720_v54  ;;  %v1550_v55 = vadd.f32 %v4714_v30, %v1549_v12 }
 0x1e6   :  { %v4976_v31 = vpop.f32.mrf.mxu0  ;;  %v1565_v4 = vadd.f32 %v4714_v30, %v3289_v36  ;;  %v1822_v36 = vmax.f32 %v1430_v51, 0.0 }
 0x1e7   :  { %v1559_v27 = vpop.f32.mrf.mxu1 }
 0x1e8   :  { %v4978_v44 = vpop.f32.mrf.mxu0  ;;  %v1849_v1 = vmax.f32 %v1565_v4, 0.0  ;;  %v1560_v58 = vadd.f32 %v4714_v30, %v1559_v27  ;;  %v2022_v62 = vmax.f32 %v1997_v9, %v1822_v36  ;;  %v2134_v4 = vld [vmem:[%s5494_s4 + $0x8] sm:$0xff] }
 0x1e9   :  { %2165 = vperm.xlu0 %3336, %v2134_v4   ;;  %v5579_v4 = vmov 0.0  }
 0x1ea   :  { %v4982_v56 = vpop.f32.mrf.mxu0  ;;  %v1848_v61 = vmax.f32 %v1560_v58, 0.0  ;;  %v1846_v58 = vmax.f32 %v1550_v55, 0.0 }
 0x1ec   :  { %v4984_v5 = vpop.f32.mrf.mxu0 }
 0x1ee   :  { %v3130_v22 = vpop.f32.mrf.mxu0 }
 0x1f0   :  { %v4986_v38 = vpop.f32.mrf.mxu0 }
 0x1f2   :  { %v3133_v28 = vpop.f32.mrf.mxu0 }
 0x1f3   :  { %v1045_v57 = vadd.f32 %v4714_v30, %v3133_v28 }
 0x1f4   :  { %v1039_v10 = vpop.f32.mrf.mxu0 }
 0x1f5   :  { %v1040_v28 = vadd.f32 %v4714_v30, %v1039_v10  ;;  %v1745_v54 = vmax.f32 %v1045_v57, 0.0  ;;  %v2020_v10 = vmax.f32 %v1995_v14, %v1820_v3  ;;  %v1535_v3 = vadd.f32 %v4714_v30, %v4959_v13  ;;  %v2136_v13 = vld [vmem:[%s5494_s4 + $0x18] sm:$0xff] }
 0x1f6   :  { %v3136_v41 = vpop.f32.mrf.mxu0  ;;  %v1025_v57 = vadd.f32 %v4714_v30, %v4982_v56  ;;  %v1020_v56 = vadd.f32 %v4714_v30, %v4984_v5  ;;  %v1015_v5 = vadd.f32 %v4714_v30, %v4976_v31  ;;  %v1010_v31 = vadd.f32 %v4714_v30, %v4978_v44 }
 0x1f7   :  { %v1055_v24 = vadd.f32 %v4714_v30, %v3136_v41  ;;  %v1005_v44 = vadd.f32 %v4714_v30, %v4972_v19  ;;  %v1000_v19 = vadd.f32 %v4714_v30, %v4974_v52  ;;  %v995_v52 = vadd.f32 %v4714_v30, %v4961_v16 }
 0x1f8   :  { %v1049_v37 = vpop.f32.mrf.mxu0  ;;  %v990_v16 = vadd.f32 %v4714_v30, %v4966_v26 }
 0x1f9   :  { %v1050_v25 = vadd.f32 %v4714_v30, %v1049_v37  ;;  %v1747_v51 = vmax.f32 %v1055_v24, 0.0  ;;  %v1735_v26 = vmax.f32 %v995_v52, 0.0 }
 0x1fa   :  { %v3139_v20 = vpop.f32.mrf.mxu0 }
 0x1fb   :  { %v1065_v41 = vadd.f32 %v4714_v30, %v3139_v20  ;;  %v5023_v20 = vpop.f32.mrf.mxu1  ;;  %v1746_v24 = vmax.f32 %v1050_v25, 0.0  ;;  %v2047_v63 = vmax.f32 %v2022_v62, %v1747_v51 }
 0x1fc   :  { %v1059_v60 = vpop.f32.mrf.mxu0  ;;  %5577 = vst [vmem:[#allocation14_spill] sm:$0xff] %v5023_v20 }
 0x1fd   :  { %v1749_v23 = vmax.f32 %v1065_v41, 0.0  ;;  %v1060_v37 = vadd.f32 %v4714_v30, %v1059_v60  ;;  %v2021_v41 = vmax.f32 %v1996_v48, %v1821_v46  ;;  %v1035_v60 = vadd.f32 %v4714_v30, %v3130_v22  ;;  %v5040_v20 = vpop.f32.mrf.mxu1 }
 0x1fe   :  { %v5027_v18 = vpop.f32.mrf.mxu0  ;;  %v1030_v46 = vadd.f32 %v4714_v30, %v4986_v38  ;;  %v1744_v22 = vmax.f32 %v1040_v28, 0.0  ;;  %v1845_v48 = vmax.f32 %v5018_v59, 0.0  ;;  %v2072_v38 = vmax.f32 %v2047_v63, %v1847_v42 }
 0x1ff   :  { %v2049_v27 = vmax.f32 %v4924_v11, %v1749_v23  ;;  %v1748_v39 = vmax.f32 %v1060_v37, 0.0  ;;  %v2135_v23 = vld [vmem:[%s5494_s4 + $0x10] sm:$0xff]  ;;  %v2137_v11 = vld [vmem:[%s5494_s4 + $0x20] sm:$0xff]  ;;  %v1743_v51 = vmax.f32 %v1035_v60, 0.0  ;;  %v2045_v37 = vmax.f32 %v2020_v10, %v1745_v54  ;;  %v5059_v14 = vpop.f32.mrf.mxu1 }
 0x200   :  { %v5036_v53 = vpop.f32.mrf.mxu0  ;;  %2170 = vperm.xlu1 %3337, %v2135_v23   ;;  %2180 = vperm.xlu0 %3336, %v2137_v11   ;;  %v1742_v59 = vmax.f32 %v1030_v46, 0.0  ;;  %v2044_v42 = vmax.f32 %v4888_v47, %v1744_v22  ;;  %v1741_v60 = vmax.f32 %v1025_v57, 0.0  ;;  %v1515_v10 = vadd.f32 %v4714_v30, %v4908_v45 }
 0x201   :  { %v2048_v9 = vmax.f32 %v2023_v15, %v1748_v39  ;;  %v5038_v36 = vmax.f32 %v2049_v27, %v1849_v1  ;;  %v2046_v15 = vmax.f32 %v2021_v41, %v1746_v24  ;;  %v1540_v1 = vadd.f32 %v4714_v30, %v4980_v32  ;;  %v2139_v32 = vld [vmem:[%s5494_s4 + $0x30] sm:$0xff] }
 0x202   :  { %v5042_v25 = vpop.f32.mrf.mxu0  ;;  %v1525_v24 = vadd.f32 %v4714_v30, %v4934_v34  ;;  %v1843_v27 = vmax.f32 %v1535_v3, 0.0  ;;  %v1530_v39 = vadd.f32 %v4714_v30, %v4970_v40  ;;  %v2043_v47 = vmax.f32 %v4894_v49, %v1743_v51  ;;  %v2138_v34 = vld [vmem:[%s5494_s4 + $0x28] sm:$0xff]  ;;  %v2141_v40 = vld [vmem:[%s5494_s4 + $0x40] sm:$0xff] }
 0x203   :  { %v2073_v12 = vmax.f32 %v2048_v9, %v1848_v61  ;;  %v2071_v28 = vmax.f32 %v2046_v15, %v1846_v58  ;;  %v1844_v41 = vmax.f32 %v1540_v1, 0.0  ;;  %v2070_v55 = vmax.f32 %v2045_v37, %v1845_v48  ;;  %v5081_v61 = vpop.f32.mrf.mxu1 }
 0x204   :  { %v5061_v62 = vpop.f32.mrf.mxu0  ;;  %2175 = vperm.xlu1 %3337, %v2136_v13   ;;  %2190 = vperm.xlu0 %3336, %v2139_v32   ;;  %v1740_v49 = vmax.f32 %v1020_v56, 0.0  ;;  %v2042_v63 = vmax.f32 %v4877_v33, %v1742_v59  ;;  %v1841_v23 = vmax.f32 %v1525_v24, 0.0  ;;  %v1520_v11 = vadd.f32 %v4714_v30, %v4948_v21  ;;  %v2140_v21 = vld [vmem:[%s5494_s4 + $0x38] sm:$0xff] }
 0x205   :  { %2360 = vmatpush1.msra.mxu1 %v2073_v12  ;;  %v2069_v9 = vmax.f32 %v2044_v42, %v1844_v41  ;;  %v1842_v46 = vmax.f32 %v1530_v39, 0.0  ;;  %v1739_v22 = vmax.f32 %v1015_v5, 0.0  ;;  %v2041_v33 = vmax.f32 %v4883_v50, %v1741_v60  ;;  %v5103_v12 = vpop.f32.mrf.mxu1  ;;  %v2143_v50 = vld [vmem:[%s5494_s4 + $0x50] sm:$0xff] }
 0x206   :  { %2361 = vmatprep.subr.mxu1 %v5579_v4  ;;  %v5083_v54 = vpop.f32.mrf.mxu0  ;;  %v2068_v15 = vmax.f32 %v2043_v47, %v1843_v27  ;;  %v5107_v45 = vadd.f32 %v4714_v30, %v4890_v8  ;;  %v1738_v48 = vmax.f32 %v1010_v31, 0.0  ;;  %v2040_v1 = vmax.f32 %v4865_v0, %v1740_v49  ;;  %v5580_v47 = vld [vmem:[#allocation7_spill] sm:$0xff]  ;;  %v5581_v31 = vld [vmem:[#allocation21_spill] sm:$0xff] }
 0x207   :  { %2362 = vmatpush1.msra.mxu1 %v2072_v38  ;;  %v2067_v8 = vmax.f32 %v2042_v63, %v1842_v46  ;;  %v980_v58 = vadd.f32 %v4714_v30, %v4954_v2  ;;  %v1839_v57 = vmax.f32 %v1515_v10, 0.0  ;;  %v1510_v51 = vadd.f32 %v4714_v30, %v4920_v6  ;;  %v5129_v32 = vpop.f32.mrf.mxu1  ;;  %v2142_v6 = vld [vmem:[%s5494_s4 + $0x48] sm:$0xff]  ;;  %v2145_v2 = vld [vmem:[%s5494_s4 + $0x60] sm:$0xff] }
 0x208   :  { %2363 = vmatprep.subr.mxu1 %v5579_v4  ;;  %2185 = vperm.xlu1 %3337, %v2138_v34   ;;  %v5109_v3 = vpop.f32.mrf.mxu0  ;;  %v1840_v37 = vmax.f32 %v1520_v11, 0.0  ;;  %v1737_v38 = vmax.f32 %v1005_v44, 0.0  ;;  %v2039_v0 = vmax.f32 %v4870_v43, %v1739_v22  ;;  %v2066_v13 = vmax.f32 %v2041_v33, %v1841_v23  ;;  %v2147_v34 = vld [vmem:[%s5494_s4 + $0x70] sm:$0xff]  ;;  %v5582_v10 = vld [vmem:[#allocation23_spill] sm:$0xff]  ;;  %v5584_v33 = vld [vmem:[#allocation22_spill] sm:$0xff] }
 0x209   :  { %2364 = vmatpush1.msra.mxu1 %v2071_v28  ;;  %2200 = vperm.xlu0 %3336, %v2141_v40   ;;  %v1736_v59 = vmax.f32 %v1000_v19, 0.0  ;;  %v2038_v43 = vmax.f32 %v4849_v7, %v1738_v48  ;;  %v1495_v28 = vadd.f32 %v4714_v30, %v4867_v35  ;;  %v1837_v24 = vmax.f32 %v5107_v45, 0.0  ;;  %v3301_v60 = vpop.f32.mrf.mxu1  ;;  %v2146_v46 = vld [vmem:[%s5494_s4 + $0x68] sm:$0xff]  ;;  %v5583_v44 = vld [vmem:[#allocation20_spill] sm:$0xff]  ;;  %v2149_v19 = vld [vmem:[%s5494_s4 + $0x80] sm:$0xff] }
 0x20a   :  { %2365 = vmatprep.subr.mxu1 %v5579_v4  ;;  %v3151_v56 = vpop.f32.mrf.mxu0  ;;  %v2065_v42 = vmax.f32 %v2040_v1, %v1840_v37  ;;  %v1500_v27 = vadd.f32 %v4714_v30, %v4900_v17  ;;  %v1838_v39 = vmax.f32 %v1510_v51, 0.0  ;;  %v1732_v41 = vmax.f32 %v980_v58, 0.0  ;;  %v2144_v17 = vld [vmem:[%s5494_s4 + $0x58] sm:$0xff] }
 0x20b   :  { %2366 = vmatpush1.msra.mxu1 %v2070_v55  ;;  %v2037_v5 = vmax.f32 %v4856_v29, %v1737_v38  ;;  %v2064_v7 = vmax.f32 %v2039_v0, %v1839_v57  ;;  %v1480_v55 = vadd.f32 %v4714_v30, %v5580_v47  ;;  %v1734_v40 = vmax.f32 %v990_v16, 0.0  ;;  %v2148_v0 = vld [vmem:[%s5494_s4 + $0x78] sm:$0xff] }
 0x20c   :  { %2367 = vmatprep.subr.mxu1 %v5579_v4  ;;  %2195 = vperm.xlu1 %3337, %v2140_v21   ;;  %v1099_v35 = vpop.f32.mrf.mxu0  ;;  %v2036_v29 = vmax.f32 %v5581_v31, %v1736_v59  ;;  %v2063_v49 = vmax.f32 %v2038_v43, %v1838_v39  ;;  %v1105_v63 = vadd.f32 %v4714_v30, %v3151_v56  ;;  %v1836_v11 = vmax.f32 %v1500_v27, 0.0  ;;  %v3339_v27 = vld [vmem:[%s5492_s2] ss:$0 sm:$0xff] }
 0x20d   :  { %2368 = vmatpush1.msra.mxu1 %v2069_v9  ;;  %2210 = vperm.xlu0 %3336, %v2143_v50   ;;  %v1835_v9 = vmax.f32 %v1495_v28, 0.0  ;;  %v1490_v23 = vadd.f32 %v4714_v30, %v5582_v10  ;;  %v2007_v22 = vmax.f32 %v5583_v44, %v1732_v41  ;;  %v2062_v45 = vmax.f32 %v2037_v5, %v1837_v24  ;;  %v1599_v50 = vpop.f32.mrf.mxu1  ;;  %v5586_v41 = vld [vmem:[#allocation10_spill] sm:$0xff] }
 0x20e   :  { %2369 = vmatprep.subr.mxu1 %v5579_v4  ;;  %v1100_v21 = vadd.f32 %v4714_v30, %v1099_v35  ;;  %v1832_v48 = vmax.f32 %v1480_v55, 0.0  ;;  %v1605_v1 = vadd.f32 %v4714_v30, %v3301_v60  ;;  %v2061_v57 = vmax.f32 %v2036_v29, %v1836_v11  ;;  %v5587_v55 = vld [vmem:[#allocation11_spill] sm:$0xff]  ;;  %v5589_v29 = vld [vmem:[#allocation26_spill] sm:$0xff]  ;;  %v5591_v11 = vld [vmem:[#allocation9_spill] sm:$0xff] }
 0x20f   :  { %2370 = vmatpush1.msra.mxu1 %v2068_v15  ;;  %v2035_v15 = vmax.f32 %v5584_v33, %v1735_v26  ;;  %v1095_v51 = vadd.f32 %v4714_v30, %v5083_v54  ;;  %v1757_v37 = vmax.f32 %v1105_v63, 0.0  ;;  %v1834_v52 = vmax.f32 %v1490_v23, 0.0  ;;  %v2151_v54 = vld [vmem:[%s5494_s4 + $0x90] sm:$0xff]  ;;  %v2154_v33 = vld [vmem:[%s5494_s4 + $0xa8] sm:$0xff] }
 0x210   :  { %2371 = vmatprep.subr.mxu1 %v5579_v4  ;;  %2205 = vperm.xlu1 %3337, %v2142_v6   ;;  %v1600_v38 = vadd.f32 %v4714_v30, %v1599_v50  ;;  %v1090_v6 = vadd.f32 %v4714_v30, %v5109_v3  ;;  %v1595_v16 = vadd.f32 %v4714_v30, %v5103_v12  ;;  %v1857_v59 = vmax.f32 %v1605_v1, 0.0  ;;  %v2150_v12 = vld [vmem:[%s5494_s4 + $0x88] sm:$0xff] }
 0x211   :  { %2372 = vmatpush1.msra.mxu1 %v2067_v8  ;;  %2220 = vperm.xlu0 %3336, %v2145_v2   ;;  %v5585_v8 = vld [vmem:[#allocation6_spill] sm:$0xff]  ;;  %v2060_v56 = vmax.f32 %v2035_v15, %v1835_v9  ;;  %v1756_v2 = vmax.f32 %v1100_v21, 0.0  ;;  %v1755_v28 = vmax.f32 %v1095_v51, 0.0  ;;  %v1590_v3 = vadd.f32 %v4714_v30, %v5129_v32  ;;  %v2155_v9 = vld [vmem:[%s5494_s4 + $0xb0] sm:$0xff] }
 0x212   :  { %2373 = vmatprep.subr.mxu1 %v5579_v4  ;;  %v2034_v58 = vmax.f32 %v5585_v8, %v1734_v40  ;;  %v1754_v39 = vmax.f32 %v1090_v6, 0.0  ;;  %v1856_v5 = vmax.f32 %v1600_v38, 0.0  ;;  %v1585_v32 = vadd.f32 %v3339_v27, %v5059_v14  ;;  %v2152_v14 = vld [vmem:[%s5494_s4 + $0x98] sm:$0xff]  ;;  %v5594_v51 = vld [vmem:[#allocation24_spill] sm:$0xff] }
 0x213   :  { %2374 = vmatpush1.msra.mxu1 %v2066_v13  ;;  %v2032_v13 = vmax.f32 %v2007_v22, %v1832_v48  ;;  %v2056_v26 = vmax.f32 %v5586_v41, %v1756_v2  ;;  %v1075_v60 = vadd.f32 %v3339_v27, %v5027_v18  ;;  %v2055_v35 = vmax.f32 %v5587_v55, %v1755_v28  ;;  %v2157_v48 = vld [vmem:[%s5494_s4 + $0xc0] sm:$0xff]  ;;  %v2086_v6 = vld [vmem:[%s5493_s3 + $0x18] sm:$0xff]  ;;  %v2085_v2 = vld [vmem:[%s5493_s3 + $0x10] sm:$0xff] }
 0x214   :  { %2375 = vmatprep.subr.mxu1 %v5579_v4  ;;  %2215 = vperm.xlu1 %3337, %v2144_v17   ;;  %v2059_v43 = vmax.f32 %v2034_v58, %v1834_v52  ;;  %v5588_v17 = vld [vmem:[#allocation12_spill] sm:$0xff]  ;;  %v1854_v40 = vmax.f32 %v1590_v3, 0.0  ;;  %v1070_v31 = vadd.f32 %v3339_v27, %v5036_v53  ;;  %v1853_v44 = vmax.f32 %v1585_v32, 0.0  ;;  %v2095_v3 = vld [vmem:[%s5493_s3 + $0x60] sm:$0xff]  ;;  %v2102_v41 = vld [vmem:[%s5493_s3 + $0x98] sm:$0xff] }
 0x215   :  { %2376 = vmatpush1.msra.mxu1 %v2065_v42  ;;  %2230 = vperm.xlu0 %3336, %v2147_v34   ;;  %v1085_v42 = vadd.f32 %v4714_v30, %v5042_v25  ;;  %v2057_v24 = vmax.f32 %v2032_v13, %v1757_v37  ;;  %v1080_v25 = vadd.f32 %v3339_v27, %v5061_v62  ;;  %v2153_v30 = vld [vmem:[%s5494_s4 + $0xa0] sm:$0xff]  ;;  %v1751_v23 = vmax.f32 %v1075_v60, 0.0  ;;  %v2093_v28 = vld [vmem:[%s5493_s3 + $0x50] sm:$0xff]  ;;  %v2106_v32 = vld [vmem:[%s5493_s3 + $0xb8] sm:$0xff] }
 0x216   :  { %2377 = vmatprep.subr.mxu1 %v5579_v4  ;;  %v1580_v34 = vadd.f32 %v3339_v27, %v5081_v61  ;;  %v2081_v63 = vmax.f32 %v2056_v26, %v1856_v5  ;;  %v5590_v61 = vld [vmem:[#allocation14_spill] sm:$0xff]  ;;  %v1570_v53 = vadd.f32 %v3339_v27, %v5040_v20  ;;  %v1750_v15 = vmax.f32 %v1070_v31, 0.0  ;;  %v5593_v20 = vld [vmem:[#allocation25_spill] sm:$0xff]  ;;  %v2101_v26 = vld [vmem:[%s5493_s3 + $0x90] sm:$0xff] }
 0x217   :  { %2378 = vmatpush1.msra.mxu1 %v2064_v7  ;;  %v1855_v7 = vmax.f32 %v1595_v16, 0.0  ;;  %v1753_v47 = vmax.f32 %v1085_v42, 0.0  ;;  %v2082_v62 = vmax.f32 %v2057_v24, %v1857_v59  ;;  %v1752_v18 = vmax.f32 %v1080_v25, 0.0  ;;  %v2089_v16 = vld [vmem:[%s5493_s3 + $0x30] sm:$0xff]  ;;  %v2092_v59 = vld [vmem:[%s5493_s3 + $0x48] sm:$0xff]  ;;  %v2094_v42 = vld [vmem:[%s5493_s3 + $0x58] sm:$0xff] }
 0x218   :  { %2379 = vmatprep.subr.mxu1 %v5579_v4  ;;  %2225 = vperm.xlu1 %3337, %v2146_v46   ;;  %v1575_v10 = vadd.f32 %v3339_v27, %v5590_v61  ;;  %v1852_v50 = vmax.f32 %v1580_v34, 0.0  ;;  %v2051_v1 = vmax.f32 %v5593_v20, %v1751_v23  ;;  %v2050_v37 = vmax.f32 %v5594_v51, %v1750_v15  ;;  %v2096_v24 = vld [vmem:[%s5493_s3 + $0x68] sm:$0xff]  ;;  %v2097_v27 = vld [vmem:[%s5493_s3 + $0x70] sm:$0xff]  ;;  %v2110_v55 = vld [vmem:[%s5493_s3 + $0xd8] sm:$0xff] }
 0x219   :  { %2380 = vmatpush1.msra.mxu1 %v2063_v49  ;;  %2240 = vperm.xlu0 %3336, %v2149_v19   ;;  %v2054_v49 = vmax.f32 %v5589_v29, %v1754_v39  ;;  %v2053_v46 = vmax.f32 %v5591_v11, %v1753_v47  ;;  %v2080_v22 = vmax.f32 %v2055_v35, %v1855_v7  ;;  %v1850_v52 = vmax.f32 %v1570_v53, 0.0  ;;  %v2100_v25 = vld [vmem:[%s5493_s3 + $0x88] sm:$0xff]  ;;  %v2099_v39 = vld [vmem:[%s5493_s3 + $0x80] sm:$0xff]  ;;  %v2105_v7 = vld [vmem:[%s5493_s3 + $0xb0] sm:$0xff] }
 0x21a   :  { %2381 = vmatprep.subr.mxu1 %v5579_v4  ;;  %v1851_v8 = vmax.f32 %v1575_v10, 0.0  ;;  %v2104_v5 = vld [vmem:[%s5493_s3 + $0xa8] sm:$0xff]  ;;  %v2107_v47 = vld [vmem:[%s5493_s3 + $0xc0] sm:$0xff]  ;;  %v2109_v35 = vld [vmem:[%s5493_s3 + $0xd0] sm:$0xff] }
 0x21b   :  { %2382 = vmatpush1.msra.mxu1 %v2062_v45  ;;  %v5592_v45 = vld [vmem:[#allocation8_spill] sm:$0xff]  ;;  %v2079_v19 = vmax.f32 %v2054_v49, %v1854_v40  ;;  %v2078_v58 = vmax.f32 %v2053_v46, %v1853_v44  ;;  %v2075_v13 = vmax.f32 %v2050_v37, %v1850_v52  ;;  %v2108_v60 = vld [vmem:[%s5493_s3 + $0xc8] sm:$0xff]  ;;  %v2114_v34 = vld [vmem:[%s5493_s3 + $0xf8] sm:$0xff] }
 0x21c   :  { %2383 = vmatprep.subr.mxu1 %v5579_v4  ;;  %2235 = vperm.xlu1 %3337, %v2148_v0   ;;  %v2052_v21 = vmax.f32 %v5592_v45, %v1752_v18  ;;  %v2076_v0 = vmax.f32 %v2051_v1, %v1851_v8  ;;  %v2113_v40 = vld [vmem:[%s5493_s3 + $0xf0] sm:$0xff]  ;;  %v2115_v31 = vld [vmem:[%s5493_s3 + $0x100] sm:$0xff]  ;;  %v2118_v18 = vld [vmem:[%s5493_s3 + $0x118] sm:$0xff] }
 0x21d   :  { %2384 = vmatpush1.msra.mxu1 %v2061_v57  ;;  %2250 = vperm.xlu0 %3336, %v2151_v54   ;;  %v2156_v57 = vld [vmem:[%s5494_s4 + $0xb8] sm:$0xff]  ;;  %v2088_v54 = vld [vmem:[%s5493_s3 + $0x28] sm:$0xff]  ;;  %v2117_v29 = vld [vmem:[%s5493_s3 + $0x110] sm:$0xff] }
 0x21e   :  { %2385 = vmatprep.subr.mxu1 %v5579_v4  ;;  %v2077_v38 = vmax.f32 %v2052_v21, %v1852_v50  ;;  %v2120_v49 = vld [vmem:[%s5493_s3 + $0x128] sm:$0xff]  ;;  %v2121_v61 = vld [vmem:[%s5493_s3 + $0x130] sm:$0xff]  ;;  %v2123_v23 = vld [vmem:[%s5493_s3 + $0x140] sm:$0xff] }
 0x21f   :  { %2386 = vmatpush1.msra.mxu1 %v2060_v56  ;;  %v2083_v56 = vld [vmem:[%s5493_s3] sm:$0xff]  ;;  %v2124_v10 = vld [vmem:[%s5493_s3 + $0x148] sm:$0xff]  ;;  %v2126_v11 = vld [vmem:[%s5493_s3 + $0x158] sm:$0xff] }
 0x220   :  { %2387 = vmatprep.subr.mxu1 %v5579_v4  ;;  %2245 = vperm.xlu1 %3337, %v2150_v12   ;;  %v2098_v12 = vld [vmem:[%s5493_s3 + $0x78] sm:$0xff]  ;;  %v2125_v46 = vld [vmem:[%s5493_s3 + $0x150] sm:$0xff]  ;;  %v2128_v44 = vld [vmem:[%s5493_s3 + $0x168] sm:$0xff] }
 0x221   :  { %2388 = vmatpush1.msra.mxu1 %v2059_v43  ;;  %2260 = vperm.xlu0 %3336, %v2153_v30   ;;  %v2091_v43 = vld [vmem:[%s5493_s3 + $0x40] sm:$0xff]  ;;  %v2130_v53 = vld [vmem:[%s5493_s3 + $0x178] sm:$0xff]  ;;  %v2132_v15 = vld [vmem:[%s5493_s3 + $0x188] sm:$0xff] }
 0x222   :  { %2389 = vmatprep.subr.mxu1 %v5579_v4  ;;  %v2103_v30 = vld [vmem:[%s5493_s3 + $0xa0] sm:$0xff] }
 0x223   :  { %2390 = vmatpush1.msra.mxu1 %v5588_v17  ;;  %v2111_v17 = vld [vmem:[%s5493_s3 + $0xe0] sm:$0xff] }
 0x224   :  { %2405 = vmatprep.subr.mxu1 %v5579_v4  ;;  %2255 = vperm.xlu1 %3337, %v2152_v14   ;;  %v2116_v14 = vld [vmem:[%s5493_s3 + $0x108] sm:$0xff]  ;;  %v2131_v45 = vld [vmem:[%s5493_s3 + $0x180] sm:$0xff] }
 0x225   :  { %2406 = vmatpush2.msra.mxu1 %v2082_v62  ;;  %2270 = vperm.xlu0 %3336, %v2155_v9   ;;  %v2112_v62 = vld [vmem:[%s5493_s3 + $0xe8] sm:$0xff]  ;;  %v2122_v9 = vld [vmem:[%s5493_s3 + $0x138] sm:$0xff] }
 0x226   :  { %2407 = vmatprep.subr.mxu1 %v5579_v4 }
 0x227   :  { %2408 = vmatpush2.msra.mxu1 %v2081_v63  ;;  %v2119_v63 = vld [vmem:[%s5493_s3 + $0x120] sm:$0xff] }
 0x228   :  { %2409 = vmatprep.subr.mxu1 %v5579_v4  ;;  %2265 = vperm.xlu1 %3337, %v2154_v33   ;;  %v2129_v33 = vld [vmem:[%s5493_s3 + $0x170] sm:$0xff] }
 0x229   :  { %2410 = vmatpush2.msra.mxu1 %v2080_v22  ;;  %2280 = vperm.xlu0 %3336, %v2157_v48   ;;  %v2127_v22 = vld [vmem:[%s5493_s3 + $0x160] sm:$0xff] }
 0x22a   :  { %2411 = vmatprep.subr.mxu1 %v5579_v4 }
 0x22b   :  { %2412 = vmatpush2.msra.mxu1 %v2079_v19 }
 0x22c   :  { %2413 = vmatprep.subr.mxu1 %v5579_v4  ;;  %2275 = vperm.xlu1 %3337, %v2156_v57  }
 0x22d   :  { %2414 = vmatpush2.msra.mxu1 %v2078_v58 }
 0x22e   :  { %2415 = vmatprep.subr.mxu1 %v5579_v4 }
 0x22f   :  { %2416 = vmatpush2.msra.mxu1 %v2077_v38 }
 0x230   :  { %2417 = vmatprep.subr.mxu1 %v5579_v4 }
 0x231   :  { %2418 = vmatpush2.msra.mxu1 %v2076_v0 }
 0x232   :  { %2419 = vmatprep.subr.mxu1 %v5579_v4 }
 0x233   :  { %2420 = vmatpush2.msra.mxu1 %v2075_v13 }
 0x234   :  { %2421 = vmatprep.subr.mxu1 %v5579_v4  ;;  %v2087_v4 = vld [vmem:[%s5493_s3 + $0x20] sm:$0xff] }
 0x235   :  { %2422 = vmatpush2.msra.mxu1 %v5038_v36  ;;  %v2090_v36 = vld [vmem:[%s5493_s3 + $0x38] sm:$0xff] }
 0x236   :  { %2424 = vmatmul.mubr.f32.vlgmr.msra.gmra.mxu1 %v2083_v56 }
 0x237   :  { %2605 = vmatprep.mubr.msk.f32.mxu1 %vm2283_vm0, %v2086_v6 }
 0x23a   :  { %2429 = vmatmul.mubr.f32.gmra.mxu1 %v2085_v2 }
 0x23b   :  { %2606 = vmatprep.mubr.msk.f32.mxu1 %vm2283_vm0, %v2088_v54 }
 0x23e   :  { %2434 = vmatmul.mubr.f32.gmra.mxu1 %v2087_v4 }
 0x23f   :  { %2607 = vmatprep.mubr.msk.f32.mxu1 %vm2283_vm0, %v2090_v36 }
 0x242   :  { %2439 = vmatmul.mubr.f32.gmra.mxu1 %v2089_v16 }
 0x243   :  { %2608 = vmatprep.mubr.msk.f32.mxu1 %vm2283_vm0, %v2092_v59 }
 0x246   :  { %2444 = vmatmul.mubr.f32.gmra.mxu1 %v2091_v43 }
 0x247   :  { %2609 = vmatprep.mubr.msk.f32.mxu1 %vm2283_vm0, %v2094_v42 }
 0x24a   :  { %2449 = vmatmul.mubr.f32.gmra.mxu1 %v2093_v28 }
 0x24b   :  { %2610 = vmatprep.mubr.msk.f32.mxu1 %vm2283_vm0, %v2096_v24 }
 0x24e   :  { %2454 = vmatmul.mubr.f32.gmra.mxu1 %v2095_v3 }
 0x24f   :  { %2611 = vmatprep.mubr.msk.f32.mxu1 %vm2283_vm0, %v2098_v12 }
 0x252   :  { %2459 = vmatmul.mubr.f32.gmra.mxu1 %v2097_v27 }
 0x253   :  { %2612 = vmatprep.mubr.msk.f32.mxu1 %vm2283_vm0, %v2100_v25 }
 0x256   :  { %2464 = vmatmul.mubr.f32.gmra.mxu1 %v2099_v39 }
 0x257   :  { %2613 = vmatprep.mubr.msk.f32.mxu1 %vm2283_vm0, %v2102_v41 }
 0x25a   :  { %2469 = vmatmul.mubr.f32.gmra.mxu1 %v2101_v26 }
 0x25b   :  { %2614 = vmatprep.mubr.msk.f32.mxu1 %vm2283_vm0, %v2104_v5 }
 0x25e   :  { %2474 = vmatmul.mubr.f32.gmra.mxu1 %v2103_v30 }
 0x25f   :  { %2615 = vmatprep.mubr.msk.f32.mxu1 %vm2283_vm0, %v2106_v32  ;;  %v2161_v21 = vpop.permute.xlu0 %2160 }
 0x262   :  { %2479 = vmatmul.mubr.f32.gmra.mxu1 %v2105_v7 }
 0x263   :  { %2616 = vmatprep.mubr.msk.f32.mxu1 %vm2283_vm0, %v2108_v60 }
 0x264   :  { %v2166_v20 = vpop.permute.xlu0 %2165 }
 0x266   :  { %2484 = vmatmul.mubr.f32.gmra.mxu1 %v2107_v47 }
 0x267   :  { %2617 = vmatprep.mubr.msk.f32.mxu1 %vm2283_vm0, %v2110_v55 }
 0x26a   :  { %2489 = vmatmul.mubr.f32.gmra.mxu1 %v2109_v35 }
 0x26b   :  { %2618 = vmatprep.mubr.msk.f32.mxu1 %vm2283_vm0, %v2112_v62 }
 0x26e   :  { %2494 = vmatmul.mubr.f32.gmra.mxu1 %v2111_v17 }
 0x26f   :  { %2619 = vmatprep.mubr.msk.f32.mxu1 %vm2283_vm0, %v2114_v34 }
 0x272   :  { %2499 = vmatmul.mubr.f32.gmra.mxu1 %v2113_v40 }
 0x273   :  { %2620 = vmatprep.mubr.msk.f32.mxu1 %vm2283_vm0, %v2116_v14 }
 0x276   :  { %2504 = vmatmul.mubr.f32.gmra.mxu1 %v2115_v31 }
 0x277   :  { %2621 = vmatprep.mubr.msk.f32.mxu1 %vm2283_vm0, %v2118_v18 }
 0x27a   :  { %2509 = vmatmul.mubr.f32.gmra.mxu1 %v2117_v29 }
 0x27b   :  { %2622 = vmatprep.mubr.msk.f32.mxu1 %vm2283_vm0, %v2120_v49  ;;  %v2171_v58 = vpop.permute.xlu1 %2170  ;;  %v2181_v16 = vpop.permute.xlu0 %2180 }
 0x27e   :  { %2514 = vmatmul.mubr.f32.gmra.mxu1 %v2119_v63 }
 0x27f   :  { %2623 = vmatprep.mubr.msk.f32.mxu1 %vm2283_vm0, %v2122_v9  ;;  %v2176_v13 = vpop.permute.xlu1 %2175  ;;  %v2191_v39 = vpop.permute.xlu0 %2190 }
 0x282   :  { %2519 = vmatmul.mubr.f32.gmra.mxu1 %v2121_v61 }
 0x283   :  { %2624 = vmatprep.mubr.msk.f32.mxu1 %vm2283_vm0, %v2124_v10  ;;  %v2186_v24 = vpop.permute.xlu1 %2185 }
 0x284   :  { %v2201_v35 = vpop.permute.xlu0 %2200 }
 0x286   :  { %2524 = vmatmul.mubr.f32.gmra.mxu1 %v2123_v23 }
 0x287   :  { %2625 = vmatprep.mubr.msk.f32.mxu1 %vm2283_vm0, %v2126_v11  ;;  %v2196_v32 = vpop.permute.xlu1 %2195 }
 0x288   :  { %v2211_v63 = vpop.permute.xlu0 %2210 }
 0x28a   :  { %2529 = vmatmul.mubr.f32.gmra.mxu1 %v2125_v46 }
 0x28b   :  { %2626 = vmatprep.mubr.msk.f32.mxu1 %vm2283_vm0, %v2128_v44  ;;  %v2206_v14 = vpop.permute.xlu1 %2205 }
 0x28e   :  { %2534 = vmatmul.mubr.f32.gmra.mxu1 %v2127_v22 }
 0x28f   :  { %2627 = vmatprep.mubr.msk.f32.mxu1 %vm2283_vm0, %v2130_v53  ;;  %v2216_v11 = vpop.permute.xlu1 %2215 }
 0x292   :  { %2539 = vmatmul.mubr.f32.gmra.mxu1 %v2129_v33  ;;  %v2221_v33 = vpop.permute.xlu0 %2220 }
 0x293   :  { %2628 = vmatprep.mubr.msk.f32.mxu1 %vm2283_vm0, %v2132_v15 }
 0x296   :  { %2544 = vmatmul.mubr.f32.gmra.mxu1 %v2131_v45 }
 0x2f6   :  { %v2425_v50 = vpop.f32.mrf.mxu1 }
 0x2f7   :  { %v2426_v19 = vadd.f32 %v2425_v50, %v2161_v21 }
 0x2f8   :  { %v2427_v48 = vpop.f32.mrf.mxu1 }
 0x2f9   :  { %v2549_v1 = vmax.f32 %v2426_v19, 0.0  ;;  %v2226_v19 = vpop.permute.xlu1 %2225 }
 0x2fa   :  { %v2430_v8 = vpop.f32.mrf.mxu1 }
 0x2fb   :  { %2574 = vst [vmem:[%s5495_s5] sm:$0xff] %v2549_v1  ;;  %v2431_v57 = vadd.f32 %v2430_v8, %v2166_v20 }
 0x2fc   :  { %v2432_v51 = vpop.f32.mrf.mxu1 }
 0x2fd   :  { %v2550_v37 = vmax.f32 %v2431_v57, 0.0 }
 0x2fe   :  { %v2435_v52 = vpop.f32.mrf.mxu1 }
 0x2ff   :  { %2575 = vst [vmem:[%s5495_s5 + $0x8] sm:$0xff] %v2550_v37  ;;  %v2436_v38 = vadd.f32 %v2435_v52, %v2171_v58  ;;  %v2231_v58 = vpop.permute.xlu0 %2230 }
 0x300   :  { %v2437_v0 = vpop.f32.mrf.mxu1 }
 0x301   :  { %v2551_v56 = vmax.f32 %v2436_v38, 0.0  ;;  %v2236_v38 = vpop.permute.xlu1 %2235 }
 0x302   :  { %v2440_v6 = vpop.f32.mrf.mxu1 }
 0x303   :  { %2576 = vst [vmem:[%s5495_s5 + $0x10] sm:$0xff] %v2551_v56  ;;  %v2441_v2 = vadd.f32 %v2440_v6, %v2176_v13 }
 0x304   :  { %v2442_v54 = vpop.f32.mrf.mxu1 }
 0x305   :  { %v2552_v4 = vmax.f32 %v2441_v2, 0.0  ;;  %v2241_v2 = vpop.permute.xlu0 %2240 }
 0x306   :  { %v2445_v36 = vpop.f32.mrf.mxu1 }
 0x307   :  { %v2446_v59 = vadd.f32 %v2445_v36, %v2181_v16  ;;  %2577 = vst [vmem:[%s5495_s5 + $0x18] sm:$0xff] %v2552_v4 }
 0x308   :  { %v2447_v43 = vpop.f32.mrf.mxu1 }
 0x309   :  { %v2553_v42 = vmax.f32 %v2446_v59, 0.0  ;;  %v2246_v59 = vpop.permute.xlu1 %2245 }
 0x30a   :  { %v2450_v28 = vpop.f32.mrf.mxu1 }
 0x30b   :  { %2578 = vst [vmem:[%s5495_s5 + $0x20] sm:$0xff] %v2553_v42  ;;  %v2451_v3 = vadd.f32 %v2450_v28, %v2186_v24 }
 0x30c   :  { %v2452_v12 = vpop.f32.mrf.mxu1 }
 0x30d   :  { %v2554_v27 = vmax.f32 %v2451_v3, 0.0  ;;  %v2251_v3 = vpop.permute.xlu0 %2250 }
 0x30e   :  { %v2455_v25 = vpop.f32.mrf.mxu1 }
 0x30f   :  { %v2456_v41 = vadd.f32 %v2455_v25, %v2191_v39  ;;  %2579 = vst [vmem:[%s5495_s5 + $0x28] sm:$0xff] %v2554_v27 }
 0x310   :  { %v2457_v26 = vpop.f32.mrf.mxu1 }
 0x311   :  { %v2555_v5 = vmax.f32 %v2456_v41, 0.0  ;;  %v2256_v41 = vpop.permute.xlu1 %2255 }
 0x312   :  { %v2460_v30 = vpop.f32.mrf.mxu1 }
 0x313   :  { %2580 = vst [vmem:[%s5495_s5 + $0x30] sm:$0xff] %v2555_v5  ;;  %v2461_v7 = vadd.f32 %v2460_v30, %v2196_v32 }
 0x314   :  { %v2462_v60 = vpop.f32.mrf.mxu1 }
 0x315   :  { %v2556_v47 = vmax.f32 %v2461_v7, 0.0  ;;  %v2261_v7 = vpop.permute.xlu0 %2260 }
 0x316   :  { %v2465_v55 = vpop.f32.mrf.mxu1 }
 0x317   :  { %v2466_v62 = vadd.f32 %v2465_v55, %v2201_v35  ;;  %2581 = vst [vmem:[%s5495_s5 + $0x38] sm:$0xff] %v2556_v47 }
 0x318   :  { %v2467_v17 = vpop.f32.mrf.mxu1 }
 0x319   :  { %v2557_v34 = vmax.f32 %v2466_v62, 0.0  ;;  %v2266_v62 = vpop.permute.xlu1 %2265 }
 0x31a   :  { %v2470_v40 = vpop.f32.mrf.mxu1 }
 0x31b   :  { %2582 = vst [vmem:[%s5495_s5 + $0x40] sm:$0xff] %v2557_v34  ;;  %v2471_v31 = vadd.f32 %v2470_v40, %v2206_v14 }
 0x31c   :  { %v2472_v18 = vpop.f32.mrf.mxu1 }
 0x31d   :  { %v2558_v29 = vmax.f32 %v2471_v31, 0.0  ;;  %v2271_v31 = vpop.permute.xlu0 %2270 }
 0x31e   :  { %v2475_v49 = vpop.f32.mrf.mxu1 }
 0x31f   :  { %v2476_v9 = vadd.f32 %v2475_v49, %v2211_v63  ;;  %2583 = vst [vmem:[%s5495_s5 + $0x48] sm:$0xff] %v2558_v29 }
 0x320   :  { %v2477_v61 = vpop.f32.mrf.mxu1 }
 0x321   :  { %v2559_v10 = vmax.f32 %v2476_v9, 0.0  ;;  %v2276_v9 = vpop.permute.xlu1 %2275 }
 0x322   :  { %v2480_v23 = vpop.f32.mrf.mxu1 }
 0x323   :  { %2584 = vst [vmem:[%s5495_s5 + $0x50] sm:$0xff] %v2559_v10  ;;  %v2481_v46 = vadd.f32 %v2480_v23, %v2216_v11  ;;  %v2281_v11 = vpop.permute.xlu0 %2280 }
 0x324   :  { %v2482_v44 = vpop.f32.mrf.mxu1 }
 0x325   :  { %v2560_v22 = vmax.f32 %v2481_v46, 0.0 }
 0x326   :  { %v2485_v53 = vpop.f32.mrf.mxu1 }
 0x327   :  { %v2486_v15 = vadd.f32 %v2485_v53, %v2221_v33  ;;  %2585 = vst [vmem:[%s5495_s5 + $0x58] sm:$0xff] %v2560_v22 }
 0x328   :  { %v2487_v45 = vpop.f32.mrf.mxu1 }
 0x329   :  { %v2561_v21 = vmax.f32 %v2486_v15, 0.0 }
 0x32a   :  { %v2490_v50 = vpop.f32.mrf.mxu1 }
 0x32b   :  { %2586 = vst [vmem:[%s5495_s5 + $0x60] sm:$0xff] %v2561_v21  ;;  %v2491_v48 = vadd.f32 %v2490_v50, %v2226_v19 }
 0x32c   :  { %v2492_v20 = vpop.f32.mrf.mxu1 }
 0x32d   :  { %v2562_v1 = vmax.f32 %v2491_v48, 0.0 }
 0x32e   :  { %v2495_v8 = vpop.f32.mrf.mxu1 }
 0x32f   :  { %v2496_v57 = vadd.f32 %v2495_v8, %v2231_v58  ;;  %2587 = vst [vmem:[%s5495_s5 + $0x68] sm:$0xff] %v2562_v1 }
 0x330   :  { %v2497_v51 = vpop.f32.mrf.mxu1 }
 0x331   :  { %v2563_v37 = vmax.f32 %v2496_v57, 0.0 }
 0x332   :  { %v2500_v52 = vpop.f32.mrf.mxu1 }
 0x333   :  { %2588 = vst [vmem:[%s5495_s5 + $0x70] sm:$0xff] %v2563_v37  ;;  %v2501_v0 = vadd.f32 %v2500_v52, %v2236_v38 }
 0x334   :  { %v2502_v13 = vpop.f32.mrf.mxu1 }
 0x335   :  { %v2564_v56 = vmax.f32 %v2501_v0, 0.0 }
 0x336   :  { %v2505_v6 = vpop.f32.mrf.mxu1 }
 0x337   :  { %v2506_v54 = vadd.f32 %v2505_v6, %v2241_v2  ;;  %2589 = vst [vmem:[%s5495_s5 + $0x78] sm:$0xff] %v2564_v56 }
 0x338   :  { %v2507_v4 = vpop.f32.mrf.mxu1 }
 0x339   :  { %v2565_v36 = vmax.f32 %v2506_v54, 0.0 }
 0x33a   :  { %v2510_v16 = vpop.f32.mrf.mxu1 }
 0x33b   :  { %2590 = vst [vmem:[%s5495_s5 + $0x80] sm:$0xff] %v2565_v36  ;;  %v2511_v43 = vadd.f32 %v2510_v16, %v2246_v59 }
 0x33c   :  { %v2512_v42 = vpop.f32.mrf.mxu1 }
 0x33d   :  { %v2566_v28 = vmax.f32 %v2511_v43, 0.0 }
 0x33e   :  { %v2515_v24 = vpop.f32.mrf.mxu1 }
 0x33f   :  { %v2516_v12 = vadd.f32 %v2515_v24, %v2251_v3  ;;  %2591 = vst [vmem:[%s5495_s5 + $0x88] sm:$0xff] %v2566_v28 }
 0x340   :  { %v2517_v27 = vpop.f32.mrf.mxu1 }
 0x341   :  { %v2567_v25 = vmax.f32 %v2516_v12, 0.0 }
 0x342   :  { %v2520_v39 = vpop.f32.mrf.mxu1 }
 0x343   :  { %2592 = vst [vmem:[%s5495_s5 + $0x90] sm:$0xff] %v2567_v25  ;;  %v2521_v26 = vadd.f32 %v2520_v39, %v2256_v41 }
 0x344   :  { %v2522_v5 = vpop.f32.mrf.mxu1 }
 0x345   :  { %v2568_v30 = vmax.f32 %v2521_v26, 0.0 }
 0x346   :  { %v2525_v32 = vpop.f32.mrf.mxu1 }
 0x347   :  { %v2526_v60 = vadd.f32 %v2525_v32, %v2261_v7  ;;  %2593 = vst [vmem:[%s5495_s5 + $0x98] sm:$0xff] %v2568_v30 }
 0x348   :  { %v2527_v47 = vpop.f32.mrf.mxu1 }
 0x349   :  { %v2569_v55 = vmax.f32 %v2526_v60, 0.0 }
 0x34a   :  { %v2530_v35 = vpop.f32.mrf.mxu1 }
 0x34b   :  { %2594 = vst [vmem:[%s5495_s5 + $0xa0] sm:$0xff] %v2569_v55  ;;  %v2531_v17 = vadd.f32 %v2530_v35, %v2266_v62 }
 0x34c   :  { %v2532_v34 = vpop.f32.mrf.mxu1 }
 0x34d   :  { %v2570_v40 = vmax.f32 %v2531_v17, 0.0 }
 0x34e   :  { %v2535_v14 = vpop.f32.mrf.mxu1 }
 0x34f   :  { %v2536_v18 = vadd.f32 %v2535_v14, %v2271_v31  ;;  %2595 = vst [vmem:[%s5495_s5 + $0xa8] sm:$0xff] %v2570_v40 }
 0x350   :  { %v2537_v29 = vpop.f32.mrf.mxu1 }
 0x351   :  { %v2571_v49 = vmax.f32 %v2536_v18, 0.0 }
 0x352   :  { %v2540_v63 = vpop.f32.mrf.mxu1 }
 0x353   :  { %2596 = vst [vmem:[%s5495_s5 + $0xb0] sm:$0xff] %v2571_v49  ;;  %v2541_v61 = vadd.f32 %v2540_v63, %v2276_v9 }
 0x354   :  { %v2542_v10 = vpop.f32.mrf.mxu1 }
 0x355   :  { %v2572_v23 = vmax.f32 %v2541_v61, 0.0 }
 0x356   :  { %v2545_v46 = vpop.f32.mrf.mxu1 }
 0x357   :  { %v2546_v44 = vadd.f32 %v2545_v46, %v2281_v11  ;;  %2597 = vst [vmem:[%s5495_s5 + $0xb8] sm:$0xff] %v2572_v23 }
 0x358   :  { %v2547_v22 = vpop.f32.mrf.mxu1 }
 0x359   :  { %v2573_v53 = vmax.f32 %v2546_v44, 0.0 }
 0x35b   :  { %2598 = vst [vmem:[%s5495_s5 + $0xc0] sm:$0xff] %v2573_v53 }

// kernel: cnn_lstm2_forward.8
= control target key start
LH: loop header
LB: loop body
LE: loop exit
PB: predicated region body
PF: predicated region fallthrough
CT: control target
= control target key end

     0   :  { %v1274_v3 = vmov 0.0   ;;  %s2843_s1 = inlined_call_operand.vmem [shape: f32[128,1024], index: 1, kind: input, shape index: {}]   ;;  %s2844_s0 = inlined_call_operand.vmem [shape: f32[200,128], index: 0, kind: input, shape index: {}]   ;;  %s2845_s2 = inlined_call_operand.vmem [shape: f32[1,1024], index: 2, kind: input, shape index: {}]   ;;  %s2846_s3 = inlined_call_operand.vmem [shape: f32[200,1024], index: 3, kind: output, shape index: {}]  }
   0x1   :  { %v160_v0 = vld [vmem:[%s2843_s1 + $0x3c8] sm:$0xff]  ;;  %v162_v1 = vld [vmem:[%s2843_s1 + $0x3d8] sm:$0xff]  ;;  %v159_v2 = vld [vmem:[%s2843_s1 + $0x3c0] sm:$0xff]  ;;  %273 = vmatprep.mubr.f32.mxu0 %v1274_v3  ;;  %488 = vmatprep.mubr.f32.mxu1 %v1274_v3 }
   0x2   :  { %209 = vmatprep.subr.mxu0 %v160_v0  ;;  %424 = vmatprep.subr.mxu1 %v162_v1  ;;  %v161_v4 = vld [vmem:[%s2843_s1 + $0x3d0] sm:$0xff]  ;;  %v152_v5 = vld [vmem:[%s2843_s1 + $0x388] sm:$0xff]  ;;  %v154_v6 = vld [vmem:[%s2843_s1 + $0x398] sm:$0xff] }
   0x3   :  { %210 = vmatpush1.msra.mxu0 %v159_v2  ;;  %425 = vmatpush1.msra.mxu1 %v161_v4  ;;  %v151_v7 = vld [vmem:[%s2843_s1 + $0x380] sm:$0xff]  ;;  %v153_v8 = vld [vmem:[%s2843_s1 + $0x390] sm:$0xff]  ;;  %v144_v9 = vld [vmem:[%s2843_s1 + $0x348] sm:$0xff] }
   0x4   :  { %211 = vmatprep.subr.mxu0 %v152_v5  ;;  %426 = vmatprep.subr.mxu1 %v154_v6  ;;  %v146_v10 = vld [vmem:[%s2843_s1 + $0x358] sm:$0xff]  ;;  %v143_v11 = vld [vmem:[%s2843_s1 + $0x340] sm:$0xff]  ;;  %v145_v12 = vld [vmem:[%s2843_s1 + $0x350] sm:$0xff] }
   0x5   :  { %212 = vmatpush1.msra.mxu0 %v151_v7  ;;  %427 = vmatpush1.msra.mxu1 %v153_v8  ;;  %v136_v13 = vld [vmem:[%s2843_s1 + $0x308] sm:$0xff]  ;;  %v138_v14 = vld [vmem:[%s2843_s1 + $0x318] sm:$0xff]  ;;  %v135_v15 = vld [vmem:[%s2843_s1 + $0x300] sm:$0xff] }
   0x6   :  { %213 = vmatprep.subr.mxu0 %v144_v9  ;;  %428 = vmatprep.subr.mxu1 %v146_v10  ;;  %v137_v16 = vld [vmem:[%s2843_s1 + $0x310] sm:$0xff]  ;;  %v128_v17 = vld [vmem:[%s2843_s1 + $0x2c8] sm:$0xff]  ;;  %v130_v18 = vld [vmem:[%s2843_s1 + $0x2d8] sm:$0xff] }
   0x7   :  { %214 = vmatpush1.msra.mxu0 %v143_v11  ;;  %429 = vmatpush1.msra.mxu1 %v145_v12  ;;  %v127_v19 = vld [vmem:[%s2843_s1 + $0x2c0] sm:$0xff]  ;;  %v129_v20 = vld [vmem:[%s2843_s1 + $0x2d0] sm:$0xff]  ;;  %v120_v21 = vld [vmem:[%s2843_s1 + $0x288] sm:$0xff] }
   0x8   :  { %215 = vmatprep.subr.mxu0 %v136_v13  ;;  %430 = vmatprep.subr.mxu1 %v138_v14  ;;  %v122_v22 = vld [vmem:[%s2843_s1 + $0x298] sm:$0xff]  ;;  %v119_v23 = vld [vmem:[%s2843_s1 + $0x280] sm:$0xff]  ;;  %v121_v24 = vld [vmem:[%s2843_s1 + $0x290] sm:$0xff] }
   0x9   :  { %216 = vmatpush1.msra.mxu0 %v135_v15  ;;  %431 = vmatpush1.msra.mxu1 %v137_v16  ;;  %v112_v25 = vld [vmem:[%s2843_s1 + $0x248] sm:$0xff]  ;;  %v114_v26 = vld [vmem:[%s2843_s1 + $0x258] sm:$0xff]  ;;  %v111_v27 = vld [vmem:[%s2843_s1 + $0x240] sm:$0xff] }
   0xa   :  { %217 = vmatprep.subr.mxu0 %v128_v17  ;;  %432 = vmatprep.subr.mxu1 %v130_v18  ;;  %v113_v28 = vld [vmem:[%s2843_s1 + $0x250] sm:$0xff]  ;;  %v104_v29 = vld [vmem:[%s2843_s1 + $0x208] sm:$0xff]  ;;  %v106_v30 = vld [vmem:[%s2843_s1 + $0x218] sm:$0xff] }
   0xb   :  { %218 = vmatpush1.msra.mxu0 %v127_v19  ;;  %433 = vmatpush1.msra.mxu1 %v129_v20  ;;  %v103_v31 = vld [vmem:[%s2843_s1 + $0x200] sm:$0xff]  ;;  %v105_v32 = vld [vmem:[%s2843_s1 + $0x210] sm:$0xff]  ;;  %v96_v33 = vld [vmem:[%s2843_s1 + $0x1c8] sm:$0xff] }
   0xc   :  { %219 = vmatprep.subr.mxu0 %v120_v21  ;;  %434 = vmatprep.subr.mxu1 %v122_v22  ;;  %v98_v34 = vld [vmem:[%s2843_s1 + $0x1d8] sm:$0xff]  ;;  %v95_v35 = vld [vmem:[%s2843_s1 + $0x1c0] sm:$0xff]  ;;  %v97_v36 = vld [vmem:[%s2843_s1 + $0x1d0] sm:$0xff] }
   0xd   :  { %220 = vmatpush1.msra.mxu0 %v119_v23  ;;  %435 = vmatpush1.msra.mxu1 %v121_v24  ;;  %v88_v37 = vld [vmem:[%s2843_s1 + $0x188] sm:$0xff]  ;;  %v90_v38 = vld [vmem:[%s2843_s1 + $0x198] sm:$0xff]  ;;  %v87_v39 = vld [vmem:[%s2843_s1 + $0x180] sm:$0xff] }
   0xe   :  { %221 = vmatprep.subr.mxu0 %v112_v25  ;;  %436 = vmatprep.subr.mxu1 %v114_v26  ;;  %v89_v40 = vld [vmem:[%s2843_s1 + $0x190] sm:$0xff]  ;;  %v80_v41 = vld [vmem:[%s2843_s1 + $0x148] sm:$0xff]  ;;  %v82_v42 = vld [vmem:[%s2843_s1 + $0x158] sm:$0xff] }
   0xf   :  { %222 = vmatpush1.msra.mxu0 %v111_v27  ;;  %437 = vmatpush1.msra.mxu1 %v113_v28  ;;  %v79_v43 = vld [vmem:[%s2843_s1 + $0x140] sm:$0xff]  ;;  %v81_v44 = vld [vmem:[%s2843_s1 + $0x150] sm:$0xff]  ;;  %v72_v45 = vld [vmem:[%s2843_s1 + $0x108] sm:$0xff] }
  0x10   :  { %223 = vmatprep.subr.mxu0 %v104_v29  ;;  %438 = vmatprep.subr.mxu1 %v106_v30  ;;  %v74_v46 = vld [vmem:[%s2843_s1 + $0x118] sm:$0xff]  ;;  %v71_v47 = vld [vmem:[%s2843_s1 + $0x100] sm:$0xff]  ;;  %v73_v48 = vld [vmem:[%s2843_s1 + $0x110] sm:$0xff] }
  0x11   :  { %224 = vmatpush1.msra.mxu0 %v103_v31  ;;  %439 = vmatpush1.msra.mxu1 %v105_v32  ;;  %v64_v49 = vld [vmem:[%s2843_s1 + $0xc8] sm:$0xff]  ;;  %v66_v50 = vld [vmem:[%s2843_s1 + $0xd8] sm:$0xff]  ;;  %v63_v51 = vld [vmem:[%s2843_s1 + $0xc0] sm:$0xff] }
  0x12   :  { %225 = vmatprep.subr.mxu0 %v96_v33  ;;  %440 = vmatprep.subr.mxu1 %v98_v34  ;;  %v65_v52 = vld [vmem:[%s2843_s1 + $0xd0] sm:$0xff]  ;;  %v56_v53 = vld [vmem:[%s2843_s1 + $0x88] sm:$0xff]  ;;  %v58_v54 = vld [vmem:[%s2843_s1 + $0x98] sm:$0xff] }
  0x13   :  { %226 = vmatpush1.msra.mxu0 %v95_v35  ;;  %441 = vmatpush1.msra.mxu1 %v97_v36  ;;  %v55_v55 = vld [vmem:[%s2843_s1 + $0x80] sm:$0xff]  ;;  %v57_v56 = vld [vmem:[%s2843_s1 + $0x90] sm:$0xff]  ;;  %v48_v57 = vld [vmem:[%s2843_s1 + $0x48] sm:$0xff] }
  0x14   :  { %227 = vmatprep.subr.mxu0 %v88_v37  ;;  %442 = vmatprep.subr.mxu1 %v90_v38  ;;  %v50_v58 = vld [vmem:[%s2843_s1 + $0x58] sm:$0xff]  ;;  %v47_v59 = vld [vmem:[%s2843_s1 + $0x40] sm:$0xff]  ;;  %v49_v60 = vld [vmem:[%s2843_s1 + $0x50] sm:$0xff] }
  0x15   :  { %228 = vmatpush1.msra.mxu0 %v87_v39  ;;  %443 = vmatpush1.msra.mxu1 %v89_v40  ;;  %v40_v61 = vld [vmem:[%s2843_s1 + $0x8] sm:$0xff]  ;;  %v42_v62 = vld [vmem:[%s2843_s1 + $0x18] sm:$0xff]  ;;  %v39_v63 = vld [vmem:[%s2843_s1] sm:$0xff] }
  0x16   :  { %229 = vmatprep.subr.mxu0 %v80_v41  ;;  %444 = vmatprep.subr.mxu1 %v82_v42  ;;  %v41_v0 = vld [vmem:[%s2843_s1 + $0x10] sm:$0xff]  ;;  %v1492_v1 = vld [vmem:[%s2844_s0] sm:$0xff]  ;;  %v164_v2 = vld [vmem:[%s2843_s1 + $0x3e8] sm:$0xff] }
  0x17   :  { %230 = vmatpush1.msra.mxu0 %v79_v43  ;;  %445 = vmatpush1.msra.mxu1 %v81_v44  ;;  %v166_v4 = vld [vmem:[%s2843_s1 + $0x3f8] sm:$0xff]  ;;  %v163_v5 = vld [vmem:[%s2843_s1 + $0x3e0] sm:$0xff]  ;;  %v165_v6 = vld [vmem:[%s2843_s1 + $0x3f0] sm:$0xff] }
  0x18   :  { %231 = vmatprep.subr.mxu0 %v72_v45  ;;  %446 = vmatprep.subr.mxu1 %v74_v46  ;;  %v1511_v7 = vld [vmem:[%s2844_s0 + $0x8] sm:$0xff]  ;;  %v158_v9 = vld [vmem:[%s2843_s1 + $0x3b8] sm:$0xff]  ;;  %v155_v10 = vld [vmem:[%s2843_s1 + $0x3a0] sm:$0xff] }
  0x19   :  { %232 = vmatpush1.msra.mxu0 %v71_v47  ;;  %447 = vmatpush1.msra.mxu1 %v73_v48  ;;  %v156_v8 = vld [vmem:[%s2843_s1 + $0x3a8] sm:$0xff]  ;;  %v157_v11 = vld [vmem:[%s2843_s1 + $0x3b0] sm:$0xff]  ;;  %v150_v14 = vld [vmem:[%s2843_s1 + $0x378] sm:$0xff] }
  0x1a   :  { %233 = vmatprep.subr.mxu0 %v64_v49  ;;  %448 = vmatprep.subr.mxu1 %v66_v50  ;;  %v1534_v12 = vld [vmem:[%s2844_s0 + $0x10] sm:$0xff]  ;;  %v148_v13 = vld [vmem:[%s2843_s1 + $0x368] sm:$0xff]  ;;  %v147_v15 = vld [vmem:[%s2843_s1 + $0x360] sm:$0xff] }
  0x1b   :  { %234 = vmatpush1.msra.mxu0 %v63_v51  ;;  %449 = vmatpush1.msra.mxu1 %v65_v52  ;;  %v149_v16 = vld [vmem:[%s2843_s1 + $0x370] sm:$0xff]  ;;  %v1555_v17 = vld [vmem:[%s2844_s0 + $0x18] sm:$0xff]  ;;  %v140_v18 = vld [vmem:[%s2843_s1 + $0x328] sm:$0xff] }
  0x1c   :  { %235 = vmatprep.subr.mxu0 %v56_v53  ;;  %450 = vmatprep.subr.mxu1 %v58_v54  ;;  %v142_v19 = vld [vmem:[%s2843_s1 + $0x338] sm:$0xff]  ;;  %v139_v20 = vld [vmem:[%s2843_s1 + $0x320] sm:$0xff]  ;;  %v141_v21 = vld [vmem:[%s2843_s1 + $0x330] sm:$0xff] }
  0x1d   :  { %236 = vmatpush1.msra.mxu0 %v55_v55  ;;  %451 = vmatpush1.msra.mxu1 %v57_v56  ;;  %v1576_v22 = vld [vmem:[%s2844_s0 + $0x20] sm:$0xff]  ;;  %v132_v23 = vld [vmem:[%s2843_s1 + $0x2e8] sm:$0xff]  ;;  %v134_v24 = vld [vmem:[%s2843_s1 + $0x2f8] sm:$0xff] }
  0x1e   :  { %237 = vmatprep.subr.mxu0 %v48_v57  ;;  %452 = vmatprep.subr.mxu1 %v50_v58  ;;  %v131_v25 = vld [vmem:[%s2843_s1 + $0x2e0] sm:$0xff]  ;;  %v133_v26 = vld [vmem:[%s2843_s1 + $0x2f0] sm:$0xff]  ;;  %v1597_v27 = vld [vmem:[%s2844_s0 + $0x28] sm:$0xff] }
  0x1f   :  { %238 = vmatpush1.msra.mxu0 %v47_v59  ;;  %453 = vmatpush1.msra.mxu1 %v49_v60  ;;  %v124_v28 = vld [vmem:[%s2843_s1 + $0x2a8] sm:$0xff]  ;;  %v126_v29 = vld [vmem:[%s2843_s1 + $0x2b8] sm:$0xff]  ;;  %v123_v30 = vld [vmem:[%s2843_s1 + $0x2a0] sm:$0xff] }
  0x20   :  { %239 = vmatprep.subr.mxu0 %v40_v61  ;;  %454 = vmatprep.subr.mxu1 %v42_v62  ;;  %v125_v31 = vld [vmem:[%s2843_s1 + $0x2b0] sm:$0xff]  ;;  %v116_v33 = vld [vmem:[%s2843_s1 + $0x268] sm:$0xff]  ;;  %v118_v34 = vld [vmem:[%s2843_s1 + $0x278] sm:$0xff] }
  0x21   :  { %240 = vmatpush1.msra.mxu0 %v39_v63  ;;  %455 = vmatpush1.msra.mxu1 %v41_v0  ;;  %v1618_v32 = vld [vmem:[%s2844_s0 + $0x30] sm:$0xff]  ;;  %v115_v35 = vld [vmem:[%s2843_s1 + $0x260] sm:$0xff]  ;;  %v1639_v37 = vld [vmem:[%s2844_s0 + $0x38] sm:$0xff] }
  0x22   :  { %274 = vmatmul.mubr.f32.vlgmr.msra.gmra.mxu0 %v1492_v1  ;;  %489 = vmatmul.mubr.f32.vlgmr.msra.gmra.mxu1 %v1492_v1  ;;  %v117_v36 = vld [vmem:[%s2843_s1 + $0x270] sm:$0xff]  ;;  %v108_v38 = vld [vmem:[%s2843_s1 + $0x228] sm:$0xff]  ;;  %v110_v39 = vld [vmem:[%s2843_s1 + $0x238] sm:$0xff] }
  0x23   :  { %639 = vmatprep.subr.mxu0 %v164_v2  ;;  %854 = vmatprep.subr.mxu1 %v166_v4  ;;  %v107_v40 = vld [vmem:[%s2843_s1 + $0x220] sm:$0xff]  ;;  %v109_v41 = vld [vmem:[%s2843_s1 + $0x230] sm:$0xff]  ;;  %v100_v43 = vld [vmem:[%s2843_s1 + $0x1e8] sm:$0xff] }
  0x24   :  { %640 = vmatpush1.msra.mxu0 %v163_v5  ;;  %855 = vmatpush1.msra.mxu1 %v165_v6  ;;  %v1660_v42 = vld [vmem:[%s2844_s0 + $0x40] sm:$0xff]  ;;  %v102_v44 = vld [vmem:[%s2843_s1 + $0x1f8] sm:$0xff]  ;;  %v101_v46 = vld [vmem:[%s2843_s1 + $0x1f0] sm:$0xff] }
  0x25   :  { %279 = vmatprep.mubr.f32.mxu0 %v1274_v3  ;;  %494 = vmatprep.mubr.f32.mxu1 %v1274_v3  ;;  %v99_v45 = vld [vmem:[%s2843_s1 + $0x1e0] sm:$0xff]  ;;  %v1681_v47 = vld [vmem:[%s2844_s0 + $0x48] sm:$0xff]  ;;  %v94_v49 = vld [vmem:[%s2843_s1 + $0x1b8] sm:$0xff] }
  0x26   :  { %280 = vmatmul.mubr.f32.gmra.mxu0 %v1511_v7  ;;  %495 = vmatmul.mubr.f32.gmra.mxu1 %v1511_v7  ;;  %v92_v48 = vld [vmem:[%s2843_s1 + $0x1a8] sm:$0xff]  ;;  %v91_v50 = vld [vmem:[%s2843_s1 + $0x1a0] sm:$0xff]  ;;  %v93_v51 = vld [vmem:[%s2843_s1 + $0x1b0] sm:$0xff] }
  0x27   :  { %285 = vmatprep.mubr.f32.mxu0 %v1274_v3  ;;  %500 = vmatprep.mubr.f32.mxu1 %v1274_v3  ;;  %v1702_v52 = vld [vmem:[%s2844_s0 + $0x50] sm:$0xff]  ;;  %v84_v53 = vld [vmem:[%s2843_s1 + $0x168] sm:$0xff]  ;;  %v86_v54 = vld [vmem:[%s2843_s1 + $0x178] sm:$0xff] }
  0x28   :  { %641 = vmatprep.subr.mxu0 %v156_v8  ;;  %856 = vmatprep.subr.mxu1 %v158_v9  ;;  %v83_v55 = vld [vmem:[%s2843_s1 + $0x160] sm:$0xff]  ;;  %v85_v56 = vld [vmem:[%s2843_s1 + $0x170] sm:$0xff]  ;;  %v1723_v57 = vld [vmem:[%s2844_s0 + $0x58] sm:$0xff] }
  0x29   :  { %642 = vmatpush1.msra.mxu0 %v155_v10  ;;  %857 = vmatpush1.msra.mxu1 %v157_v11  ;;  %v76_v58 = vld [vmem:[%s2843_s1 + $0x128] sm:$0xff]  ;;  %v78_v59 = vld [vmem:[%s2843_s1 + $0x138] sm:$0xff]  ;;  %v75_v60 = vld [vmem:[%s2843_s1 + $0x120] sm:$0xff] }
  0x2a   :  { %286 = vmatmul.mubr.f32.gmra.mxu0 %v1534_v12  ;;  %501 = vmatmul.mubr.f32.gmra.mxu1 %v1534_v12  ;;  %v77_v61 = vld [vmem:[%s2843_s1 + $0x130] sm:$0xff]  ;;  %v1744_v62 = vld [vmem:[%s2844_s0 + $0x60] sm:$0xff]  ;;  %v68_v63 = vld [vmem:[%s2843_s1 + $0xe8] sm:$0xff] }
  0x2b   :  { %291 = vmatprep.mubr.f32.mxu0 %v1274_v3  ;;  %506 = vmatprep.mubr.f32.mxu1 %v1274_v3  ;;  %v70_v0 = vld [vmem:[%s2843_s1 + $0xf8] sm:$0xff]  ;;  %v67_v2 = vld [vmem:[%s2843_s1 + $0xe0] sm:$0xff]  ;;  %v69_v4 = vld [vmem:[%s2843_s1 + $0xf0] sm:$0xff] }
  0x2c   :  { %643 = vmatprep.subr.mxu0 %v148_v13  ;;  %858 = vmatprep.subr.mxu1 %v150_v14  ;;  %v1765_v5 = vld [vmem:[%s2844_s0 + $0x68] sm:$0xff]  ;;  %v62_v8 = vld [vmem:[%s2843_s1 + $0xb8] sm:$0xff]  ;;  %v59_v9 = vld [vmem:[%s2843_s1 + $0xa0] sm:$0xff] }
  0x2d   :  { %644 = vmatpush1.msra.mxu0 %v147_v15  ;;  %859 = vmatpush1.msra.mxu1 %v149_v16  ;;  %v60_v6 = vld [vmem:[%s2843_s1 + $0xa8] sm:$0xff]  ;;  %v61_v10 = vld [vmem:[%s2843_s1 + $0xb0] sm:$0xff]  ;;  %v54_v14 = vld [vmem:[%s2843_s1 + $0x78] sm:$0xff] }
  0x2e   :  { %292 = vmatmul.mubr.f32.gmra.mxu0 %v1555_v17  ;;  %507 = vmatmul.mubr.f32.gmra.mxu1 %v1555_v17  ;;  %v1786_v11 = vld [vmem:[%s2844_s0 + $0x70] sm:$0xff]  ;;  %v52_v13 = vld [vmem:[%s2843_s1 + $0x68] sm:$0xff]  ;;  %v51_v15 = vld [vmem:[%s2843_s1 + $0x60] sm:$0xff] }
  0x2f   :  { %297 = vmatprep.mubr.f32.mxu0 %v1274_v3  ;;  %512 = vmatprep.mubr.f32.mxu1 %v1274_v3  ;;  %v53_v16 = vld [vmem:[%s2843_s1 + $0x70] sm:$0xff] }
  0x30   :  { %645 = vmatprep.subr.mxu0 %v140_v18  ;;  %860 = vmatprep.subr.mxu1 %v142_v19  ;;  %v1807_v18 = vld [vmem:[%s2844_s0 + $0x78] sm:$0xff]  ;;  %v44_v19 = vld [vmem:[%s2843_s1 + $0x28] sm:$0xff] }
  0x31   :  { %646 = vmatpush1.msra.mxu0 %v139_v20  ;;  %861 = vmatpush1.msra.mxu1 %v141_v21  ;;  %v46_v20 = vld [vmem:[%s2843_s1 + $0x38] sm:$0xff]  ;;  %v43_v21 = vld [vmem:[%s2843_s1 + $0x20] sm:$0xff] }
  0x32   :  { %298 = vmatmul.mubr.f32.gmra.mxu0 %v1576_v22  ;;  %513 = vmatmul.mubr.f32.gmra.mxu1 %v1576_v22 }
  0x33   :  { %303 = vmatprep.mubr.f32.mxu0 %v1274_v3  ;;  %518 = vmatprep.mubr.f32.mxu1 %v1274_v3 }
  0x34   :  { %647 = vmatprep.subr.mxu0 %v132_v23  ;;  %862 = vmatprep.subr.mxu1 %v134_v24  ;;  %v45_v23 = vld [vmem:[%s2843_s1 + $0x30] sm:$0xff]  ;;  %v1828_v24 = vld [vmem:[%s2844_s0 + $0x80] sm:$0xff] }
  0x35   :  { %648 = vmatpush1.msra.mxu0 %v131_v25  ;;  %863 = vmatpush1.msra.mxu1 %v133_v26  ;;  %v1837_v25 = vld [vmem:[%s2844_s0 + $0x88] sm:$0xff]  ;;  %v1846_v26 = vld [vmem:[%s2844_s0 + $0x90] sm:$0xff] }
  0x36   :  { %304 = vmatmul.mubr.f32.gmra.mxu0 %v1597_v27  ;;  %519 = vmatmul.mubr.f32.gmra.mxu1 %v1597_v27 }
  0x37   :  { %309 = vmatprep.mubr.f32.mxu0 %v1274_v3  ;;  %524 = vmatprep.mubr.f32.mxu1 %v1274_v3 }
  0x38   :  { %649 = vmatprep.subr.mxu0 %v124_v28  ;;  %864 = vmatprep.subr.mxu1 %v126_v29  ;;  %v1855_v28 = vld [vmem:[%s2844_s0 + $0x98] sm:$0xff]  ;;  %v1864_v29 = vld [vmem:[%s2844_s0 + $0xa0] sm:$0xff] }
  0x39   :  { %650 = vmatpush1.msra.mxu0 %v123_v30  ;;  %865 = vmatpush1.msra.mxu1 %v125_v31  ;;  %v1873_v30 = vld [vmem:[%s2844_s0 + $0xa8] sm:$0xff]  ;;  %v1882_v31 = vld [vmem:[%s2844_s0 + $0xb0] sm:$0xff] }
  0x3a   :  { %310 = vmatmul.mubr.f32.gmra.mxu0 %v1618_v32  ;;  %525 = vmatmul.mubr.f32.gmra.mxu1 %v1618_v32 }
  0x3b   :  { %315 = vmatprep.mubr.f32.mxu0 %v1274_v3  ;;  %530 = vmatprep.mubr.f32.mxu1 %v1274_v3 }
  0x3c   :  { %651 = vmatprep.subr.mxu0 %v116_v33  ;;  %866 = vmatprep.subr.mxu1 %v118_v34  ;;  %v1891_v33 = vld [vmem:[%s2844_s0 + $0xb8] sm:$0xff]  ;;  %v1900_v34 = vld [vmem:[%s2844_s0 + $0xc0] sm:$0xff] }
  0x3d   :  { %652 = vmatpush1.msra.mxu0 %v115_v35  ;;  %867 = vmatpush1.msra.mxu1 %v117_v36 }
  0x3e   :  { %316 = vmatmul.mubr.f32.gmra.mxu0 %v1639_v37  ;;  %531 = vmatmul.mubr.f32.gmra.mxu1 %v1639_v37 }
  0x3f   :  { %321 = vmatprep.mubr.f32.mxu0 %v1274_v3  ;;  %536 = vmatprep.mubr.f32.mxu1 %v1274_v3 }
  0x40   :  { %653 = vmatprep.subr.mxu0 %v108_v38  ;;  %868 = vmatprep.subr.mxu1 %v110_v39 }
  0x41   :  { %654 = vmatpush1.msra.mxu0 %v107_v40  ;;  %869 = vmatpush1.msra.mxu1 %v109_v41 }
  0x42   :  { %322 = vmatmul.mubr.f32.gmra.mxu0 %v1660_v42  ;;  %537 = vmatmul.mubr.f32.gmra.mxu1 %v1660_v42 }
  0x43   :  { %327 = vmatprep.mubr.f32.mxu0 %v1274_v3  ;;  %542 = vmatprep.mubr.f32.mxu1 %v1274_v3 }
  0x44   :  { %655 = vmatprep.subr.mxu0 %v100_v43  ;;  %870 = vmatprep.subr.mxu1 %v102_v44 }
  0x45   :  { %656 = vmatpush1.msra.mxu0 %v99_v45  ;;  %871 = vmatpush1.msra.mxu1 %v101_v46 }
  0x46   :  { %328 = vmatmul.mubr.f32.gmra.mxu0 %v1681_v47  ;;  %543 = vmatmul.mubr.f32.gmra.mxu1 %v1681_v47 }
  0x47   :  { %333 = vmatprep.mubr.f32.mxu0 %v1274_v3  ;;  %548 = vmatprep.mubr.f32.mxu1 %v1274_v3 }
  0x48   :  { %657 = vmatprep.subr.mxu0 %v92_v48  ;;  %872 = vmatprep.subr.mxu1 %v94_v49 }
  0x49   :  { %658 = vmatpush1.msra.mxu0 %v91_v50  ;;  %873 = vmatpush1.msra.mxu1 %v93_v51 }
  0x4a   :  { %334 = vmatmul.mubr.f32.gmra.mxu0 %v1702_v52  ;;  %549 = vmatmul.mubr.f32.gmra.mxu1 %v1702_v52 }
  0x4b   :  { %339 = vmatprep.mubr.f32.mxu0 %v1274_v3  ;;  %554 = vmatprep.mubr.f32.mxu1 %v1274_v3 }
  0x4c   :  { %659 = vmatprep.subr.mxu0 %v84_v53  ;;  %874 = vmatprep.subr.mxu1 %v86_v54 }
  0x4d   :  { %660 = vmatpush1.msra.mxu0 %v83_v55  ;;  %875 = vmatpush1.msra.mxu1 %v85_v56 }
  0x4e   :  { %340 = vmatmul.mubr.f32.gmra.mxu0 %v1723_v57  ;;  %555 = vmatmul.mubr.f32.gmra.mxu1 %v1723_v57 }
  0x4f   :  { %345 = vmatprep.mubr.f32.mxu0 %v1274_v3  ;;  %560 = vmatprep.mubr.f32.mxu1 %v1274_v3 }
  0x50   :  { %661 = vmatprep.subr.mxu0 %v76_v58  ;;  %876 = vmatprep.subr.mxu1 %v78_v59 }
  0x51   :  { %662 = vmatpush1.msra.mxu0 %v75_v60  ;;  %877 = vmatpush1.msra.mxu1 %v77_v61 }
  0x52   :  { %346 = vmatmul.mubr.f32.gmra.mxu0 %v1744_v62  ;;  %561 = vmatmul.mubr.f32.gmra.mxu1 %v1744_v62 }
  0x53   :  { %351 = vmatprep.mubr.f32.mxu0 %v1274_v3  ;;  %566 = vmatprep.mubr.f32.mxu1 %v1274_v3 }
  0x54   :  { %663 = vmatprep.subr.mxu0 %v68_v63  ;;  %878 = vmatprep.subr.mxu1 %v70_v0 }
  0x55   :  { %664 = vmatpush1.msra.mxu0 %v67_v2  ;;  %879 = vmatpush1.msra.mxu1 %v69_v4 }
  0x56   :  { %352 = vmatmul.mubr.f32.gmra.mxu0 %v1765_v5  ;;  %567 = vmatmul.mubr.f32.gmra.mxu1 %v1765_v5 }
  0x57   :  { %357 = vmatprep.mubr.f32.mxu0 %v1274_v3  ;;  %572 = vmatprep.mubr.f32.mxu1 %v1274_v3 }
  0x58   :  { %665 = vmatprep.subr.mxu0 %v60_v6  ;;  %880 = vmatprep.subr.mxu1 %v62_v8 }
  0x59   :  { %666 = vmatpush1.msra.mxu0 %v59_v9  ;;  %881 = vmatpush1.msra.mxu1 %v61_v10 }
  0x5a   :  { %358 = vmatmul.mubr.f32.gmra.mxu0 %v1786_v11  ;;  %573 = vmatmul.mubr.f32.gmra.mxu1 %v1786_v11 }
  0x5b   :  { %363 = vmatprep.mubr.f32.mxu0 %v1274_v3  ;;  %578 = vmatprep.mubr.f32.mxu1 %v1274_v3 }
  0x5c   :  { %667 = vmatprep.subr.mxu0 %v52_v13  ;;  %882 = vmatprep.subr.mxu1 %v54_v14 }
  0x5d   :  { %668 = vmatpush1.msra.mxu0 %v51_v15  ;;  %883 = vmatpush1.msra.mxu1 %v53_v16 }
  0x5e   :  { %364 = vmatmul.mubr.f32.gmra.mxu0 %v1807_v18  ;;  %579 = vmatmul.mubr.f32.gmra.mxu1 %v1807_v18 }
  0x5f   :  { %369 = vmatprep.mubr.f32.mxu0 %v1274_v3  ;;  %584 = vmatprep.mubr.f32.mxu1 %v1274_v3 }
  0x60   :  { %669 = vmatprep.subr.mxu0 %v44_v19  ;;  %884 = vmatprep.subr.mxu1 %v46_v20 }
  0x61   :  { %670 = vmatpush1.msra.mxu0 %v43_v21  ;;  %885 = vmatpush1.msra.mxu1 %v45_v23 }
  0x62   :  { %370 = vmatmul.mubr.f32.gmra.mxu0 %v1828_v24  ;;  %585 = vmatmul.mubr.f32.gmra.mxu1 %v1828_v24 }
  0x63   :  { %375 = vmatprep.mubr.f32.mxu0 %v1274_v3  ;;  %590 = vmatprep.mubr.f32.mxu1 %v1274_v3 }
  0x66   :  { %376 = vmatmul.mubr.f32.gmra.mxu0 %v1837_v25  ;;  %591 = vmatmul.mubr.f32.gmra.mxu1 %v1837_v25 }
  0x67   :  { %381 = vmatprep.mubr.f32.mxu0 %v1274_v3  ;;  %596 = vmatprep.mubr.f32.mxu1 %v1274_v3 }
  0x6a   :  { %382 = vmatmul.mubr.f32.gmra.mxu0 %v1846_v26  ;;  %597 = vmatmul.mubr.f32.gmra.mxu1 %v1846_v26 }
  0x6b   :  { %387 = vmatprep.mubr.f32.mxu0 %v1274_v3  ;;  %602 = vmatprep.mubr.f32.mxu1 %v1274_v3 }
  0x6e   :  { %388 = vmatmul.mubr.f32.gmra.mxu0 %v1855_v28  ;;  %603 = vmatmul.mubr.f32.gmra.mxu1 %v1855_v28 }
  0x6f   :  { %393 = vmatprep.mubr.f32.mxu0 %v1274_v3  ;;  %608 = vmatprep.mubr.f32.mxu1 %v1274_v3 }
  0x72   :  { %394 = vmatmul.mubr.f32.gmra.mxu0 %v1864_v29  ;;  %609 = vmatmul.mubr.f32.gmra.mxu1 %v1864_v29 }
  0x73   :  { %399 = vmatprep.mubr.f32.mxu0 %v1274_v3  ;;  %614 = vmatprep.mubr.f32.mxu1 %v1274_v3 }
  0x76   :  { %400 = vmatmul.mubr.f32.gmra.mxu0 %v1873_v30  ;;  %615 = vmatmul.mubr.f32.gmra.mxu1 %v1873_v30 }
  0x77   :  { %405 = vmatprep.mubr.f32.mxu0 %v1274_v3  ;;  %620 = vmatprep.mubr.f32.mxu1 %v1274_v3 }
  0x7a   :  { %406 = vmatmul.mubr.f32.gmra.mxu0 %v1882_v31  ;;  %621 = vmatmul.mubr.f32.gmra.mxu1 %v1882_v31 }
  0x7b   :  { %411 = vmatprep.mubr.f32.mxu0 %v1274_v3  ;;  %626 = vmatprep.mubr.f32.mxu1 %v1274_v3 }
  0x7e   :  { %412 = vmatmul.mubr.f32.gmra.mxu0 %v1891_v33  ;;  %627 = vmatmul.mubr.f32.gmra.mxu1 %v1891_v33 }
  0x7f   :  { %417 = vmatprep.mubr.f32.mxu0 %v1274_v3  ;;  %632 = vmatprep.mubr.f32.mxu1 %v1274_v3 }
  0x82   :  { %418 = vmatmul.mubr.f32.gmra.mxu0 %v1900_v34  ;;  %633 = vmatmul.mubr.f32.gmra.mxu1 %v1900_v34 }
  0x83   :  { %703 = vmatprep.mubr.f32.mxu0 %v1274_v3  ;;  %918 = vmatprep.mubr.f32.mxu1 %v1274_v3 }
  0x86   :  { %704 = vmatmul.mubr.f32.vlgmr.msra.gmra.mxu0 %v1492_v1  ;;  %919 = vmatmul.mubr.f32.vlgmr.msra.gmra.mxu1 %v1492_v1  ;;  %v169_v1 = vlaneseq }
  0x87   :  { %709 = vmatprep.mubr.f32.mxu0 %v1274_v3  ;;  %924 = vmatprep.mubr.f32.mxu1 %v1274_v3 }
  0x8a   :  { %710 = vmatmul.mubr.f32.gmra.mxu0 %v1511_v7  ;;  %925 = vmatmul.mubr.f32.gmra.mxu1 %v1511_v7  ;;  %v1990_v7 = vshrl.u32 %v169_v1, 7 }
  0x8b   :  { %715 = vmatprep.mubr.f32.mxu0 %v1274_v3  ;;  %930 = vmatprep.mubr.f32.mxu1 %v1274_v3 }
  0x8e   :  { %716 = vmatmul.mubr.f32.gmra.mxu0 %v1534_v12  ;;  %931 = vmatmul.mubr.f32.gmra.mxu1 %v1534_v12  ;;  %v171_v12 = vsub.s32 0, %v1990_v7 }
  0x8f   :  { %721 = vmatprep.mubr.f32.mxu0 %v1274_v3  ;;  %936 = vmatprep.mubr.f32.mxu1 %v1274_v3 }
  0x92   :  { %722 = vmatmul.mubr.f32.gmra.mxu0 %v1555_v17  ;;  %937 = vmatmul.mubr.f32.gmra.mxu1 %v1555_v17  ;;  %v179_v17 = vsub.s32 2, %v1990_v7 }
  0x93   :  { %727 = vmatprep.mubr.f32.mxu0 %v1274_v3  ;;  %942 = vmatprep.mubr.f32.mxu1 %v1274_v3 }
  0x96   :  { %728 = vmatmul.mubr.f32.gmra.mxu0 %v1576_v22  ;;  %943 = vmatmul.mubr.f32.gmra.mxu1 %v1576_v22  ;;  %v2001_v22 = vld [vmem:[%s2845_s2] sm:$0xff] }
  0x97   :  { %733 = vmatprep.mubr.f32.mxu0 %v1274_v3  ;;  %948 = vmatprep.mubr.f32.mxu1 %v1274_v3  ;;  %v2010_v35 = vrot.slane %v2001_v22, %v171_v12  ;;  %v2013_v36 = vrot.slane %v2001_v22, %v179_v17 }
  0x9a   :  { %734 = vmatmul.mubr.f32.gmra.mxu0 %v1597_v27  ;;  %949 = vmatmul.mubr.f32.gmra.mxu1 %v1597_v27  ;;  %v175_v27 = vsub.s32 1, %v1990_v7 }
  0x9b   :  { %739 = vmatprep.mubr.f32.mxu0 %v1274_v3  ;;  %954 = vmatprep.mubr.f32.mxu1 %v1274_v3 }
  0x9e   :  { %740 = vmatmul.mubr.f32.gmra.mxu0 %v1618_v32  ;;  %955 = vmatmul.mubr.f32.gmra.mxu1 %v1618_v32  ;;  %v183_v32 = vsub.s32 3, %v1990_v7 }
  0x9f   :  { %745 = vmatprep.mubr.f32.mxu0 %v1274_v3  ;;  %960 = vmatprep.mubr.f32.mxu1 %v1274_v3 }
  0xa0   :  { %v2019_v38 = vrot.slane %v2001_v22, %v183_v32 }
  0xa2   :  { %746 = vmatmul.mubr.f32.gmra.mxu0 %v1639_v37  ;;  %961 = vmatmul.mubr.f32.gmra.mxu1 %v1639_v37  ;;  %v2016_v37 = vrot.slane %v2001_v22, %v175_v27 }
  0xa3   :  { %751 = vmatprep.mubr.f32.mxu0 %v1274_v3  ;;  %966 = vmatprep.mubr.f32.mxu1 %v1274_v3 }
  0xa6   :  { %752 = vmatmul.mubr.f32.gmra.mxu0 %v1660_v42  ;;  %967 = vmatmul.mubr.f32.gmra.mxu1 %v1660_v42 }
  0xa7   :  { %757 = vmatprep.mubr.f32.mxu0 %v1274_v3  ;;  %972 = vmatprep.mubr.f32.mxu1 %v1274_v3 }
  0xaa   :  { %758 = vmatmul.mubr.f32.gmra.mxu0 %v1681_v47  ;;  %973 = vmatmul.mubr.f32.gmra.mxu1 %v1681_v47 }
  0xab   :  { %763 = vmatprep.mubr.f32.mxu0 %v1274_v3  ;;  %978 = vmatprep.mubr.f32.mxu1 %v1274_v3 }
  0xae   :  { %764 = vmatmul.mubr.f32.gmra.mxu0 %v1702_v52  ;;  %979 = vmatmul.mubr.f32.gmra.mxu1 %v1702_v52 }
  0xaf   :  { %769 = vmatprep.mubr.f32.mxu0 %v1274_v3  ;;  %984 = vmatprep.mubr.f32.mxu1 %v1274_v3 }
  0xb2   :  { %770 = vmatmul.mubr.f32.gmra.mxu0 %v1723_v57  ;;  %985 = vmatmul.mubr.f32.gmra.mxu1 %v1723_v57 }
  0xb3   :  { %775 = vmatprep.mubr.f32.mxu0 %v1274_v3  ;;  %990 = vmatprep.mubr.f32.mxu1 %v1274_v3 }
  0xb6   :  { %776 = vmatmul.mubr.f32.gmra.mxu0 %v1744_v62  ;;  %991 = vmatmul.mubr.f32.gmra.mxu1 %v1744_v62 }
  0xb7   :  { %781 = vmatprep.mubr.f32.mxu0 %v1274_v3  ;;  %996 = vmatprep.mubr.f32.mxu1 %v1274_v3 }
  0xba   :  { %782 = vmatmul.mubr.f32.gmra.mxu0 %v1765_v5  ;;  %997 = vmatmul.mubr.f32.gmra.mxu1 %v1765_v5 }
  0xbb   :  { %787 = vmatprep.mubr.f32.mxu0 %v1274_v3  ;;  %1002 = vmatprep.mubr.f32.mxu1 %v1274_v3 }
  0xbe   :  { %788 = vmatmul.mubr.f32.gmra.mxu0 %v1786_v11  ;;  %1003 = vmatmul.mubr.f32.gmra.mxu1 %v1786_v11 }
  0xbf   :  { %793 = vmatprep.mubr.f32.mxu0 %v1274_v3  ;;  %1008 = vmatprep.mubr.f32.mxu1 %v1274_v3 }
  0xc2   :  { %794 = vmatmul.mubr.f32.gmra.mxu0 %v1807_v18  ;;  %1009 = vmatmul.mubr.f32.gmra.mxu1 %v1807_v18 }
  0xc3   :  { %799 = vmatprep.mubr.f32.mxu0 %v1274_v3  ;;  %1014 = vmatprep.mubr.f32.mxu1 %v1274_v3 }
  0xc6   :  { %800 = vmatmul.mubr.f32.gmra.mxu0 %v1828_v24  ;;  %1015 = vmatmul.mubr.f32.gmra.mxu1 %v1828_v24 }
  0xc7   :  { %805 = vmatprep.mubr.f32.mxu0 %v1274_v3  ;;  %1020 = vmatprep.mubr.f32.mxu1 %v1274_v3 }
  0xca   :  { %806 = vmatmul.mubr.f32.gmra.mxu0 %v1837_v25  ;;  %1021 = vmatmul.mubr.f32.gmra.mxu1 %v1837_v25 }
  0xcb   :  { %811 = vmatprep.mubr.f32.mxu0 %v1274_v3  ;;  %1026 = vmatprep.mubr.f32.mxu1 %v1274_v3 }
  0xce   :  { %812 = vmatmul.mubr.f32.gmra.mxu0 %v1846_v26  ;;  %1027 = vmatmul.mubr.f32.gmra.mxu1 %v1846_v26 }
  0xcf   :  { %817 = vmatprep.mubr.f32.mxu0 %v1274_v3  ;;  %1032 = vmatprep.mubr.f32.mxu1 %v1274_v3 }
  0xd2   :  { %818 = vmatmul.mubr.f32.gmra.mxu0 %v1855_v28  ;;  %1033 = vmatmul.mubr.f32.gmra.mxu1 %v1855_v28 }
  0xd3   :  { %823 = vmatprep.mubr.f32.mxu0 %v1274_v3  ;;  %1038 = vmatprep.mubr.f32.mxu1 %v1274_v3 }
  0xd6   :  { %824 = vmatmul.mubr.f32.gmra.mxu0 %v1864_v29  ;;  %1039 = vmatmul.mubr.f32.gmra.mxu1 %v1864_v29 }
  0xd7   :  { %829 = vmatprep.mubr.f32.mxu0 %v1274_v3  ;;  %1044 = vmatprep.mubr.f32.mxu1 %v1274_v3 }
  0xda   :  { %830 = vmatmul.mubr.f32.gmra.mxu0 %v1873_v30  ;;  %1045 = vmatmul.mubr.f32.gmra.mxu1 %v1873_v30 }
  0xdb   :  { %835 = vmatprep.mubr.f32.mxu0 %v1274_v3  ;;  %1050 = vmatprep.mubr.f32.mxu1 %v1274_v3 }
  0xde   :  { %836 = vmatmul.mubr.f32.gmra.mxu0 %v1882_v31  ;;  %1051 = vmatmul.mubr.f32.gmra.mxu1 %v1882_v31 }
  0xdf   :  { %841 = vmatprep.mubr.f32.mxu0 %v1274_v3  ;;  %1056 = vmatprep.mubr.f32.mxu1 %v1274_v3 }
  0xe2   :  { %v275_v39 = vpop.f32.mrf.mxu0  ;;  %v490_v40 = vpop.f32.mrf.mxu1  ;;  %842 = vmatmul.mubr.f32.gmra.mxu0 %v1891_v33  ;;  %1057 = vmatmul.mubr.f32.gmra.mxu1 %v1891_v33 }
  0xe3   :  { %v276_v41 = vadd.f32 %v275_v39, %v2010_v35  ;;  %v491_v42 = vadd.f32 %v490_v40, %v2013_v36  ;;  %847 = vmatprep.mubr.f32.mxu0 %v1274_v3  ;;  %1062 = vmatprep.mubr.f32.mxu1 %v1274_v3 }
  0xe4   :  { %v277_v43 = vpop.f32.mrf.mxu0  ;;  %v492_v44 = vpop.f32.mrf.mxu1 }
  0xe5   :  { %1069 = vst [vmem:[%s2846_s3] sm:$0xff] %v276_v41  ;;  %1071 = vst [vmem:[%s2846_s3 + $0x10] sm:$0xff] %v491_v42  ;;  %v278_v45 = vadd.f32 %v277_v43, %v2016_v37  ;;  %v493_v46 = vadd.f32 %v492_v44, %v2019_v38 }
  0xe6   :  { %v281_v47 = vpop.f32.mrf.mxu0  ;;  %v496_v48 = vpop.f32.mrf.mxu1  ;;  %848 = vmatmul.mubr.f32.gmra.mxu0 %v1900_v34  ;;  %1063 = vmatmul.mubr.f32.gmra.mxu1 %v1900_v34 }
  0xe7   :  { %1070 = vst [vmem:[%s2846_s3 + $0x8] sm:$0xff] %v278_v45  ;;  %1072 = vst [vmem:[%s2846_s3 + $0x18] sm:$0xff] %v493_v46  ;;  %v282_v3 = vadd.f32 %v281_v47, %v2010_v35  ;;  %v497_v49 = vadd.f32 %v496_v48, %v2013_v36 }
  0xe8   :  { %v283_v50 = vpop.f32.mrf.mxu0  ;;  %v498_v51 = vpop.f32.mrf.mxu1 }
  0xe9   :  { %1077 = vst [vmem:[%s2846_s3 + $0x40] sm:$0xff] %v282_v3  ;;  %1079 = vst [vmem:[%s2846_s3 + $0x50] sm:$0xff] %v497_v49  ;;  %v284_v52 = vadd.f32 %v283_v50, %v2016_v37  ;;  %v499_v53 = vadd.f32 %v498_v51, %v2019_v38 }
  0xea   :  { %v287_v54 = vpop.f32.mrf.mxu0  ;;  %v502_v55 = vpop.f32.mrf.mxu1 }
  0xeb   :  { %1078 = vst [vmem:[%s2846_s3 + $0x48] sm:$0xff] %v284_v52  ;;  %1080 = vst [vmem:[%s2846_s3 + $0x58] sm:$0xff] %v499_v53  ;;  %v288_v56 = vadd.f32 %v287_v54, %v2010_v35  ;;  %v503_v57 = vadd.f32 %v502_v55, %v2013_v36 }
  0xec   :  { %v289_v58 = vpop.f32.mrf.mxu0  ;;  %v504_v59 = vpop.f32.mrf.mxu1 }
  0xed   :  { %1085 = vst [vmem:[%s2846_s3 + $0x80] sm:$0xff] %v288_v56  ;;  %1087 = vst [vmem:[%s2846_s3 + $0x90] sm:$0xff] %v503_v57  ;;  %v290_v60 = vadd.f32 %v289_v58, %v2016_v37  ;;  %v505_v61 = vadd.f32 %v504_v59, %v2019_v38 }
  0xee   :  { %v293_v62 = vpop.f32.mrf.mxu0  ;;  %v508_v63 = vpop.f32.mrf.mxu1 }
  0xef   :  { %1086 = vst [vmem:[%s2846_s3 + $0x88] sm:$0xff] %v290_v60  ;;  %1088 = vst [vmem:[%s2846_s3 + $0x98] sm:$0xff] %v505_v61  ;;  %v294_v0 = vadd.f32 %v293_v62, %v2010_v35  ;;  %v509_v2 = vadd.f32 %v508_v63, %v2013_v36 }
  0xf0   :  { %v295_v4 = vpop.f32.mrf.mxu0  ;;  %v510_v5 = vpop.f32.mrf.mxu1 }
  0xf1   :  { %1093 = vst [vmem:[%s2846_s3 + $0xc0] sm:$0xff] %v294_v0  ;;  %1095 = vst [vmem:[%s2846_s3 + $0xd0] sm:$0xff] %v509_v2  ;;  %v296_v6 = vadd.f32 %v295_v4, %v2016_v37  ;;  %v511_v8 = vadd.f32 %v510_v5, %v2019_v38 }
  0xf2   :  { %v299_v9 = vpop.f32.mrf.mxu0  ;;  %v514_v10 = vpop.f32.mrf.mxu1 }
  0xf3   :  { %1094 = vst [vmem:[%s2846_s3 + $0xc8] sm:$0xff] %v296_v6  ;;  %1096 = vst [vmem:[%s2846_s3 + $0xd8] sm:$0xff] %v511_v8  ;;  %v300_v11 = vadd.f32 %v299_v9, %v2010_v35  ;;  %v515_v13 = vadd.f32 %v514_v10, %v2013_v36 }
  0xf4   :  { %v301_v14 = vpop.f32.mrf.mxu0  ;;  %v516_v15 = vpop.f32.mrf.mxu1 }
  0xf5   :  { %1101 = vst [vmem:[%s2846_s3 + $0x100] sm:$0xff] %v300_v11  ;;  %1103 = vst [vmem:[%s2846_s3 + $0x110] sm:$0xff] %v515_v13  ;;  %v302_v16 = vadd.f32 %v301_v14, %v2016_v37  ;;  %v517_v18 = vadd.f32 %v516_v15, %v2019_v38 }
  0xf6   :  { %v305_v19 = vpop.f32.mrf.mxu0  ;;  %v520_v20 = vpop.f32.mrf.mxu1 }
  0xf7   :  { %1102 = vst [vmem:[%s2846_s3 + $0x108] sm:$0xff] %v302_v16  ;;  %1104 = vst [vmem:[%s2846_s3 + $0x118] sm:$0xff] %v517_v18  ;;  %v306_v21 = vadd.f32 %v305_v19, %v2010_v35  ;;  %v521_v23 = vadd.f32 %v520_v20, %v2013_v36 }
  0xf8   :  { %v307_v24 = vpop.f32.mrf.mxu0  ;;  %v522_v25 = vpop.f32.mrf.mxu1 }
  0xf9   :  { %1109 = vst [vmem:[%s2846_s3 + $0x140] sm:$0xff] %v306_v21  ;;  %1111 = vst [vmem:[%s2846_s3 + $0x150] sm:$0xff] %v521_v23  ;;  %v308_v26 = vadd.f32 %v307_v24, %v2016_v37  ;;  %v523_v28 = vadd.f32 %v522_v25, %v2019_v38 }
  0xfa   :  { %v311_v29 = vpop.f32.mrf.mxu0  ;;  %v526_v30 = vpop.f32.mrf.mxu1 }
  0xfb   :  { %1110 = vst [vmem:[%s2846_s3 + $0x148] sm:$0xff] %v308_v26  ;;  %1112 = vst [vmem:[%s2846_s3 + $0x158] sm:$0xff] %v523_v28  ;;  %v312_v31 = vadd.f32 %v311_v29, %v2010_v35  ;;  %v527_v33 = vadd.f32 %v526_v30, %v2013_v36 }
  0xfc   :  { %v313_v34 = vpop.f32.mrf.mxu0  ;;  %v528_v1 = vpop.f32.mrf.mxu1 }
  0xfd   :  { %1117 = vst [vmem:[%s2846_s3 + $0x180] sm:$0xff] %v312_v31  ;;  %1119 = vst [vmem:[%s2846_s3 + $0x190] sm:$0xff] %v527_v33  ;;  %v314_v12 = vadd.f32 %v313_v34, %v2016_v37  ;;  %v529_v17 = vadd.f32 %v528_v1, %v2019_v38 }
  0xfe   :  { %v317_v27 = vpop.f32.mrf.mxu0  ;;  %v532_v32 = vpop.f32.mrf.mxu1 }
  0xff   :  { %1118 = vst [vmem:[%s2846_s3 + $0x188] sm:$0xff] %v314_v12  ;;  %1120 = vst [vmem:[%s2846_s3 + $0x198] sm:$0xff] %v529_v17  ;;  %v318_v39 = vadd.f32 %v317_v27, %v2010_v35  ;;  %v533_v40 = vadd.f32 %v532_v32, %v2013_v36 }
 0x100   :  { %v319_v41 = vpop.f32.mrf.mxu0  ;;  %v534_v42 = vpop.f32.mrf.mxu1 }
 0x101   :  { %1125 = vst [vmem:[%s2846_s3 + $0x1c0] sm:$0xff] %v318_v39  ;;  %1127 = vst [vmem:[%s2846_s3 + $0x1d0] sm:$0xff] %v533_v40  ;;  %v320_v43 = vadd.f32 %v319_v41, %v2016_v37  ;;  %v535_v44 = vadd.f32 %v534_v42, %v2019_v38 }
 0x102   :  { %v323_v45 = vpop.f32.mrf.mxu0  ;;  %v538_v46 = vpop.f32.mrf.mxu1 }
 0x103   :  { %1126 = vst [vmem:[%s2846_s3 + $0x1c8] sm:$0xff] %v320_v43  ;;  %1128 = vst [vmem:[%s2846_s3 + $0x1d8] sm:$0xff] %v535_v44  ;;  %v324_v47 = vadd.f32 %v323_v45, %v2010_v35  ;;  %v539_v48 = vadd.f32 %v538_v46, %v2013_v36 }
 0x104   :  { %v325_v3 = vpop.f32.mrf.mxu0  ;;  %v540_v49 = vpop.f32.mrf.mxu1 }
 0x105   :  { %1133 = vst [vmem:[%s2846_s3 + $0x200] sm:$0xff] %v324_v47  ;;  %1135 = vst [vmem:[%s2846_s3 + $0x210] sm:$0xff] %v539_v48  ;;  %v326_v50 = vadd.f32 %v325_v3, %v2016_v37  ;;  %v541_v51 = vadd.f32 %v540_v49, %v2019_v38 }
 0x106   :  { %v329_v52 = vpop.f32.mrf.mxu0  ;;  %v544_v53 = vpop.f32.mrf.mxu1 }
 0x107   :  { %1134 = vst [vmem:[%s2846_s3 + $0x208] sm:$0xff] %v326_v50  ;;  %1136 = vst [vmem:[%s2846_s3 + $0x218] sm:$0xff] %v541_v51  ;;  %v330_v54 = vadd.f32 %v329_v52, %v2010_v35  ;;  %v545_v55 = vadd.f32 %v544_v53, %v2013_v36 }
 0x108   :  { %v331_v56 = vpop.f32.mrf.mxu0  ;;  %v546_v57 = vpop.f32.mrf.mxu1 }
 0x109   :  { %1141 = vst [vmem:[%s2846_s3 + $0x240] sm:$0xff] %v330_v54  ;;  %1143 = vst [vmem:[%s2846_s3 + $0x250] sm:$0xff] %v545_v55  ;;  %v332_v58 = vadd.f32 %v331_v56, %v2016_v37  ;;  %v547_v59 = vadd.f32 %v546_v57, %v2019_v38 }
 0x10a   :  { %v335_v60 = vpop.f32.mrf.mxu0  ;;  %v550_v61 = vpop.f32.mrf.mxu1 }
 0x10b   :  { %1142 = vst [vmem:[%s2846_s3 + $0x248] sm:$0xff] %v332_v58  ;;  %1144 = vst [vmem:[%s2846_s3 + $0x258] sm:$0xff] %v547_v59  ;;  %v336_v62 = vadd.f32 %v335_v60, %v2010_v35  ;;  %v551_v63 = vadd.f32 %v550_v61, %v2013_v36 }
 0x10c   :  { %v337_v0 = vpop.f32.mrf.mxu0  ;;  %v552_v2 = vpop.f32.mrf.mxu1 }
 0x10d   :  { %1149 = vst [vmem:[%s2846_s3 + $0x280] sm:$0xff] %v336_v62  ;;  %1151 = vst [vmem:[%s2846_s3 + $0x290] sm:$0xff] %v551_v63  ;;  %v338_v4 = vadd.f32 %v337_v0, %v2016_v37  ;;  %v553_v5 = vadd.f32 %v552_v2, %v2019_v38 }
 0x10e   :  { %v341_v6 = vpop.f32.mrf.mxu0  ;;  %v556_v8 = vpop.f32.mrf.mxu1 }
 0x10f   :  { %1150 = vst [vmem:[%s2846_s3 + $0x288] sm:$0xff] %v338_v4  ;;  %1152 = vst [vmem:[%s2846_s3 + $0x298] sm:$0xff] %v553_v5  ;;  %v342_v9 = vadd.f32 %v341_v6, %v2010_v35  ;;  %v557_v10 = vadd.f32 %v556_v8, %v2013_v36 }
 0x110   :  { %v343_v11 = vpop.f32.mrf.mxu0  ;;  %v558_v13 = vpop.f32.mrf.mxu1 }
 0x111   :  { %1157 = vst [vmem:[%s2846_s3 + $0x2c0] sm:$0xff] %v342_v9  ;;  %1159 = vst [vmem:[%s2846_s3 + $0x2d0] sm:$0xff] %v557_v10  ;;  %v344_v14 = vadd.f32 %v343_v11, %v2016_v37  ;;  %v559_v15 = vadd.f32 %v558_v13, %v2019_v38 }
 0x112   :  { %v347_v16 = vpop.f32.mrf.mxu0  ;;  %v562_v18 = vpop.f32.mrf.mxu1 }
 0x113   :  { %1158 = vst [vmem:[%s2846_s3 + $0x2c8] sm:$0xff] %v344_v14  ;;  %1160 = vst [vmem:[%s2846_s3 + $0x2d8] sm:$0xff] %v559_v15  ;;  %v348_v19 = vadd.f32 %v347_v16, %v2010_v35  ;;  %v563_v20 = vadd.f32 %v562_v18, %v2013_v36 }
 0x114   :  { %v349_v21 = vpop.f32.mrf.mxu0  ;;  %v564_v23 = vpop.f32.mrf.mxu1 }
 0x115   :  { %1165 = vst [vmem:[%s2846_s3 + $0x300] sm:$0xff] %v348_v19  ;;  %1167 = vst [vmem:[%s2846_s3 + $0x310] sm:$0xff] %v563_v20  ;;  %v350_v24 = vadd.f32 %v349_v21, %v2016_v37  ;;  %v565_v25 = vadd.f32 %v564_v23, %v2019_v38 }
 0x116   :  { %v353_v26 = vpop.f32.mrf.mxu0  ;;  %v568_v28 = vpop.f32.mrf.mxu1 }
 0x117   :  { %1166 = vst [vmem:[%s2846_s3 + $0x308] sm:$0xff] %v350_v24  ;;  %1168 = vst [vmem:[%s2846_s3 + $0x318] sm:$0xff] %v565_v25  ;;  %v354_v29 = vadd.f32 %v353_v26, %v2010_v35  ;;  %v569_v30 = vadd.f32 %v568_v28, %v2013_v36 }
 0x118   :  { %v355_v31 = vpop.f32.mrf.mxu0  ;;  %v570_v33 = vpop.f32.mrf.mxu1 }
 0x119   :  { %1173 = vst [vmem:[%s2846_s3 + $0x340] sm:$0xff] %v354_v29  ;;  %1175 = vst [vmem:[%s2846_s3 + $0x350] sm:$0xff] %v569_v30  ;;  %v356_v34 = vadd.f32 %v355_v31, %v2016_v37  ;;  %v571_v1 = vadd.f32 %v570_v33, %v2019_v38 }
 0x11a   :  { %v359_v12 = vpop.f32.mrf.mxu0  ;;  %v574_v17 = vpop.f32.mrf.mxu1 }
 0x11b   :  { %1174 = vst [vmem:[%s2846_s3 + $0x348] sm:$0xff] %v356_v34  ;;  %1176 = vst [vmem:[%s2846_s3 + $0x358] sm:$0xff] %v571_v1  ;;  %v360_v27 = vadd.f32 %v359_v12, %v2010_v35  ;;  %v575_v32 = vadd.f32 %v574_v17, %v2013_v36 }
 0x11c   :  { %v361_v39 = vpop.f32.mrf.mxu0  ;;  %v576_v40 = vpop.f32.mrf.mxu1 }
 0x11d   :  { %1181 = vst [vmem:[%s2846_s3 + $0x380] sm:$0xff] %v360_v27  ;;  %1183 = vst [vmem:[%s2846_s3 + $0x390] sm:$0xff] %v575_v32  ;;  %v362_v41 = vadd.f32 %v361_v39, %v2016_v37  ;;  %v577_v42 = vadd.f32 %v576_v40, %v2019_v38 }
 0x11e   :  { %v365_v43 = vpop.f32.mrf.mxu0  ;;  %v580_v44 = vpop.f32.mrf.mxu1 }
 0x11f   :  { %1182 = vst [vmem:[%s2846_s3 + $0x388] sm:$0xff] %v362_v41  ;;  %1184 = vst [vmem:[%s2846_s3 + $0x398] sm:$0xff] %v577_v42  ;;  %v366_v45 = vadd.f32 %v365_v43, %v2010_v35  ;;  %v581_v46 = vadd.f32 %v580_v44, %v2013_v36 }
 0x120   :  { %v367_v47 = vpop.f32.mrf.mxu0  ;;  %v582_v48 = vpop.f32.mrf.mxu1 }
 0x121   :  { %1189 = vst [vmem:[%s2846_s3 + $0x3c0] sm:$0xff] %v366_v45  ;;  %1191 = vst [vmem:[%s2846_s3 + $0x3d0] sm:$0xff] %v581_v46  ;;  %v368_v3 = vadd.f32 %v367_v47, %v2016_v37  ;;  %v583_v49 = vadd.f32 %v582_v48, %v2019_v38 }
 0x122   :  { %v371_v50 = vpop.f32.mrf.mxu0  ;;  %v586_v51 = vpop.f32.mrf.mxu1 }
 0x123   :  { %1190 = vst [vmem:[%s2846_s3 + $0x3c8] sm:$0xff] %v368_v3  ;;  %1192 = vst [vmem:[%s2846_s3 + $0x3d8] sm:$0xff] %v583_v49  ;;  %v372_v52 = vadd.f32 %v371_v50, %v2010_v35  ;;  %v587_v53 = vadd.f32 %v586_v51, %v2013_v36 }
 0x124   :  { %v373_v54 = vpop.f32.mrf.mxu0  ;;  %v588_v55 = vpop.f32.mrf.mxu1 }
 0x125   :  { %1197 = vst [vmem:[%s2846_s3 + $0x400] sm:$0xff] %v372_v52  ;;  %1199 = vst [vmem:[%s2846_s3 + $0x410] sm:$0xff] %v587_v53  ;;  %v374_v56 = vadd.f32 %v373_v54, %v2016_v37  ;;  %v589_v57 = vadd.f32 %v588_v55, %v2019_v38  ;;  %v187_v52 = vsub.s32 4, %v1990_v7  ;;  %v195_v53 = vsub.s32 6, %v1990_v7 }
 0x126   :  { %v377_v58 = vpop.f32.mrf.mxu0  ;;  %v592_v59 = vpop.f32.mrf.mxu1 }
 0x127   :  { %1198 = vst [vmem:[%s2846_s3 + $0x408] sm:$0xff] %v374_v56  ;;  %1200 = vst [vmem:[%s2846_s3 + $0x418] sm:$0xff] %v589_v57  ;;  %v378_v60 = vadd.f32 %v377_v58, %v2010_v35  ;;  %v593_v61 = vadd.f32 %v592_v59, %v2013_v36  ;;  %v191_v58 = vsub.s32 5, %v1990_v7  ;;  %v199_v59 = vsub.s32 7, %v1990_v7 }
 0x128   :  { %v379_v62 = vpop.f32.mrf.mxu0  ;;  %v594_v63 = vpop.f32.mrf.mxu1 }
 0x129   :  { %1205 = vst [vmem:[%s2846_s3 + $0x440] sm:$0xff] %v378_v60  ;;  %1207 = vst [vmem:[%s2846_s3 + $0x450] sm:$0xff] %v593_v61  ;;  %v380_v0 = vadd.f32 %v379_v62, %v2016_v37  ;;  %v595_v2 = vadd.f32 %v594_v63, %v2019_v38 }
 0x12a   :  { %v383_v4 = vpop.f32.mrf.mxu0  ;;  %v598_v5 = vpop.f32.mrf.mxu1 }
 0x12b   :  { %1206 = vst [vmem:[%s2846_s3 + $0x448] sm:$0xff] %v380_v0  ;;  %1208 = vst [vmem:[%s2846_s3 + $0x458] sm:$0xff] %v595_v2  ;;  %v384_v6 = vadd.f32 %v383_v4, %v2010_v35  ;;  %v599_v8 = vadd.f32 %v598_v5, %v2013_v36  ;;  %v2418_v0 = vrot.slane %v2001_v22, %v187_v52 }
 0x12c   :  { %v385_v9 = vpop.f32.mrf.mxu0  ;;  %v600_v10 = vpop.f32.mrf.mxu1  ;;  %v2421_v2 = vrot.slane %v2001_v22, %v195_v53  ;;  %v2432_v5 = vrot.slane %v2001_v22, %v191_v58 }
 0x12d   :  { %1213 = vst [vmem:[%s2846_s3 + $0x480] sm:$0xff] %v384_v6  ;;  %1215 = vst [vmem:[%s2846_s3 + $0x490] sm:$0xff] %v599_v8  ;;  %v386_v11 = vadd.f32 %v385_v9, %v2016_v37  ;;  %v601_v13 = vadd.f32 %v600_v10, %v2019_v38  ;;  %v2435_v6 = vrot.slane %v2001_v22, %v199_v59 }
 0x12e   :  { %v389_v14 = vpop.f32.mrf.mxu0  ;;  %v604_v15 = vpop.f32.mrf.mxu1 }
 0x12f   :  { %1214 = vst [vmem:[%s2846_s3 + $0x488] sm:$0xff] %v386_v11  ;;  %1216 = vst [vmem:[%s2846_s3 + $0x498] sm:$0xff] %v601_v13  ;;  %v390_v16 = vadd.f32 %v389_v14, %v2010_v35  ;;  %v605_v18 = vadd.f32 %v604_v15, %v2013_v36 }
 0x130   :  { %v391_v19 = vpop.f32.mrf.mxu0  ;;  %v606_v20 = vpop.f32.mrf.mxu1 }
 0x131   :  { %1221 = vst [vmem:[%s2846_s3 + $0x4c0] sm:$0xff] %v390_v16  ;;  %1223 = vst [vmem:[%s2846_s3 + $0x4d0] sm:$0xff] %v605_v18  ;;  %v392_v21 = vadd.f32 %v391_v19, %v2016_v37  ;;  %v607_v23 = vadd.f32 %v606_v20, %v2019_v38 }
 0x132   :  { %v395_v24 = vpop.f32.mrf.mxu0  ;;  %v610_v25 = vpop.f32.mrf.mxu1 }
 0x133   :  { %1222 = vst [vmem:[%s2846_s3 + $0x4c8] sm:$0xff] %v392_v21  ;;  %1224 = vst [vmem:[%s2846_s3 + $0x4d8] sm:$0xff] %v607_v23  ;;  %v396_v26 = vadd.f32 %v395_v24, %v2010_v35  ;;  %v611_v28 = vadd.f32 %v610_v25, %v2013_v36 }
 0x134   :  { %v397_v29 = vpop.f32.mrf.mxu0  ;;  %v612_v30 = vpop.f32.mrf.mxu1 }
 0x135   :  { %1229 = vst [vmem:[%s2846_s3 + $0x500] sm:$0xff] %v396_v26  ;;  %1231 = vst [vmem:[%s2846_s3 + $0x510] sm:$0xff] %v611_v28  ;;  %v398_v31 = vadd.f32 %v397_v29, %v2016_v37  ;;  %v613_v33 = vadd.f32 %v612_v30, %v2019_v38 }
 0x136   :  { %v401_v34 = vpop.f32.mrf.mxu0  ;;  %v616_v1 = vpop.f32.mrf.mxu1 }
 0x137   :  { %1230 = vst [vmem:[%s2846_s3 + $0x508] sm:$0xff] %v398_v31  ;;  %1232 = vst [vmem:[%s2846_s3 + $0x518] sm:$0xff] %v613_v33  ;;  %v402_v12 = vadd.f32 %v401_v34, %v2010_v35  ;;  %v617_v17 = vadd.f32 %v616_v1, %v2013_v36 }
 0x138   :  { %v403_v27 = vpop.f32.mrf.mxu0  ;;  %v618_v32 = vpop.f32.mrf.mxu1 }
 0x139   :  { %1237 = vst [vmem:[%s2846_s3 + $0x540] sm:$0xff] %v402_v12  ;;  %1239 = vst [vmem:[%s2846_s3 + $0x550] sm:$0xff] %v617_v17  ;;  %v404_v39 = vadd.f32 %v403_v27, %v2016_v37  ;;  %v619_v40 = vadd.f32 %v618_v32, %v2019_v38 }
 0x13a   :  { %v407_v41 = vpop.f32.mrf.mxu0  ;;  %v622_v42 = vpop.f32.mrf.mxu1 }
 0x13b   :  { %1238 = vst [vmem:[%s2846_s3 + $0x548] sm:$0xff] %v404_v39  ;;  %1240 = vst [vmem:[%s2846_s3 + $0x558] sm:$0xff] %v619_v40  ;;  %v408_v43 = vadd.f32 %v407_v41, %v2010_v35  ;;  %v623_v44 = vadd.f32 %v622_v42, %v2013_v36 }
 0x13c   :  { %v409_v45 = vpop.f32.mrf.mxu0  ;;  %v624_v46 = vpop.f32.mrf.mxu1 }
 0x13d   :  { %1245 = vst [vmem:[%s2846_s3 + $0x580] sm:$0xff] %v408_v43  ;;  %1247 = vst [vmem:[%s2846_s3 + $0x590] sm:$0xff] %v623_v44  ;;  %v410_v47 = vadd.f32 %v409_v45, %v2016_v37  ;;  %v625_v48 = vadd.f32 %v624_v46, %v2019_v38 }
 0x13e   :  { %v413_v3 = vpop.f32.mrf.mxu0  ;;  %v628_v49 = vpop.f32.mrf.mxu1 }
 0x13f   :  { %1246 = vst [vmem:[%s2846_s3 + $0x588] sm:$0xff] %v410_v47  ;;  %1248 = vst [vmem:[%s2846_s3 + $0x598] sm:$0xff] %v625_v48  ;;  %v414_v50 = vadd.f32 %v413_v3, %v2010_v35  ;;  %v629_v51 = vadd.f32 %v628_v49, %v2013_v36 }
 0x140   :  { %v415_v54 = vpop.f32.mrf.mxu0  ;;  %v630_v55 = vpop.f32.mrf.mxu1 }
 0x141   :  { %1253 = vst [vmem:[%s2846_s3 + $0x5c0] sm:$0xff] %v414_v50  ;;  %1255 = vst [vmem:[%s2846_s3 + $0x5d0] sm:$0xff] %v629_v51  ;;  %v416_v56 = vadd.f32 %v415_v54, %v2016_v37  ;;  %v631_v57 = vadd.f32 %v630_v55, %v2019_v38 }
 0x142   :  { %v419_v60 = vpop.f32.mrf.mxu0  ;;  %v634_v61 = vpop.f32.mrf.mxu1 }
 0x143   :  { %1254 = vst [vmem:[%s2846_s3 + $0x5c8] sm:$0xff] %v416_v56  ;;  %1256 = vst [vmem:[%s2846_s3 + $0x5d8] sm:$0xff] %v631_v57  ;;  %v420_v62 = vadd.f32 %v419_v60, %v2010_v35  ;;  %v635_v63 = vadd.f32 %v634_v61, %v2013_v36 }
 0x144   :  { %v421_v7 = vpop.f32.mrf.mxu0  ;;  %v636_v4 = vpop.f32.mrf.mxu1 }
 0x145   :  { %1261 = vst [vmem:[%s2846_s3 + $0x600] sm:$0xff] %v420_v62  ;;  %1263 = vst [vmem:[%s2846_s3 + $0x610] sm:$0xff] %v635_v63  ;;  %v422_v35 = vadd.f32 %v421_v7, %v2016_v37  ;;  %v637_v36 = vadd.f32 %v636_v4, %v2019_v38 }
 0x146   :  { %v705_v8 = vpop.f32.mrf.mxu0  ;;  %v920_v9 = vpop.f32.mrf.mxu1 }
 0x147   :  { %1262 = vst [vmem:[%s2846_s3 + $0x608] sm:$0xff] %v422_v35  ;;  %1264 = vst [vmem:[%s2846_s3 + $0x618] sm:$0xff] %v637_v36  ;;  %v706_v37 = vadd.f32 %v705_v8, %v2418_v0  ;;  %v921_v38 = vadd.f32 %v920_v9, %v2421_v2 }
 0x148   :  { %v707_v10 = vpop.f32.mrf.mxu0  ;;  %v922_v11 = vpop.f32.mrf.mxu1 }
 0x149   :  { %1073 = vst [vmem:[%s2846_s3 + $0x20] sm:$0xff] %v706_v37  ;;  %1075 = vst [vmem:[%s2846_s3 + $0x30] sm:$0xff] %v921_v38  ;;  %v708_v22 = vadd.f32 %v707_v10, %v2432_v5  ;;  %v923_v13 = vadd.f32 %v922_v11, %v2435_v6 }
 0x14a   :  { %v711_v14 = vpop.f32.mrf.mxu0  ;;  %v926_v15 = vpop.f32.mrf.mxu1 }
 0x14b   :  { %1074 = vst [vmem:[%s2846_s3 + $0x28] sm:$0xff] %v708_v22  ;;  %1076 = vst [vmem:[%s2846_s3 + $0x38] sm:$0xff] %v923_v13  ;;  %v712_v16 = vadd.f32 %v711_v14, %v2418_v0  ;;  %v927_v18 = vadd.f32 %v926_v15, %v2421_v2 }
 0x14c   :  { %v713_v19 = vpop.f32.mrf.mxu0  ;;  %v928_v20 = vpop.f32.mrf.mxu1 }
 0x14d   :  { %1081 = vst [vmem:[%s2846_s3 + $0x60] sm:$0xff] %v712_v16  ;;  %1083 = vst [vmem:[%s2846_s3 + $0x70] sm:$0xff] %v927_v18  ;;  %v714_v21 = vadd.f32 %v713_v19, %v2432_v5  ;;  %v929_v23 = vadd.f32 %v928_v20, %v2435_v6 }
 0x14e   :  { %v717_v24 = vpop.f32.mrf.mxu0  ;;  %v932_v25 = vpop.f32.mrf.mxu1 }
 0x14f   :  { %1082 = vst [vmem:[%s2846_s3 + $0x68] sm:$0xff] %v714_v21  ;;  %1084 = vst [vmem:[%s2846_s3 + $0x78] sm:$0xff] %v929_v23  ;;  %v718_v26 = vadd.f32 %v717_v24, %v2418_v0  ;;  %v933_v28 = vadd.f32 %v932_v25, %v2421_v2 }
 0x150   :  { %v719_v29 = vpop.f32.mrf.mxu0  ;;  %v934_v30 = vpop.f32.mrf.mxu1 }
 0x151   :  { %1089 = vst [vmem:[%s2846_s3 + $0xa0] sm:$0xff] %v718_v26  ;;  %1091 = vst [vmem:[%s2846_s3 + $0xb0] sm:$0xff] %v933_v28  ;;  %v720_v31 = vadd.f32 %v719_v29, %v2432_v5  ;;  %v935_v33 = vadd.f32 %v934_v30, %v2435_v6 }
 0x152   :  { %v723_v34 = vpop.f32.mrf.mxu0  ;;  %v938_v1 = vpop.f32.mrf.mxu1 }
 0x153   :  { %1090 = vst [vmem:[%s2846_s3 + $0xa8] sm:$0xff] %v720_v31  ;;  %1092 = vst [vmem:[%s2846_s3 + $0xb8] sm:$0xff] %v935_v33  ;;  %v724_v12 = vadd.f32 %v723_v34, %v2418_v0  ;;  %v939_v17 = vadd.f32 %v938_v1, %v2421_v2 }
 0x154   :  { %v725_v27 = vpop.f32.mrf.mxu0  ;;  %v940_v32 = vpop.f32.mrf.mxu1 }
 0x155   :  { %1097 = vst [vmem:[%s2846_s3 + $0xe0] sm:$0xff] %v724_v12  ;;  %1099 = vst [vmem:[%s2846_s3 + $0xf0] sm:$0xff] %v939_v17  ;;  %v726_v39 = vadd.f32 %v725_v27, %v2432_v5  ;;  %v941_v40 = vadd.f32 %v940_v32, %v2435_v6 }
 0x156   :  { %v729_v41 = vpop.f32.mrf.mxu0  ;;  %v944_v42 = vpop.f32.mrf.mxu1 }
 0x157   :  { %1098 = vst [vmem:[%s2846_s3 + $0xe8] sm:$0xff] %v726_v39  ;;  %1100 = vst [vmem:[%s2846_s3 + $0xf8] sm:$0xff] %v941_v40  ;;  %v730_v43 = vadd.f32 %v729_v41, %v2418_v0  ;;  %v945_v44 = vadd.f32 %v944_v42, %v2421_v2 }
 0x158   :  { %v731_v45 = vpop.f32.mrf.mxu0  ;;  %v946_v46 = vpop.f32.mrf.mxu1 }
 0x159   :  { %1105 = vst [vmem:[%s2846_s3 + $0x120] sm:$0xff] %v730_v43  ;;  %1107 = vst [vmem:[%s2846_s3 + $0x130] sm:$0xff] %v945_v44  ;;  %v732_v47 = vadd.f32 %v731_v45, %v2432_v5  ;;  %v947_v48 = vadd.f32 %v946_v46, %v2435_v6 }
 0x15a   :  { %v735_v3 = vpop.f32.mrf.mxu0  ;;  %v950_v49 = vpop.f32.mrf.mxu1 }
 0x15b   :  { %1106 = vst [vmem:[%s2846_s3 + $0x128] sm:$0xff] %v732_v47  ;;  %1108 = vst [vmem:[%s2846_s3 + $0x138] sm:$0xff] %v947_v48  ;;  %v736_v50 = vadd.f32 %v735_v3, %v2418_v0  ;;  %v951_v51 = vadd.f32 %v950_v49, %v2421_v2 }
 0x15c   :  { %v737_v52 = vpop.f32.mrf.mxu0  ;;  %v952_v53 = vpop.f32.mrf.mxu1 }
 0x15d   :  { %1113 = vst [vmem:[%s2846_s3 + $0x160] sm:$0xff] %v736_v50  ;;  %1115 = vst [vmem:[%s2846_s3 + $0x170] sm:$0xff] %v951_v51  ;;  %v738_v54 = vadd.f32 %v737_v52, %v2432_v5  ;;  %v953_v55 = vadd.f32 %v952_v53, %v2435_v6 }
 0x15e   :  { %v741_v56 = vpop.f32.mrf.mxu0  ;;  %v956_v57 = vpop.f32.mrf.mxu1 }
 0x15f   :  { %1114 = vst [vmem:[%s2846_s3 + $0x168] sm:$0xff] %v738_v54  ;;  %1116 = vst [vmem:[%s2846_s3 + $0x178] sm:$0xff] %v953_v55  ;;  %v742_v58 = vadd.f32 %v741_v56, %v2418_v0  ;;  %v957_v59 = vadd.f32 %v956_v57, %v2421_v2 }
 0x160   :  { %v743_v60 = vpop.f32.mrf.mxu0  ;;  %v958_v61 = vpop.f32.mrf.mxu1 }
 0x161   :  { %1121 = vst [vmem:[%s2846_s3 + $0x1a0] sm:$0xff] %v742_v58  ;;  %1123 = vst [vmem:[%s2846_s3 + $0x1b0] sm:$0xff] %v957_v59  ;;  %v744_v62 = vadd.f32 %v743_v60, %v2432_v5  ;;  %v959_v63 = vadd.f32 %v958_v61, %v2435_v6 }
 0x162   :  { %v747_v7 = vpop.f32.mrf.mxu0  ;;  %v962_v4 = vpop.f32.mrf.mxu1 }
 0x163   :  { %1122 = vst [vmem:[%s2846_s3 + $0x1a8] sm:$0xff] %v744_v62  ;;  %1124 = vst [vmem:[%s2846_s3 + $0x1b8] sm:$0xff] %v959_v63  ;;  %v748_v35 = vadd.f32 %v747_v7, %v2418_v0  ;;  %v963_v36 = vadd.f32 %v962_v4, %v2421_v2 }
 0x164   :  { %v749_v8 = vpop.f32.mrf.mxu0  ;;  %v964_v9 = vpop.f32.mrf.mxu1 }
 0x165   :  { %1129 = vst [vmem:[%s2846_s3 + $0x1e0] sm:$0xff] %v748_v35  ;;  %1131 = vst [vmem:[%s2846_s3 + $0x1f0] sm:$0xff] %v963_v36  ;;  %v750_v37 = vadd.f32 %v749_v8, %v2432_v5  ;;  %v965_v38 = vadd.f32 %v964_v9, %v2435_v6 }
 0x166   :  { %v753_v10 = vpop.f32.mrf.mxu0  ;;  %v968_v11 = vpop.f32.mrf.mxu1 }
 0x167   :  { %1130 = vst [vmem:[%s2846_s3 + $0x1e8] sm:$0xff] %v750_v37  ;;  %1132 = vst [vmem:[%s2846_s3 + $0x1f8] sm:$0xff] %v965_v38  ;;  %v754_v22 = vadd.f32 %v753_v10, %v2418_v0  ;;  %v969_v13 = vadd.f32 %v968_v11, %v2421_v2 }
 0x168   :  { %v755_v14 = vpop.f32.mrf.mxu0  ;;  %v970_v15 = vpop.f32.mrf.mxu1 }
 0x169   :  { %1137 = vst [vmem:[%s2846_s3 + $0x220] sm:$0xff] %v754_v22  ;;  %1139 = vst [vmem:[%s2846_s3 + $0x230] sm:$0xff] %v969_v13  ;;  %v756_v16 = vadd.f32 %v755_v14, %v2432_v5  ;;  %v971_v18 = vadd.f32 %v970_v15, %v2435_v6 }
 0x16a   :  { %v759_v19 = vpop.f32.mrf.mxu0  ;;  %v974_v20 = vpop.f32.mrf.mxu1 }
 0x16b   :  { %1138 = vst [vmem:[%s2846_s3 + $0x228] sm:$0xff] %v756_v16  ;;  %1140 = vst [vmem:[%s2846_s3 + $0x238] sm:$0xff] %v971_v18  ;;  %v760_v21 = vadd.f32 %v759_v19, %v2418_v0  ;;  %v975_v23 = vadd.f32 %v974_v20, %v2421_v2 }
 0x16c   :  { %v761_v24 = vpop.f32.mrf.mxu0  ;;  %v976_v25 = vpop.f32.mrf.mxu1 }
 0x16d   :  { %1145 = vst [vmem:[%s2846_s3 + $0x260] sm:$0xff] %v760_v21  ;;  %1147 = vst [vmem:[%s2846_s3 + $0x270] sm:$0xff] %v975_v23  ;;  %v762_v26 = vadd.f32 %v761_v24, %v2432_v5  ;;  %v977_v28 = vadd.f32 %v976_v25, %v2435_v6 }
 0x16e   :  { %v765_v29 = vpop.f32.mrf.mxu0  ;;  %v980_v30 = vpop.f32.mrf.mxu1 }
 0x16f   :  { %1146 = vst [vmem:[%s2846_s3 + $0x268] sm:$0xff] %v762_v26  ;;  %1148 = vst [vmem:[%s2846_s3 + $0x278] sm:$0xff] %v977_v28  ;;  %v766_v31 = vadd.f32 %v765_v29, %v2418_v0  ;;  %v981_v33 = vadd.f32 %v980_v30, %v2421_v2 }
 0x170   :  { %v767_v34 = vpop.f32.mrf.mxu0  ;;  %v982_v1 = vpop.f32.mrf.mxu1 }
 0x171   :  { %1153 = vst [vmem:[%s2846_s3 + $0x2a0] sm:$0xff] %v766_v31  ;;  %1155 = vst [vmem:[%s2846_s3 + $0x2b0] sm:$0xff] %v981_v33  ;;  %v768_v12 = vadd.f32 %v767_v34, %v2432_v5  ;;  %v983_v17 = vadd.f32 %v982_v1, %v2435_v6 }
 0x172   :  { %v771_v27 = vpop.f32.mrf.mxu0  ;;  %v986_v32 = vpop.f32.mrf.mxu1 }
 0x173   :  { %1154 = vst [vmem:[%s2846_s3 + $0x2a8] sm:$0xff] %v768_v12  ;;  %1156 = vst [vmem:[%s2846_s3 + $0x2b8] sm:$0xff] %v983_v17  ;;  %v772_v39 = vadd.f32 %v771_v27, %v2418_v0  ;;  %v987_v40 = vadd.f32 %v986_v32, %v2421_v2 }
 0x174   :  { %v773_v41 = vpop.f32.mrf.mxu0  ;;  %v988_v42 = vpop.f32.mrf.mxu1 }
 0x175   :  { %1161 = vst [vmem:[%s2846_s3 + $0x2e0] sm:$0xff] %v772_v39  ;;  %1163 = vst [vmem:[%s2846_s3 + $0x2f0] sm:$0xff] %v987_v40  ;;  %v774_v43 = vadd.f32 %v773_v41, %v2432_v5  ;;  %v989_v44 = vadd.f32 %v988_v42, %v2435_v6 }
 0x176   :  { %v777_v45 = vpop.f32.mrf.mxu0  ;;  %v992_v46 = vpop.f32.mrf.mxu1 }
 0x177   :  { %1162 = vst [vmem:[%s2846_s3 + $0x2e8] sm:$0xff] %v774_v43  ;;  %1164 = vst [vmem:[%s2846_s3 + $0x2f8] sm:$0xff] %v989_v44  ;;  %v778_v47 = vadd.f32 %v777_v45, %v2418_v0  ;;  %v993_v48 = vadd.f32 %v992_v46, %v2421_v2 }
 0x178   :  { %v779_v3 = vpop.f32.mrf.mxu0  ;;  %v994_v49 = vpop.f32.mrf.mxu1 }
 0x179   :  { %1169 = vst [vmem:[%s2846_s3 + $0x320] sm:$0xff] %v778_v47  ;;  %1171 = vst [vmem:[%s2846_s3 + $0x330] sm:$0xff] %v993_v48  ;;  %v780_v50 = vadd.f32 %v779_v3, %v2432_v5  ;;  %v995_v51 = vadd.f32 %v994_v49, %v2435_v6 }
 0x17a   :  { %v783_v52 = vpop.f32.mrf.mxu0  ;;  %v998_v53 = vpop.f32.mrf.mxu1 }
 0x17b   :  { %1170 = vst [vmem:[%s2846_s3 + $0x328] sm:$0xff] %v780_v50  ;;  %1172 = vst [vmem:[%s2846_s3 + $0x338] sm:$0xff] %v995_v51  ;;  %v784_v54 = vadd.f32 %v783_v52, %v2418_v0  ;;  %v999_v55 = vadd.f32 %v998_v53, %v2421_v2 }
 0x17c   :  { %v785_v56 = vpop.f32.mrf.mxu0  ;;  %v1000_v57 = vpop.f32.mrf.mxu1 }
 0x17d   :  { %1177 = vst [vmem:[%s2846_s3 + $0x360] sm:$0xff] %v784_v54  ;;  %1179 = vst [vmem:[%s2846_s3 + $0x370] sm:$0xff] %v999_v55  ;;  %v786_v58 = vadd.f32 %v785_v56, %v2432_v5  ;;  %v1001_v59 = vadd.f32 %v1000_v57, %v2435_v6 }
 0x17e   :  { %v789_v60 = vpop.f32.mrf.mxu0  ;;  %v1004_v61 = vpop.f32.mrf.mxu1 }
 0x17f   :  { %1178 = vst [vmem:[%s2846_s3 + $0x368] sm:$0xff] %v786_v58  ;;  %1180 = vst [vmem:[%s2846_s3 + $0x378] sm:$0xff] %v1001_v59  ;;  %v790_v62 = vadd.f32 %v789_v60, %v2418_v0  ;;  %v1005_v63 = vadd.f32 %v1004_v61, %v2421_v2 }
 0x180   :  { %v791_v7 = vpop.f32.mrf.mxu0  ;;  %v1006_v4 = vpop.f32.mrf.mxu1 }
 0x181   :  { %1185 = vst [vmem:[%s2846_s3 + $0x3a0] sm:$0xff] %v790_v62  ;;  %1187 = vst [vmem:[%s2846_s3 + $0x3b0] sm:$0xff] %v1005_v63  ;;  %v792_v35 = vadd.f32 %v791_v7, %v2432_v5  ;;  %v1007_v36 = vadd.f32 %v1006_v4, %v2435_v6 }
 0x182   :  { %v795_v8 = vpop.f32.mrf.mxu0  ;;  %v1010_v9 = vpop.f32.mrf.mxu1 }
 0x183   :  { %1186 = vst [vmem:[%s2846_s3 + $0x3a8] sm:$0xff] %v792_v35  ;;  %1188 = vst [vmem:[%s2846_s3 + $0x3b8] sm:$0xff] %v1007_v36  ;;  %v796_v37 = vadd.f32 %v795_v8, %v2418_v0  ;;  %v1011_v38 = vadd.f32 %v1010_v9, %v2421_v2 }
 0x184   :  { %v797_v10 = vpop.f32.mrf.mxu0  ;;  %v1012_v11 = vpop.f32.mrf.mxu1 }
 0x185   :  { %1193 = vst [vmem:[%s2846_s3 + $0x3e0] sm:$0xff] %v796_v37  ;;  %1195 = vst [vmem:[%s2846_s3 + $0x3f0] sm:$0xff] %v1011_v38  ;;  %v798_v22 = vadd.f32 %v797_v10, %v2432_v5  ;;  %v1013_v13 = vadd.f32 %v1012_v11, %v2435_v6 }
 0x186   :  { %v801_v14 = vpop.f32.mrf.mxu0  ;;  %v1016_v15 = vpop.f32.mrf.mxu1 }
 0x187   :  { %1194 = vst [vmem:[%s2846_s3 + $0x3e8] sm:$0xff] %v798_v22  ;;  %1196 = vst [vmem:[%s2846_s3 + $0x3f8] sm:$0xff] %v1013_v13  ;;  %v802_v16 = vadd.f32 %v801_v14, %v2418_v0  ;;  %v1017_v18 = vadd.f32 %v1016_v15, %v2421_v2 }
 0x188   :  { %v803_v19 = vpop.f32.mrf.mxu0  ;;  %v1018_v20 = vpop.f32.mrf.mxu1 }
 0x189   :  { %1201 = vst [vmem:[%s2846_s3 + $0x420] sm:$0xff] %v802_v16  ;;  %1203 = vst [vmem:[%s2846_s3 + $0x430] sm:$0xff] %v1017_v18  ;;  %v804_v21 = vadd.f32 %v803_v19, %v2432_v5  ;;  %v1019_v23 = vadd.f32 %v1018_v20, %v2435_v6 }
 0x18a   :  { %v807_v24 = vpop.f32.mrf.mxu0  ;;  %v1022_v25 = vpop.f32.mrf.mxu1 }
 0x18b   :  { %1202 = vst [vmem:[%s2846_s3 + $0x428] sm:$0xff] %v804_v21  ;;  %1204 = vst [vmem:[%s2846_s3 + $0x438] sm:$0xff] %v1019_v23  ;;  %v808_v26 = vadd.f32 %v807_v24, %v2418_v0  ;;  %v1023_v28 = vadd.f32 %v1022_v25, %v2421_v2 }
 0x18c   :  { %v809_v29 = vpop.f32.mrf.mxu0  ;;  %v1024_v30 = vpop.f32.mrf.mxu1 }
 0x18d   :  { %1209 = vst [vmem:[%s2846_s3 + $0x460] sm:$0xff] %v808_v26  ;;  %1211 = vst [vmem:[%s2846_s3 + $0x470] sm:$0xff] %v1023_v28  ;;  %v810_v31 = vadd.f32 %v809_v29, %v2432_v5  ;;  %v1025_v33 = vadd.f32 %v1024_v30, %v2435_v6 }
 0x18e   :  { %v813_v34 = vpop.f32.mrf.mxu0  ;;  %v1028_v1 = vpop.f32.mrf.mxu1 }
 0x18f   :  { %1210 = vst [vmem:[%s2846_s3 + $0x468] sm:$0xff] %v810_v31  ;;  %1212 = vst [vmem:[%s2846_s3 + $0x478] sm:$0xff] %v1025_v33  ;;  %v814_v12 = vadd.f32 %v813_v34, %v2418_v0  ;;  %v1029_v17 = vadd.f32 %v1028_v1, %v2421_v2 }
 0x190   :  { %v815_v27 = vpop.f32.mrf.mxu0  ;;  %v1030_v32 = vpop.f32.mrf.mxu1 }
 0x191   :  { %1217 = vst [vmem:[%s2846_s3 + $0x4a0] sm:$0xff] %v814_v12  ;;  %1219 = vst [vmem:[%s2846_s3 + $0x4b0] sm:$0xff] %v1029_v17  ;;  %v816_v39 = vadd.f32 %v815_v27, %v2432_v5  ;;  %v1031_v40 = vadd.f32 %v1030_v32, %v2435_v6 }
 0x192   :  { %v819_v41 = vpop.f32.mrf.mxu0  ;;  %v1034_v42 = vpop.f32.mrf.mxu1 }
 0x193   :  { %1218 = vst [vmem:[%s2846_s3 + $0x4a8] sm:$0xff] %v816_v39  ;;  %1220 = vst [vmem:[%s2846_s3 + $0x4b8] sm:$0xff] %v1031_v40  ;;  %v820_v43 = vadd.f32 %v819_v41, %v2418_v0  ;;  %v1035_v44 = vadd.f32 %v1034_v42, %v2421_v2 }
 0x194   :  { %v821_v45 = vpop.f32.mrf.mxu0  ;;  %v1036_v46 = vpop.f32.mrf.mxu1 }
 0x195   :  { %1225 = vst [vmem:[%s2846_s3 + $0x4e0] sm:$0xff] %v820_v43  ;;  %1227 = vst [vmem:[%s2846_s3 + $0x4f0] sm:$0xff] %v1035_v44  ;;  %v822_v47 = vadd.f32 %v821_v45, %v2432_v5  ;;  %v1037_v48 = vadd.f32 %v1036_v46, %v2435_v6 }
 0x196   :  { %v825_v3 = vpop.f32.mrf.mxu0  ;;  %v1040_v49 = vpop.f32.mrf.mxu1 }
 0x197   :  { %1226 = vst [vmem:[%s2846_s3 + $0x4e8] sm:$0xff] %v822_v47  ;;  %1228 = vst [vmem:[%s2846_s3 + $0x4f8] sm:$0xff] %v1037_v48  ;;  %v826_v50 = vadd.f32 %v825_v3, %v2418_v0  ;;  %v1041_v51 = vadd.f32 %v1040_v49, %v2421_v2 }
 0x198   :  { %v827_v52 = vpop.f32.mrf.mxu0  ;;  %v1042_v53 = vpop.f32.mrf.mxu1 }
 0x199   :  { %1233 = vst [vmem:[%s2846_s3 + $0x520] sm:$0xff] %v826_v50  ;;  %1235 = vst [vmem:[%s2846_s3 + $0x530] sm:$0xff] %v1041_v51  ;;  %v828_v54 = vadd.f32 %v827_v52, %v2432_v5  ;;  %v1043_v55 = vadd.f32 %v1042_v53, %v2435_v6 }
 0x19a   :  { %v831_v56 = vpop.f32.mrf.mxu0  ;;  %v1046_v57 = vpop.f32.mrf.mxu1 }
 0x19b   :  { %1234 = vst [vmem:[%s2846_s3 + $0x528] sm:$0xff] %v828_v54  ;;  %1236 = vst [vmem:[%s2846_s3 + $0x538] sm:$0xff] %v1043_v55  ;;  %v832_v58 = vadd.f32 %v831_v56, %v2418_v0  ;;  %v1047_v59 = vadd.f32 %v1046_v57, %v2421_v2 }
 0x19c   :  { %v833_v60 = vpop.f32.mrf.mxu0  ;;  %v1048_v61 = vpop.f32.mrf.mxu1 }
 0x19d   :  { %1241 = vst [vmem:[%s2846_s3 + $0x560] sm:$0xff] %v832_v58  ;;  %1243 = vst [vmem:[%s2846_s3 + $0x570] sm:$0xff] %v1047_v59  ;;  %v834_v62 = vadd.f32 %v833_v60, %v2432_v5  ;;  %v1049_v63 = vadd.f32 %v1048_v61, %v2435_v6 }
 0x19e   :  { %v837_v7 = vpop.f32.mrf.mxu0  ;;  %v1052_v4 = vpop.f32.mrf.mxu1 }
 0x19f   :  { %1242 = vst [vmem:[%s2846_s3 + $0x568] sm:$0xff] %v834_v62  ;;  %1244 = vst [vmem:[%s2846_s3 + $0x578] sm:$0xff] %v1049_v63  ;;  %v838_v35 = vadd.f32 %v837_v7, %v2418_v0  ;;  %v1053_v36 = vadd.f32 %v1052_v4, %v2421_v2 }
 0x1a0   :  { %v839_v8 = vpop.f32.mrf.mxu0  ;;  %v1054_v9 = vpop.f32.mrf.mxu1 }
 0x1a1   :  { %1249 = vst [vmem:[%s2846_s3 + $0x5a0] sm:$0xff] %v838_v35  ;;  %1251 = vst [vmem:[%s2846_s3 + $0x5b0] sm:$0xff] %v1053_v36  ;;  %v840_v37 = vadd.f32 %v839_v8, %v2432_v5  ;;  %v1055_v38 = vadd.f32 %v1054_v9, %v2435_v6 }
 0x1a2   :  { %v843_v10 = vpop.f32.mrf.mxu0  ;;  %v1058_v11 = vpop.f32.mrf.mxu1 }
 0x1a3   :  { %1250 = vst [vmem:[%s2846_s3 + $0x5a8] sm:$0xff] %v840_v37  ;;  %1252 = vst [vmem:[%s2846_s3 + $0x5b8] sm:$0xff] %v1055_v38  ;;  %v844_v22 = vadd.f32 %v843_v10, %v2418_v0  ;;  %v1059_v13 = vadd.f32 %v1058_v11, %v2421_v2 }
 0x1a4   :  { %v845_v14 = vpop.f32.mrf.mxu0  ;;  %v1060_v15 = vpop.f32.mrf.mxu1 }
 0x1a5   :  { %1257 = vst [vmem:[%s2846_s3 + $0x5e0] sm:$0xff] %v844_v22  ;;  %1259 = vst [vmem:[%s2846_s3 + $0x5f0] sm:$0xff] %v1059_v13  ;;  %v846_v16 = vadd.f32 %v845_v14, %v2432_v5  ;;  %v1061_v18 = vadd.f32 %v1060_v15, %v2435_v6 }
 0x1a6   :  { %v849_v19 = vpop.f32.mrf.mxu0  ;;  %v1064_v20 = vpop.f32.mrf.mxu1 }
 0x1a7   :  { %1258 = vst [vmem:[%s2846_s3 + $0x5e8] sm:$0xff] %v846_v16  ;;  %1260 = vst [vmem:[%s2846_s3 + $0x5f8] sm:$0xff] %v1061_v18  ;;  %v850_v21 = vadd.f32 %v849_v19, %v2418_v0  ;;  %v1065_v23 = vadd.f32 %v1064_v20, %v2421_v2 }
 0x1a8   :  { %v851_v24 = vpop.f32.mrf.mxu0  ;;  %v1066_v25 = vpop.f32.mrf.mxu1 }
 0x1a9   :  { %1265 = vst [vmem:[%s2846_s3 + $0x620] sm:$0xff] %v850_v21  ;;  %1267 = vst [vmem:[%s2846_s3 + $0x630] sm:$0xff] %v1065_v23  ;;  %v852_v26 = vadd.f32 %v851_v24, %v2432_v5  ;;  %v1067_v28 = vadd.f32 %v1066_v25, %v2435_v6 }
 0x1ab   :  { %1266 = vst [vmem:[%s2846_s3 + $0x628] sm:$0xff] %v852_v26  ;;  %1268 = vst [vmem:[%s2846_s3 + $0x638] sm:$0xff] %v1067_v28 }

// kernel: cnn_lstm2_forward.9
= control target key start
LH: loop header
LB: loop body
LE: loop exit
PB: predicated region body
PF: predicated region fallthrough
CT: control target
= control target key end

     0   :  { %v141_v0 = vlaneseq  ;;  %v536_v1 = vmov 0.0   ;;  %s1196_s13 = smov 0   ;;  %s1358_s0 = inlined_call_operand.vmem [shape: f32[50,8,512], index: 0, kind: input, shape index: {}]   ;;  %s1359_s1 = inlined_call_operand.vmem [shape: f32[128,1024], index: 1, kind: input, shape index: {}]   ;;  %s1360_s2 = inlined_call_operand.vmem [shape: f32[50,8,128], index: 2, kind: output, shape index: {}]  }
   0x1   :  { %11 = vst [vmem:[#allocation2] sm:$0xff] %v536_v1  ;;  %12 = vst [vmem:[#allocation3] sm:$0xff] %v536_v1  ;;  %v556_v2 = vld [vmem:[%s1359_s1] sm:$0xff]  ;;  %v561_v3 = vld [vmem:[%s1359_s1 + $0x8] sm:$0xff] }
   0x2   :  { %1365 = vst [vmem:[#allocation4_spill] sm:$0xff] %v556_v2  ;;  %1366 = vst [vmem:[#allocation5_spill] sm:$0xff] %v561_v3  ;;  %v566_v4 = vld [vmem:[%s1359_s1 + $0x10] sm:$0xff]  ;;  %v571_v5 = vld [vmem:[%s1359_s1 + $0x18] sm:$0xff]  ;;  %v583_v8 = vshrl.u32 %v141_v0, 7 }
   0x3   :  { %1367 = vst [vmem:[#allocation6_spill] sm:$0xff] %v566_v4  ;;  %1368 = vst [vmem:[#allocation7_spill] sm:$0xff] %v571_v5  ;;  %v576_v6 = vld [vmem:[%s1359_s1 + $0x20] sm:$0xff]  ;;  %v581_v7 = vld [vmem:[%s1359_s1 + $0x28] sm:$0xff] }
   0x4   :  { %1369 = vst [vmem:[#allocation8_spill] sm:$0xff] %v576_v6  ;;  %1370 = vst [vmem:[#allocation9_spill] sm:$0xff] %v581_v7  ;;  %v588_v9 = vld [vmem:[%s1359_s1 + $0x30] sm:$0xff]  ;;  %v593_v10 = vld [vmem:[%s1359_s1 + $0x38] sm:$0xff]  ;;  %vm143_vm0 = vcmp.ge.s32.totalorder %v583_v8, 4 }
   0x5   :  { %1371 = vst [vmem:[#allocation10_spill] sm:$0xff] %v583_v8  ;;  %1372 = vst [vmem:[#allocation11_spill] sm:$0xff] %v588_v9  ;;  %v598_v11 = vld [vmem:[%s1359_s1 + $0x40] sm:$0xff]  ;;  %v603_v12 = vld [vmem:[%s1359_s1 + $0x48] sm:$0xff] }
   0x6   :  { %1373 = vst [vmem:[#allocation12_spill] sm:$0xff] %v593_v10  ;;  %1374 = vst [vmem:[#allocation13_spill] sm:$0xff] %v598_v11  ;;  %v608_v13 = vld [vmem:[%s1359_s1 + $0x50] sm:$0xff]  ;;  %v613_v14 = vld [vmem:[%s1359_s1 + $0x58] sm:$0xff] }
   0x7   :  { %1375 = vst [vmem:[#allocation14_spill] sm:$0xff] %v603_v12  ;;  %1376 = vst [vmem:[#allocation15_spill] sm:$0xff] %v608_v13  ;;  %v619_v15 = vld [vmem:[%s1359_s1 + $0x60] sm:$0xff]  ;;  %v624_v16 = vld [vmem:[%s1359_s1 + $0x68] sm:$0xff] }
   0x8   :  { %1377 = vst [vmem:[#allocation16_spill] sm:$0xff] %v613_v14  ;;  %1378 = vst [vmem:[#allocation17_spill] sm:$0xff] %v619_v15  ;;  %v629_v17 = vld [vmem:[%s1359_s1 + $0x70] sm:$0xff]  ;;  %v634_v18 = vld [vmem:[%s1359_s1 + $0x78] sm:$0xff] }
   0x9   :  { %1379 = vst [vmem:[#allocation18_spill] sm:$0xff] %v624_v16  ;;  %1380 = vst [vmem:[#allocation19_spill] sm:$0xff] %v629_v17  ;;  %v639_v19 = vld [vmem:[%s1359_s1 + $0x80] sm:$0xff]  ;;  %v644_v20 = vld [vmem:[%s1359_s1 + $0x88] sm:$0xff] }
   0xa   :  { %1381 = vst [vmem:[#allocation20_spill] sm:$0xff] %v634_v18  ;;  %1382 = vst [vmem:[#allocation21_spill] sm:$0xff] %v639_v19  ;;  %v649_v21 = vld [vmem:[%s1359_s1 + $0x90] sm:$0xff]  ;;  %v654_v22 = vld [vmem:[%s1359_s1 + $0x98] sm:$0xff] }
   0xb   :  { %1383 = vst [vmem:[#allocation22_spill] sm:$0xff] %v644_v20  ;;  %1384 = vst [vmem:[#allocation23_spill] sm:$0xff] %v649_v21  ;;  %v659_v23 = vld [vmem:[%s1359_s1 + $0xa0] sm:$0xff]  ;;  %v664_v24 = vld [vmem:[%s1359_s1 + $0xa8] sm:$0xff] }
   0xc   :  { %1385 = vst [vmem:[#allocation24_spill] sm:$0xff] %v659_v23  ;;  %1386 = vst [vmem:[#allocation25_spill] sm:$0xff] %v664_v24  ;;  %v669_v25 = vld [vmem:[%s1359_s1 + $0xb0] sm:$0xff]  ;;  %v674_v26 = vld [vmem:[%s1359_s1 + $0xb8] sm:$0xff] }
   0xd   :  { %1387 = vst [vmem:[#allocation26_spill] sm:$0xff] %v669_v25  ;;  %1388 = vst [vmem:[#allocation27_spill] sm:$0xff] %v674_v26  ;;  %v679_v27 = vld [vmem:[%s1359_s1 + $0xc0] sm:$0xff]  ;;  %v684_v28 = vld [vmem:[%s1359_s1 + $0xc8] sm:$0xff] }
   0xe   :  { %v689_v29 = vld [vmem:[%s1359_s1 + $0xd0] sm:$0xff]  ;;  %v694_v30 = vld [vmem:[%s1359_s1 + $0xd8] sm:$0xff]  ;;  %v699_v31 = vld [vmem:[%s1359_s1 + $0xe0] sm:$0xff] }
   0xf   :  { %1389 = vst [vmem:[#allocation28_spill] sm:$0xff] %v699_v31  ;;  %v704_v32 = vld [vmem:[%s1359_s1 + $0xe8] sm:$0xff]  ;;  %v709_v33 = vld [vmem:[%s1359_s1 + $0xf0] sm:$0xff]  ;;  %v714_v34 = vld [vmem:[%s1359_s1 + $0xf8] sm:$0xff] }
  0x10   :  { %1390 = vst [vmem:[#allocation29_spill] sm:$0xff] %v704_v32  ;;  %1391 = vst [vmem:[#allocation30_spill] sm:$0xff] %v709_v33  ;;  %v719_v35 = vld [vmem:[%s1359_s1 + $0x100] sm:$0xff]  ;;  %v724_v36 = vld [vmem:[%s1359_s1 + $0x108] sm:$0xff] }
  0x11   :  { %1392 = vst [vmem:[#allocation31_spill] sm:$0xff] %v714_v34  ;;  %v729_v37 = vld [vmem:[%s1359_s1 + $0x110] sm:$0xff]  ;;  %v734_v38 = vld [vmem:[%s1359_s1 + $0x118] sm:$0xff]  ;;  %v739_v39 = vld [vmem:[%s1359_s1 + $0x120] sm:$0xff] }
  0x12   :  { %1393 = vst [vmem:[#allocation32_spill] sm:$0xff] %v739_v39  ;;  %v744_v40 = vld [vmem:[%s1359_s1 + $0x128] sm:$0xff]  ;;  %v749_v41 = vld [vmem:[%s1359_s1 + $0x130] sm:$0xff]  ;;  %v754_v42 = vld [vmem:[%s1359_s1 + $0x138] sm:$0xff] }
  0x13   :  { %1394 = vst [vmem:[#allocation33_spill] sm:$0xff] %v744_v40  ;;  %1395 = vst [vmem:[#allocation34_spill] sm:$0xff] %v749_v41  ;;  %v759_v43 = vld [vmem:[%s1359_s1 + $0x140] sm:$0xff]  ;;  %v764_v44 = vld [vmem:[%s1359_s1 + $0x148] sm:$0xff] }
  0x14   :  { %1396 = vst [vmem:[#allocation35_spill] sm:$0xff] %v754_v42  ;;  %v769_v45 = vld [vmem:[%s1359_s1 + $0x150] sm:$0xff]  ;;  %v774_v46 = vld [vmem:[%s1359_s1 + $0x158] sm:$0xff]  ;;  %v779_v47 = vld [vmem:[%s1359_s1 + $0x160] sm:$0xff] }
  0x15   :  { %1397 = vst [vmem:[#allocation36_spill] sm:$0xff] %v779_v47  ;;  %v784_v48 = vld [vmem:[%s1359_s1 + $0x168] sm:$0xff]  ;;  %v789_v49 = vld [vmem:[%s1359_s1 + $0x170] sm:$0xff]  ;;  %v794_v50 = vld [vmem:[%s1359_s1 + $0x178] sm:$0xff] }
  0x16   :  { %1398 = vst [vmem:[#allocation37_spill] sm:$0xff] %v784_v48  ;;  %1399 = vst [vmem:[#allocation38_spill] sm:$0xff] %v789_v49  ;;  %v799_v51 = vld [vmem:[%s1359_s1 + $0x180] sm:$0xff]  ;;  %v804_v52 = vld [vmem:[%s1359_s1 + $0x188] sm:$0xff] }
  0x17   :  { %1400 = vst [vmem:[#allocation39_spill] sm:$0xff] %v794_v50  ;;  %v809_v53 = vld [vmem:[%s1359_s1 + $0x190] sm:$0xff]  ;;  %v814_v54 = vld [vmem:[%s1359_s1 + $0x198] sm:$0xff]  ;;  %v819_v55 = vld [vmem:[%s1359_s1 + $0x1a0] sm:$0xff] }
  0x18   :  { %1401 = vst [vmem:[#allocation40_spill] sm:$0xff] %v819_v55  ;;  %v824_v56 = vld [vmem:[%s1359_s1 + $0x1a8] sm:$0xff]  ;;  %v829_v57 = vld [vmem:[%s1359_s1 + $0x1b0] sm:$0xff]  ;;  %v834_v58 = vld [vmem:[%s1359_s1 + $0x1b8] sm:$0xff] }
  0x19   :  { %1402 = vst [vmem:[#allocation41_spill] sm:$0xff] %v824_v56  ;;  %1403 = vst [vmem:[#allocation42_spill] sm:$0xff] %v829_v57  ;;  %v839_v59 = vld [vmem:[%s1359_s1 + $0x1c0] sm:$0xff]  ;;  %v844_v60 = vld [vmem:[%s1359_s1 + $0x1c8] sm:$0xff] }
  0x1a   :  { %1404 = vst [vmem:[#allocation43_spill] sm:$0xff] %v834_v58  ;;  %v849_v61 = vld [vmem:[%s1359_s1 + $0x1d0] sm:$0xff]  ;;  %v854_v62 = vld [vmem:[%s1359_s1 + $0x1d8] sm:$0xff]  ;;  %v859_v63 = vld [vmem:[%s1359_s1 + $0x1e0] sm:$0xff] }
  0x1b   :  { %1405 = vst [vmem:[#allocation44_spill] sm:$0xff] %v859_v63  ;;  %v864_v0 = vld [vmem:[%s1359_s1 + $0x1e8] sm:$0xff]  ;;  %v869_v1 = vld [vmem:[%s1359_s1 + $0x1f0] sm:$0xff]  ;;  %v874_v8 = vld [vmem:[%s1359_s1 + $0x1f8] sm:$0xff] }
  0x1c   :  { %1406 = vst [vmem:[#allocation45_spill] sm:$0xff] %v864_v0  ;;  %1407 = vst [vmem:[#allocation46_spill] sm:$0xff] %v869_v1  ;;  %v879_v9 = vld [vmem:[%s1359_s1 + $0x200] sm:$0xff]  ;;  %v884_v6 = vld [vmem:[%s1359_s1 + $0x208] sm:$0xff] }
  0x1d   :  { %1408 = vst [vmem:[#allocation47_spill] sm:$0xff] %v874_v8  ;;  %1409 = vst [vmem:[#allocation48_spill] sm:$0xff] %v879_v9  ;;  %v889_v10 = vld [vmem:[%s1359_s1 + $0x210] sm:$0xff]  ;;  %v894_v7 = vld [vmem:[%s1359_s1 + $0x218] sm:$0xff] }
  0x1e   :  { %1410 = vst [vmem:[#allocation49_spill] sm:$0xff] %v884_v6  ;;  %1411 = vst [vmem:[#allocation50_spill] sm:$0xff] %v889_v10  ;;  %v899_v17 = vld [vmem:[%s1359_s1 + $0x220] sm:$0xff]  ;;  %v904_v15 = vld [vmem:[%s1359_s1 + $0x228] sm:$0xff] }
  0x1f   :  { %1412 = vst [vmem:[#allocation51_spill] sm:$0xff] %v894_v7  ;;  %1413 = vst [vmem:[#allocation52_spill] sm:$0xff] %v899_v17  ;;  %v909_v18 = vld [vmem:[%s1359_s1 + $0x230] sm:$0xff]  ;;  %v914_v16 = vld [vmem:[%s1359_s1 + $0x238] sm:$0xff] }
  0x20   :  { %1414 = vst [vmem:[#allocation53_spill] sm:$0xff] %v904_v15  ;;  %1415 = vst [vmem:[#allocation54_spill] sm:$0xff] %v909_v18  ;;  %v919_v25 = vld [vmem:[%s1359_s1 + $0x240] sm:$0xff]  ;;  %v924_v23 = vld [vmem:[%s1359_s1 + $0x248] sm:$0xff] }
  0x21   :  { %1416 = vst [vmem:[#allocation55_spill] sm:$0xff] %v914_v16  ;;  %v929_v26 = vld [vmem:[%s1359_s1 + $0x250] sm:$0xff]  ;;  %v934_v24 = vld [vmem:[%s1359_s1 + $0x258] sm:$0xff]  ;;  %v939_v33 = vld [vmem:[%s1359_s1 + $0x260] sm:$0xff] }
  0x22   :  { %1417 = vst [vmem:[#allocation56_spill] sm:$0xff] %v939_v33  ;;  %v944_v31 = vld [vmem:[%s1359_s1 + $0x268] sm:$0xff]  ;;  %v949_v34 = vld [vmem:[%s1359_s1 + $0x270] sm:$0xff]  ;;  %v954_v32 = vld [vmem:[%s1359_s1 + $0x278] sm:$0xff] }
  0x23   :  { %1418 = vst [vmem:[#allocation57_spill] sm:$0xff] %v944_v31  ;;  %1419 = vst [vmem:[#allocation58_spill] sm:$0xff] %v949_v34  ;;  %v959_v41 = vld [vmem:[%s1359_s1 + $0x280] sm:$0xff]  ;;  %v964_v39 = vld [vmem:[%s1359_s1 + $0x288] sm:$0xff] }
  0x24   :  { %1420 = vst [vmem:[#allocation59_spill] sm:$0xff] %v954_v32  ;;  %v969_v42 = vld [vmem:[%s1359_s1 + $0x290] sm:$0xff]  ;;  %v974_v40 = vld [vmem:[%s1359_s1 + $0x298] sm:$0xff]  ;;  %v979_v49 = vld [vmem:[%s1359_s1 + $0x2a0] sm:$0xff] }
  0x25   :  { %1421 = vst [vmem:[#allocation60_spill] sm:$0xff] %v979_v49  ;;  %v984_v47 = vld [vmem:[%s1359_s1 + $0x2a8] sm:$0xff]  ;;  %v989_v50 = vld [vmem:[%s1359_s1 + $0x2b0] sm:$0xff]  ;;  %v994_v48 = vld [vmem:[%s1359_s1 + $0x2b8] sm:$0xff] }
  0x26   :  { %1422 = vst [vmem:[#allocation61_spill] sm:$0xff] %v984_v47  ;;  %1423 = vst [vmem:[#allocation62_spill] sm:$0xff] %v989_v50  ;;  %v999_v57 = vld [vmem:[%s1359_s1 + $0x2c0] sm:$0xff]  ;;  %v1004_v55 = vld [vmem:[%s1359_s1 + $0x2c8] sm:$0xff] }
  0x27   :  { %1424 = vst [vmem:[#allocation63_spill] sm:$0xff] %v994_v48  ;;  %v1009_v58 = vld [vmem:[%s1359_s1 + $0x2d0] sm:$0xff]  ;;  %v1014_v56 = vld [vmem:[%s1359_s1 + $0x2d8] sm:$0xff]  ;;  %v1019_v1 = vld [vmem:[%s1359_s1 + $0x2e0] sm:$0xff] }
  0x28   :  { %1425 = vst [vmem:[#allocation64_spill] sm:$0xff] %v1019_v1  ;;  %v1024_v63 = vld [vmem:[%s1359_s1 + $0x2e8] sm:$0xff]  ;;  %v1029_v8 = vld [vmem:[%s1359_s1 + $0x2f0] sm:$0xff]  ;;  %v1034_v0 = vld [vmem:[%s1359_s1 + $0x2f8] sm:$0xff] }
  0x29   :  { %1426 = vst [vmem:[#allocation65_spill] sm:$0xff] %v1024_v63  ;;  %1427 = vst [vmem:[#allocation66_spill] sm:$0xff] %v1029_v8  ;;  %v1039_v18 = vld [vmem:[%s1359_s1 + $0x300] sm:$0xff]  ;;  %v1044_v17 = vld [vmem:[%s1359_s1 + $0x308] sm:$0xff] }
  0x2a   :  { %1428 = vst [vmem:[#allocation67_spill] sm:$0xff] %v1034_v0  ;;  %1429 = vst [vmem:[#allocation68_spill] sm:$0xff] %v1039_v18  ;;  %v1049_v16 = vld [vmem:[%s1359_s1 + $0x310] sm:$0xff]  ;;  %v1054_v15 = vld [vmem:[%s1359_s1 + $0x318] sm:$0xff] }
  0x2b   :  { %1430 = vst [vmem:[#allocation69_spill] sm:$0xff] %v1044_v17  ;;  %1431 = vst [vmem:[#allocation70_spill] sm:$0xff] %v1049_v16  ;;  %v1059_v34 = vld [vmem:[%s1359_s1 + $0x320] sm:$0xff]  ;;  %v1064_v33 = vld [vmem:[%s1359_s1 + $0x328] sm:$0xff] }
  0x2c   :  { %1432 = vst [vmem:[#allocation71_spill] sm:$0xff] %v1054_v15  ;;  %1433 = vst [vmem:[#allocation72_spill] sm:$0xff] %v1059_v34  ;;  %v1069_v32 = vld [vmem:[%s1359_s1 + $0x330] sm:$0xff]  ;;  %v1074_v31 = vld [vmem:[%s1359_s1 + $0x338] sm:$0xff] }
  0x2d   :  { %1434 = vst [vmem:[#allocation73_spill] sm:$0xff] %v1064_v33  ;;  %1435 = vst [vmem:[#allocation74_spill] sm:$0xff] %v1069_v32  ;;  %v1079_v50 = vld [vmem:[%s1359_s1 + $0x340] sm:$0xff]  ;;  %v1084_v49 = vld [vmem:[%s1359_s1 + $0x348] sm:$0xff] }
  0x2e   :  { %1436 = vst [vmem:[#allocation75_spill] sm:$0xff] %v1074_v31  ;;  %v1089_v48 = vld [vmem:[%s1359_s1 + $0x350] sm:$0xff]  ;;  %v1094_v47 = vld [vmem:[%s1359_s1 + $0x358] sm:$0xff]  ;;  %v1099_v8 = vld [vmem:[%s1359_s1 + $0x360] sm:$0xff] }
  0x2f   :  { %1437 = vst [vmem:[#allocation76_spill] sm:$0xff] %v1099_v8  ;;  %v1104_v1 = vld [vmem:[%s1359_s1 + $0x368] sm:$0xff]  ;;  %v1109_v0 = vld [vmem:[%s1359_s1 + $0x370] sm:$0xff]  ;;  %v1114_v63 = vld [vmem:[%s1359_s1 + $0x378] sm:$0xff] }
  0x30   :  { %1438 = vst [vmem:[#allocation77_spill] sm:$0xff] %v1104_v1  ;;  %1439 = vst [vmem:[#allocation78_spill] sm:$0xff] %v1109_v0  ;;  %v1119_v32 = vld [vmem:[%s1359_s1 + $0x380] sm:$0xff]  ;;  %v1124_v34 = vld [vmem:[%s1359_s1 + $0x388] sm:$0xff] }
  0x31   :  { %1440 = vst [vmem:[#allocation79_spill] sm:$0xff] %v1114_v63  ;;  %v1129_v31 = vld [vmem:[%s1359_s1 + $0x390] sm:$0xff]  ;;  %v1134_v33 = vld [vmem:[%s1359_s1 + $0x398] sm:$0xff]  ;;  %v1139_v0 = vld [vmem:[%s1359_s1 + $0x3a0] sm:$0xff] }
  0x32   :  { %1441 = vst [vmem:[#allocation80_spill] sm:$0xff] %v1139_v0  ;;  %v1144_v8 = vld [vmem:[%s1359_s1 + $0x3a8] sm:$0xff]  ;;  %v1149_v63 = vld [vmem:[%s1359_s1 + $0x3b0] sm:$0xff]  ;;  %v1154_v1 = vld [vmem:[%s1359_s1 + $0x3b8] sm:$0xff] }
  0x33   :  { %1442 = vst [vmem:[#allocation81_spill] sm:$0xff] %v1144_v8  ;;  %1443 = vst [vmem:[#allocation82_spill] sm:$0xff] %v1149_v63  ;;  %v1159_v4 = vld [vmem:[%s1359_s1 + $0x3c0] sm:$0xff]  ;;  %v1164_v0 = vld [vmem:[%s1359_s1 + $0x3c8] sm:$0xff] }
  0x34   :  { %1444 = vst [vmem:[#allocation83_spill] sm:$0xff] %v1154_v1  ;;  %1445 = vst [vmem:[#allocation84_spill] sm:$0xff] %v1159_v4  ;;  %v1169_v8 = vld [vmem:[%s1359_s1 + $0x3d0] sm:$0xff]  ;;  %v1174_v63 = vld [vmem:[%s1359_s1 + $0x3d8] sm:$0xff] }
  0x35   :  { %1446 = vst [vmem:[#allocation85_spill] sm:$0xff] %v1164_v0  ;;  %1447 = vst [vmem:[#allocation86_spill] sm:$0xff] %v1169_v8  ;;  %v1179_v1 = vld [vmem:[%s1359_s1 + $0x3e0] sm:$0xff]  ;;  %v1184_v2 = vld [vmem:[%s1359_s1 + $0x3e8] sm:$0xff] }
  0x36   :  { %1448 = vst [vmem:[#allocation87_spill] sm:$0xff] %v1179_v1  ;;  %1449 = vst [vmem:[#allocation88_spill] sm:$0xff] %v1184_v2  ;;  %v1189_v5 = vld [vmem:[%s1359_s1 + $0x3f0] sm:$0xff]  ;;  %v1194_v3 = vld [vmem:[%s1359_s1 + $0x3f8] sm:$0xff] }
  0x37   :  { %1450 = vst [vmem:[#allocation89_spill] sm:$0xff] %v1189_v5  ;;  %1451 = vst [vmem:[#allocation90_spill] sm:$0xff] %v1194_v3 }
  0x38 LB: > { %222 = vmatprep.subr.mxu1 %v1174_v63  ;;  %v1455_v17 = vld [vmem:[#allocation69_spill] sm:$0xff]  ;;  %v1456_v15 = vld [vmem:[#allocation71_spill] sm:$0xff]  ;;  %v1457_v18 = vld [vmem:[#allocation68_spill] sm:$0xff]  ;;  %s501_s1 = sshll.u32 %s534_s13, 5  ;;  %s500_s17 = sshll.u32 %s534_s13, 3  ;;  %s534_s13 = sphi %s1196_s13, %s149_s13  }
  0x39   : > { %v1458_v16 = vld [vmem:[#allocation70_spill] sm:$0xff]  ;;  %v1459_v6 = vld [vmem:[#allocation49_spill] sm:$0xff]  ;;  %v1460_v7 = vld [vmem:[#allocation51_spill] sm:$0xff]  ;;  %s443_s16 = scalar_lea.vmem %s1358_s0, %s501_s1  ;;  %s480_s20 = scalar_lea.vmem %s1360_s2, %s500_s17 }
  0x3a   : > { %v1461_v9 = vld [vmem:[#allocation48_spill] sm:$0xff]  ;;  %v1462_v10 = vld [vmem:[#allocation50_spill] sm:$0xff]  ;;  %v1464_v19 = vld [vmem:[#allocation21_spill] sm:$0xff]  ;;  %s149_s13 = sadd.s32 1, %s534_s13  }
  0x3b   : > { %v1453_v4 = vld [vmem:[#allocation84_spill] sm:$0xff]  ;;  %v1463_v20 = vld [vmem:[#allocation22_spill] sm:$0xff]  ;;  %v1465_v21 = vld [vmem:[#allocation23_spill] sm:$0xff]  ;;  %p146_p0 = scmp.ge.s32.totalorder %s149_s13, 50  }
  0x3c   : > { %v1452_v0 = vld [vmem:[#allocation85_spill] sm:$0xff]  ;;  %v1454_v8 = vld [vmem:[#allocation86_spill] sm:$0xff]  ;;  %v1467_v14 = vld [vmem:[#allocation16_spill] sm:$0xff] }
  0x3d   : > { %151 = vmatprep.subr.mxu0 %v1452_v0  ;;  %223 = vmatpush1.msra.mxu1 %v1454_v8  ;;  %v1466_v12 = vld [vmem:[#allocation14_spill] sm:$0xff]  ;;  %v1468_v11 = vld [vmem:[#allocation13_spill] sm:$0xff]  ;;  %v1469_v13 = vld [vmem:[#allocation15_spill] sm:$0xff]  ;;  %v1363_v8 = vmov 0.0  }
  0x3e   : > { %152 = vmatpush1.msra.mxu0 %v1453_v4  ;;  %224 = vmatprep.subr.mxu1 %v1134_v33  ;;  %v1261_v0 = vld [vmem:[#allocation2] sm:$0xff]  ;;  %v1470_v4 = vld [vmem:[#allocation5_spill] sm:$0xff]  ;;  %v1474_v2 = vld [vmem:[#allocation88_spill] sm:$0xff] }
  0x3f   : > { %153 = vmatprep.subr.mxu0 %v1124_v34  ;;  %225 = vmatpush1.msra.mxu1 %v1129_v31  ;;  %v1475_v3 = vld [vmem:[#allocation90_spill] sm:$0xff]  ;;  %v1476_v1 = vld [vmem:[#allocation87_spill] sm:$0xff]  ;;  %v1477_v5 = vld [vmem:[#allocation89_spill] sm:$0xff] }
  0x40   : > { %154 = vmatpush1.msra.mxu0 %v1119_v32  ;;  %226 = vmatprep.subr.mxu1 %v1094_v47 }
  0x41   : > { %155 = vmatprep.subr.mxu0 %v1084_v49  ;;  %227 = vmatpush1.msra.mxu1 %v1089_v48 }
  0x42   : > { %156 = vmatpush1.msra.mxu0 %v1079_v50  ;;  %228 = vmatprep.subr.mxu1 %v1456_v15 }
  0x43   : > { %157 = vmatprep.subr.mxu0 %v1455_v17  ;;  %229 = vmatpush1.msra.mxu1 %v1458_v16 }
  0x44   : > { %158 = vmatpush1.msra.mxu0 %v1457_v18  ;;  %230 = vmatprep.subr.mxu1 %v1014_v56  ;;  %v447_v18 = vld [vmem:[%s443_s16 + $0x18] sm:$0xff] }
  0x45   : > { %159 = vmatprep.subr.mxu0 %v1004_v55  ;;  %231 = vmatpush1.msra.mxu1 %v1009_v58 }
  0x46   : > { %160 = vmatpush1.msra.mxu0 %v999_v57  ;;  %232 = vmatprep.subr.mxu1 %v974_v40 }
  0x47   : > { %161 = vmatprep.subr.mxu0 %v964_v39  ;;  %233 = vmatpush1.msra.mxu1 %v969_v42 }
  0x48   : > { %162 = vmatpush1.msra.mxu0 %v959_v41  ;;  %234 = vmatprep.subr.mxu1 %v934_v24 }
  0x49   : > { %163 = vmatprep.subr.mxu0 %v924_v23  ;;  %235 = vmatpush1.msra.mxu1 %v929_v26 }
  0x4a   : > { %164 = vmatpush1.msra.mxu0 %v919_v25  ;;  %236 = vmatprep.subr.mxu1 %v1460_v7  ;;  %v1472_v7 = vld [vmem:[#allocation4_spill] sm:$0xff] }
  0x4b   : > { %165 = vmatprep.subr.mxu0 %v1459_v6  ;;  %237 = vmatpush1.msra.mxu1 %v1462_v10  ;;  %v1471_v6 = vld [vmem:[#allocation7_spill] sm:$0xff]  ;;  %v1482_v10 = vld [vmem:[#allocation77_spill] sm:$0xff] }
  0x4c   : > { %166 = vmatpush1.msra.mxu0 %v1461_v9  ;;  %238 = vmatprep.subr.mxu1 %v854_v62  ;;  %v1473_v9 = vld [vmem:[#allocation6_spill] sm:$0xff] }
  0x4d   : > { %167 = vmatprep.subr.mxu0 %v844_v60  ;;  %239 = vmatpush1.msra.mxu1 %v849_v61 }
  0x4e   : > { %168 = vmatpush1.msra.mxu0 %v839_v59  ;;  %240 = vmatprep.subr.mxu1 %v814_v54 }
  0x4f   : > { %169 = vmatprep.subr.mxu0 %v804_v52  ;;  %241 = vmatpush1.msra.mxu1 %v809_v53 }
  0x50   : > { %170 = vmatpush1.msra.mxu0 %v799_v51  ;;  %242 = vmatprep.subr.mxu1 %v774_v46 }
  0x51   : > { %171 = vmatprep.subr.mxu0 %v764_v44  ;;  %243 = vmatpush1.msra.mxu1 %v769_v45 }
  0x52   : > { %172 = vmatpush1.msra.mxu0 %v759_v43  ;;  %244 = vmatprep.subr.mxu1 %v734_v38 }
  0x53   : > { %173 = vmatprep.subr.mxu0 %v724_v36  ;;  %245 = vmatpush1.msra.mxu1 %v729_v37 }
  0x54   : > { %174 = vmatpush1.msra.mxu0 %v719_v35  ;;  %246 = vmatprep.subr.mxu1 %v694_v30 }
  0x55   : > { %175 = vmatprep.subr.mxu0 %v684_v28  ;;  %247 = vmatpush1.msra.mxu1 %v689_v29 }
  0x56   : > { %176 = vmatpush1.msra.mxu0 %v679_v27  ;;  %248 = vmatprep.subr.mxu1 %v654_v22 }
  0x57   : > { %177 = vmatprep.subr.mxu0 %v1463_v20  ;;  %249 = vmatpush1.msra.mxu1 %v1465_v21 }
  0x58   : > { %178 = vmatpush1.msra.mxu0 %v1464_v19  ;;  %250 = vmatprep.subr.mxu1 %v1467_v14 }
  0x59   : > { %179 = vmatprep.subr.mxu0 %v1466_v12  ;;  %251 = vmatpush1.msra.mxu1 %v1469_v13 }
  0x5a   : > { %180 = vmatpush1.msra.mxu0 %v1468_v11  ;;  %252 = vmatprep.subr.mxu1 %v1471_v6  ;;  %v1479_v6 = vld [vmem:[#allocation83_spill] sm:$0xff]  ;;  %v1486_v11 = vld [vmem:[#allocation73_spill] sm:$0xff] }
  0x5b   : > { %181 = vmatprep.subr.mxu0 %v1470_v4  ;;  %215 = vmatprep.mubr.f32.mxu0 %v1363_v8  ;;  %v1478_v4 = vld [vmem:[#allocation81_spill] sm:$0xff] }
  0x5c   : > { %182 = vmatpush1.msra.mxu0 %v1472_v7  ;;  %253 = vmatpush1.msra.mxu1 %v1473_v9  ;;  %v1480_v7 = vld [vmem:[#allocation80_spill] sm:$0xff]  ;;  %v1481_v9 = vld [vmem:[#allocation82_spill] sm:$0xff] }
  0x5d   : > { %216 = vmatmul.mubr.f32.vlgmr.msra.gmra.mxu0 %v1261_v0  ;;  %286 = vmatprep.mubr.f32.mxu1 %v1363_v8  ;;  %v1483_v8 = vld [vmem:[#allocation79_spill] sm:$0xff] }
  0x5e   : > { %293 = vmatprep.subr.mxu0 %v1474_v2  ;;  %364 = vmatprep.subr.mxu1 %v1475_v3  ;;  %v1484_v2 = vld [vmem:[#allocation76_spill] sm:$0xff]  ;;  %v1485_v3 = vld [vmem:[#allocation78_spill] sm:$0xff] }
  0x5f   : > { %287 = vmatmul.mubr.f32.vlgmr.msra.gmra.mxu1 %v1261_v0  ;;  %294 = vmatpush1.msra.mxu0 %v1476_v1  ;;  %v1487_v1 = vld [vmem:[#allocation75_spill] sm:$0xff] }
  0x60   : > { %365 = vmatpush1.msra.mxu1 %v1477_v5  ;;  %295 = vmatprep.subr.mxu0 %v1478_v4  ;;  %v1488_v5 = vld [vmem:[#allocation72_spill] sm:$0xff]  ;;  %v1489_v4 = vld [vmem:[#allocation74_spill] sm:$0xff] }
  0x61   : > { %366 = vmatprep.subr.mxu1 %v1479_v6  ;;  %296 = vmatpush1.msra.mxu0 %v1480_v7  ;;  %v1490_v6 = vld [vmem:[#allocation65_spill] sm:$0xff]  ;;  %v1491_v7 = vld [vmem:[#allocation67_spill] sm:$0xff] }
  0x62   : > { %367 = vmatpush1.msra.mxu1 %v1481_v9  ;;  %297 = vmatprep.subr.mxu0 %v1482_v10  ;;  %v1492_v9 = vld [vmem:[#allocation64_spill] sm:$0xff]  ;;  %v1493_v10 = vld [vmem:[#allocation66_spill] sm:$0xff] }
  0x63   : > { %368 = vmatprep.subr.mxu1 %v1483_v8  ;;  %298 = vmatpush1.msra.mxu0 %v1484_v2  ;;  %v1494_v8 = vld [vmem:[#allocation61_spill] sm:$0xff]  ;;  %v1495_v2 = vld [vmem:[#allocation63_spill] sm:$0xff] }
  0x64   : > { %369 = vmatpush1.msra.mxu1 %v1485_v3  ;;  %299 = vmatprep.subr.mxu0 %v1486_v11  ;;  %v1496_v3 = vld [vmem:[#allocation60_spill] sm:$0xff]  ;;  %v1497_v11 = vld [vmem:[#allocation62_spill] sm:$0xff] }
  0x65   : > { %370 = vmatprep.subr.mxu1 %v1487_v1  ;;  %300 = vmatpush1.msra.mxu0 %v1488_v5  ;;  %v1498_v1 = vld [vmem:[#allocation57_spill] sm:$0xff]  ;;  %v1499_v5 = vld [vmem:[#allocation59_spill] sm:$0xff] }
  0x66   : > { %371 = vmatpush1.msra.mxu1 %v1489_v4  ;;  %301 = vmatprep.subr.mxu0 %v1490_v6  ;;  %v1500_v4 = vld [vmem:[#allocation56_spill] sm:$0xff]  ;;  %v1501_v6 = vld [vmem:[#allocation58_spill] sm:$0xff] }
  0x67   : > { %372 = vmatprep.subr.mxu1 %v1491_v7  ;;  %302 = vmatpush1.msra.mxu0 %v1492_v9  ;;  %v1502_v7 = vld [vmem:[#allocation53_spill] sm:$0xff]  ;;  %v1503_v9 = vld [vmem:[#allocation55_spill] sm:$0xff] }
  0x68   : > { %373 = vmatpush1.msra.mxu1 %v1493_v10  ;;  %303 = vmatprep.subr.mxu0 %v1494_v8  ;;  %v1504_v10 = vld [vmem:[#allocation52_spill] sm:$0xff]  ;;  %v1505_v8 = vld [vmem:[#allocation54_spill] sm:$0xff] }
  0x69   : > { %374 = vmatprep.subr.mxu1 %v1495_v2  ;;  %304 = vmatpush1.msra.mxu0 %v1496_v3  ;;  %v1506_v2 = vld [vmem:[#allocation45_spill] sm:$0xff]  ;;  %v1507_v3 = vld [vmem:[#allocation47_spill] sm:$0xff] }
  0x6a   : > { %375 = vmatpush1.msra.mxu1 %v1497_v11  ;;  %305 = vmatprep.subr.mxu0 %v1498_v1  ;;  %v1508_v11 = vld [vmem:[#allocation44_spill] sm:$0xff]  ;;  %v1509_v1 = vld [vmem:[#allocation46_spill] sm:$0xff] }
  0x6b   : > { %376 = vmatprep.subr.mxu1 %v1499_v5  ;;  %306 = vmatpush1.msra.mxu0 %v1500_v4  ;;  %v1510_v5 = vld [vmem:[#allocation41_spill] sm:$0xff]  ;;  %v1511_v4 = vld [vmem:[#allocation43_spill] sm:$0xff] }
  0x6c   : > { %377 = vmatpush1.msra.mxu1 %v1501_v6  ;;  %307 = vmatprep.subr.mxu0 %v1502_v7  ;;  %v1512_v6 = vld [vmem:[#allocation40_spill] sm:$0xff]  ;;  %v1513_v7 = vld [vmem:[#allocation42_spill] sm:$0xff] }
  0x6d   : > { %378 = vmatprep.subr.mxu1 %v1503_v9  ;;  %308 = vmatpush1.msra.mxu0 %v1504_v10  ;;  %v1514_v9 = vld [vmem:[#allocation37_spill] sm:$0xff]  ;;  %v1515_v10 = vld [vmem:[#allocation39_spill] sm:$0xff] }
  0x6e   : > { %379 = vmatpush1.msra.mxu1 %v1505_v8  ;;  %309 = vmatprep.subr.mxu0 %v1506_v2  ;;  %v1516_v8 = vld [vmem:[#allocation36_spill] sm:$0xff]  ;;  %v1517_v2 = vld [vmem:[#allocation38_spill] sm:$0xff] }
  0x6f   : > { %380 = vmatprep.subr.mxu1 %v1507_v3  ;;  %310 = vmatpush1.msra.mxu0 %v1508_v11  ;;  %v1518_v3 = vld [vmem:[#allocation33_spill] sm:$0xff]  ;;  %v1519_v11 = vld [vmem:[#allocation35_spill] sm:$0xff] }
  0x70   : > { %381 = vmatpush1.msra.mxu1 %v1509_v1  ;;  %311 = vmatprep.subr.mxu0 %v1510_v5  ;;  %v1520_v1 = vld [vmem:[#allocation32_spill] sm:$0xff]  ;;  %v1521_v5 = vld [vmem:[#allocation34_spill] sm:$0xff] }
  0x71   : > { %382 = vmatprep.subr.mxu1 %v1511_v4  ;;  %312 = vmatpush1.msra.mxu0 %v1512_v6  ;;  %v1522_v4 = vld [vmem:[#allocation29_spill] sm:$0xff]  ;;  %v1523_v6 = vld [vmem:[#allocation31_spill] sm:$0xff] }
  0x72   : > { %383 = vmatpush1.msra.mxu1 %v1513_v7  ;;  %313 = vmatprep.subr.mxu0 %v1514_v9  ;;  %v1524_v7 = vld [vmem:[#allocation28_spill] sm:$0xff]  ;;  %v1525_v9 = vld [vmem:[#allocation30_spill] sm:$0xff] }
  0x73   : > { %384 = vmatprep.subr.mxu1 %v1515_v10  ;;  %314 = vmatpush1.msra.mxu0 %v1516_v8  ;;  %v1526_v10 = vld [vmem:[#allocation25_spill] sm:$0xff]  ;;  %v1527_v8 = vld [vmem:[#allocation27_spill] sm:$0xff] }
  0x74   : > { %385 = vmatpush1.msra.mxu1 %v1517_v2  ;;  %315 = vmatprep.subr.mxu0 %v1518_v3  ;;  %v1528_v2 = vld [vmem:[#allocation24_spill] sm:$0xff]  ;;  %v1529_v3 = vld [vmem:[#allocation26_spill] sm:$0xff] }
  0x75   : > { %386 = vmatprep.subr.mxu1 %v1519_v11  ;;  %316 = vmatpush1.msra.mxu0 %v1520_v1  ;;  %v1530_v11 = vld [vmem:[#allocation18_spill] sm:$0xff]  ;;  %v1531_v1 = vld [vmem:[#allocation20_spill] sm:$0xff] }
  0x76   : > { %387 = vmatpush1.msra.mxu1 %v1521_v5  ;;  %317 = vmatprep.subr.mxu0 %v1522_v4  ;;  %v1532_v5 = vld [vmem:[#allocation17_spill] sm:$0xff]  ;;  %v1533_v4 = vld [vmem:[#allocation19_spill] sm:$0xff] }
  0x77   : > { %388 = vmatprep.subr.mxu1 %v1523_v6  ;;  %318 = vmatpush1.msra.mxu0 %v1524_v7  ;;  %v1534_v6 = vld [vmem:[#allocation9_spill] sm:$0xff]  ;;  %v1535_v7 = vld [vmem:[#allocation12_spill] sm:$0xff] }
  0x78   : > { %389 = vmatpush1.msra.mxu1 %v1525_v9  ;;  %319 = vmatprep.subr.mxu0 %v1526_v10  ;;  %v1536_v9 = vld [vmem:[#allocation8_spill] sm:$0xff]  ;;  %v1537_v10 = vmov 0.0  }
  0x79   : > { %390 = vmatprep.subr.mxu1 %v1527_v8  ;;  %320 = vmatpush1.msra.mxu0 %v1528_v2  ;;  %v1538_v8 = vld [vmem:[#allocation11_spill] sm:$0xff] }
  0x7a   : > { %391 = vmatpush1.msra.mxu1 %v1529_v3  ;;  %321 = vmatprep.subr.mxu0 %v1530_v11 }
  0x7b   : > { %392 = vmatprep.subr.mxu1 %v1531_v1  ;;  %322 = vmatpush1.msra.mxu0 %v1532_v5  ;;  %v444_v1 = vld [vmem:[%s443_s16] sm:$0xff] }
  0x7c   : > { %393 = vmatpush1.msra.mxu1 %v1533_v4  ;;  %323 = vmatprep.subr.mxu0 %v1534_v6 }
  0x7d   : > { %394 = vmatprep.subr.mxu1 %v1535_v7  ;;  %324 = vmatpush1.msra.mxu0 %v1536_v9  ;;  %v445_v9 = vld [vmem:[%s443_s16 + $0x8] sm:$0xff] }
  0x7e   : > { %357 = vmatprep.mubr.f32.mxu0 %v1537_v10  ;;  %395 = vmatpush1.msra.mxu1 %v1538_v8 }
  0x7f   : > { %428 = vmatprep.mubr.f32.mxu1 %v1537_v10  ;;  %358 = vmatmul.mubr.f32.vlgmr.msra.gmra.mxu0 %v1261_v0 }
  0x80   : > { %429 = vmatmul.mubr.f32.vlgmr.msra.gmra.mxu1 %v1261_v0 }
 0x11d   : > { %v217_v2 = vpop.f32.mrf.mxu0 }
 0x11f   : > { %v288_v3 = vpop.f32.mrf.mxu1  ;;  %v219_v11 = vpop.f32.mrf.mxu0 }
 0x121   : > { %v290_v4 = vpop.f32.mrf.mxu1 }
 0x13f   : > { %v359_v5 = vpop.f32.mrf.mxu0 }
 0x140   : > { %v437_v7 = vsel %vm143_vm0, %v359_v5, %v217_v2  ;;  %v430_v12 = vpop.f32.mrf.mxu1 }
 0x141   : > { %v448_v10 = vadd.f32 %v444_v1, %v437_v7  ;;  %v361_v8 = vpop.f32.mrf.mxu0  ;;  %v439_v2 = vsel %vm143_vm0, %v430_v12, %v288_v3  ;;  %v446_v1 = vld [vmem:[%s443_s16 + $0x10] sm:$0xff] }
 0x142   : > { %v438_v0 = vsel %vm143_vm0, %v361_v8, %v219_v11  ;;  %v432_v16 = vpop.f32.mrf.mxu1  ;;  %v450_v20 = vadd.f32 %v446_v1, %v439_v2 }
 0x143   : > { %v497_v13 = vmul.f32 -1.442695, %v448_v10  ;;  %v449_v14 = vadd.f32 %v445_v9, %v438_v0  ;;  %v440_v17 = vsel %vm143_vm0, %v432_v16, %v290_v4  ;;  %v471_v16 = vld [vmem:[#allocation3] sm:$0xff] }
 0x144   : > { %v451_v19 = vadd.f32 %v447_v18, %v440_v17 }
 0x145   : > { %512 = vpow2.f32 %v497_v13  ;;  %v498_v15 = vmul.f32 -1.442695, %v449_v14 }
 0x146   : > { %v499_v5 = vmul.f32 -1.442695, %v451_v19 }
 0x147   : > { %514 = vpow2.f32 %v498_v15 }
 0x148   : > { %516 = vpow2.f32 %v499_v5 }
 0x152   : > { %v513_v7 = vpop.eup %512 }
 0x153   : > { %v455_v21 = vadd.f32 1.0, %v513_v7 }
 0x154   : > { %v515_v11 = vpop.eup %514 }
 0x155   : > { %518 = vrcp.f32 %v455_v21  ;;  %v461_v13 = vadd.f32 1.0, %v515_v11  ;;  %v517_v14 = vpop.eup %516 }
 0x156   : > { %520 = vtanh.f32 %v450_v20  ;;  %v468_v18 = vadd.f32 1.0, %v517_v14 }
 0x157   : > { %522 = vrcp.f32 %v461_v13 }
 0x158   : > { %524 = vrcp.f32 %v468_v18 }
 0x162   : > { %v519_v15 = vpop.eup %518 }
 0x163   : > { %v521_v4 = vpop.eup %520 }
 0x164   : > { %v523_v17 = vpop.eup %522  ;;  %v473_v9 = vmul.f32 %v521_v4, %v519_v15 }
 0x165   : > { %v472_v12 = vmul.f32 %v523_v17, %v471_v16  ;;  %v525_v19 = vpop.eup %524 }
 0x167   : > { %v474_v3 = vadd.f32 %v473_v9, %v472_v12 }
 0x169   : > { %526 = vtanh.f32 %v474_v3  ;;  %477 = vst [vmem:[#allocation3] sm:$0xff] %v474_v3 }
 0x175   :  { %148 = sbr.rel (!%p146_p0) target bundleno = 56 (0x38), region = 37 }
 0x176   : > { %v527_v10 = vpop.eup %526 }
 0x177   : > { %v476_v20 = vmul.f32 %v527_v10, %v525_v19 }
 0x179   : > { %478 = vst [vmem:[#allocation2] sm:$0xff] %v476_v20  ;;  %481 = vst [vmem:[%s480_s20] sm:$0xff] %v476_v20 }

// kernel: cnn_lstm2_forward.10
= control target key start
LH: loop header
LB: loop body
LE: loop exit
PB: predicated region body
PF: predicated region fallthrough
CT: control target
= control target key end

     0   :  { %s3503_s1 = inlined_call_operand.vmem [shape: f32[256,1024], index: 1, kind: input, shape index: {}]   ;;  %s3504_s0 = inlined_call_operand.vmem [shape: f32[200,256], index: 0, kind: input, shape index: {}]   ;;  %s3505_s2 = inlined_call_operand.vmem [shape: f32[1,1024], index: 2, kind: input, shape index: {}]   ;;  %s3506_s3 = inlined_call_operand.vmem [shape: f32[200,1024], index: 3, kind: output, shape index: {}]  }
   0x1   :  { %v185_v0 = vld [vmem:[%s3503_s1 + $0x3c8] sm:$0xff]  ;;  %v187_v1 = vld [vmem:[%s3503_s1 + $0x3d8] sm:$0xff]  ;;  %v184_v2 = vld [vmem:[%s3503_s1 + $0x3c0] sm:$0xff] }
   0x2   :  { %362 = vmatprep.subr.mxu0 %v185_v0  ;;  %577 = vmatprep.subr.mxu1 %v187_v1  ;;  %v186_v3 = vld [vmem:[%s3503_s1 + $0x3d0] sm:$0xff]  ;;  %v177_v4 = vld [vmem:[%s3503_s1 + $0x388] sm:$0xff]  ;;  %v179_v5 = vld [vmem:[%s3503_s1 + $0x398] sm:$0xff] }
   0x3   :  { %363 = vmatpush1.msra.mxu0 %v184_v2  ;;  %578 = vmatpush1.msra.mxu1 %v186_v3  ;;  %v176_v6 = vld [vmem:[%s3503_s1 + $0x380] sm:$0xff]  ;;  %v178_v7 = vld [vmem:[%s3503_s1 + $0x390] sm:$0xff]  ;;  %v169_v8 = vld [vmem:[%s3503_s1 + $0x348] sm:$0xff] }
   0x4   :  { %364 = vmatprep.subr.mxu0 %v177_v4  ;;  %579 = vmatprep.subr.mxu1 %v179_v5  ;;  %v171_v9 = vld [vmem:[%s3503_s1 + $0x358] sm:$0xff]  ;;  %v168_v10 = vld [vmem:[%s3503_s1 + $0x340] sm:$0xff]  ;;  %v170_v11 = vld [vmem:[%s3503_s1 + $0x350] sm:$0xff] }
   0x5   :  { %365 = vmatpush1.msra.mxu0 %v176_v6  ;;  %580 = vmatpush1.msra.mxu1 %v178_v7  ;;  %v161_v12 = vld [vmem:[%s3503_s1 + $0x308] sm:$0xff]  ;;  %v163_v13 = vld [vmem:[%s3503_s1 + $0x318] sm:$0xff]  ;;  %v160_v14 = vld [vmem:[%s3503_s1 + $0x300] sm:$0xff] }
   0x6   :  { %366 = vmatprep.subr.mxu0 %v169_v8  ;;  %581 = vmatprep.subr.mxu1 %v171_v9  ;;  %v162_v15 = vld [vmem:[%s3503_s1 + $0x310] sm:$0xff]  ;;  %v153_v16 = vld [vmem:[%s3503_s1 + $0x2c8] sm:$0xff]  ;;  %v155_v17 = vld [vmem:[%s3503_s1 + $0x2d8] sm:$0xff] }
   0x7   :  { %367 = vmatpush1.msra.mxu0 %v168_v10  ;;  %582 = vmatpush1.msra.mxu1 %v170_v11  ;;  %v152_v18 = vld [vmem:[%s3503_s1 + $0x2c0] sm:$0xff]  ;;  %v154_v19 = vld [vmem:[%s3503_s1 + $0x2d0] sm:$0xff]  ;;  %v145_v20 = vld [vmem:[%s3503_s1 + $0x288] sm:$0xff] }
   0x8   :  { %368 = vmatprep.subr.mxu0 %v161_v12  ;;  %583 = vmatprep.subr.mxu1 %v163_v13  ;;  %v147_v21 = vld [vmem:[%s3503_s1 + $0x298] sm:$0xff]  ;;  %v144_v22 = vld [vmem:[%s3503_s1 + $0x280] sm:$0xff]  ;;  %v146_v23 = vld [vmem:[%s3503_s1 + $0x290] sm:$0xff] }
   0x9   :  { %369 = vmatpush1.msra.mxu0 %v160_v14  ;;  %584 = vmatpush1.msra.mxu1 %v162_v15  ;;  %v137_v24 = vld [vmem:[%s3503_s1 + $0x248] sm:$0xff]  ;;  %v139_v25 = vld [vmem:[%s3503_s1 + $0x258] sm:$0xff]  ;;  %v136_v26 = vld [vmem:[%s3503_s1 + $0x240] sm:$0xff] }
   0xa   :  { %370 = vmatprep.subr.mxu0 %v153_v16  ;;  %585 = vmatprep.subr.mxu1 %v155_v17  ;;  %v138_v27 = vld [vmem:[%s3503_s1 + $0x250] sm:$0xff]  ;;  %v129_v28 = vld [vmem:[%s3503_s1 + $0x208] sm:$0xff]  ;;  %v131_v29 = vld [vmem:[%s3503_s1 + $0x218] sm:$0xff] }
   0xb   :  { %371 = vmatpush1.msra.mxu0 %v152_v18  ;;  %586 = vmatpush1.msra.mxu1 %v154_v19  ;;  %v128_v30 = vld [vmem:[%s3503_s1 + $0x200] sm:$0xff]  ;;  %v130_v31 = vld [vmem:[%s3503_s1 + $0x210] sm:$0xff]  ;;  %v121_v32 = vld [vmem:[%s3503_s1 + $0x1c8] sm:$0xff] }
   0xc   :  { %372 = vmatprep.subr.mxu0 %v145_v20  ;;  %587 = vmatprep.subr.mxu1 %v147_v21  ;;  %v123_v33 = vld [vmem:[%s3503_s1 + $0x1d8] sm:$0xff]  ;;  %v120_v34 = vld [vmem:[%s3503_s1 + $0x1c0] sm:$0xff]  ;;  %v122_v35 = vld [vmem:[%s3503_s1 + $0x1d0] sm:$0xff] }
   0xd   :  { %373 = vmatpush1.msra.mxu0 %v144_v22  ;;  %588 = vmatpush1.msra.mxu1 %v146_v23  ;;  %v113_v36 = vld [vmem:[%s3503_s1 + $0x188] sm:$0xff]  ;;  %v115_v37 = vld [vmem:[%s3503_s1 + $0x198] sm:$0xff]  ;;  %v112_v38 = vld [vmem:[%s3503_s1 + $0x180] sm:$0xff] }
   0xe   :  { %374 = vmatprep.subr.mxu0 %v137_v24  ;;  %589 = vmatprep.subr.mxu1 %v139_v25  ;;  %v114_v39 = vld [vmem:[%s3503_s1 + $0x190] sm:$0xff]  ;;  %v105_v40 = vld [vmem:[%s3503_s1 + $0x148] sm:$0xff]  ;;  %v107_v41 = vld [vmem:[%s3503_s1 + $0x158] sm:$0xff] }
   0xf   :  { %375 = vmatpush1.msra.mxu0 %v136_v26  ;;  %590 = vmatpush1.msra.mxu1 %v138_v27  ;;  %v104_v42 = vld [vmem:[%s3503_s1 + $0x140] sm:$0xff]  ;;  %v106_v43 = vld [vmem:[%s3503_s1 + $0x150] sm:$0xff]  ;;  %v97_v44 = vld [vmem:[%s3503_s1 + $0x108] sm:$0xff] }
  0x10   :  { %376 = vmatprep.subr.mxu0 %v129_v28  ;;  %591 = vmatprep.subr.mxu1 %v131_v29  ;;  %v99_v45 = vld [vmem:[%s3503_s1 + $0x118] sm:$0xff]  ;;  %v96_v46 = vld [vmem:[%s3503_s1 + $0x100] sm:$0xff]  ;;  %v98_v47 = vld [vmem:[%s3503_s1 + $0x110] sm:$0xff] }
  0x11   :  { %377 = vmatpush1.msra.mxu0 %v128_v30  ;;  %592 = vmatpush1.msra.mxu1 %v130_v31  ;;  %v89_v48 = vld [vmem:[%s3503_s1 + $0xc8] sm:$0xff]  ;;  %v91_v49 = vld [vmem:[%s3503_s1 + $0xd8] sm:$0xff]  ;;  %v88_v50 = vld [vmem:[%s3503_s1 + $0xc0] sm:$0xff] }
  0x12   :  { %378 = vmatprep.subr.mxu0 %v121_v32  ;;  %593 = vmatprep.subr.mxu1 %v123_v33  ;;  %v90_v51 = vld [vmem:[%s3503_s1 + $0xd0] sm:$0xff]  ;;  %v81_v52 = vld [vmem:[%s3503_s1 + $0x88] sm:$0xff]  ;;  %v83_v53 = vld [vmem:[%s3503_s1 + $0x98] sm:$0xff] }
  0x13   :  { %379 = vmatpush1.msra.mxu0 %v120_v34  ;;  %594 = vmatpush1.msra.mxu1 %v122_v35  ;;  %v80_v54 = vld [vmem:[%s3503_s1 + $0x80] sm:$0xff]  ;;  %v82_v55 = vld [vmem:[%s3503_s1 + $0x90] sm:$0xff]  ;;  %v73_v56 = vld [vmem:[%s3503_s1 + $0x48] sm:$0xff] }
  0x14   :  { %380 = vmatprep.subr.mxu0 %v113_v36  ;;  %595 = vmatprep.subr.mxu1 %v115_v37  ;;  %v75_v57 = vld [vmem:[%s3503_s1 + $0x58] sm:$0xff]  ;;  %v72_v58 = vld [vmem:[%s3503_s1 + $0x40] sm:$0xff]  ;;  %v74_v59 = vld [vmem:[%s3503_s1 + $0x50] sm:$0xff] }
  0x15   :  { %381 = vmatpush1.msra.mxu0 %v112_v38  ;;  %596 = vmatpush1.msra.mxu1 %v114_v39  ;;  %v65_v60 = vld [vmem:[%s3503_s1 + $0x8] sm:$0xff]  ;;  %v67_v61 = vld [vmem:[%s3503_s1 + $0x18] sm:$0xff]  ;;  %v64_v62 = vld [vmem:[%s3503_s1] sm:$0xff] }
  0x16   :  { %382 = vmatprep.subr.mxu0 %v105_v40  ;;  %597 = vmatprep.subr.mxu1 %v107_v41  ;;  %v66_v63 = vld [vmem:[%s3503_s1 + $0x10] sm:$0xff]  ;;  %v313_v0 = vld [vmem:[%s3503_s1 + $0x7c8] sm:$0xff]  ;;  %v315_v1 = vld [vmem:[%s3503_s1 + $0x7d8] sm:$0xff] }
  0x17   :  { %383 = vmatpush1.msra.mxu0 %v104_v42  ;;  %598 = vmatpush1.msra.mxu1 %v106_v43  ;;  %v312_v2 = vld [vmem:[%s3503_s1 + $0x7c0] sm:$0xff]  ;;  %v314_v3 = vld [vmem:[%s3503_s1 + $0x7d0] sm:$0xff]  ;;  %v305_v4 = vld [vmem:[%s3503_s1 + $0x788] sm:$0xff] }
  0x18   :  { %384 = vmatprep.subr.mxu0 %v97_v44  ;;  %599 = vmatprep.subr.mxu1 %v99_v45  ;;  %v307_v5 = vld [vmem:[%s3503_s1 + $0x798] sm:$0xff]  ;;  %v304_v6 = vld [vmem:[%s3503_s1 + $0x780] sm:$0xff]  ;;  %v306_v7 = vld [vmem:[%s3503_s1 + $0x790] sm:$0xff] }
  0x19   :  { %385 = vmatpush1.msra.mxu0 %v96_v46  ;;  %600 = vmatpush1.msra.mxu1 %v98_v47  ;;  %v297_v8 = vld [vmem:[%s3503_s1 + $0x748] sm:$0xff]  ;;  %v299_v9 = vld [vmem:[%s3503_s1 + $0x758] sm:$0xff]  ;;  %v296_v10 = vld [vmem:[%s3503_s1 + $0x740] sm:$0xff] }
  0x1a   :  { %386 = vmatprep.subr.mxu0 %v89_v48  ;;  %601 = vmatprep.subr.mxu1 %v91_v49  ;;  %v298_v11 = vld [vmem:[%s3503_s1 + $0x750] sm:$0xff]  ;;  %v289_v12 = vld [vmem:[%s3503_s1 + $0x708] sm:$0xff]  ;;  %v291_v13 = vld [vmem:[%s3503_s1 + $0x718] sm:$0xff] }
  0x1b   :  { %387 = vmatpush1.msra.mxu0 %v88_v50  ;;  %602 = vmatpush1.msra.mxu1 %v90_v51  ;;  %v288_v14 = vld [vmem:[%s3503_s1 + $0x700] sm:$0xff]  ;;  %v290_v15 = vld [vmem:[%s3503_s1 + $0x710] sm:$0xff]  ;;  %v281_v16 = vld [vmem:[%s3503_s1 + $0x6c8] sm:$0xff] }
  0x1c   :  { %388 = vmatprep.subr.mxu0 %v81_v52  ;;  %603 = vmatprep.subr.mxu1 %v83_v53  ;;  %v283_v17 = vld [vmem:[%s3503_s1 + $0x6d8] sm:$0xff]  ;;  %v280_v18 = vld [vmem:[%s3503_s1 + $0x6c0] sm:$0xff]  ;;  %v282_v19 = vld [vmem:[%s3503_s1 + $0x6d0] sm:$0xff] }
  0x1d   :  { %389 = vmatpush1.msra.mxu0 %v80_v54  ;;  %604 = vmatpush1.msra.mxu1 %v82_v55  ;;  %v273_v20 = vld [vmem:[%s3503_s1 + $0x688] sm:$0xff]  ;;  %v275_v21 = vld [vmem:[%s3503_s1 + $0x698] sm:$0xff]  ;;  %v272_v22 = vld [vmem:[%s3503_s1 + $0x680] sm:$0xff] }
  0x1e   :  { %390 = vmatprep.subr.mxu0 %v73_v56  ;;  %605 = vmatprep.subr.mxu1 %v75_v57  ;;  %v274_v23 = vld [vmem:[%s3503_s1 + $0x690] sm:$0xff]  ;;  %v265_v24 = vld [vmem:[%s3503_s1 + $0x648] sm:$0xff]  ;;  %v267_v25 = vld [vmem:[%s3503_s1 + $0x658] sm:$0xff] }
  0x1f   :  { %391 = vmatpush1.msra.mxu0 %v72_v58  ;;  %606 = vmatpush1.msra.mxu1 %v74_v59  ;;  %v264_v26 = vld [vmem:[%s3503_s1 + $0x640] sm:$0xff]  ;;  %v266_v27 = vld [vmem:[%s3503_s1 + $0x650] sm:$0xff]  ;;  %v257_v28 = vld [vmem:[%s3503_s1 + $0x608] sm:$0xff] }
  0x20   :  { %392 = vmatprep.subr.mxu0 %v65_v60  ;;  %607 = vmatprep.subr.mxu1 %v67_v61  ;;  %v259_v29 = vld [vmem:[%s3503_s1 + $0x618] sm:$0xff]  ;;  %v256_v30 = vld [vmem:[%s3503_s1 + $0x600] sm:$0xff]  ;;  %v258_v31 = vld [vmem:[%s3503_s1 + $0x610] sm:$0xff] }
  0x21   :  { %393 = vmatpush1.msra.mxu0 %v64_v62  ;;  %608 = vmatpush1.msra.mxu1 %v66_v63  ;;  %v249_v32 = vld [vmem:[%s3503_s1 + $0x5c8] sm:$0xff]  ;;  %v251_v33 = vld [vmem:[%s3503_s1 + $0x5d8] sm:$0xff]  ;;  %v248_v34 = vld [vmem:[%s3503_s1 + $0x5c0] sm:$0xff] }
  0x22   :  { %394 = vmatprep.subr.mxu0 %v313_v0  ;;  %609 = vmatprep.subr.mxu1 %v315_v1  ;;  %v250_v35 = vld [vmem:[%s3503_s1 + $0x5d0] sm:$0xff]  ;;  %v241_v36 = vld [vmem:[%s3503_s1 + $0x588] sm:$0xff]  ;;  %v243_v37 = vld [vmem:[%s3503_s1 + $0x598] sm:$0xff] }
  0x23   :  { %395 = vmatpush2.msra.mxu0 %v312_v2  ;;  %610 = vmatpush2.msra.mxu1 %v314_v3  ;;  %v240_v38 = vld [vmem:[%s3503_s1 + $0x580] sm:$0xff]  ;;  %v242_v39 = vld [vmem:[%s3503_s1 + $0x590] sm:$0xff]  ;;  %v233_v40 = vld [vmem:[%s3503_s1 + $0x548] sm:$0xff] }
  0x24   :  { %396 = vmatprep.subr.mxu0 %v305_v4  ;;  %611 = vmatprep.subr.mxu1 %v307_v5  ;;  %v235_v41 = vld [vmem:[%s3503_s1 + $0x558] sm:$0xff]  ;;  %v232_v42 = vld [vmem:[%s3503_s1 + $0x540] sm:$0xff]  ;;  %v234_v43 = vld [vmem:[%s3503_s1 + $0x550] sm:$0xff] }
  0x25   :  { %397 = vmatpush2.msra.mxu0 %v304_v6  ;;  %612 = vmatpush2.msra.mxu1 %v306_v7  ;;  %v225_v44 = vld [vmem:[%s3503_s1 + $0x508] sm:$0xff]  ;;  %v227_v45 = vld [vmem:[%s3503_s1 + $0x518] sm:$0xff]  ;;  %v224_v46 = vld [vmem:[%s3503_s1 + $0x500] sm:$0xff] }
  0x26   :  { %398 = vmatprep.subr.mxu0 %v297_v8  ;;  %613 = vmatprep.subr.mxu1 %v299_v9  ;;  %v226_v47 = vld [vmem:[%s3503_s1 + $0x510] sm:$0xff]  ;;  %v217_v48 = vld [vmem:[%s3503_s1 + $0x4c8] sm:$0xff]  ;;  %v219_v49 = vld [vmem:[%s3503_s1 + $0x4d8] sm:$0xff] }
  0x27   :  { %399 = vmatpush2.msra.mxu0 %v296_v10  ;;  %614 = vmatpush2.msra.mxu1 %v298_v11  ;;  %v216_v50 = vld [vmem:[%s3503_s1 + $0x4c0] sm:$0xff]  ;;  %v218_v51 = vld [vmem:[%s3503_s1 + $0x4d0] sm:$0xff]  ;;  %v209_v52 = vld [vmem:[%s3503_s1 + $0x488] sm:$0xff] }
  0x28   :  { %400 = vmatprep.subr.mxu0 %v289_v12  ;;  %615 = vmatprep.subr.mxu1 %v291_v13  ;;  %v211_v53 = vld [vmem:[%s3503_s1 + $0x498] sm:$0xff]  ;;  %v208_v54 = vld [vmem:[%s3503_s1 + $0x480] sm:$0xff]  ;;  %v210_v55 = vld [vmem:[%s3503_s1 + $0x490] sm:$0xff] }
  0x29   :  { %401 = vmatpush2.msra.mxu0 %v288_v14  ;;  %616 = vmatpush2.msra.mxu1 %v290_v15  ;;  %v201_v56 = vld [vmem:[%s3503_s1 + $0x448] sm:$0xff]  ;;  %v203_v57 = vld [vmem:[%s3503_s1 + $0x458] sm:$0xff]  ;;  %v200_v58 = vld [vmem:[%s3503_s1 + $0x440] sm:$0xff] }
  0x2a   :  { %402 = vmatprep.subr.mxu0 %v281_v16  ;;  %617 = vmatprep.subr.mxu1 %v283_v17  ;;  %v202_v59 = vld [vmem:[%s3503_s1 + $0x450] sm:$0xff]  ;;  %v193_v60 = vld [vmem:[%s3503_s1 + $0x408] sm:$0xff]  ;;  %v195_v61 = vld [vmem:[%s3503_s1 + $0x418] sm:$0xff] }
  0x2b   :  { %403 = vmatpush2.msra.mxu0 %v280_v18  ;;  %618 = vmatpush2.msra.mxu1 %v282_v19  ;;  %v192_v62 = vld [vmem:[%s3503_s1 + $0x400] sm:$0xff]  ;;  %v1830_v63 = vld [vmem:[%s3504_s0 + $0x8] sm:$0xff]  ;;  %v194_v0 = vld [vmem:[%s3503_s1 + $0x410] sm:$0xff] }
  0x2c   :  { %404 = vmatprep.subr.mxu0 %v273_v20  ;;  %619 = vmatprep.subr.mxu1 %v275_v21  ;;  %v1838_v1 = vld [vmem:[%s3504_s0] sm:$0xff]  ;;  %v189_v2 = vld [vmem:[%s3503_s1 + $0x3e8] sm:$0xff]  ;;  %v191_v3 = vld [vmem:[%s3503_s1 + $0x3f8] sm:$0xff] }
  0x2d   :  { %405 = vmatpush2.msra.mxu0 %v272_v22  ;;  %620 = vmatpush2.msra.mxu1 %v274_v23  ;;  %v188_v4 = vld [vmem:[%s3503_s1 + $0x3e0] sm:$0xff]  ;;  %v190_v5 = vld [vmem:[%s3503_s1 + $0x3f0] sm:$0xff]  ;;  %v1859_v6 = vld [vmem:[%s3504_s0 + $0x18] sm:$0xff] }
  0x2e   :  { %406 = vmatprep.subr.mxu0 %v265_v24  ;;  %621 = vmatprep.subr.mxu1 %v267_v25  ;;  %v1864_v7 = vld [vmem:[%s3504_s0 + $0x10] sm:$0xff]  ;;  %v181_v8 = vld [vmem:[%s3503_s1 + $0x3a8] sm:$0xff]  ;;  %v183_v9 = vld [vmem:[%s3503_s1 + $0x3b8] sm:$0xff] }
  0x2f   :  { %407 = vmatpush2.msra.mxu0 %v264_v26  ;;  %622 = vmatpush2.msra.mxu1 %v266_v27  ;;  %v180_v10 = vld [vmem:[%s3503_s1 + $0x3a0] sm:$0xff]  ;;  %v182_v11 = vld [vmem:[%s3503_s1 + $0x3b0] sm:$0xff]  ;;  %v1885_v12 = vld [vmem:[%s3504_s0 + $0x28] sm:$0xff] }
  0x30   :  { %408 = vmatprep.subr.mxu0 %v257_v28  ;;  %623 = vmatprep.subr.mxu1 %v259_v29  ;;  %v173_v13 = vld [vmem:[%s3503_s1 + $0x368] sm:$0xff]  ;;  %v175_v14 = vld [vmem:[%s3503_s1 + $0x378] sm:$0xff]  ;;  %v1896_v15 = vld [vmem:[%s3504_s0 + $0x20] sm:$0xff] }
  0x31   :  { %409 = vmatpush2.msra.mxu0 %v256_v30  ;;  %624 = vmatpush2.msra.mxu1 %v258_v31  ;;  %v172_v16 = vld [vmem:[%s3503_s1 + $0x360] sm:$0xff]  ;;  %v174_v17 = vld [vmem:[%s3503_s1 + $0x370] sm:$0xff]  ;;  %v165_v18 = vld [vmem:[%s3503_s1 + $0x328] sm:$0xff] }
  0x32   :  { %410 = vmatprep.subr.mxu0 %v249_v32  ;;  %625 = vmatprep.subr.mxu1 %v251_v33  ;;  %v167_v19 = vld [vmem:[%s3503_s1 + $0x338] sm:$0xff]  ;;  %v164_v21 = vld [vmem:[%s3503_s1 + $0x320] sm:$0xff]  ;;  %v166_v22 = vld [vmem:[%s3503_s1 + $0x330] sm:$0xff] }
  0x33   :  { %411 = vmatpush2.msra.mxu0 %v248_v34  ;;  %626 = vmatpush2.msra.mxu1 %v250_v35  ;;  %v1917_v20 = vld [vmem:[%s3504_s0 + $0x38] sm:$0xff]  ;;  %v1928_v23 = vld [vmem:[%s3504_s0 + $0x30] sm:$0xff]  ;;  %v157_v24 = vld [vmem:[%s3503_s1 + $0x2e8] sm:$0xff] }
  0x34   :  { %412 = vmatprep.subr.mxu0 %v241_v36  ;;  %627 = vmatprep.subr.mxu1 %v243_v37  ;;  %v159_v25 = vld [vmem:[%s3503_s1 + $0x2f8] sm:$0xff]  ;;  %v156_v26 = vld [vmem:[%s3503_s1 + $0x2e0] sm:$0xff]  ;;  %v158_v27 = vld [vmem:[%s3503_s1 + $0x2f0] sm:$0xff] }
  0x35   :  { %413 = vmatpush2.msra.mxu0 %v240_v38  ;;  %628 = vmatpush2.msra.mxu1 %v242_v39  ;;  %v1949_v28 = vld [vmem:[%s3504_s0 + $0x48] sm:$0xff]  ;;  %v1954_v29 = vld [vmem:[%s3504_s0 + $0x40] sm:$0xff]  ;;  %v151_v31 = vld [vmem:[%s3503_s1 + $0x2b8] sm:$0xff] }
  0x36   :  { %414 = vmatprep.subr.mxu0 %v233_v40  ;;  %629 = vmatprep.subr.mxu1 %v235_v41  ;;  %v149_v30 = vld [vmem:[%s3503_s1 + $0x2a8] sm:$0xff]  ;;  %v148_v32 = vld [vmem:[%s3503_s1 + $0x2a0] sm:$0xff]  ;;  %v150_v33 = vld [vmem:[%s3503_s1 + $0x2b0] sm:$0xff] }
  0x37   :  { %415 = vmatpush2.msra.mxu0 %v232_v42  ;;  %630 = vmatpush2.msra.mxu1 %v234_v43  ;;  %v1975_v34 = vld [vmem:[%s3504_s0 + $0x58] sm:$0xff]  ;;  %v141_v35 = vld [vmem:[%s3503_s1 + $0x268] sm:$0xff]  ;;  %v1986_v37 = vld [vmem:[%s3504_s0 + $0x50] sm:$0xff] }
  0x38   :  { %416 = vmatprep.subr.mxu0 %v225_v44  ;;  %631 = vmatprep.subr.mxu1 %v227_v45  ;;  %v143_v36 = vld [vmem:[%s3503_s1 + $0x278] sm:$0xff]  ;;  %v140_v38 = vld [vmem:[%s3503_s1 + $0x260] sm:$0xff]  ;;  %v142_v39 = vld [vmem:[%s3503_s1 + $0x270] sm:$0xff] }
  0x39   :  { %417 = vmatpush2.msra.mxu0 %v224_v46  ;;  %632 = vmatpush2.msra.mxu1 %v226_v47  ;;  %v133_v40 = vld [vmem:[%s3503_s1 + $0x228] sm:$0xff]  ;;  %v135_v41 = vld [vmem:[%s3503_s1 + $0x238] sm:$0xff]  ;;  %v132_v43 = vld [vmem:[%s3503_s1 + $0x220] sm:$0xff] }
  0x3a   :  { %418 = vmatprep.subr.mxu0 %v217_v48  ;;  %633 = vmatprep.subr.mxu1 %v219_v49  ;;  %v2007_v42 = vld [vmem:[%s3504_s0 + $0x68] sm:$0xff]  ;;  %v134_v44 = vld [vmem:[%s3503_s1 + $0x230] sm:$0xff]  ;;  %v2018_v45 = vld [vmem:[%s3504_s0 + $0x60] sm:$0xff] }
  0x3b   :  { %419 = vmatpush2.msra.mxu0 %v216_v50  ;;  %634 = vmatpush2.msra.mxu1 %v218_v51  ;;  %v125_v46 = vld [vmem:[%s3503_s1 + $0x1e8] sm:$0xff]  ;;  %v127_v47 = vld [vmem:[%s3503_s1 + $0x1f8] sm:$0xff]  ;;  %v124_v48 = vld [vmem:[%s3503_s1 + $0x1e0] sm:$0xff] }
  0x3c   :  { %420 = vmatprep.subr.mxu0 %v209_v52  ;;  %635 = vmatprep.subr.mxu1 %v211_v53  ;;  %v126_v49 = vld [vmem:[%s3503_s1 + $0x1f0] sm:$0xff]  ;;  %v2039_v50 = vld [vmem:[%s3504_s0 + $0x78] sm:$0xff]  ;;  %v117_v52 = vld [vmem:[%s3503_s1 + $0x1a8] sm:$0xff] }
  0x3d   :  { %421 = vmatpush2.msra.mxu0 %v208_v54  ;;  %636 = vmatpush2.msra.mxu1 %v210_v55  ;;  %v2044_v51 = vld [vmem:[%s3504_s0 + $0x70] sm:$0xff]  ;;  %v119_v53 = vld [vmem:[%s3503_s1 + $0x1b8] sm:$0xff]  ;;  %v116_v54 = vld [vmem:[%s3503_s1 + $0x1a0] sm:$0xff] }
  0x3e   :  { %422 = vmatprep.subr.mxu0 %v201_v56  ;;  %637 = vmatprep.subr.mxu1 %v203_v57  ;;  %v118_v55 = vld [vmem:[%s3503_s1 + $0x1b0] sm:$0xff]  ;;  %v2065_v56 = vld [vmem:[%s3504_s0 + $0x88] sm:$0xff]  ;;  %v2070_v57 = vld [vmem:[%s3504_s0 + $0x80] sm:$0xff] }
  0x3f   :  { %423 = vmatpush2.msra.mxu0 %v200_v58  ;;  %638 = vmatpush2.msra.mxu1 %v202_v59  ;;  %v109_v58 = vld [vmem:[%s3503_s1 + $0x168] sm:$0xff]  ;;  %v111_v59 = vld [vmem:[%s3503_s1 + $0x178] sm:$0xff] }
  0x40   :  { %424 = vmatprep.subr.mxu0 %v193_v60  ;;  %639 = vmatprep.subr.mxu1 %v195_v61  ;;  %v108_v60 = vld [vmem:[%s3503_s1 + $0x160] sm:$0xff]  ;;  %v110_v61 = vld [vmem:[%s3503_s1 + $0x170] sm:$0xff] }
  0x41   :  { %425 = vmatpush2.msra.mxu0 %v192_v62  ;;  %426 = vmatprep.mubr.f32.mxu0 %v1830_v63  ;;  %v2091_v62 = vld [vmem:[%s3504_s0 + $0x98] sm:$0xff] }
  0x42   :  { %640 = vmatpush2.msra.mxu1 %v194_v0  ;;  %641 = vmatprep.mubr.f32.mxu1 %v1830_v63  ;;  %v101_v0 = vld [vmem:[%s3503_s1 + $0x128] sm:$0xff] }
  0x43   :  { %427 = vmatmul.mubr.f32.vlgmr.msra.gmra.mxu0 %v1838_v1  ;;  %642 = vmatmul.mubr.f32.vlgmr.msra.gmra.mxu1 %v1838_v1 }
  0x44   :  { %792 = vmatprep.subr.mxu0 %v189_v2  ;;  %1007 = vmatprep.subr.mxu1 %v191_v3  ;;  %v103_v2 = vld [vmem:[%s3503_s1 + $0x138] sm:$0xff]  ;;  %v2102_v3 = vld [vmem:[%s3504_s0 + $0x90] sm:$0xff] }
  0x45   :  { %793 = vmatpush1.msra.mxu0 %v188_v4  ;;  %1008 = vmatpush1.msra.mxu1 %v190_v5  ;;  %v100_v4 = vld [vmem:[%s3503_s1 + $0x120] sm:$0xff]  ;;  %v102_v5 = vld [vmem:[%s3503_s1 + $0x130] sm:$0xff] }
  0x46   :  { %432 = vmatprep.mubr.f32.mxu0 %v1859_v6  ;;  %647 = vmatprep.mubr.f32.mxu1 %v1859_v6 }
  0x47   :  { %433 = vmatmul.mubr.f32.gmra.mxu0 %v1864_v7  ;;  %648 = vmatmul.mubr.f32.gmra.mxu1 %v1864_v7 }
  0x48   :  { %794 = vmatprep.subr.mxu0 %v181_v8  ;;  %1009 = vmatprep.subr.mxu1 %v183_v9  ;;  %v93_v8 = vld [vmem:[%s3503_s1 + $0xe8] sm:$0xff]  ;;  %v95_v9 = vld [vmem:[%s3503_s1 + $0xf8] sm:$0xff] }
  0x49   :  { %795 = vmatpush1.msra.mxu0 %v180_v10  ;;  %1010 = vmatpush1.msra.mxu1 %v182_v11  ;;  %v2123_v10 = vld [vmem:[%s3504_s0 + $0xa8] sm:$0xff]  ;;  %v92_v11 = vld [vmem:[%s3503_s1 + $0xe0] sm:$0xff] }
  0x4a   :  { %438 = vmatprep.mubr.f32.mxu0 %v1885_v12  ;;  %653 = vmatprep.mubr.f32.mxu1 %v1885_v12 }
  0x4b   :  { %796 = vmatprep.subr.mxu0 %v173_v13  ;;  %1011 = vmatprep.subr.mxu1 %v175_v14  ;;  %v94_v13 = vld [vmem:[%s3503_s1 + $0xf0] sm:$0xff]  ;;  %v2134_v14 = vld [vmem:[%s3504_s0 + $0xa0] sm:$0xff] }
  0x4c   :  { %439 = vmatmul.mubr.f32.gmra.mxu0 %v1896_v15  ;;  %654 = vmatmul.mubr.f32.gmra.mxu1 %v1896_v15 }
  0x4d   :  { %797 = vmatpush1.msra.mxu0 %v172_v16  ;;  %1012 = vmatpush1.msra.mxu1 %v174_v17  ;;  %v85_v16 = vld [vmem:[%s3503_s1 + $0xa8] sm:$0xff]  ;;  %v87_v17 = vld [vmem:[%s3503_s1 + $0xb8] sm:$0xff] }
  0x4e   :  { %798 = vmatprep.subr.mxu0 %v165_v18  ;;  %1013 = vmatprep.subr.mxu1 %v167_v19  ;;  %v84_v18 = vld [vmem:[%s3503_s1 + $0xa0] sm:$0xff]  ;;  %v86_v19 = vld [vmem:[%s3503_s1 + $0xb0] sm:$0xff] }
  0x4f   :  { %444 = vmatprep.mubr.f32.mxu0 %v1917_v20  ;;  %659 = vmatprep.mubr.f32.mxu1 %v1917_v20 }
  0x50   :  { %799 = vmatpush1.msra.mxu0 %v164_v21  ;;  %1014 = vmatpush1.msra.mxu1 %v166_v22  ;;  %v2155_v21 = vld [vmem:[%s3504_s0 + $0xb8] sm:$0xff]  ;;  %v2160_v22 = vld [vmem:[%s3504_s0 + $0xb0] sm:$0xff] }
  0x51   :  { %445 = vmatmul.mubr.f32.gmra.mxu0 %v1928_v23  ;;  %660 = vmatmul.mubr.f32.gmra.mxu1 %v1928_v23 }
  0x52   :  { %800 = vmatprep.subr.mxu0 %v157_v24  ;;  %1015 = vmatprep.subr.mxu1 %v159_v25  ;;  %v77_v24 = vld [vmem:[%s3503_s1 + $0x68] sm:$0xff]  ;;  %v79_v25 = vld [vmem:[%s3503_s1 + $0x78] sm:$0xff] }
  0x53   :  { %801 = vmatpush1.msra.mxu0 %v156_v26  ;;  %1016 = vmatpush1.msra.mxu1 %v158_v27  ;;  %v76_v26 = vld [vmem:[%s3503_s1 + $0x60] sm:$0xff]  ;;  %v78_v27 = vld [vmem:[%s3503_s1 + $0x70] sm:$0xff] }
  0x54   :  { %450 = vmatprep.mubr.f32.mxu0 %v1949_v28  ;;  %665 = vmatprep.mubr.f32.mxu1 %v1949_v28 }
  0x55   :  { %451 = vmatmul.mubr.f32.gmra.mxu0 %v1954_v29  ;;  %666 = vmatmul.mubr.f32.gmra.mxu1 %v1954_v29 }
  0x56   :  { %802 = vmatprep.subr.mxu0 %v149_v30  ;;  %1017 = vmatprep.subr.mxu1 %v151_v31  ;;  %v2181_v30 = vld [vmem:[%s3504_s0 + $0xc8] sm:$0xff] }
  0x57   :  { %803 = vmatpush1.msra.mxu0 %v148_v32  ;;  %1018 = vmatpush1.msra.mxu1 %v150_v33  ;;  %v69_v31 = vld [vmem:[%s3503_s1 + $0x28] sm:$0xff]  ;;  %v71_v32 = vld [vmem:[%s3503_s1 + $0x38] sm:$0xff]  ;;  %v2192_v33 = vld [vmem:[%s3504_s0 + $0xc0] sm:$0xff] }
  0x58   :  { %456 = vmatprep.mubr.f32.mxu0 %v1975_v34  ;;  %671 = vmatprep.mubr.f32.mxu1 %v1975_v34 }
  0x59   :  { %804 = vmatprep.subr.mxu0 %v141_v35  ;;  %1019 = vmatprep.subr.mxu1 %v143_v36  ;;  %v68_v35 = vld [vmem:[%s3503_s1 + $0x20] sm:$0xff]  ;;  %v70_v36 = vld [vmem:[%s3503_s1 + $0x30] sm:$0xff] }
  0x5a   :  { %457 = vmatmul.mubr.f32.gmra.mxu0 %v1986_v37  ;;  %672 = vmatmul.mubr.f32.gmra.mxu1 %v1986_v37 }
  0x5b   :  { %805 = vmatpush1.msra.mxu0 %v140_v38  ;;  %1020 = vmatpush1.msra.mxu1 %v142_v39  ;;  %v317_v38 = vld [vmem:[%s3503_s1 + $0x7e8] sm:$0xff]  ;;  %v319_v39 = vld [vmem:[%s3503_s1 + $0x7f8] sm:$0xff] }
  0x5c   :  { %806 = vmatprep.subr.mxu0 %v133_v40  ;;  %1021 = vmatprep.subr.mxu1 %v135_v41  ;;  %v2213_v40 = vld [vmem:[%s3504_s0 + $0xd8] sm:$0xff]  ;;  %v316_v41 = vld [vmem:[%s3503_s1 + $0x7e0] sm:$0xff] }
  0x5d   :  { %462 = vmatprep.mubr.f32.mxu0 %v2007_v42  ;;  %677 = vmatprep.mubr.f32.mxu1 %v2007_v42 }
  0x5e   :  { %807 = vmatpush1.msra.mxu0 %v132_v43  ;;  %1022 = vmatpush1.msra.mxu1 %v134_v44  ;;  %v318_v43 = vld [vmem:[%s3503_s1 + $0x7f0] sm:$0xff] }
  0x5f   :  { %463 = vmatmul.mubr.f32.gmra.mxu0 %v2018_v45  ;;  %678 = vmatmul.mubr.f32.gmra.mxu1 %v2018_v45  ;;  %v2224_v44 = vld [vmem:[%s3504_s0 + $0xd0] sm:$0xff] }
  0x60   :  { %808 = vmatprep.subr.mxu0 %v125_v46  ;;  %1023 = vmatprep.subr.mxu1 %v127_v47  ;;  %v309_v46 = vld [vmem:[%s3503_s1 + $0x7a8] sm:$0xff]  ;;  %v311_v47 = vld [vmem:[%s3503_s1 + $0x7b8] sm:$0xff] }
  0x61   :  { %809 = vmatpush1.msra.mxu0 %v124_v48  ;;  %1024 = vmatpush1.msra.mxu1 %v126_v49  ;;  %v2237_v48 = vld [vmem:[%s3504_s0 + $0xe8] sm:$0xff]  ;;  %v308_v49 = vld [vmem:[%s3503_s1 + $0x7a0] sm:$0xff] }
  0x62   :  { %468 = vmatprep.mubr.f32.mxu0 %v2039_v50  ;;  %683 = vmatprep.mubr.f32.mxu1 %v2039_v50 }
  0x63   :  { %469 = vmatmul.mubr.f32.gmra.mxu0 %v2044_v51  ;;  %684 = vmatmul.mubr.f32.gmra.mxu1 %v2044_v51 }
  0x64   :  { %810 = vmatprep.subr.mxu0 %v117_v52  ;;  %1025 = vmatprep.subr.mxu1 %v119_v53  ;;  %v310_v52 = vld [vmem:[%s3503_s1 + $0x7b0] sm:$0xff]  ;;  %v2250_v53 = vld [vmem:[%s3504_s0 + $0xe0] sm:$0xff] }
  0x65   :  { %811 = vmatpush1.msra.mxu0 %v116_v54  ;;  %1026 = vmatpush1.msra.mxu1 %v118_v55  ;;  %v301_v54 = vld [vmem:[%s3503_s1 + $0x768] sm:$0xff]  ;;  %v303_v55 = vld [vmem:[%s3503_s1 + $0x778] sm:$0xff] }
  0x66   :  { %474 = vmatprep.mubr.f32.mxu0 %v2065_v56  ;;  %689 = vmatprep.mubr.f32.mxu1 %v2065_v56 }
  0x67   :  { %475 = vmatmul.mubr.f32.gmra.mxu0 %v2070_v57  ;;  %690 = vmatmul.mubr.f32.gmra.mxu1 %v2070_v57 }
  0x68   :  { %812 = vmatprep.subr.mxu0 %v109_v58  ;;  %1027 = vmatprep.subr.mxu1 %v111_v59  ;;  %v300_v58 = vld [vmem:[%s3503_s1 + $0x760] sm:$0xff]  ;;  %v302_v59 = vld [vmem:[%s3503_s1 + $0x770] sm:$0xff] }
  0x69   :  { %813 = vmatpush1.msra.mxu0 %v108_v60  ;;  %1028 = vmatpush1.msra.mxu1 %v110_v61  ;;  %v2271_v60 = vld [vmem:[%s3504_s0 + $0xf8] sm:$0xff]  ;;  %v2276_v61 = vld [vmem:[%s3504_s0 + $0xf0] sm:$0xff] }
  0x6a   :  { %480 = vmatprep.mubr.f32.mxu0 %v2091_v62  ;;  %695 = vmatprep.mubr.f32.mxu1 %v2091_v62 }
  0x6b   :  { %814 = vmatprep.subr.mxu0 %v101_v0  ;;  %1029 = vmatprep.subr.mxu1 %v103_v2  ;;  %v293_v0 = vld [vmem:[%s3503_s1 + $0x728] sm:$0xff]  ;;  %v295_v2 = vld [vmem:[%s3503_s1 + $0x738] sm:$0xff] }
  0x6c   :  { %481 = vmatmul.mubr.f32.gmra.mxu0 %v2102_v3  ;;  %696 = vmatmul.mubr.f32.gmra.mxu1 %v2102_v3 }
  0x6d   :  { %815 = vmatpush1.msra.mxu0 %v100_v4  ;;  %1030 = vmatpush1.msra.mxu1 %v102_v5  ;;  %v292_v4 = vld [vmem:[%s3503_s1 + $0x720] sm:$0xff]  ;;  %v294_v5 = vld [vmem:[%s3503_s1 + $0x730] sm:$0xff] }
  0x6e   :  { %816 = vmatprep.subr.mxu0 %v93_v8  ;;  %1031 = vmatprep.subr.mxu1 %v95_v9  ;;  %v2297_v8 = vld [vmem:[%s3504_s0 + $0x108] sm:$0xff] }
  0x6f   :  { %486 = vmatprep.mubr.f32.mxu0 %v2123_v10  ;;  %701 = vmatprep.mubr.f32.mxu1 %v2123_v10  ;;  %v285_v9 = vld [vmem:[%s3503_s1 + $0x6e8] sm:$0xff] }
  0x70   :  { %817 = vmatpush1.msra.mxu0 %v92_v11  ;;  %1032 = vmatpush1.msra.mxu1 %v94_v13  ;;  %v287_v11 = vld [vmem:[%s3503_s1 + $0x6f8] sm:$0xff]  ;;  %v2308_v13 = vld [vmem:[%s3504_s0 + $0x100] sm:$0xff] }
  0x71   :  { %487 = vmatmul.mubr.f32.gmra.mxu0 %v2134_v14  ;;  %702 = vmatmul.mubr.f32.gmra.mxu1 %v2134_v14 }
  0x72   :  { %818 = vmatprep.subr.mxu0 %v85_v16  ;;  %1033 = vmatprep.subr.mxu1 %v87_v17  ;;  %v284_v16 = vld [vmem:[%s3503_s1 + $0x6e0] sm:$0xff]  ;;  %v286_v17 = vld [vmem:[%s3503_s1 + $0x6f0] sm:$0xff] }
  0x73   :  { %819 = vmatpush1.msra.mxu0 %v84_v18  ;;  %1034 = vmatpush1.msra.mxu1 %v86_v19  ;;  %v277_v18 = vld [vmem:[%s3503_s1 + $0x6a8] sm:$0xff]  ;;  %v279_v19 = vld [vmem:[%s3503_s1 + $0x6b8] sm:$0xff] }
  0x74   :  { %492 = vmatprep.mubr.f32.mxu0 %v2155_v21  ;;  %707 = vmatprep.mubr.f32.mxu1 %v2155_v21 }
  0x75   :  { %493 = vmatmul.mubr.f32.gmra.mxu0 %v2160_v22  ;;  %708 = vmatmul.mubr.f32.gmra.mxu1 %v2160_v22 }
  0x76   :  { %820 = vmatprep.subr.mxu0 %v77_v24  ;;  %1035 = vmatprep.subr.mxu1 %v79_v25  ;;  %v2329_v24 = vld [vmem:[%s3504_s0 + $0x118] sm:$0xff]  ;;  %v276_v25 = vld [vmem:[%s3503_s1 + $0x6a0] sm:$0xff] }
  0x77   :  { %821 = vmatpush1.msra.mxu0 %v76_v26  ;;  %1036 = vmatpush1.msra.mxu1 %v78_v27  ;;  %v278_v26 = vld [vmem:[%s3503_s1 + $0x6b0] sm:$0xff] }
  0x78   :  { %498 = vmatprep.mubr.f32.mxu0 %v2181_v30  ;;  %713 = vmatprep.mubr.f32.mxu1 %v2181_v30  ;;  %v2340_v27 = vld [vmem:[%s3504_s0 + $0x110] sm:$0xff] }
  0x79   :  { %822 = vmatprep.subr.mxu0 %v69_v31  ;;  %1037 = vmatprep.subr.mxu1 %v71_v32  ;;  %v269_v31 = vld [vmem:[%s3503_s1 + $0x668] sm:$0xff]  ;;  %v271_v32 = vld [vmem:[%s3503_s1 + $0x678] sm:$0xff] }
  0x7a   :  { %499 = vmatmul.mubr.f32.gmra.mxu0 %v2192_v33  ;;  %714 = vmatmul.mubr.f32.gmra.mxu1 %v2192_v33 }
  0x7b   :  { %823 = vmatpush1.msra.mxu0 %v68_v35  ;;  %1038 = vmatpush1.msra.mxu1 %v70_v36  ;;  %v268_v35 = vld [vmem:[%s3503_s1 + $0x660] sm:$0xff]  ;;  %v270_v36 = vld [vmem:[%s3503_s1 + $0x670] sm:$0xff] }
  0x7c   :  { %824 = vmatprep.subr.mxu0 %v317_v38  ;;  %1039 = vmatprep.subr.mxu1 %v319_v39  ;;  %v2361_v38 = vld [vmem:[%s3504_s0 + $0x128] sm:$0xff]  ;;  %v2366_v39 = vld [vmem:[%s3504_s0 + $0x120] sm:$0xff] }
  0x7d   :  { %504 = vmatprep.mubr.f32.mxu0 %v2213_v40  ;;  %719 = vmatprep.mubr.f32.mxu1 %v2213_v40 }
  0x7e   :  { %825 = vmatpush2.msra.mxu0 %v316_v41  ;;  %1040 = vmatpush2.msra.mxu1 %v318_v43  ;;  %v261_v41 = vld [vmem:[%s3503_s1 + $0x628] sm:$0xff]  ;;  %v263_v43 = vld [vmem:[%s3503_s1 + $0x638] sm:$0xff] }
  0x7f   :  { %505 = vmatmul.mubr.f32.gmra.mxu0 %v2224_v44  ;;  %720 = vmatmul.mubr.f32.gmra.mxu1 %v2224_v44 }
  0x80   :  { %826 = vmatprep.subr.mxu0 %v309_v46  ;;  %1041 = vmatprep.subr.mxu1 %v311_v47  ;;  %v260_v46 = vld [vmem:[%s3503_s1 + $0x620] sm:$0xff]  ;;  %v262_v47 = vld [vmem:[%s3503_s1 + $0x630] sm:$0xff] }
  0x81   :  { %510 = vmatprep.mubr.f32.mxu0 %v2237_v48  ;;  %725 = vmatprep.mubr.f32.mxu1 %v2237_v48 }
  0x82   :  { %827 = vmatpush2.msra.mxu0 %v308_v49  ;;  %1042 = vmatpush2.msra.mxu1 %v310_v52  ;;  %v2387_v49 = vld [vmem:[%s3504_s0 + $0x138] sm:$0xff]  ;;  %v253_v52 = vld [vmem:[%s3503_s1 + $0x5e8] sm:$0xff] }
  0x83   :  { %511 = vmatmul.mubr.f32.gmra.mxu0 %v2250_v53  ;;  %726 = vmatmul.mubr.f32.gmra.mxu1 %v2250_v53 }
  0x84   :  { %828 = vmatprep.subr.mxu0 %v301_v54  ;;  %1043 = vmatprep.subr.mxu1 %v303_v55  ;;  %v255_v54 = vld [vmem:[%s3503_s1 + $0x5f8] sm:$0xff]  ;;  %v2398_v55 = vld [vmem:[%s3504_s0 + $0x130] sm:$0xff] }
  0x85   :  { %829 = vmatpush2.msra.mxu0 %v300_v58  ;;  %1044 = vmatpush2.msra.mxu1 %v302_v59  ;;  %v252_v58 = vld [vmem:[%s3503_s1 + $0x5e0] sm:$0xff]  ;;  %v254_v59 = vld [vmem:[%s3503_s1 + $0x5f0] sm:$0xff] }
  0x86   :  { %516 = vmatprep.mubr.f32.mxu0 %v2271_v60  ;;  %731 = vmatprep.mubr.f32.mxu1 %v2271_v60 }
  0x87   :  { %517 = vmatmul.mubr.f32.gmra.mxu0 %v2276_v61  ;;  %732 = vmatmul.mubr.f32.gmra.mxu1 %v2276_v61 }
  0x88   :  { %830 = vmatprep.subr.mxu0 %v293_v0  ;;  %1045 = vmatprep.subr.mxu1 %v295_v2  ;;  %v2411_v0 = vld [vmem:[%s3504_s0 + $0x148] sm:$0xff] }
  0x89   :  { %831 = vmatpush2.msra.mxu0 %v292_v4  ;;  %1046 = vmatpush2.msra.mxu1 %v294_v5  ;;  %v245_v2 = vld [vmem:[%s3503_s1 + $0x5a8] sm:$0xff]  ;;  %v247_v4 = vld [vmem:[%s3503_s1 + $0x5b8] sm:$0xff]  ;;  %v2424_v5 = vld [vmem:[%s3504_s0 + $0x140] sm:$0xff] }
  0x8a   :  { %522 = vmatprep.mubr.f32.mxu0 %v2297_v8  ;;  %737 = vmatprep.mubr.f32.mxu1 %v2297_v8 }
  0x8b   :  { %832 = vmatprep.subr.mxu0 %v285_v9  ;;  %1047 = vmatprep.subr.mxu1 %v287_v11  ;;  %v244_v9 = vld [vmem:[%s3503_s1 + $0x5a0] sm:$0xff]  ;;  %v246_v11 = vld [vmem:[%s3503_s1 + $0x5b0] sm:$0xff] }
  0x8c   :  { %523 = vmatmul.mubr.f32.gmra.mxu0 %v2308_v13  ;;  %738 = vmatmul.mubr.f32.gmra.mxu1 %v2308_v13 }
  0x8d   :  { %833 = vmatpush2.msra.mxu0 %v284_v16  ;;  %1048 = vmatpush2.msra.mxu1 %v286_v17  ;;  %v237_v16 = vld [vmem:[%s3503_s1 + $0x568] sm:$0xff]  ;;  %v239_v17 = vld [vmem:[%s3503_s1 + $0x578] sm:$0xff] }
  0x8e   :  { %834 = vmatprep.subr.mxu0 %v277_v18  ;;  %1049 = vmatprep.subr.mxu1 %v279_v19  ;;  %v2445_v18 = vld [vmem:[%s3504_s0 + $0x158] sm:$0xff]  ;;  %v236_v19 = vld [vmem:[%s3503_s1 + $0x560] sm:$0xff] }
  0x8f   :  { %528 = vmatprep.mubr.f32.mxu0 %v2329_v24  ;;  %743 = vmatprep.mubr.f32.mxu1 %v2329_v24 }
  0x90   :  { %835 = vmatpush2.msra.mxu0 %v276_v25  ;;  %1050 = vmatpush2.msra.mxu1 %v278_v26  ;;  %v238_v25 = vld [vmem:[%s3503_s1 + $0x570] sm:$0xff] }
  0x91   :  { %529 = vmatmul.mubr.f32.gmra.mxu0 %v2340_v27  ;;  %744 = vmatmul.mubr.f32.gmra.mxu1 %v2340_v27  ;;  %v2456_v26 = vld [vmem:[%s3504_s0 + $0x150] sm:$0xff] }
  0x92   :  { %836 = vmatprep.subr.mxu0 %v269_v31  ;;  %1051 = vmatprep.subr.mxu1 %v271_v32  ;;  %v229_v31 = vld [vmem:[%s3503_s1 + $0x528] sm:$0xff]  ;;  %v231_v32 = vld [vmem:[%s3503_s1 + $0x538] sm:$0xff] }
  0x93   :  { %837 = vmatpush2.msra.mxu0 %v268_v35  ;;  %1052 = vmatpush2.msra.mxu1 %v270_v36  ;;  %v228_v35 = vld [vmem:[%s3503_s1 + $0x520] sm:$0xff]  ;;  %v230_v36 = vld [vmem:[%s3503_s1 + $0x530] sm:$0xff] }
  0x94   :  { %534 = vmatprep.mubr.f32.mxu0 %v2361_v38  ;;  %749 = vmatprep.mubr.f32.mxu1 %v2361_v38 }
  0x95   :  { %535 = vmatmul.mubr.f32.gmra.mxu0 %v2366_v39  ;;  %750 = vmatmul.mubr.f32.gmra.mxu1 %v2366_v39 }
  0x96   :  { %838 = vmatprep.subr.mxu0 %v261_v41  ;;  %1053 = vmatprep.subr.mxu1 %v263_v43  ;;  %v2477_v41 = vld [vmem:[%s3504_s0 + $0x168] sm:$0xff]  ;;  %v2482_v43 = vld [vmem:[%s3504_s0 + $0x160] sm:$0xff] }
  0x97   :  { %839 = vmatpush2.msra.mxu0 %v260_v46  ;;  %1054 = vmatpush2.msra.mxu1 %v262_v47  ;;  %v221_v46 = vld [vmem:[%s3503_s1 + $0x4e8] sm:$0xff]  ;;  %v223_v47 = vld [vmem:[%s3503_s1 + $0x4f8] sm:$0xff] }
  0x98   :  { %540 = vmatprep.mubr.f32.mxu0 %v2387_v49  ;;  %755 = vmatprep.mubr.f32.mxu1 %v2387_v49 }
  0x99   :  { %840 = vmatprep.subr.mxu0 %v253_v52  ;;  %1055 = vmatprep.subr.mxu1 %v255_v54  ;;  %v220_v52 = vld [vmem:[%s3503_s1 + $0x4e0] sm:$0xff]  ;;  %v222_v54 = vld [vmem:[%s3503_s1 + $0x4f0] sm:$0xff] }
  0x9a   :  { %541 = vmatmul.mubr.f32.gmra.mxu0 %v2398_v55  ;;  %756 = vmatmul.mubr.f32.gmra.mxu1 %v2398_v55 }
  0x9b   :  { %841 = vmatpush2.msra.mxu0 %v252_v58  ;;  %1056 = vmatpush2.msra.mxu1 %v254_v59  ;;  %v2503_v58 = vld [vmem:[%s3504_s0 + $0x178] sm:$0xff]  ;;  %v213_v59 = vld [vmem:[%s3503_s1 + $0x4a8] sm:$0xff] }
  0x9c   :  { %546 = vmatprep.mubr.f32.mxu0 %v2411_v0  ;;  %761 = vmatprep.mubr.f32.mxu1 %v2411_v0 }
  0x9d   :  { %842 = vmatprep.subr.mxu0 %v245_v2  ;;  %1057 = vmatprep.subr.mxu1 %v247_v4  ;;  %v215_v2 = vld [vmem:[%s3503_s1 + $0x4b8] sm:$0xff]  ;;  %v2514_v4 = vld [vmem:[%s3504_s0 + $0x170] sm:$0xff] }
  0x9e   :  { %547 = vmatmul.mubr.f32.gmra.mxu0 %v2424_v5  ;;  %762 = vmatmul.mubr.f32.gmra.mxu1 %v2424_v5 }
  0x9f   :  { %843 = vmatpush2.msra.mxu0 %v244_v9  ;;  %1058 = vmatpush2.msra.mxu1 %v246_v11  ;;  %v212_v9 = vld [vmem:[%s3503_s1 + $0x4a0] sm:$0xff]  ;;  %v214_v11 = vld [vmem:[%s3503_s1 + $0x4b0] sm:$0xff] }
  0xa0   :  { %844 = vmatprep.subr.mxu0 %v237_v16  ;;  %1059 = vmatprep.subr.mxu1 %v239_v17  ;;  %v205_v16 = vld [vmem:[%s3503_s1 + $0x468] sm:$0xff]  ;;  %v207_v17 = vld [vmem:[%s3503_s1 + $0x478] sm:$0xff] }
  0xa1   :  { %552 = vmatprep.mubr.f32.mxu0 %v2445_v18  ;;  %767 = vmatprep.mubr.f32.mxu1 %v2445_v18 }
  0xa2   :  { %845 = vmatpush2.msra.mxu0 %v236_v19  ;;  %1060 = vmatpush2.msra.mxu1 %v238_v25  ;;  %v2535_v19 = vld [vmem:[%s3504_s0 + $0x188] sm:$0xff]  ;;  %v204_v25 = vld [vmem:[%s3503_s1 + $0x460] sm:$0xff] }
  0xa3   :  { %553 = vmatmul.mubr.f32.gmra.mxu0 %v2456_v26  ;;  %768 = vmatmul.mubr.f32.gmra.mxu1 %v2456_v26 }
  0xa4   :  { %846 = vmatprep.subr.mxu0 %v229_v31  ;;  %1061 = vmatprep.subr.mxu1 %v231_v32  ;;  %v206_v31 = vld [vmem:[%s3503_s1 + $0x470] sm:$0xff]  ;;  %v2546_v32 = vld [vmem:[%s3504_s0 + $0x180] sm:$0xff] }
  0xa5   :  { %847 = vmatpush2.msra.mxu0 %v228_v35  ;;  %1062 = vmatpush2.msra.mxu1 %v230_v36  ;;  %v197_v35 = vld [vmem:[%s3503_s1 + $0x428] sm:$0xff]  ;;  %v199_v36 = vld [vmem:[%s3503_s1 + $0x438] sm:$0xff] }
  0xa6   :  { %558 = vmatprep.mubr.f32.mxu0 %v2477_v41  ;;  %773 = vmatprep.mubr.f32.mxu1 %v2477_v41 }
  0xa7   :  { %559 = vmatmul.mubr.f32.gmra.mxu0 %v2482_v43  ;;  %774 = vmatmul.mubr.f32.gmra.mxu1 %v2482_v43 }
  0xa8   :  { %848 = vmatprep.subr.mxu0 %v221_v46  ;;  %1063 = vmatprep.subr.mxu1 %v223_v47  ;;  %v196_v46 = vld [vmem:[%s3503_s1 + $0x420] sm:$0xff]  ;;  %v198_v47 = vld [vmem:[%s3503_s1 + $0x430] sm:$0xff] }
  0xa9   :  { %849 = vmatpush2.msra.mxu0 %v220_v52  ;;  %1064 = vmatpush2.msra.mxu1 %v222_v54 }
  0xaa   :  { %564 = vmatprep.mubr.f32.mxu0 %v2503_v58  ;;  %779 = vmatprep.mubr.f32.mxu1 %v2503_v58 }
  0xab   :  { %850 = vmatprep.subr.mxu0 %v213_v59  ;;  %1065 = vmatprep.subr.mxu1 %v215_v2 }
  0xac   :  { %565 = vmatmul.mubr.f32.gmra.mxu0 %v2514_v4  ;;  %780 = vmatmul.mubr.f32.gmra.mxu1 %v2514_v4 }
  0xad   :  { %851 = vmatpush2.msra.mxu0 %v212_v9  ;;  %1066 = vmatpush2.msra.mxu1 %v214_v11 }
  0xae   :  { %852 = vmatprep.subr.mxu0 %v205_v16  ;;  %1067 = vmatprep.subr.mxu1 %v207_v17 }
  0xaf   :  { %570 = vmatprep.mubr.f32.mxu0 %v2535_v19  ;;  %785 = vmatprep.mubr.f32.mxu1 %v2535_v19 }
  0xb0   :  { %853 = vmatpush2.msra.mxu0 %v204_v25  ;;  %1068 = vmatpush2.msra.mxu1 %v206_v31 }
  0xb1   :  { %571 = vmatmul.mubr.f32.gmra.mxu0 %v2546_v32  ;;  %786 = vmatmul.mubr.f32.gmra.mxu1 %v2546_v32 }
  0xb2   :  { %854 = vmatprep.subr.mxu0 %v197_v35  ;;  %1069 = vmatprep.subr.mxu1 %v199_v36 }
  0xb3   :  { %855 = vmatpush2.msra.mxu0 %v196_v46  ;;  %1070 = vmatpush2.msra.mxu1 %v198_v47 }
  0xb4   :  { %856 = vmatprep.mubr.f32.mxu0 %v1830_v63  ;;  %1071 = vmatprep.mubr.f32.mxu1 %v1830_v63  ;;  %v322_v63 = vlaneseq }
  0xb5   :  { %857 = vmatmul.mubr.f32.vlgmr.msra.gmra.mxu0 %v1838_v1  ;;  %1072 = vmatmul.mubr.f32.vlgmr.msra.gmra.mxu1 %v1838_v1 }
  0xb6   :  { %862 = vmatprep.mubr.f32.mxu0 %v1859_v6  ;;  %1077 = vmatprep.mubr.f32.mxu1 %v1859_v6  ;;  %v2634_v1 = vshrl.u32 %v322_v63, 7 }
  0xb8   :  { %v324_v6 = vsub.s32 0, %v2634_v1 }
  0xb9   :  { %863 = vmatmul.mubr.f32.gmra.mxu0 %v1864_v7  ;;  %1078 = vmatmul.mubr.f32.gmra.mxu1 %v1864_v7  ;;  %v332_v7 = vsub.s32 2, %v2634_v1 }
  0xba   :  { %868 = vmatprep.mubr.f32.mxu0 %v1885_v12  ;;  %1083 = vmatprep.mubr.f32.mxu1 %v1885_v12  ;;  %v2647_v12 = vld [vmem:[%s3505_s2] sm:$0xff] }
  0xbd   :  { %869 = vmatmul.mubr.f32.gmra.mxu0 %v1896_v15  ;;  %1084 = vmatmul.mubr.f32.gmra.mxu1 %v1896_v15  ;;  %v328_v15 = vsub.s32 1, %v2634_v1 }
  0xbe   :  { %874 = vmatprep.mubr.f32.mxu0 %v1917_v20  ;;  %1089 = vmatprep.mubr.f32.mxu1 %v1917_v20  ;;  %v336_v20 = vsub.s32 3, %v2634_v1 }
  0xc1   :  { %875 = vmatmul.mubr.f32.gmra.mxu0 %v1928_v23  ;;  %1090 = vmatmul.mubr.f32.gmra.mxu1 %v1928_v23  ;;  %v2654_v23 = vrot.slane %v2647_v12, %v324_v6 }
  0xc2   :  { %880 = vmatprep.mubr.f32.mxu0 %v1949_v28  ;;  %1095 = vmatprep.mubr.f32.mxu1 %v1949_v28  ;;  %v2657_v28 = vrot.slane %v2647_v12, %v332_v7 }
  0xc5   :  { %881 = vmatmul.mubr.f32.gmra.mxu0 %v1954_v29  ;;  %1096 = vmatmul.mubr.f32.gmra.mxu1 %v1954_v29  ;;  %v2664_v29 = vrot.slane %v2647_v12, %v328_v15 }
  0xc6   :  { %886 = vmatprep.mubr.f32.mxu0 %v1975_v34  ;;  %1101 = vmatprep.mubr.f32.mxu1 %v1975_v34  ;;  %v2667_v34 = vrot.slane %v2647_v12, %v336_v20 }
  0xc9   :  { %887 = vmatmul.mubr.f32.gmra.mxu0 %v1986_v37  ;;  %1102 = vmatmul.mubr.f32.gmra.mxu1 %v1986_v37 }
  0xca   :  { %892 = vmatprep.mubr.f32.mxu0 %v2007_v42  ;;  %1107 = vmatprep.mubr.f32.mxu1 %v2007_v42 }
  0xcd   :  { %893 = vmatmul.mubr.f32.gmra.mxu0 %v2018_v45  ;;  %1108 = vmatmul.mubr.f32.gmra.mxu1 %v2018_v45 }
  0xce   :  { %898 = vmatprep.mubr.f32.mxu0 %v2039_v50  ;;  %1113 = vmatprep.mubr.f32.mxu1 %v2039_v50 }
  0xd1   :  { %899 = vmatmul.mubr.f32.gmra.mxu0 %v2044_v51  ;;  %1114 = vmatmul.mubr.f32.gmra.mxu1 %v2044_v51 }
  0xd2   :  { %904 = vmatprep.mubr.f32.mxu0 %v2065_v56  ;;  %1119 = vmatprep.mubr.f32.mxu1 %v2065_v56 }
  0xd5   :  { %905 = vmatmul.mubr.f32.gmra.mxu0 %v2070_v57  ;;  %1120 = vmatmul.mubr.f32.gmra.mxu1 %v2070_v57 }
  0xd6   :  { %910 = vmatprep.mubr.f32.mxu0 %v2091_v62  ;;  %1125 = vmatprep.mubr.f32.mxu1 %v2091_v62 }
  0xd9   :  { %911 = vmatmul.mubr.f32.gmra.mxu0 %v2102_v3  ;;  %1126 = vmatmul.mubr.f32.gmra.mxu1 %v2102_v3 }
  0xda   :  { %916 = vmatprep.mubr.f32.mxu0 %v2123_v10  ;;  %1131 = vmatprep.mubr.f32.mxu1 %v2123_v10 }
  0xdd   :  { %917 = vmatmul.mubr.f32.gmra.mxu0 %v2134_v14  ;;  %1132 = vmatmul.mubr.f32.gmra.mxu1 %v2134_v14 }
  0xde   :  { %922 = vmatprep.mubr.f32.mxu0 %v2155_v21  ;;  %1137 = vmatprep.mubr.f32.mxu1 %v2155_v21 }
  0xe1   :  { %923 = vmatmul.mubr.f32.gmra.mxu0 %v2160_v22  ;;  %1138 = vmatmul.mubr.f32.gmra.mxu1 %v2160_v22 }
  0xe2   :  { %928 = vmatprep.mubr.f32.mxu0 %v2181_v30  ;;  %1143 = vmatprep.mubr.f32.mxu1 %v2181_v30 }
  0xe5   :  { %929 = vmatmul.mubr.f32.gmra.mxu0 %v2192_v33  ;;  %1144 = vmatmul.mubr.f32.gmra.mxu1 %v2192_v33 }
  0xe6   :  { %934 = vmatprep.mubr.f32.mxu0 %v2213_v40  ;;  %1149 = vmatprep.mubr.f32.mxu1 %v2213_v40 }
  0xe9   :  { %935 = vmatmul.mubr.f32.gmra.mxu0 %v2224_v44  ;;  %1150 = vmatmul.mubr.f32.gmra.mxu1 %v2224_v44 }
  0xea   :  { %940 = vmatprep.mubr.f32.mxu0 %v2237_v48  ;;  %1155 = vmatprep.mubr.f32.mxu1 %v2237_v48 }
  0xed   :  { %941 = vmatmul.mubr.f32.gmra.mxu0 %v2250_v53  ;;  %1156 = vmatmul.mubr.f32.gmra.mxu1 %v2250_v53 }
  0xee   :  { %946 = vmatprep.mubr.f32.mxu0 %v2271_v60  ;;  %1161 = vmatprep.mubr.f32.mxu1 %v2271_v60 }
  0xf1   :  { %947 = vmatmul.mubr.f32.gmra.mxu0 %v2276_v61  ;;  %1162 = vmatmul.mubr.f32.gmra.mxu1 %v2276_v61 }
  0xf2   :  { %952 = vmatprep.mubr.f32.mxu0 %v2297_v8  ;;  %1167 = vmatprep.mubr.f32.mxu1 %v2297_v8 }
  0xf5   :  { %953 = vmatmul.mubr.f32.gmra.mxu0 %v2308_v13  ;;  %1168 = vmatmul.mubr.f32.gmra.mxu1 %v2308_v13 }
  0xf6   :  { %958 = vmatprep.mubr.f32.mxu0 %v2329_v24  ;;  %1173 = vmatprep.mubr.f32.mxu1 %v2329_v24 }
  0xf9   :  { %959 = vmatmul.mubr.f32.gmra.mxu0 %v2340_v27  ;;  %1174 = vmatmul.mubr.f32.gmra.mxu1 %v2340_v27 }
  0xfa   :  { %964 = vmatprep.mubr.f32.mxu0 %v2361_v38  ;;  %1179 = vmatprep.mubr.f32.mxu1 %v2361_v38 }
  0xfd   :  { %965 = vmatmul.mubr.f32.gmra.mxu0 %v2366_v39  ;;  %1180 = vmatmul.mubr.f32.gmra.mxu1 %v2366_v39 }
  0xfe   :  { %970 = vmatprep.mubr.f32.mxu0 %v2387_v49  ;;  %1185 = vmatprep.mubr.f32.mxu1 %v2387_v49 }
 0x101   :  { %971 = vmatmul.mubr.f32.gmra.mxu0 %v2398_v55  ;;  %1186 = vmatmul.mubr.f32.gmra.mxu1 %v2398_v55 }
 0x102   :  { %976 = vmatprep.mubr.f32.mxu0 %v2411_v0  ;;  %1191 = vmatprep.mubr.f32.mxu1 %v2411_v0 }
 0x103   :  { %v428_v37 = vpop.f32.mrf.mxu0  ;;  %v643_v42 = vpop.f32.mrf.mxu1 }
 0x104   :  { %v429_v45 = vadd.f32 %v428_v37, %v2654_v23  ;;  %v644_v50 = vadd.f32 %v643_v42, %v2657_v28 }
 0x105   :  { %977 = vmatmul.mubr.f32.gmra.mxu0 %v2424_v5  ;;  %1192 = vmatmul.mubr.f32.gmra.mxu1 %v2424_v5  ;;  %v430_v51 = vpop.f32.mrf.mxu0  ;;  %v645_v56 = vpop.f32.mrf.mxu1 }
 0x106   :  { %982 = vmatprep.mubr.f32.mxu0 %v2445_v18  ;;  %1197 = vmatprep.mubr.f32.mxu1 %v2445_v18  ;;  %1222 = vst [vmem:[%s3506_s3] sm:$0xff] %v429_v45  ;;  %1224 = vst [vmem:[%s3506_s3 + $0x10] sm:$0xff] %v644_v50  ;;  %v431_v57 = vadd.f32 %v430_v51, %v2664_v29  ;;  %v646_v62 = vadd.f32 %v645_v56, %v2667_v34 }
 0x107   :  { %v434_v3 = vpop.f32.mrf.mxu0  ;;  %v649_v10 = vpop.f32.mrf.mxu1 }
 0x108   :  { %1223 = vst [vmem:[%s3506_s3 + $0x8] sm:$0xff] %v431_v57  ;;  %1225 = vst [vmem:[%s3506_s3 + $0x18] sm:$0xff] %v646_v62  ;;  %v435_v14 = vadd.f32 %v434_v3, %v2654_v23  ;;  %v650_v21 = vadd.f32 %v649_v10, %v2657_v28 }
 0x109   :  { %983 = vmatmul.mubr.f32.gmra.mxu0 %v2456_v26  ;;  %1198 = vmatmul.mubr.f32.gmra.mxu1 %v2456_v26  ;;  %v436_v22 = vpop.f32.mrf.mxu0  ;;  %v651_v30 = vpop.f32.mrf.mxu1 }
 0x10a   :  { %988 = vmatprep.mubr.f32.mxu0 %v2477_v41  ;;  %1203 = vmatprep.mubr.f32.mxu1 %v2477_v41  ;;  %1230 = vst [vmem:[%s3506_s3 + $0x40] sm:$0xff] %v435_v14  ;;  %1232 = vst [vmem:[%s3506_s3 + $0x50] sm:$0xff] %v650_v21  ;;  %v437_v33 = vadd.f32 %v436_v22, %v2664_v29  ;;  %v652_v40 = vadd.f32 %v651_v30, %v2667_v34 }
 0x10c   :  { %1231 = vst [vmem:[%s3506_s3 + $0x48] sm:$0xff] %v437_v33  ;;  %1233 = vst [vmem:[%s3506_s3 + $0x58] sm:$0xff] %v652_v40  ;;  %v440_v44 = vpop.f32.mrf.mxu0  ;;  %v655_v48 = vpop.f32.mrf.mxu1 }
 0x10d   :  { %989 = vmatmul.mubr.f32.gmra.mxu0 %v2482_v43  ;;  %1204 = vmatmul.mubr.f32.gmra.mxu1 %v2482_v43  ;;  %v441_v53 = vadd.f32 %v440_v44, %v2654_v23  ;;  %v656_v60 = vadd.f32 %v655_v48, %v2657_v28 }
 0x10e   :  { %994 = vmatprep.mubr.f32.mxu0 %v2503_v58  ;;  %1209 = vmatprep.mubr.f32.mxu1 %v2503_v58  ;;  %v442_v61 = vpop.f32.mrf.mxu0  ;;  %v657_v8 = vpop.f32.mrf.mxu1 }
 0x10f   :  { %1238 = vst [vmem:[%s3506_s3 + $0x80] sm:$0xff] %v441_v53  ;;  %1240 = vst [vmem:[%s3506_s3 + $0x90] sm:$0xff] %v656_v60  ;;  %v443_v13 = vadd.f32 %v442_v61, %v2664_v29  ;;  %v658_v24 = vadd.f32 %v657_v8, %v2667_v34 }
 0x111   :  { %995 = vmatmul.mubr.f32.gmra.mxu0 %v2514_v4  ;;  %1210 = vmatmul.mubr.f32.gmra.mxu1 %v2514_v4  ;;  %1239 = vst [vmem:[%s3506_s3 + $0x88] sm:$0xff] %v443_v13  ;;  %1241 = vst [vmem:[%s3506_s3 + $0x98] sm:$0xff] %v658_v24  ;;  %v446_v27 = vpop.f32.mrf.mxu0  ;;  %v661_v38 = vpop.f32.mrf.mxu1 }
 0x112   :  { %1000 = vmatprep.mubr.f32.mxu0 %v2535_v19  ;;  %1215 = vmatprep.mubr.f32.mxu1 %v2535_v19  ;;  %v447_v39 = vadd.f32 %v446_v27, %v2654_v23  ;;  %v662_v49 = vadd.f32 %v661_v38, %v2657_v28 }
 0x113   :  { %v448_v55 = vpop.f32.mrf.mxu0  ;;  %v663_v0 = vpop.f32.mrf.mxu1 }
 0x114   :  { %1246 = vst [vmem:[%s3506_s3 + $0xc0] sm:$0xff] %v447_v39  ;;  %1248 = vst [vmem:[%s3506_s3 + $0xd0] sm:$0xff] %v662_v49  ;;  %v449_v5 = vadd.f32 %v448_v55, %v2664_v29  ;;  %v664_v18 = vadd.f32 %v663_v0, %v2667_v34 }
 0x115   :  { %1001 = vmatmul.mubr.f32.gmra.mxu0 %v2546_v32  ;;  %1216 = vmatmul.mubr.f32.gmra.mxu1 %v2546_v32  ;;  %v452_v26 = vpop.f32.mrf.mxu0  ;;  %v667_v41 = vpop.f32.mrf.mxu1 }
 0x116   :  { %1247 = vst [vmem:[%s3506_s3 + $0xc8] sm:$0xff] %v449_v5  ;;  %1249 = vst [vmem:[%s3506_s3 + $0xd8] sm:$0xff] %v664_v18  ;;  %v453_v43 = vadd.f32 %v452_v26, %v2654_v23  ;;  %v668_v52 = vadd.f32 %v667_v41, %v2657_v28 }
 0x117   :  { %v454_v54 = vpop.f32.mrf.mxu0  ;;  %v669_v58 = vpop.f32.mrf.mxu1 }
 0x118   :  { %1254 = vst [vmem:[%s3506_s3 + $0x100] sm:$0xff] %v453_v43  ;;  %1256 = vst [vmem:[%s3506_s3 + $0x110] sm:$0xff] %v668_v52  ;;  %v455_v59 = vadd.f32 %v454_v54, %v2664_v29  ;;  %v670_v2 = vadd.f32 %v669_v58, %v2667_v34 }
 0x11a   :  { %1255 = vst [vmem:[%s3506_s3 + $0x108] sm:$0xff] %v455_v59  ;;  %1257 = vst [vmem:[%s3506_s3 + $0x118] sm:$0xff] %v670_v2  ;;  %v458_v4 = vpop.f32.mrf.mxu0  ;;  %v673_v9 = vpop.f32.mrf.mxu1 }
 0x11b   :  { %v459_v11 = vadd.f32 %v458_v4, %v2654_v23  ;;  %v674_v16 = vadd.f32 %v673_v9, %v2657_v28 }
 0x11c   :  { %v460_v17 = vpop.f32.mrf.mxu0  ;;  %v675_v19 = vpop.f32.mrf.mxu1 }
 0x11d   :  { %1262 = vst [vmem:[%s3506_s3 + $0x140] sm:$0xff] %v459_v11  ;;  %1264 = vst [vmem:[%s3506_s3 + $0x150] sm:$0xff] %v674_v16  ;;  %v461_v25 = vadd.f32 %v460_v17, %v2664_v29  ;;  %v676_v31 = vadd.f32 %v675_v19, %v2667_v34 }
 0x11f   :  { %1263 = vst [vmem:[%s3506_s3 + $0x148] sm:$0xff] %v461_v25  ;;  %1265 = vst [vmem:[%s3506_s3 + $0x158] sm:$0xff] %v676_v31  ;;  %v464_v32 = vpop.f32.mrf.mxu0  ;;  %v679_v35 = vpop.f32.mrf.mxu1 }
 0x120   :  { %v465_v36 = vadd.f32 %v464_v32, %v2654_v23  ;;  %v680_v46 = vadd.f32 %v679_v35, %v2657_v28 }
 0x121   :  { %v466_v47 = vpop.f32.mrf.mxu0  ;;  %v681_v63 = vpop.f32.mrf.mxu1 }
 0x122   :  { %1270 = vst [vmem:[%s3506_s3 + $0x180] sm:$0xff] %v465_v36  ;;  %1272 = vst [vmem:[%s3506_s3 + $0x190] sm:$0xff] %v680_v46  ;;  %v467_v6 = vadd.f32 %v466_v47, %v2664_v29  ;;  %v682_v7 = vadd.f32 %v681_v63, %v2667_v34 }
 0x123   :  { %v470_v15 = vpop.f32.mrf.mxu0  ;;  %v685_v20 = vpop.f32.mrf.mxu1 }
 0x124   :  { %1271 = vst [vmem:[%s3506_s3 + $0x188] sm:$0xff] %v467_v6  ;;  %1273 = vst [vmem:[%s3506_s3 + $0x198] sm:$0xff] %v682_v7  ;;  %v471_v37 = vadd.f32 %v470_v15, %v2654_v23  ;;  %v686_v42 = vadd.f32 %v685_v20, %v2657_v28 }
 0x125   :  { %v472_v45 = vpop.f32.mrf.mxu0  ;;  %v687_v50 = vpop.f32.mrf.mxu1 }
 0x126   :  { %1278 = vst [vmem:[%s3506_s3 + $0x1c0] sm:$0xff] %v471_v37  ;;  %1280 = vst [vmem:[%s3506_s3 + $0x1d0] sm:$0xff] %v686_v42  ;;  %v473_v51 = vadd.f32 %v472_v45, %v2664_v29  ;;  %v688_v56 = vadd.f32 %v687_v50, %v2667_v34 }
 0x127   :  { %v476_v57 = vpop.f32.mrf.mxu0  ;;  %v691_v62 = vpop.f32.mrf.mxu1 }
 0x128   :  { %1279 = vst [vmem:[%s3506_s3 + $0x1c8] sm:$0xff] %v473_v51  ;;  %1281 = vst [vmem:[%s3506_s3 + $0x1d8] sm:$0xff] %v688_v56  ;;  %v477_v3 = vadd.f32 %v476_v57, %v2654_v23  ;;  %v692_v10 = vadd.f32 %v691_v62, %v2657_v28 }
 0x129   :  { %v478_v14 = vpop.f32.mrf.mxu0  ;;  %v693_v21 = vpop.f32.mrf.mxu1 }
 0x12a   :  { %1286 = vst [vmem:[%s3506_s3 + $0x200] sm:$0xff] %v477_v3  ;;  %1288 = vst [vmem:[%s3506_s3 + $0x210] sm:$0xff] %v692_v10  ;;  %v479_v22 = vadd.f32 %v478_v14, %v2664_v29  ;;  %v694_v30 = vadd.f32 %v693_v21, %v2667_v34 }
 0x12c   :  { %1287 = vst [vmem:[%s3506_s3 + $0x208] sm:$0xff] %v479_v22  ;;  %1289 = vst [vmem:[%s3506_s3 + $0x218] sm:$0xff] %v694_v30  ;;  %v482_v33 = vpop.f32.mrf.mxu0  ;;  %v697_v40 = vpop.f32.mrf.mxu1 }
 0x12d   :  { %v483_v44 = vadd.f32 %v482_v33, %v2654_v23  ;;  %v698_v48 = vadd.f32 %v697_v40, %v2657_v28 }
 0x12e   :  { %v484_v53 = vpop.f32.mrf.mxu0  ;;  %v699_v60 = vpop.f32.mrf.mxu1 }
 0x12f   :  { %1294 = vst [vmem:[%s3506_s3 + $0x240] sm:$0xff] %v483_v44  ;;  %1296 = vst [vmem:[%s3506_s3 + $0x250] sm:$0xff] %v698_v48  ;;  %v485_v61 = vadd.f32 %v484_v53, %v2664_v29  ;;  %v700_v8 = vadd.f32 %v699_v60, %v2667_v34 }
 0x131   :  { %1295 = vst [vmem:[%s3506_s3 + $0x248] sm:$0xff] %v485_v61  ;;  %1297 = vst [vmem:[%s3506_s3 + $0x258] sm:$0xff] %v700_v8  ;;  %v488_v13 = vpop.f32.mrf.mxu0  ;;  %v703_v24 = vpop.f32.mrf.mxu1 }
 0x132   :  { %v489_v27 = vadd.f32 %v488_v13, %v2654_v23  ;;  %v704_v38 = vadd.f32 %v703_v24, %v2657_v28 }
 0x133   :  { %v490_v39 = vpop.f32.mrf.mxu0  ;;  %v705_v49 = vpop.f32.mrf.mxu1 }
 0x134   :  { %1302 = vst [vmem:[%s3506_s3 + $0x280] sm:$0xff] %v489_v27  ;;  %1304 = vst [vmem:[%s3506_s3 + $0x290] sm:$0xff] %v704_v38  ;;  %v491_v55 = vadd.f32 %v490_v39, %v2664_v29  ;;  %v706_v0 = vadd.f32 %v705_v49, %v2667_v34 }
 0x135   :  { %v494_v5 = vpop.f32.mrf.mxu0  ;;  %v709_v18 = vpop.f32.mrf.mxu1 }
 0x136   :  { %1303 = vst [vmem:[%s3506_s3 + $0x288] sm:$0xff] %v491_v55  ;;  %1305 = vst [vmem:[%s3506_s3 + $0x298] sm:$0xff] %v706_v0  ;;  %v495_v26 = vadd.f32 %v494_v5, %v2654_v23  ;;  %v710_v41 = vadd.f32 %v709_v18, %v2657_v28 }
 0x137   :  { %v496_v43 = vpop.f32.mrf.mxu0  ;;  %v711_v52 = vpop.f32.mrf.mxu1 }
 0x138   :  { %1310 = vst [vmem:[%s3506_s3 + $0x2c0] sm:$0xff] %v495_v26  ;;  %1312 = vst [vmem:[%s3506_s3 + $0x2d0] sm:$0xff] %v710_v41  ;;  %v497_v54 = vadd.f32 %v496_v43, %v2664_v29  ;;  %v712_v58 = vadd.f32 %v711_v52, %v2667_v34 }
 0x13a   :  { %1311 = vst [vmem:[%s3506_s3 + $0x2c8] sm:$0xff] %v497_v54  ;;  %1313 = vst [vmem:[%s3506_s3 + $0x2d8] sm:$0xff] %v712_v58  ;;  %v500_v59 = vpop.f32.mrf.mxu0  ;;  %v715_v2 = vpop.f32.mrf.mxu1 }
 0x13b   :  { %v501_v4 = vadd.f32 %v500_v59, %v2654_v23  ;;  %v716_v9 = vadd.f32 %v715_v2, %v2657_v28 }
 0x13c   :  { %v502_v11 = vpop.f32.mrf.mxu0  ;;  %v717_v16 = vpop.f32.mrf.mxu1 }
 0x13d   :  { %1318 = vst [vmem:[%s3506_s3 + $0x300] sm:$0xff] %v501_v4  ;;  %1320 = vst [vmem:[%s3506_s3 + $0x310] sm:$0xff] %v716_v9  ;;  %v503_v17 = vadd.f32 %v502_v11, %v2664_v29  ;;  %v718_v19 = vadd.f32 %v717_v16, %v2667_v34 }
 0x13f   :  { %1319 = vst [vmem:[%s3506_s3 + $0x308] sm:$0xff] %v503_v17  ;;  %1321 = vst [vmem:[%s3506_s3 + $0x318] sm:$0xff] %v718_v19  ;;  %v506_v25 = vpop.f32.mrf.mxu0  ;;  %v721_v31 = vpop.f32.mrf.mxu1 }
 0x140   :  { %v507_v32 = vadd.f32 %v506_v25, %v2654_v23  ;;  %v722_v35 = vadd.f32 %v721_v31, %v2657_v28 }
 0x141   :  { %v508_v36 = vpop.f32.mrf.mxu0  ;;  %v723_v46 = vpop.f32.mrf.mxu1 }
 0x142   :  { %1326 = vst [vmem:[%s3506_s3 + $0x340] sm:$0xff] %v507_v32  ;;  %1328 = vst [vmem:[%s3506_s3 + $0x350] sm:$0xff] %v722_v35  ;;  %v509_v47 = vadd.f32 %v508_v36, %v2664_v29  ;;  %v724_v63 = vadd.f32 %v723_v46, %v2667_v34 }
 0x143   :  { %v512_v6 = vpop.f32.mrf.mxu0  ;;  %v727_v7 = vpop.f32.mrf.mxu1 }
 0x144   :  { %1327 = vst [vmem:[%s3506_s3 + $0x348] sm:$0xff] %v509_v47  ;;  %1329 = vst [vmem:[%s3506_s3 + $0x358] sm:$0xff] %v724_v63  ;;  %v513_v15 = vadd.f32 %v512_v6, %v2654_v23  ;;  %v728_v20 = vadd.f32 %v727_v7, %v2657_v28 }
 0x145   :  { %v514_v37 = vpop.f32.mrf.mxu0  ;;  %v729_v42 = vpop.f32.mrf.mxu1 }
 0x146   :  { %1334 = vst [vmem:[%s3506_s3 + $0x380] sm:$0xff] %v513_v15  ;;  %1336 = vst [vmem:[%s3506_s3 + $0x390] sm:$0xff] %v728_v20  ;;  %v515_v45 = vadd.f32 %v514_v37, %v2664_v29  ;;  %v730_v50 = vadd.f32 %v729_v42, %v2667_v34 }
 0x147   :  { %v518_v51 = vpop.f32.mrf.mxu0  ;;  %v733_v56 = vpop.f32.mrf.mxu1 }
 0x148   :  { %1335 = vst [vmem:[%s3506_s3 + $0x388] sm:$0xff] %v515_v45  ;;  %1337 = vst [vmem:[%s3506_s3 + $0x398] sm:$0xff] %v730_v50  ;;  %v519_v57 = vadd.f32 %v518_v51, %v2654_v23  ;;  %v734_v62 = vadd.f32 %v733_v56, %v2657_v28 }
 0x149   :  { %v520_v3 = vpop.f32.mrf.mxu0  ;;  %v735_v10 = vpop.f32.mrf.mxu1 }
 0x14a   :  { %1342 = vst [vmem:[%s3506_s3 + $0x3c0] sm:$0xff] %v519_v57  ;;  %1344 = vst [vmem:[%s3506_s3 + $0x3d0] sm:$0xff] %v734_v62  ;;  %v521_v14 = vadd.f32 %v520_v3, %v2664_v29  ;;  %v736_v21 = vadd.f32 %v735_v10, %v2667_v34 }
 0x14c   :  { %1343 = vst [vmem:[%s3506_s3 + $0x3c8] sm:$0xff] %v521_v14  ;;  %1345 = vst [vmem:[%s3506_s3 + $0x3d8] sm:$0xff] %v736_v21  ;;  %v524_v22 = vpop.f32.mrf.mxu0  ;;  %v739_v30 = vpop.f32.mrf.mxu1 }
 0x14d   :  { %v525_v33 = vadd.f32 %v524_v22, %v2654_v23  ;;  %v740_v40 = vadd.f32 %v739_v30, %v2657_v28 }
 0x14e   :  { %v526_v44 = vpop.f32.mrf.mxu0  ;;  %v741_v48 = vpop.f32.mrf.mxu1 }
 0x14f   :  { %1350 = vst [vmem:[%s3506_s3 + $0x400] sm:$0xff] %v525_v33  ;;  %1352 = vst [vmem:[%s3506_s3 + $0x410] sm:$0xff] %v740_v40  ;;  %v527_v53 = vadd.f32 %v526_v44, %v2664_v29  ;;  %v742_v60 = vadd.f32 %v741_v48, %v2667_v34  ;;  %v340_v44 = vsub.s32 4, %v2634_v1  ;;  %v348_v48 = vsub.s32 6, %v2634_v1 }
 0x151   :  { %1351 = vst [vmem:[%s3506_s3 + $0x408] sm:$0xff] %v527_v53  ;;  %1353 = vst [vmem:[%s3506_s3 + $0x418] sm:$0xff] %v742_v60  ;;  %v530_v61 = vpop.f32.mrf.mxu0  ;;  %v745_v8 = vpop.f32.mrf.mxu1 }
 0x152   :  { %v531_v13 = vadd.f32 %v530_v61, %v2654_v23  ;;  %v746_v24 = vadd.f32 %v745_v8, %v2657_v28  ;;  %v344_v61 = vsub.s32 5, %v2634_v1  ;;  %v352_v8 = vsub.s32 7, %v2634_v1 }
 0x153   :  { %v532_v27 = vpop.f32.mrf.mxu0  ;;  %v747_v38 = vpop.f32.mrf.mxu1 }
 0x154   :  { %1358 = vst [vmem:[%s3506_s3 + $0x440] sm:$0xff] %v531_v13  ;;  %1360 = vst [vmem:[%s3506_s3 + $0x450] sm:$0xff] %v746_v24  ;;  %v533_v39 = vadd.f32 %v532_v27, %v2664_v29  ;;  %v748_v49 = vadd.f32 %v747_v38, %v2667_v34 }
 0x155   :  { %v536_v55 = vpop.f32.mrf.mxu0  ;;  %v751_v0 = vpop.f32.mrf.mxu1 }
 0x156   :  { %1359 = vst [vmem:[%s3506_s3 + $0x448] sm:$0xff] %v533_v39  ;;  %1361 = vst [vmem:[%s3506_s3 + $0x458] sm:$0xff] %v748_v49  ;;  %v537_v5 = vadd.f32 %v536_v55, %v2654_v23  ;;  %v752_v18 = vadd.f32 %v751_v0, %v2657_v28  ;;  %v3078_v39 = vrot.slane %v2647_v12, %v340_v44 }
 0x157   :  { %v538_v26 = vpop.f32.mrf.mxu0  ;;  %v753_v41 = vpop.f32.mrf.mxu1  ;;  %v3081_v49 = vrot.slane %v2647_v12, %v348_v48  ;;  %v3092_v0 = vrot.slane %v2647_v12, %v344_v61 }
 0x158   :  { %1366 = vst [vmem:[%s3506_s3 + $0x480] sm:$0xff] %v537_v5  ;;  %1368 = vst [vmem:[%s3506_s3 + $0x490] sm:$0xff] %v752_v18  ;;  %v539_v43 = vadd.f32 %v538_v26, %v2664_v29  ;;  %v754_v52 = vadd.f32 %v753_v41, %v2667_v34  ;;  %v3095_v5 = vrot.slane %v2647_v12, %v352_v8 }
 0x15a   :  { %1367 = vst [vmem:[%s3506_s3 + $0x488] sm:$0xff] %v539_v43  ;;  %1369 = vst [vmem:[%s3506_s3 + $0x498] sm:$0xff] %v754_v52  ;;  %v542_v54 = vpop.f32.mrf.mxu0  ;;  %v757_v58 = vpop.f32.mrf.mxu1 }
 0x15b   :  { %v543_v59 = vadd.f32 %v542_v54, %v2654_v23  ;;  %v758_v2 = vadd.f32 %v757_v58, %v2657_v28 }
 0x15c   :  { %v544_v4 = vpop.f32.mrf.mxu0  ;;  %v759_v9 = vpop.f32.mrf.mxu1 }
 0x15d   :  { %1374 = vst [vmem:[%s3506_s3 + $0x4c0] sm:$0xff] %v543_v59  ;;  %1376 = vst [vmem:[%s3506_s3 + $0x4d0] sm:$0xff] %v758_v2  ;;  %v545_v11 = vadd.f32 %v544_v4, %v2664_v29  ;;  %v760_v16 = vadd.f32 %v759_v9, %v2667_v34 }
 0x15e   :  { %v548_v17 = vpop.f32.mrf.mxu0  ;;  %v763_v19 = vpop.f32.mrf.mxu1 }
 0x15f   :  { %1375 = vst [vmem:[%s3506_s3 + $0x4c8] sm:$0xff] %v545_v11  ;;  %1377 = vst [vmem:[%s3506_s3 + $0x4d8] sm:$0xff] %v760_v16  ;;  %v549_v25 = vadd.f32 %v548_v17, %v2654_v23  ;;  %v764_v31 = vadd.f32 %v763_v19, %v2657_v28 }
 0x160   :  { %v550_v32 = vpop.f32.mrf.mxu0  ;;  %v765_v35 = vpop.f32.mrf.mxu1 }
 0x161   :  { %1382 = vst [vmem:[%s3506_s3 + $0x500] sm:$0xff] %v549_v25  ;;  %1384 = vst [vmem:[%s3506_s3 + $0x510] sm:$0xff] %v764_v31  ;;  %v551_v36 = vadd.f32 %v550_v32, %v2664_v29  ;;  %v766_v46 = vadd.f32 %v765_v35, %v2667_v34 }
 0x163   :  { %1383 = vst [vmem:[%s3506_s3 + $0x508] sm:$0xff] %v551_v36  ;;  %1385 = vst [vmem:[%s3506_s3 + $0x518] sm:$0xff] %v766_v46  ;;  %v554_v47 = vpop.f32.mrf.mxu0  ;;  %v769_v63 = vpop.f32.mrf.mxu1 }
 0x164   :  { %v555_v6 = vadd.f32 %v554_v47, %v2654_v23  ;;  %v770_v7 = vadd.f32 %v769_v63, %v2657_v28 }
 0x165   :  { %v556_v15 = vpop.f32.mrf.mxu0  ;;  %v771_v20 = vpop.f32.mrf.mxu1 }
 0x166   :  { %1390 = vst [vmem:[%s3506_s3 + $0x540] sm:$0xff] %v555_v6  ;;  %1392 = vst [vmem:[%s3506_s3 + $0x550] sm:$0xff] %v770_v7  ;;  %v557_v37 = vadd.f32 %v556_v15, %v2664_v29  ;;  %v772_v42 = vadd.f32 %v771_v20, %v2667_v34 }
 0x167   :  { %v560_v45 = vpop.f32.mrf.mxu0  ;;  %v775_v50 = vpop.f32.mrf.mxu1 }
 0x168   :  { %1391 = vst [vmem:[%s3506_s3 + $0x548] sm:$0xff] %v557_v37  ;;  %1393 = vst [vmem:[%s3506_s3 + $0x558] sm:$0xff] %v772_v42  ;;  %v561_v51 = vadd.f32 %v560_v45, %v2654_v23  ;;  %v776_v56 = vadd.f32 %v775_v50, %v2657_v28 }
 0x169   :  { %v562_v57 = vpop.f32.mrf.mxu0  ;;  %v777_v62 = vpop.f32.mrf.mxu1 }
 0x16a   :  { %1398 = vst [vmem:[%s3506_s3 + $0x580] sm:$0xff] %v561_v51  ;;  %1400 = vst [vmem:[%s3506_s3 + $0x590] sm:$0xff] %v776_v56  ;;  %v563_v3 = vadd.f32 %v562_v57, %v2664_v29  ;;  %v778_v10 = vadd.f32 %v777_v62, %v2667_v34 }
 0x16c   :  { %1399 = vst [vmem:[%s3506_s3 + $0x588] sm:$0xff] %v563_v3  ;;  %1401 = vst [vmem:[%s3506_s3 + $0x598] sm:$0xff] %v778_v10  ;;  %v566_v14 = vpop.f32.mrf.mxu0  ;;  %v781_v21 = vpop.f32.mrf.mxu1 }
 0x16d   :  { %v567_v22 = vadd.f32 %v566_v14, %v2654_v23  ;;  %v782_v30 = vadd.f32 %v781_v21, %v2657_v28 }
 0x16e   :  { %v568_v33 = vpop.f32.mrf.mxu0  ;;  %v783_v40 = vpop.f32.mrf.mxu1 }
 0x16f   :  { %1406 = vst [vmem:[%s3506_s3 + $0x5c0] sm:$0xff] %v567_v22  ;;  %1408 = vst [vmem:[%s3506_s3 + $0x5d0] sm:$0xff] %v782_v30  ;;  %v569_v53 = vadd.f32 %v568_v33, %v2664_v29  ;;  %v784_v60 = vadd.f32 %v783_v40, %v2667_v34 }
 0x171   :  { %1407 = vst [vmem:[%s3506_s3 + $0x5c8] sm:$0xff] %v569_v53  ;;  %1409 = vst [vmem:[%s3506_s3 + $0x5d8] sm:$0xff] %v784_v60  ;;  %v572_v13 = vpop.f32.mrf.mxu0  ;;  %v787_v24 = vpop.f32.mrf.mxu1 }
 0x172   :  { %v573_v27 = vadd.f32 %v572_v13, %v2654_v23  ;;  %v788_v38 = vadd.f32 %v787_v24, %v2657_v28 }
 0x173   :  { %v574_v1 = vpop.f32.mrf.mxu0  ;;  %v789_v55 = vpop.f32.mrf.mxu1 }
 0x174   :  { %1414 = vst [vmem:[%s3506_s3 + $0x600] sm:$0xff] %v573_v27  ;;  %1416 = vst [vmem:[%s3506_s3 + $0x610] sm:$0xff] %v788_v38  ;;  %v575_v23 = vadd.f32 %v574_v1, %v2664_v29  ;;  %v790_v28 = vadd.f32 %v789_v55, %v2667_v34 }
 0x175   :  { %v858_v18 = vpop.f32.mrf.mxu0  ;;  %v1073_v26 = vpop.f32.mrf.mxu1 }
 0x176   :  { %1415 = vst [vmem:[%s3506_s3 + $0x608] sm:$0xff] %v575_v23  ;;  %1417 = vst [vmem:[%s3506_s3 + $0x618] sm:$0xff] %v790_v28  ;;  %v859_v29 = vadd.f32 %v858_v18, %v3078_v39  ;;  %v1074_v34 = vadd.f32 %v1073_v26, %v3081_v49 }
 0x177   :  { %v860_v41 = vpop.f32.mrf.mxu0  ;;  %v1075_v43 = vpop.f32.mrf.mxu1 }
 0x178   :  { %1226 = vst [vmem:[%s3506_s3 + $0x20] sm:$0xff] %v859_v29  ;;  %1228 = vst [vmem:[%s3506_s3 + $0x30] sm:$0xff] %v1074_v34  ;;  %v861_v12 = vadd.f32 %v860_v41, %v3092_v0  ;;  %v1076_v52 = vadd.f32 %v1075_v43, %v3095_v5 }
 0x179   :  { %v864_v54 = vpop.f32.mrf.mxu0  ;;  %v1079_v58 = vpop.f32.mrf.mxu1 }
 0x17a   :  { %1227 = vst [vmem:[%s3506_s3 + $0x28] sm:$0xff] %v861_v12  ;;  %1229 = vst [vmem:[%s3506_s3 + $0x38] sm:$0xff] %v1076_v52  ;;  %v865_v59 = vadd.f32 %v864_v54, %v3078_v39  ;;  %v1080_v2 = vadd.f32 %v1079_v58, %v3081_v49 }
 0x17b   :  { %v866_v4 = vpop.f32.mrf.mxu0  ;;  %v1081_v9 = vpop.f32.mrf.mxu1 }
 0x17c   :  { %1234 = vst [vmem:[%s3506_s3 + $0x60] sm:$0xff] %v865_v59  ;;  %1236 = vst [vmem:[%s3506_s3 + $0x70] sm:$0xff] %v1080_v2  ;;  %v867_v11 = vadd.f32 %v866_v4, %v3092_v0  ;;  %v1082_v16 = vadd.f32 %v1081_v9, %v3095_v5 }
 0x17d   :  { %v870_v17 = vpop.f32.mrf.mxu0  ;;  %v1085_v19 = vpop.f32.mrf.mxu1 }
 0x17e   :  { %1235 = vst [vmem:[%s3506_s3 + $0x68] sm:$0xff] %v867_v11  ;;  %1237 = vst [vmem:[%s3506_s3 + $0x78] sm:$0xff] %v1082_v16  ;;  %v871_v25 = vadd.f32 %v870_v17, %v3078_v39  ;;  %v1086_v31 = vadd.f32 %v1085_v19, %v3081_v49 }
 0x17f   :  { %v872_v32 = vpop.f32.mrf.mxu0  ;;  %v1087_v35 = vpop.f32.mrf.mxu1 }
 0x180   :  { %1242 = vst [vmem:[%s3506_s3 + $0xa0] sm:$0xff] %v871_v25  ;;  %1244 = vst [vmem:[%s3506_s3 + $0xb0] sm:$0xff] %v1086_v31  ;;  %v873_v36 = vadd.f32 %v872_v32, %v3092_v0  ;;  %v1088_v46 = vadd.f32 %v1087_v35, %v3095_v5 }
 0x181   :  { %v876_v47 = vpop.f32.mrf.mxu0  ;;  %v1091_v63 = vpop.f32.mrf.mxu1 }
 0x182   :  { %1243 = vst [vmem:[%s3506_s3 + $0xa8] sm:$0xff] %v873_v36  ;;  %1245 = vst [vmem:[%s3506_s3 + $0xb8] sm:$0xff] %v1088_v46  ;;  %v877_v6 = vadd.f32 %v876_v47, %v3078_v39  ;;  %v1092_v7 = vadd.f32 %v1091_v63, %v3081_v49 }
 0x183   :  { %v878_v15 = vpop.f32.mrf.mxu0  ;;  %v1093_v20 = vpop.f32.mrf.mxu1 }
 0x184   :  { %1250 = vst [vmem:[%s3506_s3 + $0xe0] sm:$0xff] %v877_v6  ;;  %1252 = vst [vmem:[%s3506_s3 + $0xf0] sm:$0xff] %v1092_v7  ;;  %v879_v37 = vadd.f32 %v878_v15, %v3092_v0  ;;  %v1094_v42 = vadd.f32 %v1093_v20, %v3095_v5 }
 0x185   :  { %v882_v45 = vpop.f32.mrf.mxu0  ;;  %v1097_v50 = vpop.f32.mrf.mxu1 }
 0x186   :  { %1251 = vst [vmem:[%s3506_s3 + $0xe8] sm:$0xff] %v879_v37  ;;  %1253 = vst [vmem:[%s3506_s3 + $0xf8] sm:$0xff] %v1094_v42  ;;  %v883_v51 = vadd.f32 %v882_v45, %v3078_v39  ;;  %v1098_v56 = vadd.f32 %v1097_v50, %v3081_v49 }
 0x187   :  { %v884_v57 = vpop.f32.mrf.mxu0  ;;  %v1099_v62 = vpop.f32.mrf.mxu1 }
 0x188   :  { %1258 = vst [vmem:[%s3506_s3 + $0x120] sm:$0xff] %v883_v51  ;;  %1260 = vst [vmem:[%s3506_s3 + $0x130] sm:$0xff] %v1098_v56  ;;  %v885_v3 = vadd.f32 %v884_v57, %v3092_v0  ;;  %v1100_v10 = vadd.f32 %v1099_v62, %v3095_v5 }
 0x189   :  { %v888_v14 = vpop.f32.mrf.mxu0  ;;  %v1103_v21 = vpop.f32.mrf.mxu1 }
 0x18a   :  { %1259 = vst [vmem:[%s3506_s3 + $0x128] sm:$0xff] %v885_v3  ;;  %1261 = vst [vmem:[%s3506_s3 + $0x138] sm:$0xff] %v1100_v10  ;;  %v889_v22 = vadd.f32 %v888_v14, %v3078_v39  ;;  %v1104_v30 = vadd.f32 %v1103_v21, %v3081_v49 }
 0x18b   :  { %v890_v33 = vpop.f32.mrf.mxu0  ;;  %v1105_v40 = vpop.f32.mrf.mxu1 }
 0x18c   :  { %1266 = vst [vmem:[%s3506_s3 + $0x160] sm:$0xff] %v889_v22  ;;  %1268 = vst [vmem:[%s3506_s3 + $0x170] sm:$0xff] %v1104_v30  ;;  %v891_v44 = vadd.f32 %v890_v33, %v3092_v0  ;;  %v1106_v48 = vadd.f32 %v1105_v40, %v3095_v5 }
 0x18d   :  { %v894_v53 = vpop.f32.mrf.mxu0  ;;  %v1109_v60 = vpop.f32.mrf.mxu1 }
 0x18e   :  { %1267 = vst [vmem:[%s3506_s3 + $0x168] sm:$0xff] %v891_v44  ;;  %1269 = vst [vmem:[%s3506_s3 + $0x178] sm:$0xff] %v1106_v48  ;;  %v895_v61 = vadd.f32 %v894_v53, %v3078_v39  ;;  %v1110_v8 = vadd.f32 %v1109_v60, %v3081_v49 }
 0x18f   :  { %v896_v13 = vpop.f32.mrf.mxu0  ;;  %v1111_v24 = vpop.f32.mrf.mxu1 }
 0x190   :  { %1274 = vst [vmem:[%s3506_s3 + $0x1a0] sm:$0xff] %v895_v61  ;;  %1276 = vst [vmem:[%s3506_s3 + $0x1b0] sm:$0xff] %v1110_v8  ;;  %v897_v27 = vadd.f32 %v896_v13, %v3092_v0  ;;  %v1112_v38 = vadd.f32 %v1111_v24, %v3095_v5 }
 0x191   :  { %v900_v1 = vpop.f32.mrf.mxu0  ;;  %v1115_v55 = vpop.f32.mrf.mxu1 }
 0x192   :  { %1275 = vst [vmem:[%s3506_s3 + $0x1a8] sm:$0xff] %v897_v27  ;;  %1277 = vst [vmem:[%s3506_s3 + $0x1b8] sm:$0xff] %v1112_v38  ;;  %v901_v23 = vadd.f32 %v900_v1, %v3078_v39  ;;  %v1116_v28 = vadd.f32 %v1115_v55, %v3081_v49 }
 0x193   :  { %v902_v18 = vpop.f32.mrf.mxu0  ;;  %v1117_v26 = vpop.f32.mrf.mxu1 }
 0x194   :  { %1282 = vst [vmem:[%s3506_s3 + $0x1e0] sm:$0xff] %v901_v23  ;;  %1284 = vst [vmem:[%s3506_s3 + $0x1f0] sm:$0xff] %v1116_v28  ;;  %v903_v29 = vadd.f32 %v902_v18, %v3092_v0  ;;  %v1118_v34 = vadd.f32 %v1117_v26, %v3095_v5 }
 0x195   :  { %v906_v41 = vpop.f32.mrf.mxu0  ;;  %v1121_v43 = vpop.f32.mrf.mxu1 }
 0x196   :  { %1283 = vst [vmem:[%s3506_s3 + $0x1e8] sm:$0xff] %v903_v29  ;;  %1285 = vst [vmem:[%s3506_s3 + $0x1f8] sm:$0xff] %v1118_v34  ;;  %v907_v12 = vadd.f32 %v906_v41, %v3078_v39  ;;  %v1122_v52 = vadd.f32 %v1121_v43, %v3081_v49 }
 0x197   :  { %v908_v54 = vpop.f32.mrf.mxu0  ;;  %v1123_v58 = vpop.f32.mrf.mxu1 }
 0x198   :  { %1290 = vst [vmem:[%s3506_s3 + $0x220] sm:$0xff] %v907_v12  ;;  %1292 = vst [vmem:[%s3506_s3 + $0x230] sm:$0xff] %v1122_v52  ;;  %v909_v59 = vadd.f32 %v908_v54, %v3092_v0  ;;  %v1124_v2 = vadd.f32 %v1123_v58, %v3095_v5 }
 0x199   :  { %v912_v4 = vpop.f32.mrf.mxu0  ;;  %v1127_v9 = vpop.f32.mrf.mxu1 }
 0x19a   :  { %1291 = vst [vmem:[%s3506_s3 + $0x228] sm:$0xff] %v909_v59  ;;  %1293 = vst [vmem:[%s3506_s3 + $0x238] sm:$0xff] %v1124_v2  ;;  %v913_v11 = vadd.f32 %v912_v4, %v3078_v39  ;;  %v1128_v16 = vadd.f32 %v1127_v9, %v3081_v49 }
 0x19b   :  { %v914_v17 = vpop.f32.mrf.mxu0  ;;  %v1129_v19 = vpop.f32.mrf.mxu1 }
 0x19c   :  { %1298 = vst [vmem:[%s3506_s3 + $0x260] sm:$0xff] %v913_v11  ;;  %1300 = vst [vmem:[%s3506_s3 + $0x270] sm:$0xff] %v1128_v16  ;;  %v915_v25 = vadd.f32 %v914_v17, %v3092_v0  ;;  %v1130_v31 = vadd.f32 %v1129_v19, %v3095_v5 }
 0x19d   :  { %v918_v32 = vpop.f32.mrf.mxu0  ;;  %v1133_v35 = vpop.f32.mrf.mxu1 }
 0x19e   :  { %1299 = vst [vmem:[%s3506_s3 + $0x268] sm:$0xff] %v915_v25  ;;  %1301 = vst [vmem:[%s3506_s3 + $0x278] sm:$0xff] %v1130_v31  ;;  %v919_v36 = vadd.f32 %v918_v32, %v3078_v39  ;;  %v1134_v46 = vadd.f32 %v1133_v35, %v3081_v49 }
 0x19f   :  { %v920_v47 = vpop.f32.mrf.mxu0  ;;  %v1135_v63 = vpop.f32.mrf.mxu1 }
 0x1a0   :  { %1306 = vst [vmem:[%s3506_s3 + $0x2a0] sm:$0xff] %v919_v36  ;;  %1308 = vst [vmem:[%s3506_s3 + $0x2b0] sm:$0xff] %v1134_v46  ;;  %v921_v6 = vadd.f32 %v920_v47, %v3092_v0  ;;  %v1136_v7 = vadd.f32 %v1135_v63, %v3095_v5 }
 0x1a1   :  { %v924_v15 = vpop.f32.mrf.mxu0  ;;  %v1139_v20 = vpop.f32.mrf.mxu1 }
 0x1a2   :  { %1307 = vst [vmem:[%s3506_s3 + $0x2a8] sm:$0xff] %v921_v6  ;;  %1309 = vst [vmem:[%s3506_s3 + $0x2b8] sm:$0xff] %v1136_v7  ;;  %v925_v37 = vadd.f32 %v924_v15, %v3078_v39  ;;  %v1140_v42 = vadd.f32 %v1139_v20, %v3081_v49 }
 0x1a3   :  { %v926_v45 = vpop.f32.mrf.mxu0  ;;  %v1141_v50 = vpop.f32.mrf.mxu1 }
 0x1a4   :  { %1314 = vst [vmem:[%s3506_s3 + $0x2e0] sm:$0xff] %v925_v37  ;;  %1316 = vst [vmem:[%s3506_s3 + $0x2f0] sm:$0xff] %v1140_v42  ;;  %v927_v51 = vadd.f32 %v926_v45, %v3092_v0  ;;  %v1142_v56 = vadd.f32 %v1141_v50, %v3095_v5 }
 0x1a5   :  { %v930_v57 = vpop.f32.mrf.mxu0  ;;  %v1145_v62 = vpop.f32.mrf.mxu1 }
 0x1a6   :  { %1315 = vst [vmem:[%s3506_s3 + $0x2e8] sm:$0xff] %v927_v51  ;;  %1317 = vst [vmem:[%s3506_s3 + $0x2f8] sm:$0xff] %v1142_v56  ;;  %v931_v3 = vadd.f32 %v930_v57, %v3078_v39  ;;  %v1146_v10 = vadd.f32 %v1145_v62, %v3081_v49 }
 0x1a7   :  { %v932_v14 = vpop.f32.mrf.mxu0  ;;  %v1147_v21 = vpop.f32.mrf.mxu1 }
 0x1a8   :  { %1322 = vst [vmem:[%s3506_s3 + $0x320] sm:$0xff] %v931_v3  ;;  %1324 = vst [vmem:[%s3506_s3 + $0x330] sm:$0xff] %v1146_v10  ;;  %v933_v22 = vadd.f32 %v932_v14, %v3092_v0  ;;  %v1148_v30 = vadd.f32 %v1147_v21, %v3095_v5 }
 0x1a9   :  { %v936_v33 = vpop.f32.mrf.mxu0  ;;  %v1151_v40 = vpop.f32.mrf.mxu1 }
 0x1aa   :  { %1323 = vst [vmem:[%s3506_s3 + $0x328] sm:$0xff] %v933_v22  ;;  %1325 = vst [vmem:[%s3506_s3 + $0x338] sm:$0xff] %v1148_v30  ;;  %v937_v44 = vadd.f32 %v936_v33, %v3078_v39  ;;  %v1152_v48 = vadd.f32 %v1151_v40, %v3081_v49 }
 0x1ab   :  { %v938_v53 = vpop.f32.mrf.mxu0  ;;  %v1153_v60 = vpop.f32.mrf.mxu1 }
 0x1ac   :  { %1330 = vst [vmem:[%s3506_s3 + $0x360] sm:$0xff] %v937_v44  ;;  %1332 = vst [vmem:[%s3506_s3 + $0x370] sm:$0xff] %v1152_v48  ;;  %v939_v61 = vadd.f32 %v938_v53, %v3092_v0  ;;  %v1154_v8 = vadd.f32 %v1153_v60, %v3095_v5 }
 0x1ad   :  { %v942_v13 = vpop.f32.mrf.mxu0  ;;  %v1157_v24 = vpop.f32.mrf.mxu1 }
 0x1ae   :  { %1331 = vst [vmem:[%s3506_s3 + $0x368] sm:$0xff] %v939_v61  ;;  %1333 = vst [vmem:[%s3506_s3 + $0x378] sm:$0xff] %v1154_v8  ;;  %v943_v27 = vadd.f32 %v942_v13, %v3078_v39  ;;  %v1158_v38 = vadd.f32 %v1157_v24, %v3081_v49 }
 0x1af   :  { %v944_v1 = vpop.f32.mrf.mxu0  ;;  %v1159_v55 = vpop.f32.mrf.mxu1 }
 0x1b0   :  { %1338 = vst [vmem:[%s3506_s3 + $0x3a0] sm:$0xff] %v943_v27  ;;  %1340 = vst [vmem:[%s3506_s3 + $0x3b0] sm:$0xff] %v1158_v38  ;;  %v945_v23 = vadd.f32 %v944_v1, %v3092_v0  ;;  %v1160_v28 = vadd.f32 %v1159_v55, %v3095_v5 }
 0x1b1   :  { %v948_v18 = vpop.f32.mrf.mxu0  ;;  %v1163_v26 = vpop.f32.mrf.mxu1 }
 0x1b2   :  { %1339 = vst [vmem:[%s3506_s3 + $0x3a8] sm:$0xff] %v945_v23  ;;  %1341 = vst [vmem:[%s3506_s3 + $0x3b8] sm:$0xff] %v1160_v28  ;;  %v949_v29 = vadd.f32 %v948_v18, %v3078_v39  ;;  %v1164_v34 = vadd.f32 %v1163_v26, %v3081_v49 }
 0x1b3   :  { %v950_v41 = vpop.f32.mrf.mxu0  ;;  %v1165_v43 = vpop.f32.mrf.mxu1 }
 0x1b4   :  { %1346 = vst [vmem:[%s3506_s3 + $0x3e0] sm:$0xff] %v949_v29  ;;  %1348 = vst [vmem:[%s3506_s3 + $0x3f0] sm:$0xff] %v1164_v34  ;;  %v951_v12 = vadd.f32 %v950_v41, %v3092_v0  ;;  %v1166_v52 = vadd.f32 %v1165_v43, %v3095_v5 }
 0x1b5   :  { %v954_v54 = vpop.f32.mrf.mxu0  ;;  %v1169_v58 = vpop.f32.mrf.mxu1 }
 0x1b6   :  { %1347 = vst [vmem:[%s3506_s3 + $0x3e8] sm:$0xff] %v951_v12  ;;  %1349 = vst [vmem:[%s3506_s3 + $0x3f8] sm:$0xff] %v1166_v52  ;;  %v955_v59 = vadd.f32 %v954_v54, %v3078_v39  ;;  %v1170_v2 = vadd.f32 %v1169_v58, %v3081_v49 }
 0x1b7   :  { %v956_v4 = vpop.f32.mrf.mxu0  ;;  %v1171_v9 = vpop.f32.mrf.mxu1 }
 0x1b8   :  { %1354 = vst [vmem:[%s3506_s3 + $0x420] sm:$0xff] %v955_v59  ;;  %1356 = vst [vmem:[%s3506_s3 + $0x430] sm:$0xff] %v1170_v2  ;;  %v957_v11 = vadd.f32 %v956_v4, %v3092_v0  ;;  %v1172_v16 = vadd.f32 %v1171_v9, %v3095_v5 }
 0x1b9   :  { %v960_v17 = vpop.f32.mrf.mxu0  ;;  %v1175_v19 = vpop.f32.mrf.mxu1 }
 0x1ba   :  { %1355 = vst [vmem:[%s3506_s3 + $0x428] sm:$0xff] %v957_v11  ;;  %1357 = vst [vmem:[%s3506_s3 + $0x438] sm:$0xff] %v1172_v16  ;;  %v961_v25 = vadd.f32 %v960_v17, %v3078_v39  ;;  %v1176_v31 = vadd.f32 %v1175_v19, %v3081_v49 }
 0x1bb   :  { %v962_v32 = vpop.f32.mrf.mxu0  ;;  %v1177_v35 = vpop.f32.mrf.mxu1 }
 0x1bc   :  { %1362 = vst [vmem:[%s3506_s3 + $0x460] sm:$0xff] %v961_v25  ;;  %1364 = vst [vmem:[%s3506_s3 + $0x470] sm:$0xff] %v1176_v31  ;;  %v963_v36 = vadd.f32 %v962_v32, %v3092_v0  ;;  %v1178_v46 = vadd.f32 %v1177_v35, %v3095_v5 }
 0x1bd   :  { %v966_v47 = vpop.f32.mrf.mxu0  ;;  %v1181_v63 = vpop.f32.mrf.mxu1 }
 0x1be   :  { %1363 = vst [vmem:[%s3506_s3 + $0x468] sm:$0xff] %v963_v36  ;;  %1365 = vst [vmem:[%s3506_s3 + $0x478] sm:$0xff] %v1178_v46  ;;  %v967_v6 = vadd.f32 %v966_v47, %v3078_v39  ;;  %v1182_v7 = vadd.f32 %v1181_v63, %v3081_v49 }
 0x1bf   :  { %v968_v15 = vpop.f32.mrf.mxu0  ;;  %v1183_v20 = vpop.f32.mrf.mxu1 }
 0x1c0   :  { %1370 = vst [vmem:[%s3506_s3 + $0x4a0] sm:$0xff] %v967_v6  ;;  %1372 = vst [vmem:[%s3506_s3 + $0x4b0] sm:$0xff] %v1182_v7  ;;  %v969_v37 = vadd.f32 %v968_v15, %v3092_v0  ;;  %v1184_v42 = vadd.f32 %v1183_v20, %v3095_v5 }
 0x1c1   :  { %v972_v45 = vpop.f32.mrf.mxu0  ;;  %v1187_v50 = vpop.f32.mrf.mxu1 }
 0x1c2   :  { %1371 = vst [vmem:[%s3506_s3 + $0x4a8] sm:$0xff] %v969_v37  ;;  %1373 = vst [vmem:[%s3506_s3 + $0x4b8] sm:$0xff] %v1184_v42  ;;  %v973_v51 = vadd.f32 %v972_v45, %v3078_v39  ;;  %v1188_v56 = vadd.f32 %v1187_v50, %v3081_v49 }
 0x1c3   :  { %v974_v57 = vpop.f32.mrf.mxu0  ;;  %v1189_v62 = vpop.f32.mrf.mxu1 }
 0x1c4   :  { %1378 = vst [vmem:[%s3506_s3 + $0x4e0] sm:$0xff] %v973_v51  ;;  %1380 = vst [vmem:[%s3506_s3 + $0x4f0] sm:$0xff] %v1188_v56  ;;  %v975_v3 = vadd.f32 %v974_v57, %v3092_v0  ;;  %v1190_v10 = vadd.f32 %v1189_v62, %v3095_v5 }
 0x1c5   :  { %v978_v14 = vpop.f32.mrf.mxu0  ;;  %v1193_v21 = vpop.f32.mrf.mxu1 }
 0x1c6   :  { %1379 = vst [vmem:[%s3506_s3 + $0x4e8] sm:$0xff] %v975_v3  ;;  %1381 = vst [vmem:[%s3506_s3 + $0x4f8] sm:$0xff] %v1190_v10  ;;  %v979_v22 = vadd.f32 %v978_v14, %v3078_v39  ;;  %v1194_v30 = vadd.f32 %v1193_v21, %v3081_v49 }
 0x1c7   :  { %v980_v33 = vpop.f32.mrf.mxu0  ;;  %v1195_v40 = vpop.f32.mrf.mxu1 }
 0x1c8   :  { %1386 = vst [vmem:[%s3506_s3 + $0x520] sm:$0xff] %v979_v22  ;;  %1388 = vst [vmem:[%s3506_s3 + $0x530] sm:$0xff] %v1194_v30  ;;  %v981_v44 = vadd.f32 %v980_v33, %v3092_v0  ;;  %v1196_v48 = vadd.f32 %v1195_v40, %v3095_v5 }
 0x1c9   :  { %v984_v53 = vpop.f32.mrf.mxu0  ;;  %v1199_v60 = vpop.f32.mrf.mxu1 }
 0x1ca   :  { %1387 = vst [vmem:[%s3506_s3 + $0x528] sm:$0xff] %v981_v44  ;;  %1389 = vst [vmem:[%s3506_s3 + $0x538] sm:$0xff] %v1196_v48  ;;  %v985_v61 = vadd.f32 %v984_v53, %v3078_v39  ;;  %v1200_v8 = vadd.f32 %v1199_v60, %v3081_v49 }
 0x1cb   :  { %v986_v13 = vpop.f32.mrf.mxu0  ;;  %v1201_v24 = vpop.f32.mrf.mxu1 }
 0x1cc   :  { %1394 = vst [vmem:[%s3506_s3 + $0x560] sm:$0xff] %v985_v61  ;;  %1396 = vst [vmem:[%s3506_s3 + $0x570] sm:$0xff] %v1200_v8  ;;  %v987_v27 = vadd.f32 %v986_v13, %v3092_v0  ;;  %v1202_v38 = vadd.f32 %v1201_v24, %v3095_v5 }
 0x1cd   :  { %v990_v1 = vpop.f32.mrf.mxu0  ;;  %v1205_v55 = vpop.f32.mrf.mxu1 }
 0x1ce   :  { %1395 = vst [vmem:[%s3506_s3 + $0x568] sm:$0xff] %v987_v27  ;;  %1397 = vst [vmem:[%s3506_s3 + $0x578] sm:$0xff] %v1202_v38  ;;  %v991_v23 = vadd.f32 %v990_v1, %v3078_v39  ;;  %v1206_v28 = vadd.f32 %v1205_v55, %v3081_v49 }
 0x1cf   :  { %v992_v18 = vpop.f32.mrf.mxu0  ;;  %v1207_v26 = vpop.f32.mrf.mxu1 }
 0x1d0   :  { %1402 = vst [vmem:[%s3506_s3 + $0x5a0] sm:$0xff] %v991_v23  ;;  %1404 = vst [vmem:[%s3506_s3 + $0x5b0] sm:$0xff] %v1206_v28  ;;  %v993_v29 = vadd.f32 %v992_v18, %v3092_v0  ;;  %v1208_v34 = vadd.f32 %v1207_v26, %v3095_v5 }
 0x1d1   :  { %v996_v41 = vpop.f32.mrf.mxu0  ;;  %v1211_v43 = vpop.f32.mrf.mxu1 }
 0x1d2   :  { %1403 = vst [vmem:[%s3506_s3 + $0x5a8] sm:$0xff] %v993_v29  ;;  %1405 = vst [vmem:[%s3506_s3 + $0x5b8] sm:$0xff] %v1208_v34  ;;  %v997_v12 = vadd.f32 %v996_v41, %v3078_v39  ;;  %v1212_v52 = vadd.f32 %v1211_v43, %v3081_v49 }
 0x1d3   :  { %v998_v54 = vpop.f32.mrf.mxu0  ;;  %v1213_v58 = vpop.f32.mrf.mxu1 }
 0x1d4   :  { %1410 = vst [vmem:[%s3506_s3 + $0x5e0] sm:$0xff] %v997_v12  ;;  %1412 = vst [vmem:[%s3506_s3 + $0x5f0] sm:$0xff] %v1212_v52  ;;  %v999_v59 = vadd.f32 %v998_v54, %v3092_v0  ;;  %v1214_v2 = vadd.f32 %v1213_v58, %v3095_v5 }
 0x1d5   :  { %v1002_v4 = vpop.f32.mrf.mxu0  ;;  %v1217_v9 = vpop.f32.mrf.mxu1 }
 0x1d6   :  { %1411 = vst [vmem:[%s3506_s3 + $0x5e8] sm:$0xff] %v999_v59  ;;  %1413 = vst [vmem:[%s3506_s3 + $0x5f8] sm:$0xff] %v1214_v2  ;;  %v1003_v11 = vadd.f32 %v1002_v4, %v3078_v39  ;;  %v1218_v16 = vadd.f32 %v1217_v9, %v3081_v49 }
 0x1d7   :  { %v1004_v17 = vpop.f32.mrf.mxu0  ;;  %v1219_v19 = vpop.f32.mrf.mxu1 }
 0x1d8   :  { %1418 = vst [vmem:[%s3506_s3 + $0x620] sm:$0xff] %v1003_v11  ;;  %1420 = vst [vmem:[%s3506_s3 + $0x630] sm:$0xff] %v1218_v16  ;;  %v1005_v25 = vadd.f32 %v1004_v17, %v3092_v0  ;;  %v1220_v31 = vadd.f32 %v1219_v19, %v3095_v5 }
 0x1da   :  { %1419 = vst [vmem:[%s3506_s3 + $0x628] sm:$0xff] %v1005_v25  ;;  %1421 = vst [vmem:[%s3506_s3 + $0x638] sm:$0xff] %v1220_v31 }

// kernel: cnn_lstm2_forward.13
= control target key start
LH: loop header
LB: loop body
LE: loop exit
PB: predicated region body
PF: predicated region fallthrough
CT: control target
= control target key end

     0   :  { %v371_v30 = vmov 1983009808   ;;  %v92_v32 = vlaneseq  ;;  %s594_s0 = inlined_call_operand.vmem [shape: f32[2,512], index: 0, kind: input, shape index: {}]   ;;  %s595_s1 = inlined_call_operand.vmem [shape: f32[512,128], index: 1, kind: input, shape index: {}]   ;;  %s596_s2 = inlined_call_operand.vmem [shape: f32[1,128], index: 2, kind: input, shape index: {}]   ;;  %s597_s3 = inlined_call_operand.hbm [shape: f32[2,128], index: 3, kind: output, shape index: {}]  }
   0x1   :  { %v47_v0 = vld [vmem:[%s595_s1 + $0xf8] sm:$0xff]  ;;  %v46_v4 = vld [vmem:[%s595_s1 + $0xf0] sm:$0xff]  ;;  %v45_v8 = vld [vmem:[%s595_s1 + $0xe8] sm:$0xff]  ;;  %v90_v31 = vunpack.c.l.s4 %v371_v30 }
   0x2   :  { %v79_v1 = vld [vmem:[%s595_s1 + $0x1f8] sm:$0xff]  ;;  %272 = vmatprep.subr.mxu0 %v47_v0  ;;  %v78_v5 = vld [vmem:[%s595_s1 + $0x1f0] sm:$0xff]  ;;  %v77_v9 = vld [vmem:[%s595_s1 + $0x1e8] sm:$0xff]  ;;  %v93_v42 = vshrl.u32 %v92_v32, 7 }
   0x3   :  { %v31_v2 = vld [vmem:[%s595_s1 + $0x78] sm:$0xff]  ;;  %307 = vmatprep.subr.mxu1 %v79_v1  ;;  %v30_v6 = vld [vmem:[%s595_s1 + $0x70] sm:$0xff]  ;;  %v29_v10 = vld [vmem:[%s595_s1 + $0x68] sm:$0xff]  ;;  %v91_v41 = vunpack.c.0.s8 %v90_v31 }
   0x4   :  { %v63_v3 = vld [vmem:[%s595_s1 + $0x178] sm:$0xff]  ;;  %273 = vmatpush3.msra.mxu0 %v31_v2  ;;  %v62_v7 = vld [vmem:[%s595_s1 + $0x170] sm:$0xff]  ;;  %v61_v11 = vld [vmem:[%s595_s1 + $0x168] sm:$0xff] }
   0x5   :  { %308 = vmatpush3.msra.mxu1 %v63_v3  ;;  %274 = vmatprep.subr.mxu0 %v46_v4  ;;  %v44_v12 = vld [vmem:[%s595_s1 + $0xe0] sm:$0xff]  ;;  %v43_v16 = vld [vmem:[%s595_s1 + $0xd8] sm:$0xff]  ;;  %v42_v20 = vld [vmem:[%s595_s1 + $0xd0] sm:$0xff]  ;;  %v94_v52 = vsub.s32 %v91_v41, %v93_v42 }
   0x6   :  { %309 = vmatprep.subr.mxu1 %v78_v5  ;;  %275 = vmatpush3.msra.mxu0 %v30_v6  ;;  %v76_v13 = vld [vmem:[%s595_s1 + $0x1e0] sm:$0xff]  ;;  %v75_v17 = vld [vmem:[%s595_s1 + $0x1d8] sm:$0xff]  ;;  %v74_v21 = vld [vmem:[%s595_s1 + $0x1d0] sm:$0xff] }
   0x7   :  { %310 = vmatpush3.msra.mxu1 %v62_v7  ;;  %276 = vmatprep.subr.mxu0 %v45_v8  ;;  %v28_v14 = vld [vmem:[%s595_s1 + $0x60] sm:$0xff]  ;;  %v27_v18 = vld [vmem:[%s595_s1 + $0x58] sm:$0xff]  ;;  %v26_v22 = vld [vmem:[%s595_s1 + $0x50] sm:$0xff] }
   0x8   :  { %311 = vmatprep.subr.mxu1 %v77_v9  ;;  %v60_v15 = vld [vmem:[%s595_s1 + $0x160] sm:$0xff]  ;;  %277 = vmatpush3.msra.mxu0 %v29_v10  ;;  %v59_v19 = vld [vmem:[%s595_s1 + $0x158] sm:$0xff]  ;;  %v58_v23 = vld [vmem:[%s595_s1 + $0x150] sm:$0xff] }
   0x9   :  { %312 = vmatpush3.msra.mxu1 %v61_v11  ;;  %278 = vmatprep.subr.mxu0 %v44_v12  ;;  %v41_v24 = vld [vmem:[%s595_s1 + $0xc8] sm:$0xff]  ;;  %v40_v28 = vld [vmem:[%s595_s1 + $0xc0] sm:$0xff]  ;;  %v39_v35 = vld [vmem:[%s595_s1 + $0xb8] sm:$0xff] }
   0xa   :  { %313 = vmatprep.subr.mxu1 %v76_v13  ;;  %279 = vmatpush3.msra.mxu0 %v28_v14  ;;  %v73_v25 = vld [vmem:[%s595_s1 + $0x1c8] sm:$0xff]  ;;  %v72_v29 = vld [vmem:[%s595_s1 + $0x1c0] sm:$0xff]  ;;  %v71_v36 = vld [vmem:[%s595_s1 + $0x1b8] sm:$0xff] }
   0xb   :  { %314 = vmatpush3.msra.mxu1 %v60_v15  ;;  %280 = vmatprep.subr.mxu0 %v43_v16  ;;  %v25_v26 = vld [vmem:[%s595_s1 + $0x48] sm:$0xff]  ;;  %v24_v33 = vld [vmem:[%s595_s1 + $0x40] sm:$0xff]  ;;  %v23_v37 = vld [vmem:[%s595_s1 + $0x38] sm:$0xff] }
   0xc   :  { %315 = vmatprep.subr.mxu1 %v75_v17  ;;  %281 = vmatpush3.msra.mxu0 %v27_v18  ;;  %v57_v27 = vld [vmem:[%s595_s1 + $0x148] sm:$0xff]  ;;  %v56_v34 = vld [vmem:[%s595_s1 + $0x140] sm:$0xff]  ;;  %v55_v38 = vld [vmem:[%s595_s1 + $0x138] sm:$0xff] }
   0xd   :  { %316 = vmatpush3.msra.mxu1 %v59_v19  ;;  %282 = vmatprep.subr.mxu0 %v42_v20  ;;  %v38_v39 = vld [vmem:[%s595_s1 + $0xb0] sm:$0xff]  ;;  %v37_v45 = vld [vmem:[%s595_s1 + $0xa8] sm:$0xff]  ;;  %v36_v49 = vld [vmem:[%s595_s1 + $0xa0] sm:$0xff] }
   0xe   :  { %317 = vmatprep.subr.mxu1 %v74_v21  ;;  %283 = vmatpush3.msra.mxu0 %v26_v22  ;;  %v70_v40 = vld [vmem:[%s595_s1 + $0x1b0] sm:$0xff]  ;;  %v69_v46 = vld [vmem:[%s595_s1 + $0x1a8] sm:$0xff]  ;;  %v68_v50 = vld [vmem:[%s595_s1 + $0x1a0] sm:$0xff] }
   0xf   :  { %318 = vmatpush3.msra.mxu1 %v58_v23  ;;  %284 = vmatprep.subr.mxu0 %v41_v24  ;;  %v22_v43 = vld [vmem:[%s595_s1 + $0x30] sm:$0xff]  ;;  %v21_v47 = vld [vmem:[%s595_s1 + $0x28] sm:$0xff]  ;;  %v20_v51 = vld [vmem:[%s595_s1 + $0x20] sm:$0xff] }
  0x10   :  { %319 = vmatprep.subr.mxu1 %v73_v25  ;;  %285 = vmatpush3.msra.mxu0 %v25_v26  ;;  %v54_v44 = vld [vmem:[%s595_s1 + $0x130] sm:$0xff]  ;;  %v53_v48 = vld [vmem:[%s595_s1 + $0x128] sm:$0xff]  ;;  %v52_v53 = vld [vmem:[%s595_s1 + $0x120] sm:$0xff] }
  0x11   :  { %320 = vmatpush3.msra.mxu1 %v57_v27  ;;  %286 = vmatprep.subr.mxu0 %v40_v28  ;;  %v15_v54 = vld [vmem:[%s594_s0] sm:$0xff] }
  0x12   :  { %321 = vmatprep.subr.mxu1 %v72_v29  ;;  %287 = vmatpush3.msra.mxu0 %v24_v33 }
  0x13   :  { %322 = vmatpush3.msra.mxu1 %v56_v34  ;;  %288 = vmatprep.subr.mxu0 %v39_v35 }
  0x14   :  { %323 = vmatprep.subr.mxu1 %v71_v36  ;;  %289 = vmatpush3.msra.mxu0 %v23_v37 }
  0x15   :  { %324 = vmatpush3.msra.mxu1 %v55_v38  ;;  %290 = vmatprep.subr.mxu0 %v38_v39 }
  0x16   :  { %325 = vmatprep.subr.mxu1 %v70_v40  ;;  %291 = vmatpush3.msra.mxu0 %v22_v43 }
  0x17   :  { %326 = vmatpush3.msra.mxu1 %v54_v44  ;;  %292 = vmatprep.subr.mxu0 %v37_v45 }
  0x18   :  { %327 = vmatprep.subr.mxu1 %v69_v46 }
  0x19   :  { %8 = vsyncpa [#allocation3], 0  ;;  %293 = vmatpush3.msra.mxu0 %v21_v47  ;;  %328 = vmatpush3.msra.mxu1 %v53_v48  ;;  %v35_v55 = vld [vmem:[%s595_s1 + $0x98] sm:$0xff]  ;;  %v88_v57 = vcombine.high %v15_v54, %v15_v54  ;;  %v34_v60 = vld [vmem:[%s595_s1 + $0x90] sm:$0xff]  ;;  %v95_v62 = vrot.slane %v15_v54, %v94_v52 }
  0x1a   :  { %v67_v56 = vld [vmem:[%s595_s1 + $0x198] sm:$0xff]  ;;  %294 = vmatprep.subr.mxu0 %v36_v49  ;;  %329 = vmatprep.subr.mxu1 %v68_v50  ;;  %v66_v61 = vld [vmem:[%s595_s1 + $0x190] sm:$0xff]  ;;  %v33_v2 = vld [vmem:[%s595_s1 + $0x88] sm:$0xff] }
  0x1b   :  { %v19_v58 = vld [vmem:[%s595_s1 + $0x18] sm:$0xff]  ;;  %295 = vmatpush3.msra.mxu0 %v20_v51  ;;  %330 = vmatpush3.msra.mxu1 %v52_v53  ;;  %v18_v63 = vld [vmem:[%s595_s1 + $0x10] sm:$0xff]  ;;  %v102_v1 = vrot.slane %v88_v57, %v94_v52  ;;  %v65_v3 = vld [vmem:[%s595_s1 + $0x188] sm:$0xff]  ;;  %v103_v8 = vcombine.high %v95_v62, %v95_v62 }
  0x1c   :  { %v51_v59 = vld [vmem:[%s595_s1 + $0x118] sm:$0xff]  ;;  %296 = vmatprep.subr.mxu0 %v35_v55  ;;  %331 = vmatprep.subr.mxu1 %v67_v56  ;;  %v50_v0 = vld [vmem:[%s595_s1 + $0x110] sm:$0xff]  ;;  %v17_v4 = vld [vmem:[%s595_s1 + $0x8] sm:$0xff] }
  0x1d   :  { %297 = vmatpush3.msra.mxu0 %v19_v58  ;;  %332 = vmatpush3.msra.mxu1 %v51_v59  ;;  %v49_v5 = vld [vmem:[%s595_s1 + $0x108] sm:$0xff]  ;;  %v32_v6 = vld [vmem:[%s595_s1 + $0x80] sm:$0xff]  ;;  %v104_v10 = vcombine.high %v102_v1, %v102_v1 }
  0x1e   :  { %298 = vmatprep.subr.mxu0 %v34_v60  ;;  %333 = vmatprep.subr.mxu1 %v66_v61  ;;  %v64_v7 = vld [vmem:[%s595_s1 + $0x180] sm:$0xff] }
  0x1f   :  { %299 = vmatpush3.msra.mxu0 %v18_v63  ;;  %334 = vmatpush3.msra.mxu1 %v50_v0  ;;  %v16_v9 = vld [vmem:[%s595_s1] sm:$0xff] }
  0x20   :  { %300 = vmatprep.subr.mxu0 %v33_v2  ;;  %335 = vmatprep.subr.mxu1 %v65_v3  ;;  %v48_v11 = vld [vmem:[%s595_s1 + $0x100] sm:$0xff]  ;;  %s372_s1 = smov [#allocation2]  }
  0x21   :  { %301 = vmatpush3.msra.mxu0 %v17_v4  ;;  %336 = vmatpush3.msra.mxu1 %v49_v5  ;;  %v270_v14 = vld [vmem:[%s596_s2] ss:$0 sm:$0xff]  ;;  %s262_s8 = sshll.u32 %s372_s1, 4  ;;  %s263_s8 = int_to_ptr.vmem [resolvable:$true] %s262_s8 }
  0x22   :  { %302 = vmatprep.subr.mxu0 %v32_v6  ;;  %337 = vmatprep.subr.mxu1 %v64_v7  ;;  %s349_s0 = scalar_lea.vmem %s263_s8, 32  ;;  %p354_p1 = scmp.lt.s32.totalorder %s263_s8, %s263_s8 }
  0x23   :  { %303 = vmatpush3.msra.mxu0 %v16_v9  ;;  %173 = vmatprep.mubr.f32.mxu0 %v103_v8  ;;  %p350_p0 = scmp.ne.s32.totalorder %s263_s8, %s349_s0  ;;  %p355_p2 = scmp.lt.s32.totalorder %s349_s0, %s349_s0 }
  0x24   :  { %338 = vmatpush3.msra.mxu1 %v48_v11  ;;  %243 = vmatprep.mubr.f32.mxu1 %v104_v10 }
  0x25   :  { %174 = vmatmul.mubr.f32.vlgmr.msra.gmra.mxu0 %v95_v62  ;;  %244 = vmatmul.mubr.f32.vlgmr.msra.gmra.mxu1 %v102_v1  ;;  %p356_p3 = por %p355_p2, %p354_p1 }
  0x27   :  { %p357_p4 = pnand %p356_p3, %p350_p0 }
  0xe5   :  { %v304_v12 = vpop.f32.mrf.mxu0  ;;  %v339_v13 = vpop.f32.mrf.mxu1 }
  0xe7   :  { %v305_v15 = vpop.f32.mrf.mxu0  ;;  %v340_v16 = vpop.f32.mrf.mxu1 }
  0xe8   :  { %v306_v17 = vadd.f32 %v305_v15, %v304_v12  ;;  %v341_v19 = vadd.f32 %v340_v16, %v339_v13 }
  0xea   :  { %v176_v18 = vadd.f32 %v306_v17, %v270_v14 }
  0xec   :  { %v246_v20 = vadd.f32 %v341_v19, %v176_v18 }
  0xee   :  { %v271_v21 = vmul.f32 -1.442695, %v246_v20 }
  0xf0   :  { %345 = vpow2.f32 %v271_v21 }
  0xfd   :  { %v346_v22 = vpop.eup %345 }
  0xfe   :  { %v252_v23 = vadd.f32 1.0, %v346_v22 }
 0x100   :  { %347 = vrcp.f32 %v252_v23 }
 0x10d   :  { %v348_v24 = vpop.eup %347 }
 0x10e   :  { %255 = vst [vmem:[#allocation2] sm:$0x3] %v348_v24 }
 0x10f   :  { %360 = shalt.err (!%p357_p4)
}
 0x110   :  { %265 = dma.vmem_to_hbm [thread:$0]  %s263_s8, 32, %s597_s3, [#allocation3]  }
 0x111   :  { %369 = dma.done.wait [#allocation3], 32  }
 0x112   :  { %370 = vsyncadd [#allocation3], 4294967264 }
 0x113   :  { %269 = vsyncpa [#allocation3], 1 }

// kernel: cnn_lstm2_forward.12
= control target key start
LH: loop header
LB: loop body
LE: loop exit
PB: predicated region body
PF: predicated region fallthrough
CT: control target
= control target key end

     0   :  { %s4398_s12 = smov 0   ;;  %s4919_s0 = inlined_call_operand.vmem [shape: bf16[4,12800], index: 0, kind: input, shape index: {}]   ;;  %s4920_s1 = inlined_call_operand.vmem [shape: bf16[12800,256], index: 1, kind: input, shape index: {}]   ;;  %s4921_s2 = inlined_call_operand.vmem [shape: f32[1,256], index: 2, kind: input, shape index: {}]   ;;  %s4922_s3 = inlined_call_operand.vmem [shape: f32[4,256], index: 3, kind: output, shape index: {}]  }
   0x1 LB: > { %s4404_s13 = sadd.s32 4294967295, %s4373_s12   ;;  %p3340_p0 = scmp.ge.s32.totalorder %s4373_s12, 1  ;;  %s4373_s12 = sphi %s4398_s12, %s13_s12  }
   0x2   : > { %p145_p1 = scmp.lt.s32.totalorder %s4373_s12, 5 }
   0x4   : > { %p146_p2 = pnand %p3340_p0, %p145_p1 }
   0x5   : > { %s170_s14 = smul.u32 (!%p146_p2), 25, %s4404_s13  ;;  %p3344_p5 = scmp.ne.s32.totalorder (!%p146_p2), %s4404_s13, 0 }
   0x6   : > { %149 = sbr.rel (%p146_p2) target bundleno = 652 (0x28c), region = 32 }
   0x7   : > { %s176_s15 = smul.u32 (!%p146_p2), 400, %s4404_s13  ;;  %p171_p3 = scmp.lt.s32.totalorder (!%p146_p2), %s170_s14, 99 }
   0x9   : > { %p177_p4 = scmp.lt.s32.totalorder (!%p146_p2), %s176_s15, 1599 }
   0xb   : > { %s4924_s14 = smov (!%p171_p3, %s170_s14), 99  ;;  %s4926_s15 = smov (!%p177_p4, %s176_s15), 1599 }
   0xc   : > { %s3341_s16 = sshll.u32 %s4924_s14, 1  ;;  %s3749_s20 = sshll.u32 %s4926_s15, 3 }
   0xd   : > { %s4413_s19 = scalar_lea.vmem %s4919_s0, %s3341_s16  ;;  %s4418_s23 = scalar_lea.vmem %s4920_s1, %s3749_s20 }
   0xe   : > { %187 = sbr.rel (%p3344_p5) target bundleno = 21 (0x15), region = 36 }
  0x13   : > { %v4375_v0 = vmov 0.0  }
  0x14   : > { %188 = vst [vmem:[#allocation2] sm:$0xff] %v4375_v0 }
  0x15 PF: > { %v3761_v1 = vld [vmem:[%s4418_s23 + $0x74] ss:$8 sps:$4 sm:$0xff]   ;;  %v3765_v3 = vld [vmem:[%s4418_s23 + $0x70] ss:$8 sps:$4 sm:$0xff]   ;;  %v3767_v5 = vld [vmem:[%s4418_s23 + $0x64] ss:$8 sps:$4 sm:$0xff]   ;;  %v608_v39 = vlaneseq }
  0x16   : > { %v3763_v2 = vld [vmem:[%s4418_s23 + $0x174] ss:$8 sps:$4 sm:$0xff]   ;;  %2738 = vmatprep.subr.bf16.mxu0 %v3761_v1  ;;  %v3766_v4 = vld [vmem:[%s4418_s23 + $0x170] ss:$8 sps:$4 sm:$0xff]   ;;  %v3769_v6 = vld [vmem:[%s4418_s23 + $0x164] ss:$8 sps:$4 sm:$0xff]  }
  0x17   : > { %2779 = vmatprep.subr.bf16.mxu1 %v3763_v2  ;;  %2739 = vmatpush1.bf16.msra.mxu0 %v3765_v3  ;;  %v3771_v7 = vld [vmem:[%s4418_s23 + $0x60] ss:$8 sps:$4 sm:$0xff]   ;;  %v3773_v9 = vld [vmem:[%s4418_s23 + $0x54] ss:$8 sps:$4 sm:$0xff]   ;;  %v3777_v11 = vld [vmem:[%s4418_s23 + $0x50] ss:$8 sps:$4 sm:$0xff]  }
  0x18   : > { %2780 = vmatpush1.bf16.msra.mxu1 %v3766_v4  ;;  %2740 = vmatprep.subr.bf16.mxu0 %v3767_v5  ;;  %v3772_v8 = vld [vmem:[%s4418_s23 + $0x160] ss:$8 sps:$4 sm:$0xff]   ;;  %v3775_v10 = vld [vmem:[%s4418_s23 + $0x154] ss:$8 sps:$4 sm:$0xff]   ;;  %v3778_v12 = vld [vmem:[%s4418_s23 + $0x150] ss:$8 sps:$4 sm:$0xff]  }
  0x19   : > { %2781 = vmatprep.subr.bf16.mxu1 %v3769_v6  ;;  %v3779_v13 = vld [vmem:[%s4418_s23 + $0x44] ss:$8 sps:$4 sm:$0xff]   ;;  %v3783_v15 = vld [vmem:[%s4418_s23 + $0x40] ss:$8 sps:$4 sm:$0xff]   ;;  %v3785_v17 = vld [vmem:[%s4418_s23 + $0x34] ss:$8 sps:$4 sm:$0xff]  }
  0x1a   : > { %v3781_v14 = vld [vmem:[%s4418_s23 + $0x144] ss:$8 sps:$4 sm:$0xff]   ;;  %v3784_v16 = vld [vmem:[%s4418_s23 + $0x140] ss:$8 sps:$4 sm:$0xff]   ;;  %v3787_v18 = vld [vmem:[%s4418_s23 + $0x134] ss:$8 sps:$4 sm:$0xff]  }
  0x1b   : > { %2741 = vmatpush1.bf16.msra.mxu0 %v3771_v7  ;;  %v3789_v19 = vld [vmem:[%s4418_s23 + $0x30] ss:$8 sps:$4 sm:$0xff]   ;;  %v3791_v21 = vld [vmem:[%s4418_s23 + $0x24] ss:$8 sps:$4 sm:$0xff]   ;;  %v3795_v23 = vld [vmem:[%s4418_s23 + $0x20] ss:$8 sps:$4 sm:$0xff]  }
  0x1c   : > { %2782 = vmatpush1.bf16.msra.mxu1 %v3772_v8  ;;  %2742 = vmatprep.subr.bf16.mxu0 %v3773_v9  ;;  %v3790_v20 = vld [vmem:[%s4418_s23 + $0x130] ss:$8 sps:$4 sm:$0xff]   ;;  %v3793_v22 = vld [vmem:[%s4418_s23 + $0x124] ss:$8 sps:$4 sm:$0xff]   ;;  %v3796_v24 = vld [vmem:[%s4418_s23 + $0x120] ss:$8 sps:$4 sm:$0xff]  }
  0x1d   : > { %2783 = vmatprep.subr.bf16.mxu1 %v3775_v10  ;;  %v3797_v25 = vld [vmem:[%s4418_s23 + $0x14] ss:$8 sps:$4 sm:$0xff]   ;;  %v3801_v27 = vld [vmem:[%s4418_s23 + $0x10] ss:$8 sps:$4 sm:$0xff]   ;;  %v3803_v29 = vld [vmem:[%s4418_s23 + $0x4] ss:$8 sps:$4 sm:$0xff]  }
  0x1e   : > { %v3799_v26 = vld [vmem:[%s4418_s23 + $0x114] ss:$8 sps:$4 sm:$0xff]   ;;  %v3802_v28 = vld [vmem:[%s4418_s23 + $0x110] ss:$8 sps:$4 sm:$0xff]   ;;  %v3805_v30 = vld [vmem:[%s4418_s23 + $0x104] ss:$8 sps:$4 sm:$0xff]  }
  0x1f   : > { %2743 = vmatpush1.bf16.msra.mxu0 %v3777_v11  ;;  %v3807_v31 = vld [vmem:[%s4418_s23] ss:$8 sps:$4 sm:$0xff]   ;;  %v3809_v33 = vld [vmem:[%s4418_s23 + $0xf4] ss:$8 sps:$4 sm:$0xff]   ;;  %v3813_v35 = vld [vmem:[%s4418_s23 + $0xf0] ss:$8 sps:$4 sm:$0xff]  }
  0x20   : > { %2784 = vmatpush1.bf16.msra.mxu1 %v3778_v12  ;;  %2744 = vmatprep.subr.bf16.mxu0 %v3779_v13  ;;  %v3808_v32 = vld [vmem:[%s4418_s23 + $0x100] ss:$8 sps:$4 sm:$0xff]   ;;  %v3811_v34 = vld [vmem:[%s4418_s23 + $0x1f4] ss:$8 sps:$4 sm:$0xff]   ;;  %v3814_v36 = vld [vmem:[%s4418_s23 + $0x1f0] ss:$8 sps:$4 sm:$0xff]  }
  0x21   : > { %2785 = vmatprep.subr.bf16.mxu1 %v3781_v14  ;;  %v4376_v37 = vmov 1983009808   ;;  %v3815_v40 = vld [vmem:[%s4418_s23 + $0xe4] ss:$8 sps:$4 sm:$0xff]   ;;  %v3819_v42 = vld [vmem:[%s4418_s23 + $0xe0] ss:$8 sps:$4 sm:$0xff]  }
  0x22   : > { %v606_v38 = vunpack.c.l.s4 %v4376_v37  ;;  %v3817_v41 = vld [vmem:[%s4418_s23 + $0x1e4] ss:$8 sps:$4 sm:$0xff]   ;;  %v4460_v44 = vshrl.u32 %v608_v39, 7  ;;  %v3820_v45 = vld [vmem:[%s4418_s23 + $0x1e0] ss:$8 sps:$4 sm:$0xff]   ;;  %p3746_p6 = scmp.ne.s32.totalorder %s4404_s13, 3 }
  0x23   : > { %2745 = vmatpush1.bf16.msra.mxu0 %v3783_v15  ;;  %v3821_v46 = vld [vmem:[%s4418_s23 + $0xd4] ss:$8 sps:$4 sm:$0xff]   ;;  %v3825_v48 = vld [vmem:[%s4418_s23 + $0xd0] ss:$8 sps:$4 sm:$0xff]   ;;  %v3827_v51 = vld [vmem:[%s4418_s23 + $0xc4] ss:$8 sps:$4 sm:$0xff]  }
  0x24   : > { %2786 = vmatpush1.bf16.msra.mxu1 %v3784_v16  ;;  %2746 = vmatprep.subr.bf16.mxu0 %v3785_v17  ;;  %v607_v43 = vunpack.c.0.s8 %v606_v38  ;;  %v3823_v47 = vld [vmem:[%s4418_s23 + $0x1d4] ss:$8 sps:$4 sm:$0xff]   ;;  %v3826_v49 = vld [vmem:[%s4418_s23 + $0x1d0] ss:$8 sps:$4 sm:$0xff]   ;;  %v3829_v52 = vld [vmem:[%s4418_s23 + $0x1c4] ss:$8 sps:$4 sm:$0xff]  }
  0x25   : > { %2787 = vmatprep.subr.bf16.mxu1 %v3787_v18  ;;  %v190_v53 = vld [vmem:[%s4413_s19] sm:$0xff]  ;;  %v3833_v58 = vld [vmem:[%s4418_s23 + $0xb4] ss:$8 sps:$4 sm:$0xff]   ;;  %v3837_v62 = vld [vmem:[%s4418_s23 + $0xb0] ss:$8 sps:$4 sm:$0xff]  }
  0x26   : > { %v4468_v50 = vsub.s32 %v607_v43, %v4460_v44  ;;  %v3831_v54 = vld [vmem:[%s4418_s23 + $0xc0] ss:$8 sps:$4 sm:$0xff]   ;;  %v604_v56 = vcombine.high %v190_v53, %v190_v53  ;;  %v3835_v59 = vld [vmem:[%s4418_s23 + $0x1b4] ss:$8 sps:$4 sm:$0xff]   ;;  %v3838_v0 = vld [vmem:[%s4418_s23 + $0x1b0] ss:$8 sps:$4 sm:$0xff]  }
  0x27   : > { %2747 = vmatpush1.bf16.msra.mxu0 %v3789_v19  ;;  %v3832_v57 = vld [vmem:[%s4418_s23 + $0x1c0] ss:$8 sps:$4 sm:$0xff]   ;;  %v3839_v1 = vld [vmem:[%s4418_s23 + $0xa4] ss:$8 sps:$4 sm:$0xff]   ;;  %v3845_v5 = vld [vmem:[%s4418_s23 + $0x94] ss:$8 sps:$4 sm:$0xff]  }
  0x28   : > { %2788 = vmatpush1.bf16.msra.mxu1 %v3790_v20  ;;  %2748 = vmatprep.subr.bf16.mxu0 %v3791_v21  ;;  %v611_v55 = vrot.slane %v190_v53, %v4468_v50  ;;  %v618_v61 = vrot.slane %v604_v56, %v4468_v50  ;;  %v3841_v2 = vld [vmem:[%s4418_s23 + $0x1a4] ss:$8 sps:$4 sm:$0xff]   ;;  %v3843_v3 = vld [vmem:[%s4418_s23 + $0xa0] ss:$8 sps:$4 sm:$0xff]   ;;  %v3847_v6 = vld [vmem:[%s4418_s23 + $0x194] ss:$8 sps:$4 sm:$0xff]  }
  0x29   : > { %2789 = vmatprep.subr.bf16.mxu1 %v3793_v22  ;;  %v3844_v4 = vld [vmem:[%s4418_s23 + $0x1a0] ss:$8 sps:$4 sm:$0xff]   ;;  %v3849_v7 = vld [vmem:[%s4418_s23 + $0x90] ss:$8 sps:$4 sm:$0xff]   ;;  %v3851_v9 = vld [vmem:[%s4418_s23 + $0x84] ss:$8 sps:$4 sm:$0xff]  }
  0x2a   : > { %v619_v60 = vcombine.high %v611_v55, %v611_v55  ;;  %v620_v63 = vcombine.high %v618_v61, %v618_v61  ;;  %v3850_v8 = vld [vmem:[%s4418_s23 + $0x190] ss:$8 sps:$4 sm:$0xff]   ;;  %v3853_v10 = vld [vmem:[%s4418_s23 + $0x184] ss:$8 sps:$4 sm:$0xff]   ;;  %v3855_v11 = vld [vmem:[%s4418_s23 + $0x80] ss:$8 sps:$4 sm:$0xff]  }
  0x2b   : > { %2749 = vmatpush1.bf16.msra.mxu0 %v3795_v23  ;;  %v3856_v12 = vld [vmem:[%s4418_s23 + $0x180] ss:$8 sps:$4 sm:$0xff]   ;;  %v3860_v13 = vld [vmem:[%s4418_s23 + $0x274] ss:$8 sps:$4 sm:$0xff]   ;;  %v3858_v15 = vld [vmem:[%s4418_s23 + $0x270] ss:$8 sps:$4 sm:$0xff]  }
  0x2c   : > { %2790 = vmatpush1.bf16.msra.mxu1 %v3796_v24  ;;  %2750 = vmatprep.subr.bf16.mxu0 %v3797_v25  ;;  %v3863_v14 = vld [vmem:[%s4418_s23 + $0x374] ss:$8 sps:$4 sm:$0xff]   ;;  %v3861_v16 = vld [vmem:[%s4418_s23 + $0x370] ss:$8 sps:$4 sm:$0xff]   ;;  %v3866_v17 = vld [vmem:[%s4418_s23 + $0x264] ss:$8 sps:$4 sm:$0xff]  }
  0x2d   : > { %2791 = vmatprep.subr.bf16.mxu1 %v3799_v26  ;;  %2770 = vmatprep.mubr.bf16.mxu0 %v619_v60  ;;  %v3869_v18 = vld [vmem:[%s4418_s23 + $0x364] ss:$8 sps:$4 sm:$0xff]   ;;  %v3864_v19 = vld [vmem:[%s4418_s23 + $0x260] ss:$8 sps:$4 sm:$0xff]   ;;  %v3872_v21 = vld [vmem:[%s4418_s23 + $0x254] ss:$8 sps:$4 sm:$0xff]  }
  0x2e   : > { %2811 = vmatprep.mubr.bf16.mxu1 %v620_v63  ;;  %v3867_v20 = vld [vmem:[%s4418_s23 + $0x360] ss:$8 sps:$4 sm:$0xff]   ;;  %v3875_v22 = vld [vmem:[%s4418_s23 + $0x354] ss:$8 sps:$4 sm:$0xff]   ;;  %v3870_v23 = vld [vmem:[%s4418_s23 + $0x250] ss:$8 sps:$4 sm:$0xff]  }
  0x2f   : > { %2751 = vmatpush1.bf16.msra.mxu0 %v3801_v27  ;;  %v3873_v24 = vld [vmem:[%s4418_s23 + $0x350] ss:$8 sps:$4 sm:$0xff]   ;;  %v3878_v25 = vld [vmem:[%s4418_s23 + $0x244] ss:$8 sps:$4 sm:$0xff]   ;;  %v3876_v27 = vld [vmem:[%s4418_s23 + $0x240] ss:$8 sps:$4 sm:$0xff]  }
  0x30   : > { %2792 = vmatpush1.bf16.msra.mxu1 %v3802_v28  ;;  %2752 = vmatprep.subr.bf16.mxu0 %v3803_v29  ;;  %v3881_v26 = vld [vmem:[%s4418_s23 + $0x344] ss:$8 sps:$4 sm:$0xff]   ;;  %v3879_v28 = vld [vmem:[%s4418_s23 + $0x340] ss:$8 sps:$4 sm:$0xff]   ;;  %v3884_v29 = vld [vmem:[%s4418_s23 + $0x234] ss:$8 sps:$4 sm:$0xff]  }
  0x31   : > { %2793 = vmatprep.subr.bf16.mxu1 %v3805_v30  ;;  %v3887_v30 = vld [vmem:[%s4418_s23 + $0x334] ss:$8 sps:$4 sm:$0xff]   ;;  %v191_v39 = vld [vmem:[%s4413_s19 + $0x8] sm:$0xff]  ;;  %v3897_v43 = vld [vmem:[%s4418_s23 + $0x310] ss:$8 sps:$4 sm:$0xff]  }
  0x32   : > { %v3896_v37 = vld [vmem:[%s4418_s23 + $0x214] ss:$8 sps:$4 sm:$0xff]   ;;  %v3909_v56 = vld [vmem:[%s4418_s23 + $0x3f0] ss:$8 sps:$4 sm:$0xff]   ;;  %v3915_v60 = vld [vmem:[%s4418_s23 + $0x3e0] ss:$8 sps:$4 sm:$0xff]  }
  0x33   : > { %2753 = vmatpush1.bf16.msra.mxu0 %v3807_v31  ;;  %v3882_v31 = vld [vmem:[%s4418_s23 + $0x230] ss:$8 sps:$4 sm:$0xff]   ;;  %v3899_v38 = vld [vmem:[%s4418_s23 + $0x314] ss:$8 sps:$4 sm:$0xff]  }
  0x34   : > { %2794 = vmatpush1.bf16.msra.mxu1 %v3808_v32  ;;  %2754 = vmatprep.subr.bf16.mxu0 %v3809_v33  ;;  %v3885_v32 = vld [vmem:[%s4418_s23 + $0x330] ss:$8 sps:$4 sm:$0xff]   ;;  %v3890_v33 = vld [vmem:[%s4418_s23 + $0x224] ss:$8 sps:$4 sm:$0xff]   ;;  %v3908_v53 = vld [vmem:[%s4418_s23 + $0x2f4] ss:$8 sps:$4 sm:$0xff]  }
  0x35   : > { %2795 = vmatprep.subr.bf16.mxu1 %v3811_v34  ;;  %v3893_v34 = vld [vmem:[%s4418_s23 + $0x324] ss:$8 sps:$4 sm:$0xff]   ;;  %v3918_v63 = vld [vmem:[%s4418_s23 + $0x2d0] ss:$8 sps:$4 sm:$0xff]  }
  0x37   : > { %2755 = vmatpush2.bf16.msra.mxu0 %v3813_v35  ;;  %v3888_v35 = vld [vmem:[%s4418_s23 + $0x220] ss:$8 sps:$4 sm:$0xff]  }
  0x38   : > { %2796 = vmatpush2.bf16.msra.mxu1 %v3814_v36  ;;  %2756 = vmatprep.subr.bf16.mxu0 %v3815_v40  ;;  %v3891_v36 = vld [vmem:[%s4418_s23 + $0x320] ss:$8 sps:$4 sm:$0xff]   ;;  %v4521_v40 = vrot.slane %v191_v39, %v4468_v50 }
  0x39   : > { %2797 = vmatprep.subr.bf16.mxu1 %v3817_v41  ;;  %v621_v41 = vcombine.high %v191_v39, %v191_v39  ;;  %v3975_v39 = vld [vmem:[%s4418_s23 + $0x444] ss:$8 sps:$4 sm:$0xff]  }
  0x3b   : > { %2757 = vmatpush2.bf16.msra.mxu0 %v3819_v42  ;;  %v3894_v42 = vld [vmem:[%s4418_s23 + $0x210] ss:$8 sps:$4 sm:$0xff]  }
  0x3c   : > { %2798 = vmatpush2.bf16.msra.mxu1 %v3820_v45  ;;  %2758 = vmatprep.subr.bf16.mxu0 %v3821_v46  ;;  %v636_v45 = vcombine.high %v4521_v40, %v4521_v40  ;;  %v4528_v46 = vrot.slane %v621_v41, %v4468_v50  ;;  %v3973_v41 = vld [vmem:[%s4418_s23 + $0x440] ss:$8 sps:$4 sm:$0xff]  }
  0x3d   : > { %2799 = vmatprep.subr.bf16.mxu1 %v3823_v47  ;;  %v3902_v47 = vld [vmem:[%s4418_s23 + $0x204] ss:$8 sps:$4 sm:$0xff]  }
  0x3f   : > { %2759 = vmatpush2.bf16.msra.mxu0 %v3825_v48  ;;  %v3905_v48 = vld [vmem:[%s4418_s23 + $0x304] ss:$8 sps:$4 sm:$0xff]  }
  0x40   : > { %2800 = vmatpush2.bf16.msra.mxu1 %v3826_v49  ;;  %2760 = vmatprep.subr.bf16.mxu0 %v3827_v51  ;;  %v637_v49 = vcombine.high %v4528_v46, %v4528_v46  ;;  %v3900_v51 = vld [vmem:[%s4418_s23 + $0x200] ss:$8 sps:$4 sm:$0xff]  }
  0x41   : > { %2801 = vmatprep.subr.bf16.mxu1 %v3829_v52  ;;  %v3903_v52 = vld [vmem:[%s4418_s23 + $0x300] ss:$8 sps:$4 sm:$0xff]  }
  0x43   : > { %2761 = vmatpush2.bf16.msra.mxu0 %v3831_v54  ;;  %v3911_v54 = vld [vmem:[%s4418_s23 + $0x3f4] ss:$8 sps:$4 sm:$0xff]  }
  0x44   : > { %2802 = vmatpush2.bf16.msra.mxu1 %v3832_v57  ;;  %2762 = vmatprep.subr.bf16.mxu0 %v3833_v58  ;;  %v3914_v57 = vld [vmem:[%s4418_s23 + $0x2e4] ss:$8 sps:$4 sm:$0xff]  }
  0x45   : > { %2803 = vmatprep.subr.bf16.mxu1 %v3835_v59  ;;  %v3917_v58 = vld [vmem:[%s4418_s23 + $0x3e4] ss:$8 sps:$4 sm:$0xff]   ;;  %v3912_v59 = vld [vmem:[%s4418_s23 + $0x2e0] ss:$8 sps:$4 sm:$0xff]  }
  0x47   : > { %2763 = vmatpush2.bf16.msra.mxu0 %v3837_v62  ;;  %v3923_v62 = vld [vmem:[%s4418_s23 + $0x3d4] ss:$8 sps:$4 sm:$0xff]  }
  0x48   : > { %2804 = vmatpush2.bf16.msra.mxu1 %v3838_v0  ;;  %2764 = vmatprep.subr.bf16.mxu0 %v3839_v1  ;;  %v3921_v0 = vld [vmem:[%s4418_s23 + $0x3d0] ss:$8 sps:$4 sm:$0xff]   ;;  %v3926_v1 = vld [vmem:[%s4418_s23 + $0x2c4] ss:$8 sps:$4 sm:$0xff]  }
  0x49   : > { %2805 = vmatprep.subr.bf16.mxu1 %v3841_v2  ;;  %v3929_v2 = vld [vmem:[%s4418_s23 + $0x3c4] ss:$8 sps:$4 sm:$0xff]  }
  0x4b   : > { %2765 = vmatpush2.bf16.msra.mxu0 %v3843_v3  ;;  %v3924_v3 = vld [vmem:[%s4418_s23 + $0x2c0] ss:$8 sps:$4 sm:$0xff]  }
  0x4c   : > { %2806 = vmatpush2.bf16.msra.mxu1 %v3844_v4  ;;  %2766 = vmatprep.subr.bf16.mxu0 %v3845_v5  ;;  %v3927_v4 = vld [vmem:[%s4418_s23 + $0x3c0] ss:$8 sps:$4 sm:$0xff]   ;;  %v3932_v5 = vld [vmem:[%s4418_s23 + $0x2b4] ss:$8 sps:$4 sm:$0xff]  }
  0x4d   : > { %2807 = vmatprep.subr.bf16.mxu1 %v3847_v6  ;;  %v3935_v6 = vld [vmem:[%s4418_s23 + $0x3b4] ss:$8 sps:$4 sm:$0xff]  }
  0x4f   : > { %2767 = vmatpush2.bf16.msra.mxu0 %v3849_v7  ;;  %v3930_v7 = vld [vmem:[%s4418_s23 + $0x2b0] ss:$8 sps:$4 sm:$0xff]  }
  0x50   : > { %2808 = vmatpush2.bf16.msra.mxu1 %v3850_v8  ;;  %2768 = vmatprep.subr.bf16.mxu0 %v3851_v9  ;;  %v3933_v8 = vld [vmem:[%s4418_s23 + $0x3b0] ss:$8 sps:$4 sm:$0xff]   ;;  %v3938_v9 = vld [vmem:[%s4418_s23 + $0x2a4] ss:$8 sps:$4 sm:$0xff]  }
  0x51   : > { %2809 = vmatprep.subr.bf16.mxu1 %v3853_v10  ;;  %v3941_v10 = vld [vmem:[%s4418_s23 + $0x3a4] ss:$8 sps:$4 sm:$0xff]  }
  0x53   : > { %2769 = vmatpush2.bf16.msra.mxu0 %v3855_v11  ;;  %v3936_v11 = vld [vmem:[%s4418_s23 + $0x2a0] ss:$8 sps:$4 sm:$0xff]  }
  0x54   : > { %2810 = vmatpush2.bf16.msra.mxu1 %v3856_v12  ;;  %2820 = vmatprep.subr.bf16.mxu0 %v3860_v13  ;;  %v3939_v12 = vld [vmem:[%s4418_s23 + $0x3a0] ss:$8 sps:$4 sm:$0xff]   ;;  %v3944_v13 = vld [vmem:[%s4418_s23 + $0x294] ss:$8 sps:$4 sm:$0xff]  }
  0x55   : > { %2861 = vmatprep.subr.bf16.mxu1 %v3863_v14  ;;  %v3947_v14 = vld [vmem:[%s4418_s23 + $0x394] ss:$8 sps:$4 sm:$0xff]  }
  0x56   : > { %2771 = vmatmul.mubr.bf16.vlgmr.msra.gmra.mxu0 %v611_v55  ;;  %v3906_v55 = vld [vmem:[%s4418_s23 + $0x2f0] ss:$8 sps:$4 sm:$0xff]  }
  0x57   : > { %2812 = vmatmul.mubr.bf16.vlgmr.msra.gmra.mxu1 %v618_v61  ;;  %2821 = vmatpush1.bf16.msra.mxu0 %v3858_v15  ;;  %v3920_v61 = vld [vmem:[%s4418_s23 + $0x2d4] ss:$8 sps:$4 sm:$0xff]   ;;  %v3942_v15 = vld [vmem:[%s4418_s23 + $0x290] ss:$8 sps:$4 sm:$0xff]  }
  0x58   : > { %2862 = vmatpush1.bf16.msra.mxu1 %v3861_v16  ;;  %2822 = vmatprep.subr.bf16.mxu0 %v3866_v17  ;;  %v3945_v16 = vld [vmem:[%s4418_s23 + $0x390] ss:$8 sps:$4 sm:$0xff]   ;;  %v3950_v17 = vld [vmem:[%s4418_s23 + $0x284] ss:$8 sps:$4 sm:$0xff]  }
  0x59   : > { %2863 = vmatprep.subr.bf16.mxu1 %v3869_v18  ;;  %2852 = vmatprep.mubr.bf16.mxu0 %v636_v45  ;;  %v3953_v18 = vld [vmem:[%s4418_s23 + $0x384] ss:$8 sps:$4 sm:$0xff]   ;;  %v3984_v45 = vld [vmem:[%s4418_s23 + $0x534] ss:$8 sps:$4 sm:$0xff]  }
  0x5a   : > { %2893 = vmatprep.mubr.bf16.mxu1 %v637_v49  ;;  %v3990_v49 = vld [vmem:[%s4418_s23 + $0x524] ss:$8 sps:$4 sm:$0xff]  }
  0x5b   : > { %2823 = vmatpush1.bf16.msra.mxu0 %v3864_v19  ;;  %v3948_v19 = vld [vmem:[%s4418_s23 + $0x280] ss:$8 sps:$4 sm:$0xff]  }
  0x5c   : > { %2864 = vmatpush1.bf16.msra.mxu1 %v3867_v20  ;;  %2824 = vmatprep.subr.bf16.mxu0 %v3872_v21  ;;  %v3951_v20 = vld [vmem:[%s4418_s23 + $0x380] ss:$8 sps:$4 sm:$0xff]   ;;  %v3956_v21 = vld [vmem:[%s4418_s23 + $0x474] ss:$8 sps:$4 sm:$0xff]  }
  0x5d   : > { %2865 = vmatprep.subr.bf16.mxu1 %v3875_v22  ;;  %v3960_v22 = vld [vmem:[%s4418_s23 + $0x574] ss:$8 sps:$4 sm:$0xff]  }
  0x5f   : > { %2825 = vmatpush1.bf16.msra.mxu0 %v3870_v23  ;;  %v3954_v23 = vld [vmem:[%s4418_s23 + $0x470] ss:$8 sps:$4 sm:$0xff]  }
  0x60   : > { %2866 = vmatpush1.bf16.msra.mxu1 %v3873_v24  ;;  %2826 = vmatprep.subr.bf16.mxu0 %v3878_v25  ;;  %v3958_v24 = vld [vmem:[%s4418_s23 + $0x570] ss:$8 sps:$4 sm:$0xff]   ;;  %v3963_v25 = vld [vmem:[%s4418_s23 + $0x464] ss:$8 sps:$4 sm:$0xff]  }
  0x61   : > { %2867 = vmatprep.subr.bf16.mxu1 %v3881_v26  ;;  %v192_v26 = vld [vmem:[%s4413_s19 + $0x10] sm:$0xff] }
  0x63   : > { %2827 = vmatpush1.bf16.msra.mxu0 %v3876_v27  ;;  %v3966_v27 = vld [vmem:[%s4418_s23 + $0x564] ss:$8 sps:$4 sm:$0xff]  }
  0x64   : > { %2868 = vmatpush1.bf16.msra.mxu1 %v3879_v28  ;;  %2828 = vmatprep.subr.bf16.mxu0 %v3884_v29  ;;  %v4576_v28 = vrot.slane %v192_v26, %v4468_v50  ;;  %v638_v29 = vcombine.high %v192_v26, %v192_v26  ;;  %v4047_v26 = vld [vmem:[%s4418_s23 + $0x484] ss:$8 sps:$4 sm:$0xff]  }
  0x65   : > { %2869 = vmatprep.subr.bf16.mxu1 %v3887_v30  ;;  %v3961_v30 = vld [vmem:[%s4418_s23 + $0x460] ss:$8 sps:$4 sm:$0xff]  }
  0x67   : > { %2829 = vmatpush1.bf16.msra.mxu0 %v3882_v31  ;;  %v653_v31 = vcombine.high %v4576_v28, %v4576_v28 }
  0x68   : > { %2870 = vmatpush1.bf16.msra.mxu1 %v3885_v32  ;;  %2830 = vmatprep.subr.bf16.mxu0 %v3890_v33  ;;  %v4584_v32 = vrot.slane %v638_v29, %v4468_v50  ;;  %v3964_v33 = vld [vmem:[%s4418_s23 + $0x560] ss:$8 sps:$4 sm:$0xff]  }
  0x69   : > { %2871 = vmatprep.subr.bf16.mxu1 %v3893_v34  ;;  %v3969_v34 = vld [vmem:[%s4418_s23 + $0x454] ss:$8 sps:$4 sm:$0xff]  }
  0x6b   : > { %2831 = vmatpush1.bf16.msra.mxu0 %v3888_v35  ;;  %v3972_v35 = vld [vmem:[%s4418_s23 + $0x554] ss:$8 sps:$4 sm:$0xff]  }
  0x6c   : > { %2872 = vmatpush1.bf16.msra.mxu1 %v3891_v36  ;;  %2832 = vmatprep.subr.bf16.mxu0 %v3896_v37  ;;  %v654_v36 = vcombine.high %v4584_v32, %v4584_v32  ;;  %v3967_v37 = vld [vmem:[%s4418_s23 + $0x450] ss:$8 sps:$4 sm:$0xff]  }
  0x6d   : > { %2873 = vmatprep.subr.bf16.mxu1 %v3899_v38  ;;  %v3970_v38 = vld [vmem:[%s4418_s23 + $0x550] ss:$8 sps:$4 sm:$0xff]  }
  0x6f   : > { %2833 = vmatpush1.bf16.msra.mxu0 %v3894_v42  ;;  %v3976_v42 = vld [vmem:[%s4418_s23 + $0x540] ss:$8 sps:$4 sm:$0xff]  }
  0x70   : > { %2874 = vmatpush1.bf16.msra.mxu1 %v3897_v43  ;;  %2834 = vmatprep.subr.bf16.mxu0 %v3902_v47  ;;  %v3981_v43 = vld [vmem:[%s4418_s23 + $0x434] ss:$8 sps:$4 sm:$0xff]   ;;  %v3982_v47 = vld [vmem:[%s4418_s23 + $0x530] ss:$8 sps:$4 sm:$0xff]  }
  0x71   : > { %2875 = vmatprep.subr.bf16.mxu1 %v3905_v48  ;;  %v3987_v48 = vld [vmem:[%s4418_s23 + $0x424] ss:$8 sps:$4 sm:$0xff]  }
  0x73   : > { %2835 = vmatpush1.bf16.msra.mxu0 %v3900_v51  ;;  %v3985_v51 = vld [vmem:[%s4418_s23 + $0x420] ss:$8 sps:$4 sm:$0xff]  }
  0x74   : > { %2876 = vmatpush1.bf16.msra.mxu1 %v3903_v52  ;;  %2836 = vmatprep.subr.bf16.mxu0 %v3908_v53  ;;  %v3988_v52 = vld [vmem:[%s4418_s23 + $0x520] ss:$8 sps:$4 sm:$0xff]   ;;  %v3993_v53 = vld [vmem:[%s4418_s23 + $0x414] ss:$8 sps:$4 sm:$0xff]  }
  0x75   : > { %2877 = vmatprep.subr.bf16.mxu1 %v3911_v54  ;;  %v3996_v54 = vld [vmem:[%s4418_s23 + $0x514] ss:$8 sps:$4 sm:$0xff]  }
  0x77   : > { %2837 = vmatpush2.bf16.msra.mxu0 %v3906_v55  ;;  %v3991_v55 = vld [vmem:[%s4418_s23 + $0x410] ss:$8 sps:$4 sm:$0xff]  }
  0x78   : > { %2878 = vmatpush2.bf16.msra.mxu1 %v3909_v56  ;;  %2838 = vmatprep.subr.bf16.mxu0 %v3914_v57  ;;  %v3994_v56 = vld [vmem:[%s4418_s23 + $0x510] ss:$8 sps:$4 sm:$0xff]   ;;  %v3999_v57 = vld [vmem:[%s4418_s23 + $0x404] ss:$8 sps:$4 sm:$0xff]  }
  0x79   : > { %2879 = vmatprep.subr.bf16.mxu1 %v3917_v58  ;;  %v4002_v58 = vld [vmem:[%s4418_s23 + $0x504] ss:$8 sps:$4 sm:$0xff]  }
  0x7b   : > { %2839 = vmatpush2.bf16.msra.mxu0 %v3912_v59  ;;  %v3997_v59 = vld [vmem:[%s4418_s23 + $0x400] ss:$8 sps:$4 sm:$0xff]  }
  0x7c   : > { %2880 = vmatpush2.bf16.msra.mxu1 %v3915_v60  ;;  %2840 = vmatprep.subr.bf16.mxu0 %v3920_v61  ;;  %v4000_v60 = vld [vmem:[%s4418_s23 + $0x500] ss:$8 sps:$4 sm:$0xff]   ;;  %v4005_v61 = vld [vmem:[%s4418_s23 + $0x4f4] ss:$8 sps:$4 sm:$0xff]  }
  0x7d   : > { %2881 = vmatprep.subr.bf16.mxu1 %v3923_v62  ;;  %v4008_v62 = vld [vmem:[%s4418_s23 + $0x5f4] ss:$8 sps:$4 sm:$0xff]  }
  0x7f   : > { %2841 = vmatpush2.bf16.msra.mxu0 %v3918_v63  ;;  %v4003_v63 = vld [vmem:[%s4418_s23 + $0x4f0] ss:$8 sps:$4 sm:$0xff]  }
  0x80   : > { %2882 = vmatpush2.bf16.msra.mxu1 %v3921_v0  ;;  %2842 = vmatprep.subr.bf16.mxu0 %v3926_v1  ;;  %v4006_v0 = vld [vmem:[%s4418_s23 + $0x5f0] ss:$8 sps:$4 sm:$0xff]   ;;  %v4011_v1 = vld [vmem:[%s4418_s23 + $0x4e4] ss:$8 sps:$4 sm:$0xff]  }
  0x81   : > { %2883 = vmatprep.subr.bf16.mxu1 %v3929_v2  ;;  %v4014_v2 = vld [vmem:[%s4418_s23 + $0x5e4] ss:$8 sps:$4 sm:$0xff]  }
  0x83   : > { %2843 = vmatpush2.bf16.msra.mxu0 %v3924_v3  ;;  %v4009_v3 = vld [vmem:[%s4418_s23 + $0x4e0] ss:$8 sps:$4 sm:$0xff]  }
  0x84   : > { %2884 = vmatpush2.bf16.msra.mxu1 %v3927_v4  ;;  %2844 = vmatprep.subr.bf16.mxu0 %v3932_v5  ;;  %v4012_v4 = vld [vmem:[%s4418_s23 + $0x5e0] ss:$8 sps:$4 sm:$0xff]   ;;  %v4017_v5 = vld [vmem:[%s4418_s23 + $0x4d4] ss:$8 sps:$4 sm:$0xff]  }
  0x85   : > { %2885 = vmatprep.subr.bf16.mxu1 %v3935_v6  ;;  %v4020_v6 = vld [vmem:[%s4418_s23 + $0x5d4] ss:$8 sps:$4 sm:$0xff]  }
  0x87   : > { %2845 = vmatpush2.bf16.msra.mxu0 %v3930_v7  ;;  %v4015_v7 = vld [vmem:[%s4418_s23 + $0x4d0] ss:$8 sps:$4 sm:$0xff]  }
  0x88   : > { %2886 = vmatpush2.bf16.msra.mxu1 %v3933_v8  ;;  %2846 = vmatprep.subr.bf16.mxu0 %v3938_v9  ;;  %v4018_v8 = vld [vmem:[%s4418_s23 + $0x5d0] ss:$8 sps:$4 sm:$0xff]   ;;  %v4023_v9 = vld [vmem:[%s4418_s23 + $0x4c4] ss:$8 sps:$4 sm:$0xff]  }
  0x89   : > { %2887 = vmatprep.subr.bf16.mxu1 %v3941_v10  ;;  %v4026_v10 = vld [vmem:[%s4418_s23 + $0x5c4] ss:$8 sps:$4 sm:$0xff]  }
  0x8b   : > { %2847 = vmatpush2.bf16.msra.mxu0 %v3936_v11  ;;  %v4021_v11 = vld [vmem:[%s4418_s23 + $0x4c0] ss:$8 sps:$4 sm:$0xff]  }
  0x8c   : > { %2888 = vmatpush2.bf16.msra.mxu1 %v3939_v12  ;;  %2848 = vmatprep.subr.bf16.mxu0 %v3944_v13  ;;  %v4024_v12 = vld [vmem:[%s4418_s23 + $0x5c0] ss:$8 sps:$4 sm:$0xff]   ;;  %v4029_v13 = vld [vmem:[%s4418_s23 + $0x4b4] ss:$8 sps:$4 sm:$0xff]  }
  0x8d   : > { %2889 = vmatprep.subr.bf16.mxu1 %v3947_v14  ;;  %v4032_v14 = vld [vmem:[%s4418_s23 + $0x5b4] ss:$8 sps:$4 sm:$0xff]  }
  0x8f   : > { %2849 = vmatpush2.bf16.msra.mxu0 %v3942_v15  ;;  %v4027_v15 = vld [vmem:[%s4418_s23 + $0x4b0] ss:$8 sps:$4 sm:$0xff]  }
  0x90   : > { %2890 = vmatpush2.bf16.msra.mxu1 %v3945_v16  ;;  %2850 = vmatprep.subr.bf16.mxu0 %v3950_v17  ;;  %v4030_v16 = vld [vmem:[%s4418_s23 + $0x5b0] ss:$8 sps:$4 sm:$0xff]   ;;  %v4035_v17 = vld [vmem:[%s4418_s23 + $0x4a4] ss:$8 sps:$4 sm:$0xff]  }
  0x91   : > { %2891 = vmatprep.subr.bf16.mxu1 %v3953_v18  ;;  %v4038_v18 = vld [vmem:[%s4418_s23 + $0x5a4] ss:$8 sps:$4 sm:$0xff]  }
  0x93   : > { %2851 = vmatpush2.bf16.msra.mxu0 %v3948_v19  ;;  %v4033_v19 = vld [vmem:[%s4418_s23 + $0x4a0] ss:$8 sps:$4 sm:$0xff]  }
  0x94   : > { %2892 = vmatpush2.bf16.msra.mxu1 %v3951_v20  ;;  %2902 = vmatprep.subr.bf16.mxu0 %v3956_v21  ;;  %v4036_v20 = vld [vmem:[%s4418_s23 + $0x5a0] ss:$8 sps:$4 sm:$0xff]   ;;  %v4041_v21 = vld [vmem:[%s4418_s23 + $0x494] ss:$8 sps:$4 sm:$0xff]  }
  0x95   : > { %2943 = vmatprep.subr.bf16.mxu1 %v3960_v22  ;;  %v4044_v22 = vld [vmem:[%s4418_s23 + $0x594] ss:$8 sps:$4 sm:$0xff]  }
  0x96   : > { %2853 = vmatmul.mubr.bf16.vlgmr.msra.gmra.mxu0 %v4521_v40  ;;  %v3978_v40 = vld [vmem:[%s4418_s23 + $0x544] ss:$8 sps:$4 sm:$0xff]  }
  0x97   : > { %2894 = vmatmul.mubr.bf16.vlgmr.msra.gmra.mxu1 %v4528_v46  ;;  %2903 = vmatpush1.bf16.msra.mxu0 %v3954_v23  ;;  %v3979_v46 = vld [vmem:[%s4418_s23 + $0x430] ss:$8 sps:$4 sm:$0xff]  }
  0x98   : > { %2944 = vmatpush1.bf16.msra.mxu1 %v3958_v24  ;;  %2904 = vmatprep.subr.bf16.mxu0 %v3963_v25  ;;  %v4039_v23 = vld [vmem:[%s4418_s23 + $0x490] ss:$8 sps:$4 sm:$0xff]  }
  0x99   : > { %2945 = vmatprep.subr.bf16.mxu1 %v3966_v27  ;;  %2934 = vmatprep.mubr.bf16.mxu0 %v653_v31  ;;  %v4042_v24 = vld [vmem:[%s4418_s23 + $0x590] ss:$8 sps:$4 sm:$0xff]   ;;  %v4050_v27 = vld [vmem:[%s4418_s23 + $0x584] ss:$8 sps:$4 sm:$0xff]   ;;  %v4048_v31 = vld [vmem:[%s4418_s23 + $0x580] ss:$8 sps:$4 sm:$0xff]  }
  0x9a   : > { %2975 = vmatprep.mubr.bf16.mxu1 %v654_v36  ;;  %v193_v25 = vld [vmem:[%s4413_s19 + $0x18] sm:$0xff] }
  0x9b   : > { %2905 = vmatpush1.bf16.msra.mxu0 %v3961_v30  ;;  %v655_v29 = vcombine.high %v193_v25, %v193_v25  ;;  %v4045_v30 = vld [vmem:[%s4418_s23 + $0x480] ss:$8 sps:$4 sm:$0xff]  }
  0x9c   : > { %2946 = vmatpush1.bf16.msra.mxu1 %v3964_v33  ;;  %2906 = vmatprep.subr.bf16.mxu0 %v3969_v34  ;;  %v4053_v33 = vld [vmem:[%s4418_s23 + $0x674] ss:$8 sps:$4 sm:$0xff]  }
  0x9d   : > { %2947 = vmatprep.subr.bf16.mxu1 %v3972_v35  ;;  %v4057_v34 = vld [vmem:[%s4418_s23 + $0x774] ss:$8 sps:$4 sm:$0xff]   ;;  %v4649_v35 = vrot.slane %v193_v25, %v4468_v50  ;;  %v4652_v36 = vrot.slane %v655_v29, %v4468_v50  ;;  %v4132_v25 = vld [vmem:[%s4418_s23 + $0x6a4] ss:$8 sps:$4 sm:$0xff]   ;;  %v4133_v29 = vld [vmem:[%s4418_s23 + $0x7a0] ss:$8 sps:$4 sm:$0xff]  }
  0x9f   : > { %2907 = vmatpush1.bf16.msra.mxu0 %v3967_v37  ;;  %v4051_v37 = vld [vmem:[%s4418_s23 + $0x670] ss:$8 sps:$4 sm:$0xff]  }
  0xa0   : > { %2948 = vmatpush1.bf16.msra.mxu1 %v3970_v38  ;;  %2908 = vmatprep.subr.bf16.mxu0 %v3975_v39  ;;  %v4055_v38 = vld [vmem:[%s4418_s23 + $0x770] ss:$8 sps:$4 sm:$0xff]   ;;  %v4060_v39 = vld [vmem:[%s4418_s23 + $0x664] ss:$8 sps:$4 sm:$0xff]  }
  0xa1   : > { %2949 = vmatprep.subr.bf16.mxu1 %v3978_v40  ;;  %v4063_v40 = vld [vmem:[%s4418_s23 + $0x764] ss:$8 sps:$4 sm:$0xff]  }
  0xa3   : > { %2909 = vmatpush1.bf16.msra.mxu0 %v3973_v41  ;;  %v670_v41 = vcombine.high %v4649_v35, %v4649_v35 }
  0xa4   : > { %2950 = vmatpush1.bf16.msra.mxu1 %v3976_v42  ;;  %2910 = vmatprep.subr.bf16.mxu0 %v3981_v43  ;;  %v671_v42 = vcombine.high %v4652_v36, %v4652_v36  ;;  %v4058_v43 = vld [vmem:[%s4418_s23 + $0x660] ss:$8 sps:$4 sm:$0xff]  }
  0xa5   : > { %2951 = vmatprep.subr.bf16.mxu1 %v3984_v45  ;;  %v4061_v45 = vld [vmem:[%s4418_s23 + $0x760] ss:$8 sps:$4 sm:$0xff]  }
  0xa7   : > { %2911 = vmatpush1.bf16.msra.mxu0 %v3979_v46  ;;  %v4066_v46 = vld [vmem:[%s4418_s23 + $0x654] ss:$8 sps:$4 sm:$0xff]  }
  0xa8   : > { %2952 = vmatpush1.bf16.msra.mxu1 %v3982_v47  ;;  %2912 = vmatprep.subr.bf16.mxu0 %v3987_v48  ;;  %v4069_v47 = vld [vmem:[%s4418_s23 + $0x754] ss:$8 sps:$4 sm:$0xff]   ;;  %v4064_v48 = vld [vmem:[%s4418_s23 + $0x650] ss:$8 sps:$4 sm:$0xff]  }
  0xa9   : > { %2953 = vmatprep.subr.bf16.mxu1 %v3990_v49  ;;  %v4075_v49 = vld [vmem:[%s4418_s23 + $0x744] ss:$8 sps:$4 sm:$0xff]  }
  0xab   : > { %2913 = vmatpush1.bf16.msra.mxu0 %v3985_v51  ;;  %v4070_v51 = vld [vmem:[%s4418_s23 + $0x640] ss:$8 sps:$4 sm:$0xff]  }
  0xac   : > { %2954 = vmatpush1.bf16.msra.mxu1 %v3988_v52  ;;  %2914 = vmatprep.subr.bf16.mxu0 %v3993_v53  ;;  %v4073_v52 = vld [vmem:[%s4418_s23 + $0x740] ss:$8 sps:$4 sm:$0xff]   ;;  %v4078_v53 = vld [vmem:[%s4418_s23 + $0x634] ss:$8 sps:$4 sm:$0xff]  }
  0xad   : > { %2955 = vmatprep.subr.bf16.mxu1 %v3996_v54  ;;  %v4081_v54 = vld [vmem:[%s4418_s23 + $0x734] ss:$8 sps:$4 sm:$0xff]  }
  0xaf   : > { %2915 = vmatpush1.bf16.msra.mxu0 %v3991_v55  ;;  %v4076_v55 = vld [vmem:[%s4418_s23 + $0x630] ss:$8 sps:$4 sm:$0xff]  }
  0xb0   : > { %2956 = vmatpush1.bf16.msra.mxu1 %v3994_v56  ;;  %2916 = vmatprep.subr.bf16.mxu0 %v3999_v57  ;;  %v4079_v56 = vld [vmem:[%s4418_s23 + $0x730] ss:$8 sps:$4 sm:$0xff]   ;;  %v4084_v57 = vld [vmem:[%s4418_s23 + $0x624] ss:$8 sps:$4 sm:$0xff]  }
  0xb1   : > { %2957 = vmatprep.subr.bf16.mxu1 %v4002_v58  ;;  %v4087_v58 = vld [vmem:[%s4418_s23 + $0x724] ss:$8 sps:$4 sm:$0xff]  }
  0xb3   : > { %2917 = vmatpush1.bf16.msra.mxu0 %v3997_v59  ;;  %v4082_v59 = vld [vmem:[%s4418_s23 + $0x620] ss:$8 sps:$4 sm:$0xff]  }
  0xb4   : > { %2958 = vmatpush1.bf16.msra.mxu1 %v4000_v60  ;;  %2918 = vmatprep.subr.bf16.mxu0 %v4005_v61  ;;  %v4085_v60 = vld [vmem:[%s4418_s23 + $0x720] ss:$8 sps:$4 sm:$0xff]   ;;  %v4090_v61 = vld [vmem:[%s4418_s23 + $0x614] ss:$8 sps:$4 sm:$0xff]  }
  0xb5   : > { %2959 = vmatprep.subr.bf16.mxu1 %v4008_v62  ;;  %v4093_v62 = vld [vmem:[%s4418_s23 + $0x714] ss:$8 sps:$4 sm:$0xff]  }
  0xb7   : > { %2919 = vmatpush2.bf16.msra.mxu0 %v4003_v63  ;;  %v4088_v63 = vld [vmem:[%s4418_s23 + $0x610] ss:$8 sps:$4 sm:$0xff]  }
  0xb8   : > { %2960 = vmatpush2.bf16.msra.mxu1 %v4006_v0  ;;  %2920 = vmatprep.subr.bf16.mxu0 %v4011_v1  ;;  %v4091_v0 = vld [vmem:[%s4418_s23 + $0x710] ss:$8 sps:$4 sm:$0xff]   ;;  %v4096_v1 = vld [vmem:[%s4418_s23 + $0x604] ss:$8 sps:$4 sm:$0xff]  }
  0xb9   : > { %2961 = vmatprep.subr.bf16.mxu1 %v4014_v2  ;;  %v4099_v2 = vld [vmem:[%s4418_s23 + $0x704] ss:$8 sps:$4 sm:$0xff]  }
  0xbb   : > { %2921 = vmatpush2.bf16.msra.mxu0 %v4009_v3  ;;  %v4094_v3 = vld [vmem:[%s4418_s23 + $0x600] ss:$8 sps:$4 sm:$0xff]  }
  0xbc   : > { %2962 = vmatpush2.bf16.msra.mxu1 %v4012_v4  ;;  %2922 = vmatprep.subr.bf16.mxu0 %v4017_v5  ;;  %v4097_v4 = vld [vmem:[%s4418_s23 + $0x700] ss:$8 sps:$4 sm:$0xff]   ;;  %v4102_v5 = vld [vmem:[%s4418_s23 + $0x6f4] ss:$8 sps:$4 sm:$0xff]  }
  0xbd   : > { %2963 = vmatprep.subr.bf16.mxu1 %v4020_v6  ;;  %v4105_v6 = vld [vmem:[%s4418_s23 + $0x7f4] ss:$8 sps:$4 sm:$0xff]  }
  0xbf   : > { %2923 = vmatpush2.bf16.msra.mxu0 %v4015_v7  ;;  %v4100_v7 = vld [vmem:[%s4418_s23 + $0x6f0] ss:$8 sps:$4 sm:$0xff]  }
  0xc0   : > { %2964 = vmatpush2.bf16.msra.mxu1 %v4018_v8  ;;  %2924 = vmatprep.subr.bf16.mxu0 %v4023_v9  ;;  %v4103_v8 = vld [vmem:[%s4418_s23 + $0x7f0] ss:$8 sps:$4 sm:$0xff]   ;;  %v4108_v9 = vld [vmem:[%s4418_s23 + $0x6e4] ss:$8 sps:$4 sm:$0xff]  }
  0xc1   : > { %2965 = vmatprep.subr.bf16.mxu1 %v4026_v10  ;;  %v4111_v10 = vld [vmem:[%s4418_s23 + $0x7e4] ss:$8 sps:$4 sm:$0xff]  }
  0xc3   : > { %2925 = vmatpush2.bf16.msra.mxu0 %v4021_v11  ;;  %v4106_v11 = vld [vmem:[%s4418_s23 + $0x6e0] ss:$8 sps:$4 sm:$0xff]  }
  0xc4   : > { %2966 = vmatpush2.bf16.msra.mxu1 %v4024_v12  ;;  %2926 = vmatprep.subr.bf16.mxu0 %v4029_v13  ;;  %v4109_v12 = vld [vmem:[%s4418_s23 + $0x7e0] ss:$8 sps:$4 sm:$0xff]   ;;  %v4114_v13 = vld [vmem:[%s4418_s23 + $0x6d4] ss:$8 sps:$4 sm:$0xff]  }
  0xc5   : > { %2967 = vmatprep.subr.bf16.mxu1 %v4032_v14  ;;  %v4117_v14 = vld [vmem:[%s4418_s23 + $0x7d4] ss:$8 sps:$4 sm:$0xff]  }
  0xc7   : > { %2927 = vmatpush2.bf16.msra.mxu0 %v4027_v15  ;;  %v4112_v15 = vld [vmem:[%s4418_s23 + $0x6d0] ss:$8 sps:$4 sm:$0xff]  }
  0xc8   : > { %2968 = vmatpush2.bf16.msra.mxu1 %v4030_v16  ;;  %2928 = vmatprep.subr.bf16.mxu0 %v4035_v17  ;;  %v4115_v16 = vld [vmem:[%s4418_s23 + $0x7d0] ss:$8 sps:$4 sm:$0xff]   ;;  %v4120_v17 = vld [vmem:[%s4418_s23 + $0x6c4] ss:$8 sps:$4 sm:$0xff]  }
  0xc9   : > { %2969 = vmatprep.subr.bf16.mxu1 %v4038_v18  ;;  %v4123_v18 = vld [vmem:[%s4418_s23 + $0x7c4] ss:$8 sps:$4 sm:$0xff]  }
  0xcb   : > { %2929 = vmatpush2.bf16.msra.mxu0 %v4033_v19  ;;  %v4118_v19 = vld [vmem:[%s4418_s23 + $0x6c0] ss:$8 sps:$4 sm:$0xff]  }
  0xcc   : > { %2970 = vmatpush2.bf16.msra.mxu1 %v4036_v20  ;;  %2930 = vmatprep.subr.bf16.mxu0 %v4041_v21  ;;  %v4121_v20 = vld [vmem:[%s4418_s23 + $0x7c0] ss:$8 sps:$4 sm:$0xff]   ;;  %v4126_v21 = vld [vmem:[%s4418_s23 + $0x6b4] ss:$8 sps:$4 sm:$0xff]  }
  0xcd   : > { %2971 = vmatprep.subr.bf16.mxu1 %v4044_v22  ;;  %v4129_v22 = vld [vmem:[%s4418_s23 + $0x7b4] ss:$8 sps:$4 sm:$0xff]  }
  0xcf   : > { %2931 = vmatpush2.bf16.msra.mxu0 %v4039_v23  ;;  %v4124_v23 = vld [vmem:[%s4418_s23 + $0x6b0] ss:$8 sps:$4 sm:$0xff]  }
  0xd0   : > { %2972 = vmatpush2.bf16.msra.mxu1 %v4042_v24  ;;  %2932 = vmatprep.subr.bf16.mxu0 %v4047_v26  ;;  %v4127_v24 = vld [vmem:[%s4418_s23 + $0x7b0] ss:$8 sps:$4 sm:$0xff]   ;;  %v4135_v26 = vld [vmem:[%s4418_s23 + $0x7a4] ss:$8 sps:$4 sm:$0xff]  }
  0xd1   : > { %2973 = vmatprep.subr.bf16.mxu1 %v4050_v27  ;;  %v4130_v27 = vld [vmem:[%s4418_s23 + $0x6a0] ss:$8 sps:$4 sm:$0xff]  }
  0xd3   : > { %2933 = vmatpush2.bf16.msra.mxu0 %v4045_v30  ;;  %v4138_v30 = vld [vmem:[%s4418_s23 + $0x694] ss:$8 sps:$4 sm:$0xff]  }
  0xd4   : > { %2974 = vmatpush2.bf16.msra.mxu1 %v4048_v31  ;;  %2984 = vmatprep.subr.bf16.mxu0 %v4053_v33  ;;  %v4141_v31 = vld [vmem:[%s4418_s23 + $0x794] ss:$8 sps:$4 sm:$0xff]   ;;  %v4136_v33 = vld [vmem:[%s4418_s23 + $0x690] ss:$8 sps:$4 sm:$0xff]  }
  0xd5   : > { %3025 = vmatprep.subr.bf16.mxu1 %v4057_v34  ;;  %v194_v34 = vld [vmem:[%s4413_s19 + $0x20] sm:$0xff] }
  0xd6   : > { %2935 = vmatmul.mubr.bf16.vlgmr.msra.gmra.mxu0 %v4576_v28  ;;  %v4067_v28 = vld [vmem:[%s4418_s23 + $0x750] ss:$8 sps:$4 sm:$0xff]  }
  0xd7   : > { %2976 = vmatmul.mubr.bf16.vlgmr.msra.gmra.mxu1 %v4584_v32  ;;  %2985 = vmatpush1.bf16.msra.mxu0 %v4051_v37  ;;  %v4072_v32 = vld [vmem:[%s4418_s23 + $0x644] ss:$8 sps:$4 sm:$0xff]   ;;  %v4139_v37 = vld [vmem:[%s4418_s23 + $0x790] ss:$8 sps:$4 sm:$0xff]  }
  0xd8   : > { %3026 = vmatpush1.bf16.msra.mxu1 %v4055_v38  ;;  %2986 = vmatprep.subr.bf16.mxu0 %v4060_v39  ;;  %v4144_v38 = vld [vmem:[%s4418_s23 + $0x684] ss:$8 sps:$4 sm:$0xff]  }
  0xd9   : > { %3027 = vmatprep.subr.bf16.mxu1 %v4063_v40  ;;  %3016 = vmatprep.mubr.bf16.mxu0 %v670_v41  ;;  %v4147_v39 = vld [vmem:[%s4418_s23 + $0x784] ss:$8 sps:$4 sm:$0xff]   ;;  %v672_v40 = vcombine.high %v194_v34, %v194_v34  ;;  %v4142_v41 = vld [vmem:[%s4418_s23 + $0x680] ss:$8 sps:$4 sm:$0xff]  }
  0xda   : > { %3057 = vmatprep.mubr.bf16.mxu1 %v671_v42  ;;  %v4145_v42 = vld [vmem:[%s4418_s23 + $0x780] ss:$8 sps:$4 sm:$0xff]  }
  0xdb   : > { %2987 = vmatpush1.bf16.msra.mxu0 %v4058_v43  ;;  %v4150_v43 = vld [vmem:[%s4418_s23 + $0x874] ss:$8 sps:$4 sm:$0xff]  }
  0xdc   : > { %3028 = vmatpush1.bf16.msra.mxu1 %v4061_v45  ;;  %2988 = vmatprep.subr.bf16.mxu0 %v4066_v46  ;;  %v4154_v45 = vld [vmem:[%s4418_s23 + $0x974] ss:$8 sps:$4 sm:$0xff]   ;;  %v4726_v46 = vrot.slane %v194_v34, %v4468_v50 }
  0xdd   : > { %3029 = vmatprep.subr.bf16.mxu1 %v4069_v47  ;;  %v4729_v47 = vrot.slane %v672_v40, %v4468_v50  ;;  %v4214_v34 = vld [vmem:[%s4418_s23 + $0x9d4] ss:$8 sps:$4 sm:$0xff]   ;;  %v4220_v40 = vld [vmem:[%s4418_s23 + $0x9c4] ss:$8 sps:$4 sm:$0xff]  }
  0xdf   : > { %2989 = vmatpush1.bf16.msra.mxu0 %v4064_v48  ;;  %v4148_v48 = vld [vmem:[%s4418_s23 + $0x870] ss:$8 sps:$4 sm:$0xff]  }
  0xe0   : > { %3030 = vmatpush1.bf16.msra.mxu1 %v4067_v28  ;;  %2990 = vmatprep.subr.bf16.mxu0 %v4072_v32  ;;  %v4152_v28 = vld [vmem:[%s4418_s23 + $0x970] ss:$8 sps:$4 sm:$0xff]   ;;  %v4157_v32 = vld [vmem:[%s4418_s23 + $0x864] ss:$8 sps:$4 sm:$0xff]  }
  0xe1   : > { %3031 = vmatprep.subr.bf16.mxu1 %v4075_v49  ;;  %v4160_v49 = vld [vmem:[%s4418_s23 + $0x964] ss:$8 sps:$4 sm:$0xff]  }
  0xe3   : > { %2991 = vmatpush1.bf16.msra.mxu0 %v4070_v51  ;;  %v4155_v51 = vld [vmem:[%s4418_s23 + $0x860] ss:$8 sps:$4 sm:$0xff]  }
  0xe4   : > { %3032 = vmatpush1.bf16.msra.mxu1 %v4073_v52  ;;  %2992 = vmatprep.subr.bf16.mxu0 %v4078_v53  ;;  %v4158_v52 = vld [vmem:[%s4418_s23 + $0x960] ss:$8 sps:$4 sm:$0xff]   ;;  %v687_v53 = vcombine.high %v4726_v46, %v4726_v46 }
  0xe5   : > { %3033 = vmatprep.subr.bf16.mxu1 %v4081_v54  ;;  %v688_v54 = vcombine.high %v4729_v47, %v4729_v47 }
  0xe7   : > { %2993 = vmatpush1.bf16.msra.mxu0 %v4076_v55 }
  0xe8   : > { %3034 = vmatpush1.bf16.msra.mxu1 %v4079_v56  ;;  %2994 = vmatprep.subr.bf16.mxu0 %v4084_v57  ;;  %v4163_v57 = vld [vmem:[%s4418_s23 + $0x854] ss:$8 sps:$4 sm:$0xff]  }
  0xe9   : > { %3035 = vmatprep.subr.bf16.mxu1 %v4087_v58 }
  0xeb   : > { %2995 = vmatpush1.bf16.msra.mxu0 %v4082_v59 }
  0xec   : > { %3036 = vmatpush1.bf16.msra.mxu1 %v4085_v60  ;;  %2996 = vmatprep.subr.bf16.mxu0 %v4090_v61  ;;  %v4166_v61 = vld [vmem:[%s4418_s23 + $0x954] ss:$8 sps:$4 sm:$0xff]  }
  0xed   : > { %3037 = vmatprep.subr.bf16.mxu1 %v4093_v62 }
  0xef   : > { %2997 = vmatpush1.bf16.msra.mxu0 %v4088_v63  ;;  %v4161_v63 = vld [vmem:[%s4418_s23 + $0x850] ss:$8 sps:$4 sm:$0xff]  }
  0xf0   : > { %3038 = vmatpush1.bf16.msra.mxu1 %v4091_v0  ;;  %2998 = vmatprep.subr.bf16.mxu0 %v4096_v1  ;;  %v4164_v0 = vld [vmem:[%s4418_s23 + $0x950] ss:$8 sps:$4 sm:$0xff]  }
  0xf1   : > { %3039 = vmatprep.subr.bf16.mxu1 %v4099_v2  ;;  %v4169_v2 = vld [vmem:[%s4418_s23 + $0x844] ss:$8 sps:$4 sm:$0xff]  }
  0xf3   : > { %2999 = vmatpush1.bf16.msra.mxu0 %v4094_v3  ;;  %v4172_v3 = vld [vmem:[%s4418_s23 + $0x944] ss:$8 sps:$4 sm:$0xff]  }
  0xf4   : > { %3040 = vmatpush1.bf16.msra.mxu1 %v4097_v4  ;;  %3000 = vmatprep.subr.bf16.mxu0 %v4102_v5  ;;  %v4167_v5 = vld [vmem:[%s4418_s23 + $0x840] ss:$8 sps:$4 sm:$0xff]  }
  0xf5   : > { %3041 = vmatprep.subr.bf16.mxu1 %v4105_v6  ;;  %v4170_v6 = vld [vmem:[%s4418_s23 + $0x940] ss:$8 sps:$4 sm:$0xff]  }
  0xf7   : > { %3001 = vmatpush2.bf16.msra.mxu0 %v4100_v7  ;;  %v4175_v7 = vld [vmem:[%s4418_s23 + $0x834] ss:$8 sps:$4 sm:$0xff]  }
  0xf8   : > { %3042 = vmatpush2.bf16.msra.mxu1 %v4103_v8  ;;  %3002 = vmatprep.subr.bf16.mxu0 %v4108_v9  ;;  %v4178_v8 = vld [vmem:[%s4418_s23 + $0x934] ss:$8 sps:$4 sm:$0xff]   ;;  %v4173_v9 = vld [vmem:[%s4418_s23 + $0x830] ss:$8 sps:$4 sm:$0xff]  }
  0xf9   : > { %3043 = vmatprep.subr.bf16.mxu1 %v4111_v10  ;;  %v4176_v10 = vld [vmem:[%s4418_s23 + $0x930] ss:$8 sps:$4 sm:$0xff]  }
  0xfb   : > { %3003 = vmatpush2.bf16.msra.mxu0 %v4106_v11  ;;  %v4181_v11 = vld [vmem:[%s4418_s23 + $0x824] ss:$8 sps:$4 sm:$0xff]  }
  0xfc   : > { %3044 = vmatpush2.bf16.msra.mxu1 %v4109_v12  ;;  %3004 = vmatprep.subr.bf16.mxu0 %v4114_v13  ;;  %v4184_v12 = vld [vmem:[%s4418_s23 + $0x924] ss:$8 sps:$4 sm:$0xff]   ;;  %v4179_v13 = vld [vmem:[%s4418_s23 + $0x820] ss:$8 sps:$4 sm:$0xff]  }
  0xfd   : > { %3045 = vmatprep.subr.bf16.mxu1 %v4117_v14  ;;  %v4182_v14 = vld [vmem:[%s4418_s23 + $0x920] ss:$8 sps:$4 sm:$0xff]  }
  0xff   : > { %3005 = vmatpush2.bf16.msra.mxu0 %v4112_v15  ;;  %v4187_v15 = vld [vmem:[%s4418_s23 + $0x814] ss:$8 sps:$4 sm:$0xff]  }
 0x100   : > { %3046 = vmatpush2.bf16.msra.mxu1 %v4115_v16  ;;  %3006 = vmatprep.subr.bf16.mxu0 %v4120_v17  ;;  %v4190_v16 = vld [vmem:[%s4418_s23 + $0x914] ss:$8 sps:$4 sm:$0xff]   ;;  %v4185_v17 = vld [vmem:[%s4418_s23 + $0x810] ss:$8 sps:$4 sm:$0xff]  }
 0x101   : > { %3047 = vmatprep.subr.bf16.mxu1 %v4123_v18  ;;  %v4188_v18 = vld [vmem:[%s4418_s23 + $0x910] ss:$8 sps:$4 sm:$0xff]  }
 0x103   : > { %3007 = vmatpush2.bf16.msra.mxu0 %v4118_v19  ;;  %v4193_v19 = vld [vmem:[%s4418_s23 + $0x804] ss:$8 sps:$4 sm:$0xff]  }
 0x104   : > { %3048 = vmatpush2.bf16.msra.mxu1 %v4121_v20  ;;  %3008 = vmatprep.subr.bf16.mxu0 %v4126_v21  ;;  %v4196_v20 = vld [vmem:[%s4418_s23 + $0x904] ss:$8 sps:$4 sm:$0xff]   ;;  %v4191_v21 = vld [vmem:[%s4418_s23 + $0x800] ss:$8 sps:$4 sm:$0xff]  }
 0x105   : > { %3049 = vmatprep.subr.bf16.mxu1 %v4129_v22  ;;  %v4194_v22 = vld [vmem:[%s4418_s23 + $0x900] ss:$8 sps:$4 sm:$0xff]  }
 0x107   : > { %3009 = vmatpush2.bf16.msra.mxu0 %v4124_v23  ;;  %v4199_v23 = vld [vmem:[%s4418_s23 + $0x8f4] ss:$8 sps:$4 sm:$0xff]  }
 0x108   : > { %3050 = vmatpush2.bf16.msra.mxu1 %v4127_v24  ;;  %3010 = vmatprep.subr.bf16.mxu0 %v4132_v25  ;;  %v4202_v24 = vld [vmem:[%s4418_s23 + $0x9f4] ss:$8 sps:$4 sm:$0xff]   ;;  %v4197_v25 = vld [vmem:[%s4418_s23 + $0x8f0] ss:$8 sps:$4 sm:$0xff]  }
 0x109   : > { %3051 = vmatprep.subr.bf16.mxu1 %v4135_v26  ;;  %v4200_v26 = vld [vmem:[%s4418_s23 + $0x9f0] ss:$8 sps:$4 sm:$0xff]  }
 0x10b   : > { %3011 = vmatpush2.bf16.msra.mxu0 %v4130_v27  ;;  %v4205_v27 = vld [vmem:[%s4418_s23 + $0x8e4] ss:$8 sps:$4 sm:$0xff]  }
 0x10c   : > { %3052 = vmatpush2.bf16.msra.mxu1 %v4133_v29  ;;  %3012 = vmatprep.subr.bf16.mxu0 %v4138_v30  ;;  %v4208_v29 = vld [vmem:[%s4418_s23 + $0x9e4] ss:$8 sps:$4 sm:$0xff]   ;;  %v4203_v30 = vld [vmem:[%s4418_s23 + $0x8e0] ss:$8 sps:$4 sm:$0xff]  }
 0x10d   : > { %3053 = vmatprep.subr.bf16.mxu1 %v4141_v31  ;;  %v4206_v31 = vld [vmem:[%s4418_s23 + $0x9e0] ss:$8 sps:$4 sm:$0xff]  }
 0x10f   : > { %3013 = vmatpush2.bf16.msra.mxu0 %v4136_v33  ;;  %v4211_v33 = vld [vmem:[%s4418_s23 + $0x8d4] ss:$8 sps:$4 sm:$0xff]  }
 0x110   : > { %3054 = vmatpush2.bf16.msra.mxu1 %v4139_v37  ;;  %3014 = vmatprep.subr.bf16.mxu0 %v4144_v38  ;;  %v4209_v37 = vld [vmem:[%s4418_s23 + $0x8d0] ss:$8 sps:$4 sm:$0xff]  }
 0x111   : > { %3055 = vmatprep.subr.bf16.mxu1 %v4147_v39  ;;  %v4212_v38 = vld [vmem:[%s4418_s23 + $0x9d0] ss:$8 sps:$4 sm:$0xff]   ;;  %v4217_v39 = vld [vmem:[%s4418_s23 + $0x8c4] ss:$8 sps:$4 sm:$0xff]  }
 0x113   : > { %3015 = vmatpush2.bf16.msra.mxu0 %v4142_v41  ;;  %v4215_v41 = vld [vmem:[%s4418_s23 + $0x8c0] ss:$8 sps:$4 sm:$0xff]  }
 0x114   : > { %3056 = vmatpush2.bf16.msra.mxu1 %v4145_v42  ;;  %3066 = vmatprep.subr.bf16.mxu0 %v4150_v43  ;;  %v4218_v42 = vld [vmem:[%s4418_s23 + $0x9c0] ss:$8 sps:$4 sm:$0xff]   ;;  %v4223_v43 = vld [vmem:[%s4418_s23 + $0x8b4] ss:$8 sps:$4 sm:$0xff]  }
 0x115   : > { %3107 = vmatprep.subr.bf16.mxu1 %v4154_v45  ;;  %v4226_v45 = vld [vmem:[%s4418_s23 + $0x9b4] ss:$8 sps:$4 sm:$0xff]  }
 0x116   : > { %v2772_v55 = vpop.f32.mrf.mxu0  ;;  %3017 = vmatmul.mubr.bf16.vlgmr.msra.gmra.mxu0 %v4649_v35 }
 0x117   : > { %v2813_v56 = vpop.f32.mrf.mxu1  ;;  %3058 = vmatmul.mubr.bf16.vlgmr.msra.gmra.mxu1 %v4652_v36  ;;  %3067 = vmatpush1.bf16.msra.mxu0 %v4148_v48  ;;  %v4221_v48 = vld [vmem:[%s4418_s23 + $0x8b0] ss:$8 sps:$4 sm:$0xff]  }
 0x118   : > { %v4744_v58 = vadd.f32 %v2813_v56, %v2772_v55  ;;  %3108 = vmatpush1.bf16.msra.mxu1 %v4152_v28  ;;  %v2774_v59 = vpop.f32.mrf.mxu0  ;;  %3068 = vmatprep.subr.bf16.mxu0 %v4157_v32  ;;  %v4224_v28 = vld [vmem:[%s4418_s23 + $0x9b0] ss:$8 sps:$4 sm:$0xff]   ;;  %v4229_v32 = vld [vmem:[%s4418_s23 + $0x8a4] ss:$8 sps:$4 sm:$0xff]  }
 0x119   : > { %v2815_v60 = vpop.f32.mrf.mxu1  ;;  %3109 = vmatprep.subr.bf16.mxu1 %v4160_v49  ;;  %3098 = vmatprep.mubr.bf16.mxu0 %v687_v53  ;;  %v4232_v49 = vld [vmem:[%s4418_s23 + $0x9a4] ss:$8 sps:$4 sm:$0xff]   ;;  %v4235_v53 = vld [vmem:[%s4418_s23 + $0x894] ss:$8 sps:$4 sm:$0xff]   ;;  %v4233_v56 = vld [vmem:[%s4418_s23 + $0x890] ss:$8 sps:$4 sm:$0xff]  }
 0x11a   : > { %v4747_v62 = vadd.f32 %v2815_v60, %v2774_v59  ;;  %3139 = vmatprep.mubr.bf16.mxu1 %v688_v54  ;;  %v2776_v35 = vpop.f32.mrf.mxu0  ;;  %v4238_v54 = vld [vmem:[%s4418_s23 + $0x994] ss:$8 sps:$4 sm:$0xff]   ;;  %v195_v55 = vld [vmem:[%s4413_s19 + $0x28] sm:$0xff] }
 0x11b   : > { %v2817_v36 = vpop.f32.mrf.mxu1  ;;  %3069 = vmatpush1.bf16.msra.mxu0 %v4155_v51  ;;  %v4227_v51 = vld [vmem:[%s4418_s23 + $0x8a0] ss:$8 sps:$4 sm:$0xff]   ;;  %v4241_v59 = vld [vmem:[%s4418_s23 + $0x884] ss:$8 sps:$4 sm:$0xff]  }
 0x11c   : > { %3110 = vmatpush1.bf16.msra.mxu1 %v4158_v52  ;;  %v2777_v1 = vpop.f32.mrf.mxu0  ;;  %3070 = vmatprep.subr.bf16.mxu0 %v4163_v57  ;;  %v4230_v52 = vld [vmem:[%s4418_s23 + $0x9a0] ss:$8 sps:$4 sm:$0xff]   ;;  %v4236_v57 = vld [vmem:[%s4418_s23 + $0x990] ss:$8 sps:$4 sm:$0xff]   ;;  %v4244_v60 = vld [vmem:[%s4418_s23 + $0x984] ss:$8 sps:$4 sm:$0xff]  }
 0x11d   : > { %3111 = vmatprep.subr.bf16.mxu1 %v4166_v61  ;;  %v2818_v4 = vpop.f32.mrf.mxu1  ;;  %v689_v61 = vcombine.high %v195_v55, %v195_v55  ;;  %v4242_v35 = vld [vmem:[%s4418_s23 + $0x980] ss:$8 sps:$4 sm:$0xff]   ;;  %v4247_v36 = vld [vmem:[%s4418_s23 + $0xa74] ss:$8 sps:$4 sm:$0xff]   ;;  %v4807_v1 = vrot.slane %v195_v55, %v4468_v50 }
 0x11e   : > { %v4249_v4 = vld [vmem:[%s4418_s23 + $0xb70] ss:$8 sps:$4 sm:$0xff]   ;;  %v4303_v55 = vld [vmem:[%s4418_s23 + $0xbe0] ss:$8 sps:$4 sm:$0xff]  }
 0x11f   : > { %3071 = vmatpush1.bf16.msra.mxu0 %v4161_v63  ;;  %v4239_v63 = vld [vmem:[%s4418_s23 + $0x880] ss:$8 sps:$4 sm:$0xff]  }
 0x120   : > { %3112 = vmatpush1.bf16.msra.mxu1 %v4164_v0  ;;  %3072 = vmatprep.subr.bf16.mxu0 %v4169_v2  ;;  %v4251_v0 = vld [vmem:[%s4418_s23 + $0xb74] ss:$8 sps:$4 sm:$0xff]   ;;  %v4810_v2 = vrot.slane %v689_v61, %v4468_v50  ;;  %v4314_v61 = vld [vmem:[%s4418_s23 + $0xac4] ss:$8 sps:$4 sm:$0xff]  }
 0x121   : > { %3113 = vmatprep.subr.bf16.mxu1 %v4172_v3  ;;  %v4245_v3 = vld [vmem:[%s4418_s23 + $0xa70] ss:$8 sps:$4 sm:$0xff]  }
 0x123   : > { %3073 = vmatpush1.bf16.msra.mxu0 %v4167_v5  ;;  %v4254_v5 = vld [vmem:[%s4418_s23 + $0xa64] ss:$8 sps:$4 sm:$0xff]  }
 0x124   : > { %3114 = vmatpush1.bf16.msra.mxu1 %v4170_v6  ;;  %3074 = vmatprep.subr.bf16.mxu0 %v4175_v7  ;;  %v4257_v6 = vld [vmem:[%s4418_s23 + $0xb64] ss:$8 sps:$4 sm:$0xff]   ;;  %v704_v7 = vcombine.high %v4807_v1, %v4807_v1 }
 0x125   : > { %3115 = vmatprep.subr.bf16.mxu1 %v4178_v8  ;;  %v705_v8 = vcombine.high %v4810_v2, %v4810_v2 }
 0x127   : > { %3075 = vmatpush1.bf16.msra.mxu0 %v4173_v9 }
 0x128   : > { %3116 = vmatpush1.bf16.msra.mxu1 %v4176_v10  ;;  %3076 = vmatprep.subr.bf16.mxu0 %v4181_v11  ;;  %v4252_v11 = vld [vmem:[%s4418_s23 + $0xa60] ss:$8 sps:$4 sm:$0xff]  }
 0x129   : > { %3117 = vmatprep.subr.bf16.mxu1 %v4184_v12  ;;  %v4255_v12 = vld [vmem:[%s4418_s23 + $0xb60] ss:$8 sps:$4 sm:$0xff]  }
 0x12b   : > { %3077 = vmatpush1.bf16.msra.mxu0 %v4179_v13 }
 0x12c   : > { %3118 = vmatpush1.bf16.msra.mxu1 %v4182_v14  ;;  %3078 = vmatprep.subr.bf16.mxu0 %v4187_v15  ;;  %v4260_v15 = vld [vmem:[%s4418_s23 + $0xa54] ss:$8 sps:$4 sm:$0xff]  }
 0x12d   : > { %3119 = vmatprep.subr.bf16.mxu1 %v4190_v16  ;;  %v4263_v16 = vld [vmem:[%s4418_s23 + $0xb54] ss:$8 sps:$4 sm:$0xff]  }
 0x12f   : > { %3079 = vmatpush1.bf16.msra.mxu0 %v4185_v17 }
 0x130   : > { %3120 = vmatpush1.bf16.msra.mxu1 %v4188_v18  ;;  %3080 = vmatprep.subr.bf16.mxu0 %v4193_v19  ;;  %v4258_v19 = vld [vmem:[%s4418_s23 + $0xa50] ss:$8 sps:$4 sm:$0xff]  }
 0x131   : > { %3121 = vmatprep.subr.bf16.mxu1 %v4196_v20  ;;  %v4261_v20 = vld [vmem:[%s4418_s23 + $0xb50] ss:$8 sps:$4 sm:$0xff]  }
 0x133   : > { %3081 = vmatpush1.bf16.msra.mxu0 %v4191_v21 }
 0x134   : > { %3122 = vmatpush1.bf16.msra.mxu1 %v4194_v22  ;;  %3082 = vmatprep.subr.bf16.mxu0 %v4199_v23  ;;  %v4269_v22 = vld [vmem:[%s4418_s23 + $0xb44] ss:$8 sps:$4 sm:$0xff]  }
 0x135   : > { %3123 = vmatprep.subr.bf16.mxu1 %v4202_v24  ;;  %v4264_v24 = vld [vmem:[%s4418_s23 + $0xa40] ss:$8 sps:$4 sm:$0xff]  }
 0x137   : > { %3083 = vmatpush2.bf16.msra.mxu0 %v4197_v25  ;;  %v4267_v25 = vld [vmem:[%s4418_s23 + $0xb40] ss:$8 sps:$4 sm:$0xff]  }
 0x138   : > { %3124 = vmatpush2.bf16.msra.mxu1 %v4200_v26  ;;  %3084 = vmatprep.subr.bf16.mxu0 %v4205_v27  ;;  %v4272_v26 = vld [vmem:[%s4418_s23 + $0xa34] ss:$8 sps:$4 sm:$0xff]  }
 0x139   : > { %3125 = vmatprep.subr.bf16.mxu1 %v4208_v29  ;;  %v4275_v27 = vld [vmem:[%s4418_s23 + $0xb34] ss:$8 sps:$4 sm:$0xff]   ;;  %v4270_v29 = vld [vmem:[%s4418_s23 + $0xa30] ss:$8 sps:$4 sm:$0xff]  }
 0x13b   : > { %3085 = vmatpush2.bf16.msra.mxu0 %v4203_v30  ;;  %v4273_v30 = vld [vmem:[%s4418_s23 + $0xb30] ss:$8 sps:$4 sm:$0xff]  }
 0x13c   : > { %3126 = vmatpush2.bf16.msra.mxu1 %v4206_v31  ;;  %3086 = vmatprep.subr.bf16.mxu0 %v4211_v33  ;;  %v4278_v31 = vld [vmem:[%s4418_s23 + $0xa24] ss:$8 sps:$4 sm:$0xff]  }
 0x13d   : > { %3127 = vmatprep.subr.bf16.mxu1 %v4214_v34  ;;  %v4281_v33 = vld [vmem:[%s4418_s23 + $0xb24] ss:$8 sps:$4 sm:$0xff]   ;;  %v4276_v34 = vld [vmem:[%s4418_s23 + $0xa20] ss:$8 sps:$4 sm:$0xff]  }
 0x13f   : > { %3087 = vmatpush2.bf16.msra.mxu0 %v4209_v37  ;;  %v4279_v37 = vld [vmem:[%s4418_s23 + $0xb20] ss:$8 sps:$4 sm:$0xff]  }
 0x140   : > { %3128 = vmatpush2.bf16.msra.mxu1 %v4212_v38  ;;  %3088 = vmatprep.subr.bf16.mxu0 %v4217_v39  ;;  %v4284_v38 = vld [vmem:[%s4418_s23 + $0xa14] ss:$8 sps:$4 sm:$0xff]  }
 0x141   : > { %3129 = vmatprep.subr.bf16.mxu1 %v4220_v40  ;;  %v4287_v39 = vld [vmem:[%s4418_s23 + $0xb14] ss:$8 sps:$4 sm:$0xff]   ;;  %v4282_v40 = vld [vmem:[%s4418_s23 + $0xa10] ss:$8 sps:$4 sm:$0xff]  }
 0x143   : > { %3089 = vmatpush2.bf16.msra.mxu0 %v4215_v41  ;;  %v4285_v41 = vld [vmem:[%s4418_s23 + $0xb10] ss:$8 sps:$4 sm:$0xff]  }
 0x144   : > { %3130 = vmatpush2.bf16.msra.mxu1 %v4218_v42  ;;  %3090 = vmatprep.subr.bf16.mxu0 %v4223_v43  ;;  %v4290_v42 = vld [vmem:[%s4418_s23 + $0xa04] ss:$8 sps:$4 sm:$0xff]  }
 0x145   : > { %3131 = vmatprep.subr.bf16.mxu1 %v4226_v45  ;;  %v4293_v43 = vld [vmem:[%s4418_s23 + $0xb04] ss:$8 sps:$4 sm:$0xff]   ;;  %v4288_v45 = vld [vmem:[%s4418_s23 + $0xa00] ss:$8 sps:$4 sm:$0xff]  }
 0x147   : > { %3091 = vmatpush2.bf16.msra.mxu0 %v4221_v48  ;;  %v4291_v48 = vld [vmem:[%s4418_s23 + $0xb00] ss:$8 sps:$4 sm:$0xff]  }
 0x148   : > { %3132 = vmatpush2.bf16.msra.mxu1 %v4224_v28  ;;  %3092 = vmatprep.subr.bf16.mxu0 %v4229_v32  ;;  %v4296_v28 = vld [vmem:[%s4418_s23 + $0xaf4] ss:$8 sps:$4 sm:$0xff]  }
 0x149   : > { %3133 = vmatprep.subr.bf16.mxu1 %v4232_v49  ;;  %v4299_v32 = vld [vmem:[%s4418_s23 + $0xbf4] ss:$8 sps:$4 sm:$0xff]   ;;  %v4294_v49 = vld [vmem:[%s4418_s23 + $0xaf0] ss:$8 sps:$4 sm:$0xff]  }
 0x14b   : > { %3093 = vmatpush2.bf16.msra.mxu0 %v4227_v51  ;;  %v4297_v51 = vld [vmem:[%s4418_s23 + $0xbf0] ss:$8 sps:$4 sm:$0xff]  }
 0x14c   : > { %3134 = vmatpush2.bf16.msra.mxu1 %v4230_v52  ;;  %3094 = vmatprep.subr.bf16.mxu0 %v4235_v53  ;;  %v4302_v52 = vld [vmem:[%s4418_s23 + $0xae4] ss:$8 sps:$4 sm:$0xff]  }
 0x14d   : > { %3135 = vmatprep.subr.bf16.mxu1 %v4238_v54  ;;  %v4305_v53 = vld [vmem:[%s4418_s23 + $0xbe4] ss:$8 sps:$4 sm:$0xff]   ;;  %v4300_v54 = vld [vmem:[%s4418_s23 + $0xae0] ss:$8 sps:$4 sm:$0xff]  }
 0x14f   : > { %3095 = vmatpush2.bf16.msra.mxu0 %v4233_v56  ;;  %v4308_v56 = vld [vmem:[%s4418_s23 + $0xad4] ss:$8 sps:$4 sm:$0xff]  }
 0x150   : > { %3136 = vmatpush2.bf16.msra.mxu1 %v4236_v57  ;;  %3096 = vmatprep.subr.bf16.mxu0 %v4241_v59  ;;  %v4311_v57 = vld [vmem:[%s4418_s23 + $0xbd4] ss:$8 sps:$4 sm:$0xff]   ;;  %v4306_v59 = vld [vmem:[%s4418_s23 + $0xad0] ss:$8 sps:$4 sm:$0xff]  }
 0x151   : > { %3137 = vmatprep.subr.bf16.mxu1 %v4244_v60  ;;  %v4309_v60 = vld [vmem:[%s4418_s23 + $0xbd0] ss:$8 sps:$4 sm:$0xff]  }
 0x153   : > { %3097 = vmatpush2.bf16.msra.mxu0 %v4239_v63  ;;  %v4317_v63 = vld [vmem:[%s4418_s23 + $0xbc4] ss:$8 sps:$4 sm:$0xff]  }
 0x154   : > { %3138 = vmatpush2.bf16.msra.mxu1 %v4242_v35  ;;  %3148 = vmatprep.subr.bf16.mxu0 %v4247_v36  ;;  %v4312_v35 = vld [vmem:[%s4418_s23 + $0xac0] ss:$8 sps:$4 sm:$0xff]  }
 0x155   : > { %3189 = vmatprep.subr.bf16.mxu1 %v4251_v0  ;;  %v4315_v36 = vld [vmem:[%s4418_s23 + $0xbc0] ss:$8 sps:$4 sm:$0xff]   ;;  %v4320_v0 = vld [vmem:[%s4418_s23 + $0xab4] ss:$8 sps:$4 sm:$0xff]  }
 0x156   : > { %v2854_v50 = vpop.f32.mrf.mxu0  ;;  %3099 = vmatmul.mubr.bf16.vlgmr.msra.gmra.mxu0 %v4726_v46 }
 0x157   : > { %v2895_v9 = vpop.f32.mrf.mxu1  ;;  %3140 = vmatmul.mubr.bf16.vlgmr.msra.gmra.mxu1 %v4729_v47  ;;  %v2855_v10 = vadd.f32 %v2854_v50, %v4744_v58  ;;  %3149 = vmatpush1.bf16.msra.mxu0 %v4245_v3  ;;  %v4323_v3 = vld [vmem:[%s4418_s23 + $0xbb4] ss:$8 sps:$4 sm:$0xff]   ;;  %v4327_v50 = vld [vmem:[%s4418_s23 + $0xba0] ss:$8 sps:$4 sm:$0xff]  }
 0x158   : > { %3190 = vmatpush1.bf16.msra.mxu1 %v4249_v4  ;;  %v2856_v13 = vpop.f32.mrf.mxu0  ;;  %3150 = vmatprep.subr.bf16.mxu0 %v4254_v5  ;;  %v4318_v4 = vld [vmem:[%s4418_s23 + $0xab0] ss:$8 sps:$4 sm:$0xff]  }
 0x159   : > { %v2897_v14 = vpop.f32.mrf.mxu1  ;;  %3191 = vmatprep.subr.bf16.mxu1 %v4257_v6  ;;  %v2857_v46 = vadd.f32 %v2856_v13, %v4747_v62  ;;  %v4828_v17 = vadd.f32 %v2895_v9, %v2855_v10  ;;  %3180 = vmatprep.mubr.bf16.mxu0 %v704_v7  ;;  %v4266_v62 = vld [vmem:[%s4418_s23 + $0xa44] ss:$8 sps:$4 sm:$0xff]   ;;  %v4321_v5 = vld [vmem:[%s4418_s23 + $0xbb0] ss:$8 sps:$4 sm:$0xff]   ;;  %v4332_v9 = vld [vmem:[%s4418_s23 + $0xa94] ss:$8 sps:$4 sm:$0xff]  }
 0x15a   : > { %3221 = vmatprep.mubr.bf16.mxu1 %v705_v8  ;;  %v2858_v47 = vpop.f32.mrf.mxu0  ;;  %v4326_v6 = vld [vmem:[%s4418_s23 + $0xaa4] ss:$8 sps:$4 sm:$0xff]   ;;  %v4324_v8 = vld [vmem:[%s4418_s23 + $0xaa0] ss:$8 sps:$4 sm:$0xff]   ;;  %v4335_v10 = vld [vmem:[%s4418_s23 + $0xb94] ss:$8 sps:$4 sm:$0xff]  }
 0x15b   : > { %v2899_v58 = vpop.f32.mrf.mxu1  ;;  %v4830_v18 = vadd.f32 %v2897_v14, %v2857_v46  ;;  %3151 = vmatpush1.bf16.msra.mxu0 %v4252_v11  ;;  %v4329_v7 = vld [vmem:[%s4418_s23 + $0xba4] ss:$8 sps:$4 sm:$0xff]   ;;  %v4330_v11 = vld [vmem:[%s4418_s23 + $0xa90] ss:$8 sps:$4 sm:$0xff]   ;;  %v4344_v46 = vld [vmem:[%s4418_s23 + $0xc74] ss:$8 sps:$4 sm:$0xff]  }
 0x15c   : > { %3192 = vmatpush1.bf16.msra.mxu1 %v4255_v12  ;;  %v2859_v21 = vpop.f32.mrf.mxu0  ;;  %3152 = vmatprep.subr.bf16.mxu0 %v4260_v15  ;;  %v4333_v12 = vld [vmem:[%s4418_s23 + $0xb90] ss:$8 sps:$4 sm:$0xff]   ;;  %v4338_v13 = vld [vmem:[%s4418_s23 + $0xa84] ss:$8 sps:$4 sm:$0xff]   ;;  %v4336_v15 = vld [vmem:[%s4418_s23 + $0xa80] ss:$8 sps:$4 sm:$0xff]  }
 0x15d   : > { %3193 = vmatprep.subr.bf16.mxu1 %v4263_v16  ;;  %v2900_v23 = vpop.f32.mrf.mxu1  ;;  %v4341_v14 = vld [vmem:[%s4418_s23 + $0xb84] ss:$8 sps:$4 sm:$0xff]   ;;  %v4339_v16 = vld [vmem:[%s4418_s23 + $0xb80] ss:$8 sps:$4 sm:$0xff]   ;;  %v4342_v47 = vld [vmem:[%s4418_s23 + $0xc70] ss:$8 sps:$4 sm:$0xff]  }
 0x15e   : > { %v4348_v58 = vld [vmem:[%s4418_s23 + $0xc64] ss:$8 sps:$4 sm:$0xff]  }
 0x15f   : > { %3153 = vmatpush1.bf16.msra.mxu0 %v4258_v19 }
 0x160   : > { %3194 = vmatpush1.bf16.msra.mxu1 %v4261_v20  ;;  %3154 = vmatprep.subr.bf16.mxu0 %v4266_v62  ;;  %v4346_v62 = vld [vmem:[%s4418_s23 + $0xc60] ss:$8 sps:$4 sm:$0xff]  }
 0x161   : > { %3195 = vmatprep.subr.bf16.mxu1 %v4269_v22  ;;  %v4377_v22 = vmov 0  }
 0x163   : > { %3155 = vmatpush1.bf16.msra.mxu0 %v4264_v24 }
 0x164   : > { %3196 = vmatpush1.bf16.msra.mxu1 %v4267_v25  ;;  %3156 = vmatprep.subr.bf16.mxu0 %v4272_v26  ;;  %v4351_v25 = vld [vmem:[%s4418_s23 + $0xc54] ss:$8 sps:$4 sm:$0xff]  }
 0x165   : > { %3197 = vmatprep.subr.bf16.mxu1 %v4275_v27 }
 0x167   : > { %3157 = vmatpush1.bf16.msra.mxu0 %v4270_v29 }
 0x168   : > { %3198 = vmatpush1.bf16.msra.mxu1 %v4273_v30  ;;  %3158 = vmatprep.subr.bf16.mxu0 %v4278_v31  ;;  %v4354_v31 = vld [vmem:[%s4418_s23 + $0xc44] ss:$8 sps:$4 sm:$0xff]  }
 0x169   : > { %3199 = vmatprep.subr.bf16.mxu1 %v4281_v33 }
 0x16b   : > { %3159 = vmatpush1.bf16.msra.mxu0 %v4276_v34  ;;  %v4352_v34 = vld [vmem:[%s4418_s23 + $0xc40] ss:$8 sps:$4 sm:$0xff]  }
 0x16c   : > { %3200 = vmatpush1.bf16.msra.mxu1 %v4279_v37  ;;  %3160 = vmatprep.subr.bf16.mxu0 %v4284_v38  ;;  %v4355_v37 = vld [vmem:[%s4418_s23 + $0xc30] ss:$8 sps:$4 sm:$0xff]   ;;  %v4360_v38 = vld [vmem:[%s4418_s23 + $0xc24] ss:$8 sps:$4 sm:$0xff]  }
 0x16d   : > { %3201 = vmatprep.subr.bf16.mxu1 %v4287_v39  ;;  %v4358_v39 = vld [vmem:[%s4418_s23 + $0xc20] ss:$8 sps:$4 sm:$0xff]  }
 0x16f   : > { %3161 = vmatpush1.bf16.msra.mxu0 %v4282_v40  ;;  %v4363_v40 = vld [vmem:[%s4418_s23 + $0xc14] ss:$8 sps:$4 sm:$0xff]  }
 0x170   : > { %3202 = vmatpush1.bf16.msra.mxu1 %v4285_v41  ;;  %3162 = vmatprep.subr.bf16.mxu0 %v4290_v42  ;;  %v4361_v41 = vld [vmem:[%s4418_s23 + $0xc10] ss:$8 sps:$4 sm:$0xff]   ;;  %v4366_v42 = vld [vmem:[%s4418_s23 + $0xc04] ss:$8 sps:$4 sm:$0xff]  }
 0x171   : > { %3203 = vmatprep.subr.bf16.mxu1 %v4293_v43  ;;  %v4364_v43 = vld [vmem:[%s4418_s23 + $0xc00] ss:$8 sps:$4 sm:$0xff]  }
 0x173   : > { %3163 = vmatpush1.bf16.msra.mxu0 %v4288_v45  ;;  %v3345_v45 = vld.sshfl [vmem:[%s4413_s19 + $0x30] sm:$0x3 pattern:$0x76325410] }
 0x174   : > { %3204 = vmatpush1.bf16.msra.mxu1 %v4291_v48  ;;  %3164 = vmatprep.subr.bf16.mxu0 %v4296_v28 }
 0x175   : > { %3205 = vmatprep.subr.bf16.mxu1 %v4299_v32 }
 0x177   : > { %3165 = vmatpush2.bf16.msra.mxu0 %v4294_v49 }
 0x178   : > { %3206 = vmatpush2.bf16.msra.mxu1 %v4297_v51  ;;  %3166 = vmatprep.subr.bf16.mxu0 %v4302_v52 }
 0x179   : > { %3207 = vmatprep.subr.bf16.mxu1 %v4305_v53 }
 0x17b   : > { %3167 = vmatpush2.bf16.msra.mxu0 %v4300_v54 }
 0x17c   : > { %3208 = vmatpush2.bf16.msra.mxu1 %v4303_v55  ;;  %3168 = vmatprep.subr.bf16.mxu0 %v4308_v56 }
 0x17d   : > { %3209 = vmatprep.subr.bf16.mxu1 %v4311_v57 }
 0x17f   : > { %3169 = vmatpush2.bf16.msra.mxu0 %v4306_v59 }
 0x180   : > { %3210 = vmatpush2.bf16.msra.mxu1 %v4309_v60  ;;  %3170 = vmatprep.subr.bf16.mxu0 %v4314_v61 }
 0x181   : > { %3211 = vmatprep.subr.bf16.mxu1 %v4317_v63 }
 0x183   : > { %3171 = vmatpush2.bf16.msra.mxu0 %v4312_v35 }
 0x184   : > { %3212 = vmatpush2.bf16.msra.mxu1 %v4315_v36  ;;  %3172 = vmatprep.subr.bf16.mxu0 %v4320_v0 }
 0x185   : > { %3213 = vmatprep.subr.bf16.mxu1 %v4323_v3 }
 0x187   : > { %3173 = vmatpush2.bf16.msra.mxu0 %v4318_v4 }
 0x188   : > { %3214 = vmatpush2.bf16.msra.mxu1 %v4321_v5  ;;  %3174 = vmatprep.subr.bf16.mxu0 %v4326_v6 }
 0x189   : > { %3215 = vmatprep.subr.bf16.mxu1 %v4329_v7 }
 0x18b   : > { %3175 = vmatpush2.bf16.msra.mxu0 %v4324_v8 }
 0x18c   : > { %3216 = vmatpush2.bf16.msra.mxu1 %v4327_v50  ;;  %3176 = vmatprep.subr.bf16.mxu0 %v4332_v9 }
 0x18d   : > { %3217 = vmatprep.subr.bf16.mxu1 %v4335_v10 }
 0x18f   : > { %3177 = vmatpush2.bf16.msra.mxu0 %v4330_v11 }
 0x190   : > { %3218 = vmatpush2.bf16.msra.mxu1 %v4333_v12  ;;  %3178 = vmatprep.subr.bf16.mxu0 %v4338_v13 }
 0x191   : > { %3219 = vmatprep.subr.bf16.mxu1 %v4341_v14 }
 0x193   : > { %3179 = vmatpush2.bf16.msra.mxu0 %v4336_v15 }
 0x194   : > { %3220 = vmatpush2.bf16.msra.mxu1 %v4339_v16  ;;  %3230 = vmatprep.subr.bf16.mxu0 %v4344_v46 }
 0x196   : > { %v2936_v19 = vpop.f32.mrf.mxu0  ;;  %3181 = vmatmul.mubr.bf16.vlgmr.msra.gmra.mxu0 %v4807_v1 }
 0x197   : > { %v2977_v20 = vpop.f32.mrf.mxu1  ;;  %3222 = vmatmul.mubr.bf16.vlgmr.msra.gmra.mxu1 %v4810_v2  ;;  %v2937_v21 = vadd.f32 %v2936_v19, %v4828_v17  ;;  %3231 = vmatpush1.bf16.msra.mxu0 %v4342_v47  ;;  %v4349_v17 = vld [vmem:[%s4418_s23 + $0xc50] ss:$8 sps:$4 sm:$0xff]  }
 0x198   : > { %3262 = vmatprep.mubr.bf16.mxu0 %v4377_v22  ;;  %v2938_v23 = vpop.f32.mrf.mxu0  ;;  %3232 = vmatprep.subr.bf16.mxu0 %v4348_v58  ;;  %v189_v22 = vld [vmem:[#allocation2] sm:$0xff] }
 0x199   : > { %v2979_v24 = vpop.f32.mrf.mxu1  ;;  %v2939_v26 = vadd.f32 %v2938_v23, %v4830_v18  ;;  %v2978_v1 = vadd.f32 %v2977_v20, %v2937_v21  ;;  %v4357_v18 = vld [vmem:[%s4418_s23 + $0xc34] ss:$8 sps:$4 sm:$0xff]  }
 0x19a   : > { %v2940_v27 = vpop.f32.mrf.mxu0 }
 0x19b   : > { %v2981_v2 = vpop.f32.mrf.mxu1  ;;  %v2980_v29 = vadd.f32 %v2979_v24, %v2939_v26  ;;  %3233 = vmatpush1.bf16.msra.mxu0 %v4346_v62 }
 0x19c   : > { %v2941_v30 = vpop.f32.mrf.mxu0  ;;  %3234 = vmatprep.subr.bf16.mxu0 %v4351_v25 }
 0x19d   : > { %v2982_v33 = vpop.f32.mrf.mxu1 }
 0x19f   : > { %3235 = vmatpush1.bf16.msra.mxu0 %v4349_v17 }
 0x1a0   : > { %3236 = vmatprep.subr.bf16.mxu0 %v4354_v31 }
 0x1a3   : > { %3237 = vmatpush1.bf16.msra.mxu0 %v4352_v34 }
 0x1a4   : > { %3238 = vmatprep.subr.bf16.mxu0 %v4357_v18 }
 0x1a7   : > { %3239 = vmatpush1.bf16.msra.mxu0 %v4355_v37 }
 0x1a8   : > { %3240 = vmatprep.subr.bf16.mxu0 %v4360_v38 }
 0x1ab   : > { %3241 = vmatpush1.bf16.msra.mxu0 %v4358_v39 }
 0x1ac   : > { %3242 = vmatprep.subr.bf16.mxu0 %v4363_v40 }
 0x1af   : > { %3243 = vmatpush1.bf16.msra.mxu0 %v4361_v41 }
 0x1b0   : > { %3244 = vmatprep.subr.bf16.mxu0 %v4366_v42 }
 0x1b3   : > { %3245 = vmatpush1.bf16.msra.mxu0 %v4364_v43 }
 0x1b6   : > { %3263 = vmatmul.mubr.bf16.vlgmr.msra.gmra.mxu0 %v3345_v45 }
 0x1d6   : > { %v3018_v48 = vpop.f32.mrf.mxu0 }
 0x1d7   : > { %v3059_v28 = vpop.f32.mrf.mxu1  ;;  %v3019_v32 = vadd.f32 %v3018_v48, %v2978_v1 }
 0x1d8   : > { %v3020_v49 = vpop.f32.mrf.mxu0 }
 0x1d9   : > { %v3061_v51 = vpop.f32.mrf.mxu1  ;;  %v3021_v52 = vadd.f32 %v3020_v49, %v2980_v29  ;;  %v3060_v53 = vadd.f32 %v3059_v28, %v3019_v32 }
 0x1da   : > { %v3022_v54 = vpop.f32.mrf.mxu0 }
 0x1db   : > { %v3063_v55 = vpop.f32.mrf.mxu1  ;;  %v3062_v56 = vadd.f32 %v3061_v51, %v3021_v52 }
 0x1dc   : > { %v3023_v57 = vpop.f32.mrf.mxu0 }
 0x1dd   : > { %v3064_v59 = vpop.f32.mrf.mxu1 }
 0x216   : > { %v3100_v60 = vpop.f32.mrf.mxu0 }
 0x217   : > { %v3141_v61 = vpop.f32.mrf.mxu1  ;;  %v3101_v63 = vadd.f32 %v3100_v60, %v3060_v53 }
 0x218   : > { %v3102_v35 = vpop.f32.mrf.mxu0 }
 0x219   : > { %v3143_v36 = vpop.f32.mrf.mxu1  ;;  %v3103_v0 = vadd.f32 %v3102_v35, %v3062_v56  ;;  %v3142_v3 = vadd.f32 %v3141_v61, %v3101_v63 }
 0x21a   : > { %v3104_v4 = vpop.f32.mrf.mxu0 }
 0x21b   : > { %v3145_v5 = vpop.f32.mrf.mxu1  ;;  %v3144_v6 = vadd.f32 %v3143_v36, %v3103_v0 }
 0x21c   : > { %v3105_v7 = vpop.f32.mrf.mxu0 }
 0x21d   : > { %v3146_v8 = vpop.f32.mrf.mxu1 }
 0x256   : > { %v3182_v50 = vpop.f32.mrf.mxu0 }
 0x257   : > { %v3223_v9 = vpop.f32.mrf.mxu1  ;;  %v3183_v16 = vadd.f32 %v3182_v50, %v3142_v3 }
 0x258   : > { %v3184_v10 = vpop.f32.mrf.mxu0 }
 0x259   : > { %v3225_v11 = vpop.f32.mrf.mxu1  ;;  %v3185_v46 = vadd.f32 %v3184_v10, %v3144_v6  ;;  %v3224_v58 = vadd.f32 %v3223_v9, %v3183_v16 }
 0x25a   : > { %v3186_v12 = vpop.f32.mrf.mxu0 }
 0x25b   : > { %v3227_v13 = vpop.f32.mrf.mxu1  ;;  %v3226_v19 = vadd.f32 %v3225_v11, %v3185_v46 }
 0x25c   : > { %v3187_v14 = vpop.f32.mrf.mxu0 }
 0x25d   : > { %v3228_v15 = vpop.f32.mrf.mxu1 }
 0x276   : > { %v3264_v47 = vpop.f32.mrf.mxu0 }
 0x277   : > { %v3265_v21 = vadd.f32 %v3264_v47, %v3224_v58 }
 0x278   : > { %v3266_v20 = vpop.f32.mrf.mxu0 }
 0x279   : > { %v3267_v62 = vadd.f32 %v3266_v20, %v3226_v19 }
 0x27a   : > { %v3268_v23 = vpop.f32.mrf.mxu0 }
 0x27b   : > { %v3273_v24 = vcombine.low %v3265_v21, %v3267_v62  ;;  %3280 = sbr.rel (%p3746_p6) target bundleno = 652 (0x28c), region = 40 }
 0x27c   : > { %v3269_v25 = vpop.f32.mrf.mxu0 }
 0x27d   : > { %v3275_v26 = vadd.f32 %v3273_v24, %v189_v22 }
 0x27f   : > { %3276 = vst [vmem:[#allocation2] sm:$0xff] %v3275_v26 }
 0x280   : > { %v3282_v1 = vld [vmem:[%s4921_s2] sm:$0x3]  ;;  %v3286_v27 = vsub.s32 0, %v4460_v44  ;;  %v3290_v2 = vsub.s32 1, %v4460_v44 }
 0x282   : > { %v3287_v29 = vrot.slane %v3282_v1, %v3286_v27  ;;  %v3291_v17 = vrot.slane %v3282_v1, %v3290_v2 }
 0x284   : > { %v3292_v31 = vcombine.low %v3287_v29, %v3291_v17 }
 0x286   : > { %v3281_v30 = vld [vmem:[#allocation2] sm:$0xff] }
 0x287   : > { %v3294_v33 = vadd.f32 %v3292_v31, %v3281_v30 }
 0x289   : > { %v3295_v34 = vmax.f32 %v3294_v33, 0.0 }
 0x28b   : > { %3296 = vst [vmem:[%s4922_s3] sm:$0xff] %v3295_v34 }
 0x28c PF: > { %s13_s12 = sadd.s32 1, %s4373_s12  }
 0x28d   : > { %p10_p7 = scmp.ge.s32.totalorder %s13_s12, 6  }
 0x28f   :  { %12 = sbr.rel (!%p10_p7) target bundleno = 1 (0x1), region = 69 }

</bundles_post_ra>
